<compile_context>
chip_gen: v6e
topology: v6e:2x2x1
jax: 0.10.0
libtpu: 0.0.40
codegen_flags: <defaults>
</compile_context>

<pallas_src>
import jax
import jax.numpy as jnp
import numpy as np
from jax.experimental import pallas as pl
from jax.experimental.pallas import tpu as pltpu

EPS = 1e-5
LANE = 128  # lane-dense channel padding multiple


def _vmem_limit_bytes():
    # generation-aware scoped-VMEM limit: ~100 MiB on 128-MiB parts (v5e/v6e),
    # ~48 MiB on v7x (64 MiB / TC); conservative fallback if query fails.
    try:
        cap = getattr(pltpu.get_tpu_info(), "vmem_capacity_bytes", None)
    except Exception:
        cap = None
    if not cap:
        return 48 * 1024 * 1024
    return int(max(32 * 1024 * 1024,
                   min(cap - 16 * 1024 * 1024, 100 * 1024 * 1024)))


# ----------------------------------------------------------------------------
# Fully fused per-sample kernel
#   conv1(1x1)+bn1+relu -> dynamic 3x3 (base + attn-weighted templates)
#   -> bn2+relu -> conv3(1x1)+bn3 -> +identity(x) -> relu
# ----------------------------------------------------------------------------
def _make_fused_kernel(H, W):
    Wp2 = W + 2
    HW = H * W
    # flat padded scratch rows; +8 slack so the contiguous tap windows for the
    # junk virtual rows stay in-bounds (max needed = (H+2)*(W+2) + 2).
    RPAD = (H + 2) * Wp2 + 8

    def kernel(attn_ref, x_ref, w1_ref, s1_ref, b1_ref, wdyn_ref, bdyn_ref,
               s2_ref, t2_ref, w3_ref, s3_ref, b3_ref, o_ref,
               pad_ref, weff_ref, h_ref):
        n = pl.program_id(0)
        cdt = x_ref.dtype
        cwp = w3_ref.shape[0]

        # ---- per-sample effective 3x3 weight / bias (attn scalars from SMEM) -
        w_eff = wdyn_ref[0].astype(jnp.float32)              # (9*Cwp, Cwp)
        b_eff = bdyn_ref[0:1, :]                              # (1, Cwp) f32
        for i in range(4):
            ai = attn_ref[n, i]                               # scalar f32
            w_eff = w_eff + ai * wdyn_ref[i + 1].astype(jnp.float32)
            b_eff = b_eff + ai * bdyn_ref[i + 1:i + 2, :]
        weff_ref[...] = w_eff.astype(cdt)                     # stage in cdt scratch
        t2_eff = b_eff * s2_ref[...] + t2_ref[...]            # dyn bias folded into bn2

        # ---- conv1 (1x1) + bn1 + relu ----------------------------------------
        out1 = jnp.maximum(
            jnp.dot(x_ref[0], w1_ref[...], preferred_element_type=jnp.float32)
            * s1_ref[...] + b1_ref[...], 0.0).astype(cdt)     # (HW, Cwp)

        # ---- scatter out1 into the zero-padded flat (H+2)x(W+2) scratch ------
        pad_ref[...] = jnp.zeros_like(pad_ref)
        for h in range(H):
            pad_ref[pl.ds((h + 1) * Wp2 + 1, W), :] = out1[h * W:(h + 1) * W, :]

        # ---- 3x3 conv: 9 contiguous row-window matmuls (junk cols included) --
        acc = jnp.zeros((H * Wp2, cwp), jnp.float32)
        for kh in range(3):
            for kw in range(3):
                tap = kh * 3 + kw
                lhs = pad_ref[pl.ds(kh * Wp2 + kw, H * Wp2), :]      # (H*(W+2), Cwp)
                rhs = weff_ref[tap * cwp:(tap + 1) * cwp, :]         # (Cwp, Cwp)
                acc = acc + jnp.dot(lhs, rhs,
                                    preferred_element_type=jnp.float32)

        # ---- bn2 + relu, compact away the junk columns -----------------------
        h_full = jnp.maximum(acc * s2_ref[...] + t2_eff, 0.0).astype(cdt)
        for h in range(H):
            h_ref[pl.ds(h * W, W), :] = h_full[h * Wp2:h * Wp2 + W, :]

        # ---- conv3 + bn3 + residual (identity == x) + relu -------------------
        y = jnp.dot(h_ref[...], w3_ref[...], preferred_element_type=jnp.float32)
        o_ref[0] = jnp.maximum(
            y * s3_ref[...] + b3_ref[...] + x_ref[0].astype(jnp.float32),
            0.0).astype(o_ref.dtype)

    return kernel, RPAD


# ----------------------------------------------------------------------------
# JAX glue: padding, BN folding, weight packing (templates -> dense 9C x C)
# ----------------------------------------------------------------------------
def _rup(v, m):
    return (v + m - 1) // m * m


def _fold_bn(bn, pad_to):
    gamma, beta, mean, var = bn
    s = gamma / jnp.sqrt(var + EPS)
    t = beta - mean * s
    c = gamma.shape[0]
    s = jnp.pad(s, (0, pad_to - c)).reshape(1, pad_to)
    t = jnp.pad(t, (0, pad_to - c)).reshape(1, pad_to)
    return s, t


def _pad_oihw(w, cout_p, cin_p):
    cout, cin = w.shape[0], w.shape[1]
    return jnp.pad(w, ((0, cout_p - cout), (0, cin_p - cin), (0, 0), (0, 0)))


def _pack_full3x3(w):        # (Cout, Cin, 3, 3) -> (9*Cin, Cout), tap-major rows
    cout, cin = w.shape[0], w.shape[1]
    return jnp.transpose(w, (2, 3, 1, 0)).reshape(9 * cin, cout)


def _pack_depthwise3x3(w):   # (C, 1, 3, 3), groups=C -> dense (9*C, C)
    c = w.shape[0]
    d = jnp.einsum('chw,cd->hwcd', w[:, 0], jnp.eye(c, dtype=w.dtype))
    return d.reshape(9 * c, c)


def _pack_1x1(w):            # (Cout, Cin, 1, 1) -> (9*Cin, Cout), center tap
    cout, cin = w.shape[0], w.shape[1]
    d = jnp.zeros((3, 3, cin, cout), w.dtype).at[1, 1].set(
        jnp.transpose(w[:, :, 0, 0]))
    return d.reshape(9 * cin, cout)


def _pack_3x1(w):            # (Cout, Cin, 3, 1) -> (9*Cin, Cout), center column
    cout, cin = w.shape[0], w.shape[1]
    d = jnp.zeros((3, 3, cin, cout), w.dtype).at[:, 1].set(
        jnp.transpose(w[:, :, :, 0], (2, 1, 0)))
    return d.reshape(9 * cin, cout)


def _pack_1x3(w):            # (Cout, Cin, 1, 3) -> (9*Cin, Cout), center row
    cout, cin = w.shape[0], w.shape[1]
    d = jnp.zeros((3, 3, cin, cout), w.dtype).at[1, :].set(
        jnp.transpose(w[:, :, 0, :], (2, 1, 0)))
    return d.reshape(9 * cin, cout)


# ----------------------------------------------------------------------------
# Forward pass
# ----------------------------------------------------------------------------
def bottleneck_dynamic_lrd_forward(x_nchw, P, *, compute_dtype=jnp.bfloat16):
    N, Cin, H, W = x_nchw.shape
    Cw = P['w1'].shape[0]             # width
    C4 = P['w3'].shape[0]             # planes * expansion
    assert Cin == C4, "identity residual requires inplanes == planes*expansion"
    HW = H * W
    cdt = compute_dtype

    # lane-dense (multiple-of-128) channel padding; pad lanes are zero in
    # activations, weights and folded-BN scale/shift, so they stay zero.
    Cip, Cwp, C4p = _rup(Cin, LANE), _rup(Cw, LANE), _rup(C4, LANE)
    assert Cip == C4p

    # single wrapper pass: NCHW -> NHWC, channel pad, flatten, cast
    x_nhwc = jnp.transpose(x_nchw, (0, 2, 3, 1))
    x_rows = jnp.pad(x_nhwc, ((0, 0), (0, 0), (0, 0), (0, Cip - Cin))
                     ).reshape(N, HW, Cip).astype(cdt)

    # ---- attention head: tiny matmuls, plain XLA (no kernel overhead) -------
    pooled = jnp.mean(x_nhwc.astype(jnp.float32), axis=(1, 2))          # (N, Cin)
    h_att = jax.nn.relu(pooled @ jnp.transpose(P['wa1'][:, :, 0, 0]))
    attn = jax.nn.sigmoid(h_att @ jnp.transpose(P['wa2'][:, :, 0, 0])
                          + P['ba2'].reshape(1, 4)).astype(jnp.float32)  # (N, 4)

    # ---- folded / packed parameters ------------------------------------------
    w1 = jnp.pad(jnp.transpose(P['w1'][:, :, 0, 0]),
                 ((0, Cip - Cin), (0, Cwp - Cw))).astype(cdt)            # (Cip, Cwp)
    s1, b1 = _fold_bn(P['bn1'], Cwp)
    wdyn = jnp.stack([
        _pack_full3x3(_pad_oihw(P['w_base'], Cwp, Cwp)),
        _pack_depthwise3x3(_pad_oihw(P['w_nn'], Cwp, 1)),
        _pack_1x1(_pad_oihw(P['w_11'], Cwp, Cwp)),
        _pack_3x1(_pad_oihw(P['w_n1'], Cwp, Cwp)),
        _pack_1x3(_pad_oihw(P['w_1n'], Cwp, Cwp)),
    ]).astype(cdt)                                                       # (5, 9*Cwp, Cwp)
    bdyn = jnp.stack([jnp.pad(P[k], (0, Cwp - Cw))
                      for k in ('b_base', 'b_nn', 'b_11', 'b_n1', 'b_1n')]
                     ).astype(jnp.float32)                               # (5, Cwp)
    s2, t2 = _fold_bn(P['bn2'], Cwp)
    w3 = jnp.pad(jnp.transpose(P['w3'][:, :, 0, 0]),
                 ((0, Cwp - Cw), (0, C4p - C4))).astype(cdt)             # (Cwp, C4p)
    s3, b3 = _fold_bn(P['bn3'], C4p)

    kern, rpad = _make_fused_kernel(H, W)
    out = pl.pallas_call(
        kern,
        grid=(N,),
        in_specs=[
            pl.BlockSpec(memory_space=pltpu.MemorySpace.SMEM),        # attn (N,4)
            pl.BlockSpec((1, HW, Cip), lambda n: (n, 0, 0)),          # x (+residual)
            pl.BlockSpec((Cip, Cwp), lambda n: (0, 0)),               # w1
            pl.BlockSpec((1, Cwp), lambda n: (0, 0)),                 # s1
            pl.BlockSpec((1, Cwp), lambda n: (0, 0)),                 # b1
            pl.BlockSpec((5, 9 * Cwp, Cwp), lambda n: (0, 0, 0)),     # wdyn
            pl.BlockSpec((5, Cwp), lambda n: (0, 0)),                 # bdyn
            pl.BlockSpec((1, Cwp), lambda n: (0, 0)),                 # s2
            pl.BlockSpec((1, Cwp), lambda n: (0, 0)),                 # t2
            pl.BlockSpec((Cwp, C4p), lambda n: (0, 0)),               # w3
            pl.BlockSpec((1, C4p), lambda n: (0, 0)),                 # s3
            pl.BlockSpec((1, C4p), lambda n: (0, 0)),                 # b3
        ],
        out_specs=pl.BlockSpec((1, HW, C4p), lambda n: (n, 0, 0)),
        out_shape=jax.ShapeDtypeStruct((N, HW, C4p), cdt),
        scratch_shapes=[pltpu.VMEM((rpad, Cwp), cdt),                 # padded out1
                        pltpu.VMEM((9 * Cwp, Cwp), cdt),              # W_eff
                        pltpu.VMEM((HW, Cwp), cdt)],                  # compacted h
        compiler_params=pltpu.CompilerParams(
            dimension_semantics=("parallel",),
            vmem_limit_bytes=_vmem_limit_bytes()),
    )(attn, x_rows, w1, s1, b1, wdyn, bdyn, s2, t2, w3, s3, b3)

    out = out[:, :, :C4].reshape(N, H, W, C4).astype(jnp.float32)
    return jnp.transpose(out, (0, 3, 1, 2))


# ----------------------------------------------------------------------------
# Pure-JAX reference (lax.conv, NCHW) for correctness check
# ----------------------------------------------------------------------------
def reference_forward(x, P):
    width = P['w_nn'].shape[0]
    dn = ('NCHW', 'OIHW', 'NCHW')

    def conv(z, w, pad, groups=1):
        return jax.lax.conv_general_dilated(z, w, (1, 1), pad,
                                            dimension_numbers=dn,
                                            feature_group_count=groups)

    def bn(y, p):
        g, b, m, v = p
        return ((y - m[None, :, None, None]) / jnp.sqrt(v[None, :, None, None] + EPS)
                * g[None, :, None, None] + b[None, :, None, None])

    def pb(b):
        return b[None, :, None, None]

    out = jax.nn.relu(bn(conv(x, P['w1'], 'VALID'), P['bn1']))

    pooled = jnp.mean(x, axis=(2, 3))                                   # (N, Cin)
    h = jax.nn.relu(pooled @ P['wa1'][:, :, 0, 0].T)
    a = jax.nn.sigmoid(h @ P['wa2'][:, :, 0, 0].T + P['ba2'])           # (N, 4)

    base = conv(out, P['w_base'], ((1, 1), (1, 1))) + pb(P['b_base'])
    t_nn = conv(out, P['w_nn'], ((1, 1), (1, 1)), groups=width) + pb(P['b_nn'])
    t_11 = conv(out, P['w_11'], 'VALID') + pb(P['b_11'])
    t_n1 = conv(out, P['w_n1'], ((1, 1), (0, 0))) + pb(P['b_n1'])
    t_1n = conv(out, P['w_1n'], ((0, 0), (1, 1))) + pb(P['b_1n'])
    out2 = (base
            + a[:, 0][:, None, None, None] * t_nn
            + a[:, 1][:, None, None, None] * t_11
            + a[:, 2][:, None, None, None] * t_n1
            + a[:, 3][:, None, None, None] * t_1n)
    out2 = jax.nn.relu(bn(out2, P['bn2']))

    out3 = bn(conv(out2, P['w3'], 'VALID'), P['bn3'])
    return jax.nn.relu(out3 + x)


# ----------------------------------------------------------------------------
# Deterministic parameter init (shapes follow the PyTorch module __init__)
# ----------------------------------------------------------------------------
def init_params(key, inplanes, planes, base_width=64, expansion=4, squeeze=None):
    width = int(planes * (base_width / 64.0))
    c4 = planes * expansion
    if squeeze is None:
        squeeze = max(inplanes // 16, 4)
    keys = iter(jax.random.split(key, 32))

    def n(shape, s=0.1):
        return s * jax.random.normal(next(keys), shape, jnp.float32)

    def bnp(c):
        gamma = 1.0 + 0.1 * jax.random.normal(next(keys), (c,), jnp.float32)
        beta = n((c,))
        mean = n((c,))
        var = 0.5 + jax.random.uniform(next(keys), (c,), jnp.float32)
        return (gamma, beta, mean, var)

    return dict(
        w1=n((width, inplanes, 1, 1)), bn1=bnp(width),
        w_base=n((width, width, 3, 3)), b_base=n((width,)),
        w_nn=n((width, 1, 3, 3)), b_nn=n((width,)),
        w_11=n((width, width, 1, 1)), b_11=n((width,)),
        w_n1=n((width, width, 3, 1)), b_n1=n((width,)),
        w_1n=n((width, width, 1, 3)), b_1n=n((width,)),
        wa1=n((squeeze, inplanes, 1, 1)),
        wa2=n((4, squeeze, 1, 1)), ba2=n((4,)),
        bn2=bnp(width),
        w3=n((c4, width, 1, 1)), bn3=bnp(c4),
    )


if __name__ == "__main__":
    # width=4, planes*expansion = 16 = inplanes (identity residual)
    N, inplanes, planes, H, W = 2, 16, 4, 16, 16
    key = jax.random.PRNGKey(0)
    kx, kp = jax.random.split(key)
    x = jax.random.normal(kx, (N, inplanes, H, W), jnp.float32)
    P = init_params(kp, inplanes, planes)

    ref = jax.block_until_ready(reference_forward(x, P))

    # f32 path — validates packing / padded-window tap mapping / fusion order
    out_f32 = jax.block_until_ready(
        bottleneck_dynamic_lrd_forward(x, P, compute_dtype=jnp.float32))
    np.testing.assert_allclose(np.asarray(out_f32), np.asarray(ref),
                               rtol=5e-3, atol=5e-3)

    # fast path (bf16 MXU matmuls + bf16 activation storage, f32 BN/residual math)
    out_bf16 = jax.block_until_ready(
        bottleneck_dynamic_lrd_forward(x, P, compute_dtype=jnp.bfloat16))
    rel = float(jnp.max(jnp.abs(out_bf16 - ref)) /
                (jnp.max(jnp.abs(ref)) + 1e-6))
    assert rel < 0.05, f"bf16 path relative error too large: {rel}"

    print("KERNEL_OK")
</pallas_src>

<mosaic_0001>
module attributes {stable_mosaic.version = 11 : i64} {
  func.func @kernel(%arg0: i32, %arg1: memref<2x4xf32, #tpu.memory_space<smem>>, %arg2: memref<1x256x128xf32, #tpu.memory_space<vmem>>, %arg3: memref<128x128xf32, #tpu.memory_space<vmem>>, %arg4: memref<1x128xf32, #tpu.memory_space<vmem>>, %arg5: memref<1x128xf32, #tpu.memory_space<vmem>>, %arg6: memref<5x1152x128xf32, #tpu.memory_space<vmem>>, %arg7: memref<5x128xf32, #tpu.memory_space<vmem>>, %arg8: memref<1x128xf32, #tpu.memory_space<vmem>>, %arg9: memref<1x128xf32, #tpu.memory_space<vmem>>, %arg10: memref<128x128xf32, #tpu.memory_space<vmem>>, %arg11: memref<1x128xf32, #tpu.memory_space<vmem>>, %arg12: memref<1x128xf32, #tpu.memory_space<vmem>>, %arg13: memref<1x256x128xf32, #tpu.memory_space<vmem>>, %arg14: memref<332x128xf32, #tpu.memory_space<vmem>>, %arg15: memref<1152x128xf32, #tpu.memory_space<vmem>>, %arg16: memref<256x128xf32, #tpu.memory_space<vmem>>) attributes {dimension_semantics = [#tpu.dimension_semantics<parallel>], iteration_bounds = array<i64: 2>, scalar_prefetch = 0 : i64, scratch_operands = 3 : i64, tpu.core_type = #tpu.core_type<tc>, window_params = [{transform_indices = @transform_0, window_bounds = array<i64: 2, 4>}, {transform_indices = @transform_1, window_bounds = array<i64: 1, 256, 128>}, {pipeline_mode = #tpu.pipeline_mode<synchronous>, transform_indices = @transform_2, window_bounds = array<i64: 128, 128>}, {pipeline_mode = #tpu.pipeline_mode<synchronous>, transform_indices = @transform_3, window_bounds = array<i64: 1, 128>}, {pipeline_mode = #tpu.pipeline_mode<synchronous>, transform_indices = @transform_4, window_bounds = array<i64: 1, 128>}, {pipeline_mode = #tpu.pipeline_mode<synchronous>, transform_indices = @transform_5, window_bounds = array<i64: 5, 1152, 128>}, {pipeline_mode = #tpu.pipeline_mode<synchronous>, transform_indices = @transform_6, window_bounds = array<i64: 5, 128>}, {pipeline_mode = #tpu.pipeline_mode<synchronous>, transform_indices = @transform_7, window_bounds = array<i64: 1, 128>}, {pipeline_mode = #tpu.pipeline_mode<synchronous>, transform_indices = @transform_8, window_bounds = array<i64: 1, 128>}, {pipeline_mode = #tpu.pipeline_mode<synchronous>, transform_indices = @transform_9, window_bounds = array<i64: 128, 128>}, {pipeline_mode = #tpu.pipeline_mode<synchronous>, transform_indices = @transform_10, window_bounds = array<i64: 1, 128>}, {pipeline_mode = #tpu.pipeline_mode<synchronous>, transform_indices = @transform_11, window_bounds = array<i64: 1, 128>}, {transform_indices = @transform_12, window_bounds = array<i64: 1, 256, 128>}]} {
    %c0 = arith.constant 0 : index
    %c0_0 = arith.constant 0 : index
    %c0_1 = arith.constant 0 : index
    %0 = vector.load %arg6[%c0, %c0_0, %c0_1] : memref<5x1152x128xf32, #tpu.memory_space<vmem>>, vector<1x1152x128xf32>
    %1 = vector.shape_cast %0 : vector<1x1152x128xf32> to vector<1152x128xf32>
    %c0_2 = arith.constant 0 : index
    %c0_3 = arith.constant 0 : index
    %2 = vector.load %arg7[%c0_2, %c0_3] : memref<5x128xf32, #tpu.memory_space<vmem>>, vector<1x128xf32>
    %3 = arith.index_cast %arg0 : i32 to index
    %c0_4 = arith.constant 0 : index
    %4 = memref.load %arg1[%3, %c0_4] : memref<2x4xf32, #tpu.memory_space<smem>>
    %c1 = arith.constant 1 : index
    %c0_5 = arith.constant 0 : index
    %c0_6 = arith.constant 0 : index
    %5 = vector.load %arg6[%c1, %c0_5, %c0_6] : memref<5x1152x128xf32, #tpu.memory_space<vmem>>, vector<1x1152x128xf32>
    %6 = vector.shape_cast %5 : vector<1x1152x128xf32> to vector<1152x128xf32>
    %7 = vector.broadcast %4 : f32 to vector<1152x128xf32>
    %8 = arith.mulf %7, %6 : vector<1152x128xf32>
    %9 = arith.addf %1, %8 : vector<1152x128xf32>
    %c1_7 = arith.constant 1 : index
    %c0_8 = arith.constant 0 : index
    %10 = vector.load %arg7[%c1_7, %c0_8] : memref<5x128xf32, #tpu.memory_space<vmem>>, vector<1x128xf32>
    %11 = vector.broadcast %4 : f32 to vector<1x128xf32>
    %12 = arith.mulf %11, %10 : vector<1x128xf32>
    %13 = arith.addf %2, %12 : vector<1x128xf32>
    %14 = arith.index_cast %arg0 : i32 to index
    %c1_9 = arith.constant 1 : index
    %15 = memref.load %arg1[%14, %c1_9] : memref<2x4xf32, #tpu.memory_space<smem>>
    %c2 = arith.constant 2 : index
    %c0_10 = arith.constant 0 : index
    %c0_11 = arith.constant 0 : index
    %16 = vector.load %arg6[%c2, %c0_10, %c0_11] : memref<5x1152x128xf32, #tpu.memory_space<vmem>>, vector<1x1152x128xf32>
    %17 = vector.shape_cast %16 : vector<1x1152x128xf32> to vector<1152x128xf32>
    %18 = vector.broadcast %15 : f32 to vector<1152x128xf32>
    %19 = arith.mulf %18, %17 : vector<1152x128xf32>
    %20 = arith.addf %9, %19 : vector<1152x128xf32>
    %c2_12 = arith.constant 2 : index
    %c0_13 = arith.constant 0 : index
    %21 = vector.load %arg7[%c2_12, %c0_13] : memref<5x128xf32, #tpu.memory_space<vmem>>, vector<1x128xf32>
    %22 = vector.broadcast %15 : f32 to vector<1x128xf32>
    %23 = arith.mulf %22, %21 : vector<1x128xf32>
    %24 = arith.addf %13, %23 : vector<1x128xf32>
    %25 = arith.index_cast %arg0 : i32 to index
    %c2_14 = arith.constant 2 : index
    %26 = memref.load %arg1[%25, %c2_14] : memref<2x4xf32, #tpu.memory_space<smem>>
    %c3 = arith.constant 3 : index
    %c0_15 = arith.constant 0 : index
    %c0_16 = arith.constant 0 : index
    %27 = vector.load %arg6[%c3, %c0_15, %c0_16] : memref<5x1152x128xf32, #tpu.memory_space<vmem>>, vector<1x1152x128xf32>
    %28 = vector.shape_cast %27 : vector<1x1152x128xf32> to vector<1152x128xf32>
    %29 = vector.broadcast %26 : f32 to vector<1152x128xf32>
    %30 = arith.mulf %29, %28 : vector<1152x128xf32>
    %31 = arith.addf %20, %30 : vector<1152x128xf32>
    %c3_17 = arith.constant 3 : index
    %c0_18 = arith.constant 0 : index
    %32 = vector.load %arg7[%c3_17, %c0_18] : memref<5x128xf32, #tpu.memory_space<vmem>>, vector<1x128xf32>
    %33 = vector.broadcast %26 : f32 to vector<1x128xf32>
    %34 = arith.mulf %33, %32 : vector<1x128xf32>
    %35 = arith.addf %24, %34 : vector<1x128xf32>
    %36 = arith.index_cast %arg0 : i32 to index
    %c3_19 = arith.constant 3 : index
    %37 = memref.load %arg1[%36, %c3_19] : memref<2x4xf32, #tpu.memory_space<smem>>
    %c4 = arith.constant 4 : index
    %c0_20 = arith.constant 0 : index
    %c0_21 = arith.constant 0 : index
    %38 = vector.load %arg6[%c4, %c0_20, %c0_21] : memref<5x1152x128xf32, #tpu.memory_space<vmem>>, vector<1x1152x128xf32>
    %39 = vector.shape_cast %38 : vector<1x1152x128xf32> to vector<1152x128xf32>
    %40 = vector.broadcast %37 : f32 to vector<1152x128xf32>
    %41 = arith.mulf %40, %39 : vector<1152x128xf32>
    %42 = arith.addf %31, %41 : vector<1152x128xf32>
    %c4_22 = arith.constant 4 : index
    %c0_23 = arith.constant 0 : index
    %43 = vector.load %arg7[%c4_22, %c0_23] : memref<5x128xf32, #tpu.memory_space<vmem>>, vector<1x128xf32>
    %44 = vector.broadcast %37 : f32 to vector<1x128xf32>
    %45 = arith.mulf %44, %43 : vector<1x128xf32>
    %46 = arith.addf %35, %45 : vector<1x128xf32>
    %c0_24 = arith.constant 0 : index
    %c0_25 = arith.constant 0 : index
    %47 = vector.load %arg15[%c0_24, %c0_25] : memref<1152x128xf32, #tpu.memory_space<vmem>>, vector<1152x128xf32>
    tpu.vector_store %arg15[%c0_24, %c0_25], %42 {strides = array<i32>} : memref<1152x128xf32, #tpu.memory_space<vmem>>, vector<1152x128xf32>,
    %c0_26 = arith.constant 0 : index
    %c0_27 = arith.constant 0 : index
    %48 = vector.load %arg8[%c0_26, %c0_27] : memref<1x128xf32, #tpu.memory_space<vmem>>, vector<1x128xf32>
    %49 = arith.mulf %46, %48 : vector<1x128xf32>
    %c0_28 = arith.constant 0 : index
    %c0_29 = arith.constant 0 : index
    %50 = vector.load %arg9[%c0_28, %c0_29] : memref<1x128xf32, #tpu.memory_space<vmem>>, vector<1x128xf32>
    %51 = arith.addf %49, %50 : vector<1x128xf32>
    %c0_30 = arith.constant 0 : index
    %c0_31 = arith.constant 0 : index
    %c0_32 = arith.constant 0 : index
    %52 = vector.load %arg2[%c0_30, %c0_31, %c0_32] : memref<1x256x128xf32, #tpu.memory_space<vmem>>, vector<1x256x128xf32>
    %53 = vector.shape_cast %52 : vector<1x256x128xf32> to vector<256x128xf32>
    %c0_33 = arith.constant 0 : index
    %c0_34 = arith.constant 0 : index
    %54 = vector.load %arg3[%c0_33, %c0_34] : memref<128x128xf32, #tpu.memory_space<vmem>>, vector<128x128xf32>
    %cst = arith.constant dense<0.000000e+00> : vector<256x128xf32>
    %55 = tpu.matmul %53, %54, %cst {dimension_numbers = #tpu.dot_dimension_numbers<[1], [0], [0], [1], [0, 0, 1, 1], [], []>} : vector<256x128xf32>, vector<128x128xf32>, vector<256x128xf32> -> vector<256x128xf32>
    %c0_35 = arith.constant 0 : index
    %c0_36 = arith.constant 0 : index
    %56 = vector.load %arg4[%c0_35, %c0_36] : memref<1x128xf32, #tpu.memory_space<vmem>>, vector<1x128xf32>
    %57 = vector.broadcast %56 : vector<1x128xf32> to vector<256x128xf32>
    %58 = arith.mulf %55, %57 : vector<256x128xf32>
    %c0_37 = arith.constant 0 : index
    %c0_38 = arith.constant 0 : index
    %59 = vector.load %arg5[%c0_37, %c0_38] : memref<1x128xf32, #tpu.memory_space<vmem>>, vector<1x128xf32>
    %60 = vector.broadcast %59 : vector<1x128xf32> to vector<256x128xf32>
    %61 = arith.addf %58, %60 : vector<256x128xf32>
    %cst_39 = arith.constant 0.000000e+00 : f32
    %62 = vector.broadcast %cst_39 : f32 to vector<256x128xf32>
    %63 = arith.maximumf %61, %62 : vector<256x128xf32>
    %cst_40 = arith.constant 0.000000e+00 : f32
    %64 = vector.broadcast %cst_40 : f32 to vector<332x128xf32>
    %c0_41 = arith.constant 0 : index
    %c0_42 = arith.constant 0 : index
    %65 = vector.load %arg14[%c0_41, %c0_42] : memref<332x128xf32, #tpu.memory_space<vmem>>, vector<332x128xf32>
    tpu.vector_store %arg14[%c0_41, %c0_42], %64 {strides = array<i32>} : memref<332x128xf32, #tpu.memory_space<vmem>>, vector<332x128xf32>,
    %66 = vector.extract_strided_slice %63 {offsets = [0, 0], sizes = [16, 128], strides = [1, 1]} : vector<256x128xf32> to vector<16x128xf32>
    %c19 = arith.constant 19 : index
    %c0_43 = arith.constant 0 : index
    %67 = vector.load %arg14[%c19, %c0_43] : memref<332x128xf32, #tpu.memory_space<vmem>>, vector<16x128xf32>
    tpu.vector_store %arg14[%c19, %c0_43], %66 {strides = array<i32>} : memref<332x128xf32, #tpu.memory_space<vmem>>, vector<16x128xf32>,
    %68 = vector.extract_strided_slice %63 {offsets = [16, 0], sizes = [16, 128], strides = [1, 1]} : vector<256x128xf32> to vector<16x128xf32>
    %c37 = arith.constant 37 : index
    %c0_44 = arith.constant 0 : index
    %69 = vector.load %arg14[%c37, %c0_44] : memref<332x128xf32, #tpu.memory_space<vmem>>, vector<16x128xf32>
    tpu.vector_store %arg14[%c37, %c0_44], %68 {strides = array<i32>} : memref<332x128xf32, #tpu.memory_space<vmem>>, vector<16x128xf32>,
    %70 = vector.extract_strided_slice %63 {offsets = [32, 0], sizes = [16, 128], strides = [1, 1]} : vector<256x128xf32> to vector<16x128xf32>
    %c55 = arith.constant 55 : index
    %c0_45 = arith.constant 0 : index
    %71 = vector.load %arg14[%c55, %c0_45] : memref<332x128xf32, #tpu.memory_space<vmem>>, vector<16x128xf32>
    tpu.vector_store %arg14[%c55, %c0_45], %70 {strides = array<i32>} : memref<332x128xf32, #tpu.memory_space<vmem>>, vector<16x128xf32>,
    %72 = vector.extract_strided_slice %63 {offsets = [48, 0], sizes = [16, 128], strides = [1, 1]} : vector<256x128xf32> to vector<16x128xf32>
    %c73 = arith.constant 73 : index
    %c0_46 = arith.constant 0 : index
    %73 = vector.load %arg14[%c73, %c0_46] : memref<332x128xf32, #tpu.memory_space<vmem>>, vector<16x128xf32>
    tpu.vector_store %arg14[%c73, %c0_46], %72 {strides = array<i32>} : memref<332x128xf32, #tpu.memory_space<vmem>>, vector<16x128xf32>,
    %74 = vector.extract_strided_slice %63 {offsets = [64, 0], sizes = [16, 128], strides = [1, 1]} : vector<256x128xf32> to vector<16x128xf32>
    %c91 = arith.constant 91 : index
    %c0_47 = arith.constant 0 : index
    %75 = vector.load %arg14[%c91, %c0_47] : memref<332x128xf32, #tpu.memory_space<vmem>>, vector<16x128xf32>
    tpu.vector_store %arg14[%c91, %c0_47], %74 {strides = array<i32>} : memref<332x128xf32, #tpu.memory_space<vmem>>, vector<16x128xf32>,
    %76 = vector.extract_strided_slice %63 {offsets = [80, 0], sizes = [16, 128], strides = [1, 1]} : vector<256x128xf32> to vector<16x128xf32>
    %c109 = arith.constant 109 : index
    %c0_48 = arith.constant 0 : index
    %77 = vector.load %arg14[%c109, %c0_48] : memref<332x128xf32, #tpu.memory_space<vmem>>, vector<16x128xf32>
    tpu.vector_store %arg14[%c109, %c0_48], %76 {strides = array<i32>} : memref<332x128xf32, #tpu.memory_space<vmem>>, vector<16x128xf32>,
    %78 = vector.extract_strided_slice %63 {offsets = [96, 0], sizes = [16, 128], strides = [1, 1]} : vector<256x128xf32> to vector<16x128xf32>
    %c127 = arith.constant 127 : index
    %c0_49 = arith.constant 0 : index
    %79 = vector.load %arg14[%c127, %c0_49] : memref<332x128xf32, #tpu.memory_space<vmem>>, vector<16x128xf32>
    tpu.vector_store %arg14[%c127, %c0_49], %78 {strides = array<i32>} : memref<332x128xf32, #tpu.memory_space<vmem>>, vector<16x128xf32>,
    %80 = vector.extract_strided_slice %63 {offsets = [112, 0], sizes = [16, 128], strides = [1, 1]} : vector<256x128xf32> to vector<16x128xf32>
    %c145 = arith.constant 145 : index
    %c0_50 = arith.constant 0 : index
    %81 = vector.load %arg14[%c145, %c0_50] : memref<332x128xf32, #tpu.memory_space<vmem>>, vector<16x128xf32>
    tpu.vector_store %arg14[%c145, %c0_50], %80 {strides = array<i32>} : memref<332x128xf32, #tpu.memory_space<vmem>>, vector<16x128xf32>,
    %82 = vector.extract_strided_slice %63 {offsets = [128, 0], sizes = [16, 128], strides = [1, 1]} : vector<256x128xf32> to vector<16x128xf32>
    %c163 = arith.constant 163 : index
    %c0_51 = arith.constant 0 : index
    %83 = vector.load %arg14[%c163, %c0_51] : memref<332x128xf32, #tpu.memory_space<vmem>>, vector<16x128xf32>
    tpu.vector_store %arg14[%c163, %c0_51], %82 {strides = array<i32>} : memref<332x128xf32, #tpu.memory_space<vmem>>, vector<16x128xf32>,
    %84 = vector.extract_strided_slice %63 {offsets = [144, 0], sizes = [16, 128], strides = [1, 1]} : vector<256x128xf32> to vector<16x128xf32>
    %c181 = arith.constant 181 : index
    %c0_52 = arith.constant 0 : index
    %85 = vector.load %arg14[%c181, %c0_52] : memref<332x128xf32, #tpu.memory_space<vmem>>, vector<16x128xf32>
    tpu.vector_store %arg14[%c181, %c0_52], %84 {strides = array<i32>} : memref<332x128xf32, #tpu.memory_space<vmem>>, vector<16x128xf32>,
    %86 = vector.extract_strided_slice %63 {offsets = [160, 0], sizes = [16, 128], strides = [1, 1]} : vector<256x128xf32> to vector<16x128xf32>
    %c199 = arith.constant 199 : index
    %c0_53 = arith.constant 0 : index
    %87 = vector.load %arg14[%c199, %c0_53] : memref<332x128xf32, #tpu.memory_space<vmem>>, vector<16x128xf32>
    tpu.vector_store %arg14[%c199, %c0_53], %86 {strides = array<i32>} : memref<332x128xf32, #tpu.memory_space<vmem>>, vector<16x128xf32>,
    %88 = vector.extract_strided_slice %63 {offsets = [176, 0], sizes = [16, 128], strides = [1, 1]} : vector<256x128xf32> to vector<16x128xf32>
    %c217 = arith.constant 217 : index
    %c0_54 = arith.constant 0 : index
    %89 = vector.load %arg14[%c217, %c0_54] : memref<332x128xf32, #tpu.memory_space<vmem>>, vector<16x128xf32>
    tpu.vector_store %arg14[%c217, %c0_54], %88 {strides = array<i32>} : memref<332x128xf32, #tpu.memory_space<vmem>>, vector<16x128xf32>,
    %90 = vector.extract_strided_slice %63 {offsets = [192, 0], sizes = [16, 128], strides = [1, 1]} : vector<256x128xf32> to vector<16x128xf32>
    %c235 = arith.constant 235 : index
    %c0_55 = arith.constant 0 : index
    %91 = vector.load %arg14[%c235, %c0_55] : memref<332x128xf32, #tpu.memory_space<vmem>>, vector<16x128xf32>
    tpu.vector_store %arg14[%c235, %c0_55], %90 {strides = array<i32>} : memref<332x128xf32, #tpu.memory_space<vmem>>, vector<16x128xf32>,
    %92 = vector.extract_strided_slice %63 {offsets = [208, 0], sizes = [16, 128], strides = [1, 1]} : vector<256x128xf32> to vector<16x128xf32>
    %c253 = arith.constant 253 : index
    %c0_56 = arith.constant 0 : index
    %93 = vector.load %arg14[%c253, %c0_56] : memref<332x128xf32, #tpu.memory_space<vmem>>, vector<16x128xf32>
    tpu.vector_store %arg14[%c253, %c0_56], %92 {strides = array<i32>} : memref<332x128xf32, #tpu.memory_space<vmem>>, vector<16x128xf32>,
    %94 = vector.extract_strided_slice %63 {offsets = [224, 0], sizes = [16, 128], strides = [1, 1]} : vector<256x128xf32> to vector<16x128xf32>
    %c271 = arith.constant 271 : index
    %c0_57 = arith.constant 0 : index
    %95 = vector.load %arg14[%c271, %c0_57] : memref<332x128xf32, #tpu.memory_space<vmem>>, vector<16x128xf32>
    tpu.vector_store %arg14[%c271, %c0_57], %94 {strides = array<i32>} : memref<332x128xf32, #tpu.memory_space<vmem>>, vector<16x128xf32>,
    %96 = vector.extract_strided_slice %63 {offsets = [240, 0], sizes = [16, 128], strides = [1, 1]} : vector<256x128xf32> to vector<16x128xf32>
    %c289 = arith.constant 289 : index
    %c0_58 = arith.constant 0 : index
    %97 = vector.load %arg14[%c289, %c0_58] : memref<332x128xf32, #tpu.memory_space<vmem>>, vector<16x128xf32>
    tpu.vector_store %arg14[%c289, %c0_58], %96 {strides = array<i32>} : memref<332x128xf32, #tpu.memory_space<vmem>>, vector<16x128xf32>,
    %cst_59 = arith.constant 0.000000e+00 : f32
    %98 = vector.broadcast %cst_59 : f32 to vector<288x128xf32>
    %c0_60 = arith.constant 0 : index
    %c0_61 = arith.constant 0 : index
    %99 = vector.load %arg14[%c0_60, %c0_61] : memref<332x128xf32, #tpu.memory_space<vmem>>, vector<288x128xf32>
    %c0_62 = arith.constant 0 : index
    %c0_63 = arith.constant 0 : index
    %100 = vector.load %arg15[%c0_62, %c0_63] : memref<1152x128xf32, #tpu.memory_space<vmem>>, vector<128x128xf32>
    %cst_64 = arith.constant dense<0.000000e+00> : vector<288x128xf32>
    %101 = tpu.matmul %99, %100, %cst_64 {dimension_numbers = #tpu.dot_dimension_numbers<[1], [0], [0], [1], [0, 0, 1, 1], [], []>} : vector<288x128xf32>, vector<128x128xf32>, vector<288x128xf32> -> vector<288x128xf32>
    %102 = arith.addf %98, %101 : vector<288x128xf32>
    %c1_65 = arith.constant 1 : index
    %c0_66 = arith.constant 0 : index
    %103 = vector.load %arg14[%c1_65, %c0_66] : memref<332x128xf32, #tpu.memory_space<vmem>>, vector<288x128xf32>
    %c128 = arith.constant 128 : index
    %c0_67 = arith.constant 0 : index
    %104 = vector.load %arg15[%c128, %c0_67] : memref<1152x128xf32, #tpu.memory_space<vmem>>, vector<128x128xf32>
    %cst_68 = arith.constant dense<0.000000e+00> : vector<288x128xf32>
    %105 = tpu.matmul %103, %104, %cst_68 {dimension_numbers = #tpu.dot_dimension_numbers<[1], [0], [0], [1], [0, 0, 1, 1], [], []>} : vector<288x128xf32>, vector<128x128xf32>, vector<288x128xf32> -> vector<288x128xf32>
    %106 = arith.addf %102, %105 : vector<288x128xf32>
    %c2_69 = arith.constant 2 : index
    %c0_70 = arith.constant 0 : index
    %107 = vector.load %arg14[%c2_69, %c0_70] : memref<332x128xf32, #tpu.memory_space<vmem>>, vector<288x128xf32>
    %c256 = arith.constant 256 : index
    %c0_71 = arith.constant 0 : index
    %108 = vector.load %arg15[%c256, %c0_71] : memref<1152x128xf32, #tpu.memory_space<vmem>>, vector<128x128xf32>
    %cst_72 = arith.constant dense<0.000000e+00> : vector<288x128xf32>
    %109 = tpu.matmul %107, %108, %cst_72 {dimension_numbers = #tpu.dot_dimension_numbers<[1], [0], [0], [1], [0, 0, 1, 1], [], []>} : vector<288x128xf32>, vector<128x128xf32>, vector<288x128xf32> -> vector<288x128xf32>
    %110 = arith.addf %106, %109 : vector<288x128xf32>
    %c18 = arith.constant 18 : index
    %c0_73 = arith.constant 0 : index
    %111 = vector.load %arg14[%c18, %c0_73] : memref<332x128xf32, #tpu.memory_space<vmem>>, vector<288x128xf32>
    %c384 = arith.constant 384 : index
    %c0_74 = arith.constant 0 : index
    %112 = vector.load %arg15[%c384, %c0_74] : memref<1152x128xf32, #tpu.memory_space<vmem>>, vector<128x128xf32>
    %cst_75 = arith.constant dense<0.000000e+00> : vector<288x128xf32>
    %113 = tpu.matmul %111, %112, %cst_75 {dimension_numbers = #tpu.dot_dimension_numbers<[1], [0], [0], [1], [0, 0, 1, 1], [], []>} : vector<288x128xf32>, vector<128x128xf32>, vector<288x128xf32> -> vector<288x128xf32>
    %114 = arith.addf %110, %113 : vector<288x128xf32>
    %c19_76 = arith.constant 19 : index
    %c0_77 = arith.constant 0 : index
    %115 = vector.load %arg14[%c19_76, %c0_77] : memref<332x128xf32, #tpu.memory_space<vmem>>, vector<288x128xf32>
    %c512 = arith.constant 512 : index
    %c0_78 = arith.constant 0 : index
    %116 = vector.load %arg15[%c512, %c0_78] : memref<1152x128xf32, #tpu.memory_space<vmem>>, vector<128x128xf32>
    %cst_79 = arith.constant dense<0.000000e+00> : vector<288x128xf32>
    %117 = tpu.matmul %115, %116, %cst_79 {dimension_numbers = #tpu.dot_dimension_numbers<[1], [0], [0], [1], [0, 0, 1, 1], [], []>} : vector<288x128xf32>, vector<128x128xf32>, vector<288x128xf32> -> vector<288x128xf32>
    %118 = arith.addf %114, %117 : vector<288x128xf32>
    %c20 = arith.constant 20 : index
    %c0_80 = arith.constant 0 : index
    %119 = vector.load %arg14[%c20, %c0_80] : memref<332x128xf32, #tpu.memory_space<vmem>>, vector<288x128xf32>
    %c640 = arith.constant 640 : index
    %c0_81 = arith.constant 0 : index
    %120 = vector.load %arg15[%c640, %c0_81] : memref<1152x128xf32, #tpu.memory_space<vmem>>, vector<128x128xf32>
    %cst_82 = arith.constant dense<0.000000e+00> : vector<288x128xf32>
    %121 = tpu.matmul %119, %120, %cst_82 {dimension_numbers = #tpu.dot_dimension_numbers<[1], [0], [0], [1], [0, 0, 1, 1], [], []>} : vector<288x128xf32>, vector<128x128xf32>, vector<288x128xf32> -> vector<288x128xf32>
    %122 = arith.addf %118, %121 : vector<288x128xf32>
    %c36 = arith.constant 36 : index
    %c0_83 = arith.constant 0 : index
    %123 = vector.load %arg14[%c36, %c0_83] : memref<332x128xf32, #tpu.memory_space<vmem>>, vector<288x128xf32>
    %c768 = arith.constant 768 : index
    %c0_84 = arith.constant 0 : index
    %124 = vector.load %arg15[%c768, %c0_84] : memref<1152x128xf32, #tpu.memory_space<vmem>>, vector<128x128xf32>
    %cst_85 = arith.constant dense<0.000000e+00> : vector<288x128xf32>
    %125 = tpu.matmul %123, %124, %cst_85 {dimension_numbers = #tpu.dot_dimension_numbers<[1], [0], [0], [1], [0, 0, 1, 1], [], []>} : vector<288x128xf32>, vector<128x128xf32>, vector<288x128xf32> -> vector<288x128xf32>
    %126 = arith.addf %122, %125 : vector<288x128xf32>
    %c37_86 = arith.constant 37 : index
    %c0_87 = arith.constant 0 : index
    %127 = vector.load %arg14[%c37_86, %c0_87] : memref<332x128xf32, #tpu.memory_space<vmem>>, vector<288x128xf32>
    %c896 = arith.constant 896 : index
    %c0_88 = arith.constant 0 : index
    %128 = vector.load %arg15[%c896, %c0_88] : memref<1152x128xf32, #tpu.memory_space<vmem>>, vector<128x128xf32>
    %cst_89 = arith.constant dense<0.000000e+00> : vector<288x128xf32>
    %129 = tpu.matmul %127, %128, %cst_89 {dimension_numbers = #tpu.dot_dimension_numbers<[1], [0], [0], [1], [0, 0, 1, 1], [], []>} : vector<288x128xf32>, vector<128x128xf32>, vector<288x128xf32> -> vector<288x128xf32>
    %130 = arith.addf %126, %129 : vector<288x128xf32>
    %c38 = arith.constant 38 : index
    %c0_90 = arith.constant 0 : index
    %131 = vector.load %arg14[%c38, %c0_90] : memref<332x128xf32, #tpu.memory_space<vmem>>, vector<288x128xf32>
    %c1024 = arith.constant 1024 : index
    %c0_91 = arith.constant 0 : index
    %132 = vector.load %arg15[%c1024, %c0_91] : memref<1152x128xf32, #tpu.memory_space<vmem>>, vector<128x128xf32>
    %cst_92 = arith.constant dense<0.000000e+00> : vector<288x128xf32>
    %133 = tpu.matmul %131, %132, %cst_92 {dimension_numbers = #tpu.dot_dimension_numbers<[1], [0], [0], [1], [0, 0, 1, 1], [], []>} : vector<288x128xf32>, vector<128x128xf32>, vector<288x128xf32> -> vector<288x128xf32>
    %134 = arith.addf %130, %133 : vector<288x128xf32>
    %c0_93 = arith.constant 0 : index
    %c0_94 = arith.constant 0 : index
    %135 = vector.load %arg8[%c0_93, %c0_94] : memref<1x128xf32, #tpu.memory_space<vmem>>, vector<1x128xf32>
    %136 = vector.broadcast %135 : vector<1x128xf32> to vector<288x128xf32>
    %137 = arith.mulf %134, %136 : vector<288x128xf32>
    %138 = vector.broadcast %51 : vector<1x128xf32> to vector<288x128xf32>
    %139 = arith.addf %137, %138 : vector<288x128xf32>
    %cst_95 = arith.constant 0.000000e+00 : f32
    %140 = vector.broadcast %cst_95 : f32 to vector<288x128xf32>
    %141 = arith.maximumf %139, %140 : vector<288x128xf32>
    %142 = vector.extract_strided_slice %141 {offsets = [0, 0], sizes = [16, 128], strides = [1, 1]} : vector<288x128xf32> to vector<16x128xf32>
    %c0_96 = arith.constant 0 : index
    %c0_97 = arith.constant 0 : index
    %143 = vector.load %arg16[%c0_96, %c0_97] : memref<256x128xf32, #tpu.memory_space<vmem>>, vector<16x128xf32>
    tpu.vector_store %arg16[%c0_96, %c0_97], %142 {strides = array<i32>} : memref<256x128xf32, #tpu.memory_space<vmem>>, vector<16x128xf32>,
    %144 = vector.extract_strided_slice %141 {offsets = [18, 0], sizes = [16, 128], strides = [1, 1]} : vector<288x128xf32> to vector<16x128xf32>
    %c16 = arith.constant 16 : index
    %c0_98 = arith.constant 0 : index
    %145 = vector.load %arg16[%c16, %c0_98] : memref<256x128xf32, #tpu.memory_space<vmem>>, vector<16x128xf32>
    tpu.vector_store %arg16[%c16, %c0_98], %144 {strides = array<i32>} : memref<256x128xf32, #tpu.memory_space<vmem>>, vector<16x128xf32>,
    %146 = vector.extract_strided_slice %141 {offsets = [36, 0], sizes = [16, 128], strides = [1, 1]} : vector<288x128xf32> to vector<16x128xf32>
    %c32 = arith.constant 32 : index
    %c0_99 = arith.constant 0 : index
    %147 = vector.load %arg16[%c32, %c0_99] : memref<256x128xf32, #tpu.memory_space<vmem>>, vector<16x128xf32>
    tpu.vector_store %arg16[%c32, %c0_99], %146 {strides = array<i32>} : memref<256x128xf32, #tpu.memory_space<vmem>>, vector<16x128xf32>,
    %148 = vector.extract_strided_slice %141 {offsets = [54, 0], sizes = [16, 128], strides = [1, 1]} : vector<288x128xf32> to vector<16x128xf32>
    %c48 = arith.constant 48 : index
    %c0_100 = arith.constant 0 : index
    %149 = vector.load %arg16[%c48, %c0_100] : memref<256x128xf32, #tpu.memory_space<vmem>>, vector<16x128xf32>
    tpu.vector_store %arg16[%c48, %c0_100], %148 {strides = array<i32>} : memref<256x128xf32, #tpu.memory_space<vmem>>, vector<16x128xf32>,
    %150 = vector.extract_strided_slice %141 {offsets = [72, 0], sizes = [16, 128], strides = [1, 1]} : vector<288x128xf32> to vector<16x128xf32>
    %c64 = arith.constant 64 : index
    %c0_101 = arith.constant 0 : index
    %151 = vector.load %arg16[%c64, %c0_101] : memref<256x128xf32, #tpu.memory_space<vmem>>, vector<16x128xf32>
    tpu.vector_store %arg16[%c64, %c0_101], %150 {strides = array<i32>} : memref<256x128xf32, #tpu.memory_space<vmem>>, vector<16x128xf32>,
    %152 = vector.extract_strided_slice %141 {offsets = [90, 0], sizes = [16, 128], strides = [1, 1]} : vector<288x128xf32> to vector<16x128xf32>
    %c80 = arith.constant 80 : index
    %c0_102 = arith.constant 0 : index
    %153 = vector.load %arg16[%c80, %c0_102] : memref<256x128xf32, #tpu.memory_space<vmem>>, vector<16x128xf32>
    tpu.vector_store %arg16[%c80, %c0_102], %152 {strides = array<i32>} : memref<256x128xf32, #tpu.memory_space<vmem>>, vector<16x128xf32>,
    %154 = vector.extract_strided_slice %141 {offsets = [108, 0], sizes = [16, 128], strides = [1, 1]} : vector<288x128xf32> to vector<16x128xf32>
    %c96 = arith.constant 96 : index
    %c0_103 = arith.constant 0 : index
    %155 = vector.load %arg16[%c96, %c0_103] : memref<256x128xf32, #tpu.memory_space<vmem>>, vector<16x128xf32>
    tpu.vector_store %arg16[%c96, %c0_103], %154 {strides = array<i32>} : memref<256x128xf32, #tpu.memory_space<vmem>>, vector<16x128xf32>,
    %156 = vector.extract_strided_slice %141 {offsets = [126, 0], sizes = [16, 128], strides = [1, 1]} : vector<288x128xf32> to vector<16x128xf32>
    %c112 = arith.constant 112 : index
    %c0_104 = arith.constant 0 : index
    %157 = vector.load %arg16[%c112, %c0_104] : memref<256x128xf32, #tpu.memory_space<vmem>>, vector<16x128xf32>
    tpu.vector_store %arg16[%c112, %c0_104], %156 {strides = array<i32>} : memref<256x128xf32, #tpu.memory_space<vmem>>, vector<16x128xf32>,
    %158 = vector.extract_strided_slice %141 {offsets = [144, 0], sizes = [16, 128], strides = [1, 1]} : vector<288x128xf32> to vector<16x128xf32>
    %c128_105 = arith.constant 128 : index
    %c0_106 = arith.constant 0 : index
    %159 = vector.load %arg16[%c128_105, %c0_106] : memref<256x128xf32, #tpu.memory_space<vmem>>, vector<16x128xf32>
    tpu.vector_store %arg16[%c128_105, %c0_106], %158 {strides = array<i32>} : memref<256x128xf32, #tpu.memory_space<vmem>>, vector<16x128xf32>,
    %160 = vector.extract_strided_slice %141 {offsets = [162, 0], sizes = [16, 128], strides = [1, 1]} : vector<288x128xf32> to vector<16x128xf32>
    %c144 = arith.constant 144 : index
    %c0_107 = arith.constant 0 : index
    %161 = vector.load %arg16[%c144, %c0_107] : memref<256x128xf32, #tpu.memory_space<vmem>>, vector<16x128xf32>
    tpu.vector_store %arg16[%c144, %c0_107], %160 {strides = array<i32>} : memref<256x128xf32, #tpu.memory_space<vmem>>, vector<16x128xf32>,
    %162 = vector.extract_strided_slice %141 {offsets = [180, 0], sizes = [16, 128], strides = [1, 1]} : vector<288x128xf32> to vector<16x128xf32>
    %c160 = arith.constant 160 : index
    %c0_108 = arith.constant 0 : index
    %163 = vector.load %arg16[%c160, %c0_108] : memref<256x128xf32, #tpu.memory_space<vmem>>, vector<16x128xf32>
    tpu.vector_store %arg16[%c160, %c0_108], %162 {strides = array<i32>} : memref<256x128xf32, #tpu.memory_space<vmem>>, vector<16x128xf32>,
    %164 = vector.extract_strided_slice %141 {offsets = [198, 0], sizes = [16, 128], strides = [1, 1]} : vector<288x128xf32> to vector<16x128xf32>
    %c176 = arith.constant 176 : index
    %c0_109 = arith.constant 0 : index
    %165 = vector.load %arg16[%c176, %c0_109] : memref<256x128xf32, #tpu.memory_space<vmem>>, vector<16x128xf32>
    tpu.vector_store %arg16[%c176, %c0_109], %164 {strides = array<i32>} : memref<256x128xf32, #tpu.memory_space<vmem>>, vector<16x128xf32>,
    %166 = vector.extract_strided_slice %141 {offsets = [216, 0], sizes = [16, 128], strides = [1, 1]} : vector<288x128xf32> to vector<16x128xf32>
    %c192 = arith.constant 192 : index
    %c0_110 = arith.constant 0 : index
    %167 = vector.load %arg16[%c192, %c0_110] : memref<256x128xf32, #tpu.memory_space<vmem>>, vector<16x128xf32>
    tpu.vector_store %arg16[%c192, %c0_110], %166 {strides = array<i32>} : memref<256x128xf32, #tpu.memory_space<vmem>>, vector<16x128xf32>,
    %168 = vector.extract_strided_slice %141 {offsets = [234, 0], sizes = [16, 128], strides = [1, 1]} : vector<288x128xf32> to vector<16x128xf32>
    %c208 = arith.constant 208 : index
    %c0_111 = arith.constant 0 : index
    %169 = vector.load %arg16[%c208, %c0_111] : memref<256x128xf32, #tpu.memory_space<vmem>>, vector<16x128xf32>
    tpu.vector_store %arg16[%c208, %c0_111], %168 {strides = array<i32>} : memref<256x128xf32, #tpu.memory_space<vmem>>, vector<16x128xf32>,
    %170 = vector.extract_strided_slice %141 {offsets = [252, 0], sizes = [16, 128], strides = [1, 1]} : vector<288x128xf32> to vector<16x128xf32>
    %c224 = arith.constant 224 : index
    %c0_112 = arith.constant 0 : index
    %171 = vector.load %arg16[%c224, %c0_112] : memref<256x128xf32, #tpu.memory_space<vmem>>, vector<16x128xf32>
    tpu.vector_store %arg16[%c224, %c0_112], %170 {strides = array<i32>} : memref<256x128xf32, #tpu.memory_space<vmem>>, vector<16x128xf32>,
    %172 = vector.extract_strided_slice %141 {offsets = [270, 0], sizes = [16, 128], strides = [1, 1]} : vector<288x128xf32> to vector<16x128xf32>
    %c240 = arith.constant 240 : index
    %c0_113 = arith.constant 0 : index
    %173 = vector.load %arg16[%c240, %c0_113] : memref<256x128xf32, #tpu.memory_space<vmem>>, vector<16x128xf32>
    tpu.vector_store %arg16[%c240, %c0_113], %172 {strides = array<i32>} : memref<256x128xf32, #tpu.memory_space<vmem>>, vector<16x128xf32>,
    %c0_114 = arith.constant 0 : index
    %c0_115 = arith.constant 0 : index
    %174 = vector.load %arg16[%c0_114, %c0_115] : memref<256x128xf32, #tpu.memory_space<vmem>>, vector<256x128xf32>
    %c0_116 = arith.constant 0 : index
    %c0_117 = arith.constant 0 : index
    %175 = vector.load %arg10[%c0_116, %c0_117] : memref<128x128xf32, #tpu.memory_space<vmem>>, vector<128x128xf32>
    %cst_118 = arith.constant dense<0.000000e+00> : vector<256x128xf32>
    %176 = tpu.matmul %174, %175, %cst_118 {dimension_numbers = #tpu.dot_dimension_numbers<[1], [0], [0], [1], [0, 0, 1, 1], [], []>} : vector<256x128xf32>, vector<128x128xf32>, vector<256x128xf32> -> vector<256x128xf32>
    %c0_119 = arith.constant 0 : index
    %c0_120 = arith.constant 0 : index
    %177 = vector.load %arg11[%c0_119, %c0_120] : memref<1x128xf32, #tpu.memory_space<vmem>>, vector<1x128xf32>
    %178 = vector.broadcast %177 : vector<1x128xf32> to vector<256x128xf32>
    %179 = arith.mulf %176, %178 : vector<256x128xf32>
    %c0_121 = arith.constant 0 : index
    %c0_122 = arith.constant 0 : index
    %180 = vector.load %arg12[%c0_121, %c0_122] : memref<1x128xf32, #tpu.memory_space<vmem>>, vector<1x128xf32>
    %181 = vector.broadcast %180 : vector<1x128xf32> to vector<256x128xf32>
    %182 = arith.addf %179, %181 : vector<256x128xf32>
    %c0_123 = arith.constant 0 : index
    %c0_124 = arith.constant 0 : index
    %c0_125 = arith.constant 0 : index
    %183 = vector.load %arg2[%c0_123, %c0_124, %c0_125] : memref<1x256x128xf32, #tpu.memory_space<vmem>>, vector<1x256x128xf32>
    %184 = vector.shape_cast %183 : vector<1x256x128xf32> to vector<256x128xf32>
    %185 = arith.addf %182, %184 : vector<256x128xf32>
    %cst_126 = arith.constant 0.000000e+00 : f32
    %186 = vector.broadcast %cst_126 : f32 to vector<256x128xf32>
    %187 = arith.maximumf %185, %186 : vector<256x128xf32>
    %c0_127 = arith.constant 0 : index
    %c0_128 = arith.constant 0 : index
    %c0_129 = arith.constant 0 : index
    %188 = vector.load %arg13[%c0_127, %c0_128, %c0_129] : memref<1x256x128xf32, #tpu.memory_space<vmem>>, vector<1x256x128xf32>
    %189 = vector.shape_cast %188 : vector<1x256x128xf32> to vector<256x128xf32>
    %190 = vector.shape_cast %187 : vector<256x128xf32> to vector<1x256x128xf32>
    tpu.vector_store %arg13[%c0_127, %c0_128, %c0_129], %190 {strides = array<i32>} : memref<1x256x128xf32, #tpu.memory_space<vmem>>, vector<1x256x128xf32>,
    return
  }
  func.func @transform_0(%arg0: i32) -> (i32, i32) {
    %c0_i32 = arith.constant 0 : i32
    %c0_i32_0 = arith.constant 0 : i32
    %c0_i32_1 = arith.constant 0 : i32
    return %c0_i32, %c0_i32_0 : i32, i32
  }
  func.func @transform_1(%arg0: i32) -> (i32, i32, i32) {
    %c0_i32 = arith.constant 0 : i32
    %c0_i32_0 = arith.constant 0 : i32
    %c0_i32_1 = arith.constant 0 : i32
    return %arg0, %c0_i32, %c0_i32_0 : i32, i32, i32
  }
  func.func @transform_2(%arg0: i32) -> (i32, i32) {
    %c0_i32 = arith.constant 0 : i32
    %c0_i32_0 = arith.constant 0 : i32
    %c0_i32_1 = arith.constant 0 : i32
    return %c0_i32, %c0_i32_0 : i32, i32
  }
  func.func @transform_3(%arg0: i32) -> (i32, i32) {
    %c0_i32 = arith.constant 0 : i32
    %c0_i32_0 = arith.constant 0 : i32
    %c0_i32_1 = arith.constant 0 : i32
    return %c0_i32, %c0_i32_0 : i32, i32
  }
  func.func @transform_4(%arg0: i32) -> (i32, i32) {
    %c0_i32 = arith.constant 0 : i32
    %c0_i32_0 = arith.constant 0 : i32
    %c0_i32_1 = arith.constant 0 : i32
    return %c0_i32, %c0_i32_0 : i32, i32
  }
  func.func @transform_5(%arg0: i32) -> (i32, i32, i32) {
    %c0_i32 = arith.constant 0 : i32
    %c0_i32_0 = arith.constant 0 : i32
    %c0_i32_1 = arith.constant 0 : i32
    %c0_i32_2 = arith.constant 0 : i32
    return %c0_i32, %c0_i32_0, %c0_i32_1 : i32, i32, i32
  }
  func.func @transform_6(%arg0: i32) -> (i32, i32) {
    %c0_i32 = arith.constant 0 : i32
    %c0_i32_0 = arith.constant 0 : i32
    %c0_i32_1 = arith.constant 0 : i32
    return %c0_i32, %c0_i32_0 : i32, i32
  }
  func.func @transform_7(%arg0: i32) -> (i32, i32) {
    %c0_i32 = arith.constant 0 : i32
    %c0_i32_0 = arith.constant 0 : i32
    %c0_i32_1 = arith.constant 0 : i32
    return %c0_i32, %c0_i32_0 : i32, i32
  }
  func.func @transform_8(%arg0: i32) -> (i32, i32) {
    %c0_i32 = arith.constant 0 : i32
    %c0_i32_0 = arith.constant 0 : i32
    %c0_i32_1 = arith.constant 0 : i32
    return %c0_i32, %c0_i32_0 : i32, i32
  }
  func.func @transform_9(%arg0: i32) -> (i32, i32) {
    %c0_i32 = arith.constant 0 : i32
    %c0_i32_0 = arith.constant 0 : i32
    %c0_i32_1 = arith.constant 0 : i32
    return %c0_i32, %c0_i32_0 : i32, i32
  }
  func.func @transform_10(%arg0: i32) -> (i32, i32) {
    %c0_i32 = arith.constant 0 : i32
    %c0_i32_0 = arith.constant 0 : i32
    %c0_i32_1 = arith.constant 0 : i32
    return %c0_i32, %c0_i32_0 : i32, i32
  }
  func.func @transform_11(%arg0: i32) -> (i32, i32) {
    %c0_i32 = arith.constant 0 : i32
    %c0_i32_0 = arith.constant 0 : i32
    %c0_i32_1 = arith.constant 0 : i32
    return %c0_i32, %c0_i32_0 : i32, i32
  }
  func.func @transform_12(%arg0: i32) -> (i32, i32, i32) {
    %c0_i32 = arith.constant 0 : i32
    %c0_i32_0 = arith.constant 0 : i32
    %c0_i32_1 = arith.constant 0 : i32
    return %arg0, %c0_i32, %c0_i32_0 : i32, i32, i32
  }
}

</mosaic_0001>

<bundles_post_ra>
// kernel: tpu_custom_call.1
= control target key start
LH: loop header
LB: loop body
LE: loop exit
PB: predicated region body
PF: predicated region fallthrough
CT: control target
= control target key end

     0   :  { %s11133_s0 = inlined_call_operand.hbm [shape: f32[2,4], index: 0, kind: input, shape index: {}]   ;;  %s11134_s1 = inlined_call_operand.hbm [shape: f32[2,256,128], index: 1, kind: input, shape index: {}]   ;;  %s11135_s2 = inlined_call_operand.hbm [shape: f32[128,128], index: 2, kind: input, shape index: {}]   ;;  %s11136_s3 = inlined_call_operand.hbm [shape: f32[1,128], index: 3, kind: input, shape index: {}]   ;;  %s11137_s4 = inlined_call_operand.hbm [shape: f32[1,128], index: 4, kind: input, shape index: {}]   ;;  %s11138_s5 = inlined_call_operand.hbm [shape: f32[5,1152,128], index: 5, kind: input, shape index: {}]   ;;  %s11139_s6 = inlined_call_operand.hbm [shape: f32[5,128], index: 6, kind: input, shape index: {}]   ;;  %s11140_s7 = inlined_call_operand.hbm [shape: f32[1,128], index: 7, kind: input, shape index: {}]   ;;  %s11141_s8 = inlined_call_operand.hbm [shape: f32[1,128], index: 8, kind: input, shape index: {}]   ;;  %s11142_s9 = inlined_call_operand.hbm [shape: f32[128,128], index: 9, kind: input, shape index: {}]   ;;  %s11143_s10 = inlined_call_operand.hbm [shape: f32[1,128], index: 10, kind: input, shape index: {}]   ;;  %s11144_s11 = inlined_call_operand.hbm [shape: f32[1,128], index: 11, kind: input, shape index: {}]   ;;  %s11145_s12 = inlined_call_operand.hbm [shape: f32[2,256,128], index: 12, kind: output, shape index: {}]  }
   0x1   :  { %11158 = sst [smem:[#allocation40_spill]] %s11133_s0 }
   0x2   :  { %11159 = sst [smem:[#allocation41_spill]] %s11135_s2 }
   0x3   :  { %11160 = sst [smem:[#allocation42_spill]] %s11136_s3 }
   0x4   :  { %11161 = sst [smem:[#allocation43_spill]] %s11137_s4 }
   0x5   :  { %11162 = sst [smem:[#allocation44_spill]] %s11138_s5 }
   0x6   :  { %11163 = sst [smem:[#allocation45_spill]] %s11139_s6 }
   0x7   :  { %11164 = sst [smem:[#allocation46_spill]] %s11140_s7 }
   0x8   :  { %11165 = sst [smem:[#allocation47_spill]] %s11145_s12 }
   0x9   :  { %17 = vsyncpa [#allocation8], 0 }
   0xa   :  { %18 = vsyncpa [#allocation6], 0 }
   0xb   :  { %20 = vsyncpa [#allocation6 + $0x1], 0 }
   0xc   :  { %21 = vsyncpa [#allocation11], 0 }
   0xd   :  { %22 = vsyncpa [#allocation14], 0 }
   0xe   :  { %23 = vsyncpa [#allocation17], 0 }
   0xf   :  { %24 = vsyncpa [#allocation20], 0 }
  0x10   :  { %25 = vsyncpa [#allocation23], 0 }
  0x11   :  { %26 = vsyncpa [#allocation7], 0 }
  0x12   :  { %28 = vsyncpa [#allocation7 + $0x1], 0  ;;  %s9050_s21 = smov 0   ;;  %s9052_s22 = smov 0  }
  0x13   :  { %s9054_s23 = smov 0   ;;  %s9056_s24 = smov 0  }
  0x14 LB: > { %s8967_s25 = smov [#allocation10]   ;;  %s9071_s27 = sadd.s32 4294967295, %s8965_s24   ;;  %s8965_s24 = sphi %s9056_s24, %s11226_s24   ;;  %s8961_s23 = sphi %s9054_s23, %s11225_s23   ;;  %s8957_s22 = sphi %s9052_s22, %s11224_s22   ;;  %s8953_s21 = sphi %s9050_s21, %s11223_s21  }
  0x15   : > { %s343_s26 = sshll.u32 %s8967_s25, 4  ;;  %p6843_p0 = scmp.ge.s32.totalorder %s8965_s24, 1  ;;  %s344_s26 = int_to_ptr.vmem [resolvable:$true] %s343_s26 }
  0x16   : > { %p11147_p1 = scmp.eq.s32.totalorder %s9071_s27, 0  ;;  %p322_p2 = scmp.lt.s32.totalorder %s8965_s24, 3 }
  0x17   : > { %s8968_s29 = smov [#allocation13]   ;;  %s8969_s14 = smov [#allocation16]  }
  0x18   : > { %p9076_p3 = pnand %p6843_p0, %p322_p2  ;;  %s368_s30 = sshll.u32 %s8968_s29, 4  ;;  %s369_s30 = int_to_ptr.vmem [resolvable:$true] %s368_s30 }
  0x19   : > { %s392_s15 = sshll.u32 %s8969_s14, 4  ;;  %s8589_s17 = scalar_lea.vmem %s344_s26, 2048  ;;  %s9089_s15 = int_to_ptr.vmem [resolvable:$true] %s392_s15 }
  0x1a   : > { %s11166_s28 = scalar_select %p9076_p3, 1, 0 }
  0x1b   : > { %p8464_p5 = pneg %p9076_p3  ;;  %p8590_p8 = scmp.ne.s32.totalorder %s344_s26, %s8589_s17 }
  0x1c   : > { %p8597_p11 = scmp.lt.s32.totalorder %s344_s26, %s344_s26  ;;  %p8598_p12 = scmp.lt.s32.totalorder %s8589_s17, %s8589_s17 }
  0x1d   : > { %p9085_p6 = pnand %p8464_p5, %p11147_p1 }
  0x1e   : > { %p8599_p13 = por %p8598_p12, %p8597_p11 }
  0x1f   : > { %p9093_p7 = pneg %p9085_p6 }
  0x21   : > { %p8592_p9 = pnand %p8590_p8, %p9093_p7 }
  0x23   : > { %p8593_p10 = pneg %p8592_p9 }
  0x25   : > { %p8600_p0 = pnand %p8599_p13, %p8593_p10 }
  0x27   : > { %8603 = shalt.err (!%p8600_p0)
}
  0x28   : > { %s11148_s18 = smov 128   ;;  %s11150_s19 = smov 8  }
  0x29   : > { %s11169_s2 = sld [smem:[#allocation41_spill]]  ;;  %s8615_s29 = scalar_lea.vmem %s369_s30, 16 }
  0x2a   : > { %p8616_p2 = scmp.ne.s32.totalorder %s369_s30, %s8615_s29  ;;  %s8622_s14 = scalar_lea.vmem %s369_s30, 32 }
  0x2b   : > { %p8623_p9 = scmp.lt.s32.totalorder %s369_s30, %s369_s30  ;;  %p8624_p10 = scmp.lt.s32.totalorder %s8622_s14, %s8615_s29 }
  0x2c   : > { %p8618_p5 = pnand %p8616_p2, %p9093_p7 }
  0x2d   : > { %p8625_p11 = por %p8624_p10, %p8623_p9 }
  0x2e   : > { %p8619_p8 = pneg %p8618_p5 }
  0x2f   : > { %8470 = dma.hbm_to_vmem [thread:$0]  (!%p9085_p6), %s11169_s2, 2048, %s344_s26, [#allocation11], %s11148_s18, %s11148_s18, %s11150_s19  }
  0x30   : > { %p8626_p12 = pnand %p8625_p11, %p8619_p8 }
  0x32   : > { %8629 = shalt.err (!%p8626_p12)
}
  0x33   : > { %s11170_s4 = sld [smem:[#allocation43_spill]]  ;;  %s8641_s26 = scalar_lea.vmem %s9089_s15, 128 }
  0x34   : > { %p8642_p13 = scmp.ne.s32.totalorder %s9089_s15, %s8641_s26  ;;  %p8649_p5 = scmp.lt.s32.totalorder %s9089_s15, %s9089_s15 }
  0x35   : > { %p8650_p9 = scmp.lt.s32.totalorder %s8641_s26, %s8641_s26 }
  0x36   : > { %p8644_p0 = pnand %p8642_p13, %p9093_p7 }
  0x37   : > { %p8651_p8 = por %p8650_p9, %p8649_p5 }
  0x38   : > { %p8645_p2 = pneg %p8644_p0 }
  0x39   : > { %8476 = dma.hbm_to_vmem [thread:$0]  (!%p9085_p6), %s11170_s4, 16, %s369_s30, [#allocation14]  }
  0x3a   : > { %p8652_p10 = pnand %p8651_p8, %p8645_p2 }
  0x3c   : > { %8655 = shalt.err (!%p8652_p10)
}
  0x3d   : > { %s11171_s6 = sld [smem:[#allocation45_spill]]  ;;  %s8972_s30 = smov [#allocation19]  }
  0x3e   : > { %s414_s25 = sshll.u32 %s8972_s30, 4  ;;  %s8973_s29 = smov [#allocation22]   ;;  %s415_s25 = int_to_ptr.vmem [resolvable:$true] %s414_s25 }
  0x3f   : > { %s438_s14 = sshll.u32 %s8973_s29, 4  ;;  %s8667_s17 = scalar_lea.vmem %s415_s25, 16  ;;  %s439_s14 = int_to_ptr.vmem [resolvable:$true] %s438_s14 }
  0x40   : > { %p8668_p11 = scmp.ne.s32.totalorder %s415_s25, %s8667_s17  ;;  %s8674_s26 = scalar_lea.vmem %s415_s25, 32 }
  0x41   : > { %p8675_p0 = scmp.lt.s32.totalorder %s415_s25, %s415_s25  ;;  %p8676_p2 = scmp.lt.s32.totalorder %s8674_s26, %s8667_s17 }
  0x42   : > { %p8670_p12 = pnand %p8668_p11, %p9093_p7 }
  0x43   : > { %8482 = dma.hbm_to_vmem [thread:$0]  (!%p9085_p6), %s11171_s6, 128, %s9089_s15, [#allocation17]  }
  0x44   : > { %p8671_p13 = pneg %p8670_p12  ;;  %p8677_p5 = por %p8676_p2, %p8675_p0 }
  0x46   : > { %p8678_p9 = pnand %p8677_p5, %p8671_p13 }
  0x48   : > { %8681 = shalt.err (!%p8678_p9)
}
  0x49   : > { %8488 = dma.hbm_to_vmem [thread:$0]  (!%p9085_p6), %s11141_s8, 16, %s415_s25, [#allocation20]  }
  0x4a   : > { %s8693_s20 = scalar_lea.vmem %s439_s14, 16  ;;  %s8700_s30 = scalar_lea.vmem %s439_s14, 32 }
  0x4b   : > { %p8694_p8 = scmp.ne.s32.totalorder %s439_s14, %s8693_s20  ;;  %p8701_p12 = scmp.lt.s32.totalorder %s439_s14, %s439_s14 }
  0x4c   : > { %p8702_p4 = scmp.lt.s32.totalorder %s8700_s30, %s8693_s20 }
  0x4d   : > { %p8696_p10 = pnand %p8694_p8, %p9093_p7 }
  0x4e   : > { %p8703_p1 = por %p8702_p4, %p8701_p12 }
  0x4f   : > { %p8697_p11 = pneg %p8696_p10 }
  0x51   : > { %p8704_p0 = pnand %p8703_p1, %p8697_p11 }
  0x53   : > { %8707 = shalt.err (!%p8704_p0)
}
  0x54   : > { %8494 = dma.hbm_to_vmem [thread:$0]  (!%p9085_p6), %s11143_s10, 16, %s439_s14, [#allocation23]  }
  0x55   : > { %s8974_s25 = smov [#allocation5]   ;;  %s11172_s0 = sld [smem:[#allocation40_spill]] }
  0x56   : > { %s8975_s15 = smov [#allocation12]   ;;  %s8976_s20 = smov [#allocation15]  }
  0x57   : > { %s357_s18 = sshll.u32 %s8975_s15, 4  ;;  %s378_s30 = sshll.u32 %s8976_s20, 4  ;;  %s358_s18 = int_to_ptr.vmem [resolvable:$true] %s357_s18  ;;  %s379_s30 = int_to_ptr.vmem [resolvable:$true] %s378_s30 }
  0x58   : > { %s8730_s19 = scalar_lea.vmem %s358_s18, 16  ;;  %s8737_s29 = scalar_lea.vmem %s358_s18, 32 }
  0x59   : > { %p8731_p1 = scmp.ne.s32.totalorder %s358_s18, %s8730_s19  ;;  %p8738_p2 = scmp.lt.s32.totalorder %s358_s18, %s358_s18 }
  0x5a   : > { %p8739_p5 = scmp.lt.s32.totalorder %s8737_s29, %s8730_s19 }
  0x5b   : > { %8467 = dma.hbm_to_smem (!%p9085_p6), %s11172_s0, 32, %s8974_s25, [#allocation8]  }
  0x5c   : > { %p8733_p4 = pnand %p8731_p1, %p9093_p7  ;;  %p8740_p9 = por %p8739_p5, %p8738_p2 }
  0x5e   : > { %p8734_p13 = pneg %p8733_p4 }
  0x60   : > { %p8741_p8 = pnand %p8740_p9, %p8734_p13 }
  0x62   : > { %8744 = shalt.err (!%p8741_p8)
}
  0x63   : > { %s11173_s3 = sld [smem:[#allocation42_spill]]  ;;  %s8756_s25 = scalar_lea.vmem %s379_s30, 92160 }
  0x64   : > { %p8757_p10 = scmp.ne.s32.totalorder %s379_s30, %s8756_s25  ;;  %p8764_p0 = scmp.lt.s32.totalorder %s379_s30, %s379_s30 }
  0x65   : > { %p8765_p1 = scmp.lt.s32.totalorder %s8756_s25, %s8756_s25 }
  0x66   : > { %p8759_p11 = pnand %p8757_p10, %p9093_p7 }
  0x67   : > { %p8766_p4 = por %p8765_p1, %p8764_p0 }
  0x68   : > { %p8760_p12 = pneg %p8759_p11 }
  0x69   : > { %8473 = dma.hbm_to_vmem [thread:$0]  (!%p9085_p6), %s11173_s3, 16, %s358_s18, [#allocation11]  }
  0x6a   : > { %p8767_p3 = pnand %p8766_p4, %p8760_p12 }
  0x6c   : > { %8770 = shalt.err (!%p8767_p3)
}
  0x6d   : > { %s11174_s19 = smov 8   ;;  %s11175_s26 = smov 128  }
  0x6e   : > { %s11176_s5 = sld [smem:[#allocation44_spill]]  ;;  %s8977_s18 = smov [#allocation18]  }
  0x6f   : > { %s403_s20 = sshll.u32 %s8977_s18, 4  ;;  %s8978_s29 = smov [#allocation21]   ;;  %s404_s20 = int_to_ptr.vmem [resolvable:$true] %s403_s20 }
  0x70   : > { %s424_s14 = sshll.u32 %s8978_s29, 4  ;;  %s8782_s17 = scalar_lea.vmem %s404_s20, 16  ;;  %s425_s14 = int_to_ptr.vmem [resolvable:$true] %s424_s14 }
  0x71   : > { %p8783_p13 = scmp.ne.s32.totalorder %s404_s20, %s8782_s17  ;;  %s8789_s25 = scalar_lea.vmem %s404_s20, 32 }
  0x72   : > { %p8790_p5 = scmp.lt.s32.totalorder %s404_s20, %s404_s20  ;;  %p8791_p9 = scmp.lt.s32.totalorder %s8789_s25, %s8782_s17 }
  0x73   : > { %p8785_p3 = pnand %p8783_p13, %p9093_p7 }
  0x74   : > { %8479 = dma.hbm_to_vmem [thread:$0]  (!%p9085_p6), %s11176_s5, 92160, %s379_s30, [#allocation14], %s11175_s26, %s11175_s26, %s11174_s19  }
  0x75   : > { %p8786_p2 = pneg %p8785_p3  ;;  %p8792_p8 = por %p8791_p9, %p8790_p5 }
  0x77   : > { %p8793_p10 = pnand %p8792_p8, %p8786_p2 }
  0x79   : > { %8796 = shalt.err (!%p8793_p10)
}
  0x7a   : > { %s11177_s7 = sld [smem:[#allocation46_spill]]  ;;  %s8808_s15 = scalar_lea.vmem %s425_s14, 2048 }
  0x7b   : > { %p8809_p11 = scmp.ne.s32.totalorder %s425_s14, %s8808_s15  ;;  %p8816_p1 = scmp.lt.s32.totalorder %s425_s14, %s425_s14 }
  0x7c   : > { %p8817_p4 = scmp.lt.s32.totalorder %s8808_s15, %s8808_s15 }
  0x7d   : > { %p8811_p12 = pnand %p8809_p11, %p9093_p7 }
  0x7e   : > { %p8818_p13 = por %p8817_p4, %p8816_p1 }
  0x7f   : > { %p8812_p0 = pneg %p8811_p12 }
  0x80   : > { %8485 = dma.hbm_to_vmem [thread:$0]  (!%p9085_p6), %s11177_s7, 16, %s404_s20, [#allocation17]  }
  0x81   : > { %p8819_p3 = pnand %p8818_p13, %p8812_p0 }
  0x83   : > { %8822 = shalt.err (!%p8819_p3)
}
  0x84   : > { %8491 = dma.hbm_to_vmem [thread:$0]  (!%p9085_p6), %s11142_s9, 2048, %s425_s14, [#allocation20], %s11175_s26, %s11175_s26, %s11174_s19  }
  0x85   : > { %s8979_s20 = smov [#allocation24]  }
  0x86   : > { %s449_s17 = sshll.u32 %s8979_s20, 4  ;;  %s450_s17 = int_to_ptr.vmem [resolvable:$true] %s449_s17 }
  0x87   : > { %s8834_s25 = scalar_lea.vmem %s450_s17, 16  ;;  %s8841_s30 = scalar_lea.vmem %s450_s17, 32 }
  0x88   : > { %p8835_p2 = scmp.ne.s32.totalorder %s450_s17, %s8834_s25  ;;  %p8842_p8 = scmp.lt.s32.totalorder %s450_s17, %s450_s17 }
  0x89   : > { %p8843_p10 = scmp.lt.s32.totalorder %s8841_s30, %s8834_s25 }
  0x8a   : > { %p8837_p5 = pnand %p8835_p2, %p9093_p7 }
  0x8b   : > { %p8844_p11 = por %p8843_p10, %p8842_p8 }
  0x8c   : > { %p8838_p9 = pneg %p8837_p5 }
  0x8e   : > { %p8845_p12 = pnand %p8844_p11, %p8838_p9 }
  0x90   : > { %8848 = shalt.err (!%p8845_p12)
}
  0x91   : > { %8497 = dma.hbm_to_vmem [thread:$0]  (!%p9085_p6), %s11144_s11, 16, %s450_s17, [#allocation23]  }
  0x92   : > { %s6842_s16 = sadd.s32 4294967294, %s8965_s24   ;;  %s9188_s13 = sadd.s32 1, %s8965_s24  }
  0x93   : > { %s62_s14 = sadd.s32 1, %s8961_s23  ;;  %s59_s18 = ssub.s32 %s8965_s24, %s9188_s13 }
  0x94   : > { %p69_p7 = scmp.ne.s32.totalorder %s8961_s23, %s8957_s22  ;;  %p60_p0 = scmp.eq.s32.totalorder %s59_s18, 0 }
  0x95   : > { %p70_p1 = scmp.eq.s32.totalorder %s8965_s24, 0  ;;  %p75_p4 = scmp.ne.s32.totalorder %s8957_s22, %s8953_s21 }
  0x96   : > { %p309_p13 = scmp.eq.s32.totalorder %s9071_s27, 1  ;;  %p11178_p2 = scmp.eq.s32.totalorder %s9071_s27, 0 }
  0x97   : > { %s9200_s29 = scalar_select %p60_p0, %s8961_s23, %s62_s14  }
  0x98   : > { %p71_p3 = por %p70_p1, %p69_p7  ;;  %p9204_p5 = por %p11178_p2, %p75_p4 }
  0x99   : > { %p9208_p6 = por %p309_p13, %p69_p7  ;;  %p315_p9 = scmp.eq.s32.totalorder %s6842_s16, 1 }
  0x9a   : > { %s11179_s20 = scalar_select %p9204_p5, 1, 0 }
  0x9b   : > { %s11180_s17 = scalar_select %p9208_p6, 1, 0 }
  0x9c   : > { %p8517_p8 = scmp.lt.s32.totalorder %s8965_s24, 2  ;;  %s460_s25 = sand.u32 1, %s8961_s23  }
  0x9d   : > { %p9214_p10 = por %p315_p9, %p75_p4  ;;  %s6856_s12 = sshll.u32 %s460_s25, 8 }
  0x9e   : > { %s6884_s15 = sshll.u32 %s8965_s24, 12  ;;  %s464_s2 = scalar_lea.vmem [#allocation9], %s6856_s12 }
  0x9f   : > { %s11181_s30 = scalar_select %p9214_p10, 1, 0 }
  0xa0   : > { %s9222_s0 = scalar_lea.hbm %s11134_s1, %s6884_s15  ;;  %s471_s3 = sshll.u32 %s464_s2, 4  ;;  %s9228_s3 = int_to_ptr.vmem [resolvable:$true] %s471_s3 }
  0xa1   : > { %p9224_p11 = pnand %p8517_p8, %p71_p3  ;;  %s9230_s4 = scalar_lea.sflag [#allocation6], %s460_s25 }
  0xa2   : > { %s8849_s5 = scalar_lea.hbm %s9222_s0, 4096  ;;  %s8854_s12 = scalar_lea.hbm %s11134_s1, 8192 }
  0xa3   : > { %p8850_p12 = scmp.ne.s32.totalorder %s9222_s0, %s8849_s5  ;;  %p8851_p7 = pneg %p9224_p11 }
  0xa4   : > { %p8855_p4 = scmp.lt.s32.totalorder %s9222_s0, %s11134_s1  ;;  %p8856_p13 = scmp.lt.s32.totalorder %s8854_s12, %s8849_s5 }
  0xa5   : > { %p8852_p0 = pnand %p8851_p7, %p8850_p12 }
  0xa6   : > { %p8857_p3 = por %p8856_p13, %p8855_p4 }
  0xa7   : > { %p8853_p1 = pneg %p8852_p0 }
  0xa9   : > { %p8858_p2 = pnand %p8857_p3, %p8853_p1 }
  0xab   : > { %8861 = shalt.err (!%p8858_p2)
}
  0xac   : > { %s8862_s25 = scalar_lea.vmem %s9228_s3, 4096  ;;  %s8980_s6 = smov [#allocation9]  }
  0xad   : > { %p8863_p9 = scmp.ne.s32.totalorder %s9228_s3, %s8862_s25  ;;  %s8867_s7 = sshll.u32 %s8980_s6, 4  ;;  %s8868_s7 = int_to_ptr.vmem [resolvable:$false] %s8867_s7 }
  0xae   : > { %s8869_s15 = scalar_lea.vmem %s8868_s7, 8192  ;;  %p8870_p0 = scmp.lt.s32.totalorder %s9228_s3, %s8868_s7 }
  0xaf   : > { %p8865_p8 = pnand %p8863_p9, %p8851_p7  ;;  %p8871_p10 = scmp.lt.s32.totalorder %s8869_s15, %s8862_s25 }
  0xb1   : > { %p8866_p12 = pneg %p8865_p8  ;;  %p8872_p6 = por %p8871_p10, %p8870_p0 }
  0xb3   : > { %p8873_p5 = pnand %p8872_p6, %p8866_p12 }
  0xb5   : > { %8876 = shalt.err (!%p8873_p5)
}
  0xb6   : > { %8501 = dma.hbm_to_vmem [thread:$0]  (!%p9224_p11), %s9222_s0, 4096, %s9228_s3, %s9230_s4, %s11175_s26, %s11175_s26, %s11174_s19  }
  0xb7   : > { %p11183_p7 = scmp.ne.s32.totalorder %s11166_s28, 0 }
  0xb9   : > { %483 = sbr.rel (%p11183_p7) target bundleno = 1239 (0x4d7), region = 68 }
  0xbe   : > { %p11184_p1 = scmp.eq.s32.totalorder %s9071_s27, 0 }
  0xc0   : > { %8920 = dma.done.wait (%p11184_p1), [#allocation8], 32   ;;  %p11185_p4 = pmov %p11184_p1 }
  0xc1   : > { %s9261_s5 = sand.u32 1, %s8957_s22   ;;  %p11186_p5 = scmp.ne.s32.totalorder %s11179_s20, 0 }
  0xc2   : > { %8922 = vsyncadd (%p11185_p4), [#allocation8], 4294967264  ;;  %s6861_s6 = sshll.u32 %s9261_s5, 8  ;;  %s490_s7 = scalar_lea.sflag [#allocation6], %s9261_s5 }
  0xc3   : > { %s9267_s0 = scalar_lea.vmem [#allocation9], %s6861_s6 }
  0xc4   : > { %8924 = dma.done.wait (%p11186_p5), %s490_s7, 4096  }
  0xc5   : > { %8926 = vsyncadd (%p11186_p5), %s490_s7, 4294963200  ;;  %p11187_p6 = pmov %p11184_p1 }
  0xc6   : > { %p11188_p10 = pmov %p11184_p1 }
  0xc7   : > { %8928 = dma.done.wait (%p11187_p6), [#allocation11], 2064  }
  0xc8   : > { %8930 = vsyncadd (%p11188_p10), [#allocation11], 4294965232  ;;  %p11189_p11 = pmov %p11184_p1 }
  0xc9   : > { %p11190_p13 = pmov %p11184_p1 }
  0xca   : > { %8932 = dma.done.wait (%p11189_p11), [#allocation14], 92176  }
  0xcb   : > { %8934 = vsyncadd (%p11190_p13), [#allocation14], 4294875120  ;;  %p11191_p3 = pmov %p11184_p1 }
  0xcc   : > { %p11192_p2 = pmov %p11184_p1 }
  0xcd   : > { %8936 = dma.done.wait (%p11191_p3), [#allocation17], 144  }
  0xce   : > { %8938 = vsyncadd (%p11192_p2), [#allocation17], 4294967152  ;;  %p11193_p9 = pmov %p11184_p1 }
  0xcf   : > { %p11194_p8 = pmov %p11184_p1 }
  0xd0   : > { %8940 = dma.done.wait (%p11193_p9), [#allocation20], 2064  }
  0xd1   : > { %8942 = vsyncadd (%p11194_p8), [#allocation20], 4294965232  ;;  %p11195_p12 = pmov %p11184_p1 }
  0xd2   : > { %p11196_p0 = pmov %p11184_p1 }
  0xd3   : > { %8944 = dma.done.wait (%p11195_p12), [#allocation23], 32  }
  0xd4   : > { %8946 = vsyncadd (%p11196_p0), [#allocation23], 4294967264 }
  0xd5   : > { %538 = sfence }
  0xd6   : > { %v2671_v0 = vld [vmem:[#allocation10 + $0x78] sm:$0xff]  ;;  %v2670_v1 = vld [vmem:[#allocation10 + $0x70] sm:$0xff]  ;;  %s6873_s3 = sshll.u32 %s9071_s27, 7  ;;  %v2669_v2 = vld [vmem:[#allocation10 + $0x68] sm:$0xff]  ;;  %s10959_s12 = scalar_lea.vmem [#allocation25], %s6861_s6 }
  0xd7   : > { %7450 = vmatprep.subr.mxu0 %v2671_v0  ;;  %s1159_s4 = sadd.s32 1, %s6873_s3  ;;  %v2668_v3 = vld [vmem:[#allocation10 + $0x60] sm:$0xff]  ;;  %s721_s28 = sld [smem:[#allocation5 + %s6873_s3]]  ;;  %v2667_v5 = vld [vmem:[#allocation10 + $0x58] sm:$0xff]  ;;  %v2666_v6 = vld [vmem:[#allocation10 + $0x50] sm:$0xff] }
  0xd8   : > { %7451 = vmatpush3.msra.mxu0 %v2671_v0  ;;  %v2624_v4 = vld [vmem:[%s9267_s0] sm:$0xff]  ;;  %s1598_s19 = sadd.s32 2, %s6873_s3  ;;  %s1160_s26 = sld [smem:[#allocation5 + %s1159_s4]]  ;;  %v2665_v7 = vld [vmem:[#allocation10 + $0x48] sm:$0xff]  ;;  %v2663_v9 = vld [vmem:[#allocation10 + $0x38] sm:$0xff] }
  0xd9   : > { %7452 = vmatprep.subr.mxu0 %v2670_v1  ;;  %7482 = vmatprep.mubr.f32.mxu0 %v2624_v4  ;;  %s2037_s20 = sadd.s32 3, %s6873_s3  ;;  %s1599_s16 = sld [smem:[#allocation5 + %s1598_s19]]  ;;  %v2664_v8 = vld [vmem:[#allocation10 + $0x40] sm:$0xff]  ;;  %v2662_v12 = vld [vmem:[#allocation10 + $0x30] sm:$0xff]  ;;  %v2661_v13 = vld [vmem:[#allocation10 + $0x28] sm:$0xff] }
  0xda   : > { %7453 = vmatpush3.msra.mxu0 %v2670_v1  ;;  %s2038_s14 = sld [smem:[#allocation5 + %s2037_s20]]  ;;  %v606_v14 = vld [vmem:[#allocation15 + $0xf8] sm:$0xff]  ;;  %v605_v33 = vld [vmem:[#allocation15 + $0xf0] sm:$0xff]  ;;  %v604_v55 = vld [vmem:[#allocation15 + $0xe8] sm:$0xff]  ;;  %s6885_s2 = sshll.u32 %s9071_s27, 12 }
  0xdb   : > { %7454 = vmatprep.subr.mxu0 %v2669_v2  ;;  %v754_v15 = vld [vmem:[#allocation15 + $0x578] sm:$0xff]  ;;  %v753_v34 = vld [vmem:[#allocation15 + $0x570] sm:$0xff]  ;;  %v752_v60 = vld [vmem:[#allocation15 + $0x568] sm:$0xff]  ;;  %s6662_s18 = sshll.u32 %s10959_s12, 4  ;;  %s11219_s6 = sld [smem:[#allocation47_spill]]  ;;  %s11088_s18 = int_to_ptr.vmem [resolvable:$true] %s6662_s18 }
  0xdc   : > { %7455 = vmatpush3.msra.mxu0 %v2669_v2  ;;  %v1193_v16 = vld [vmem:[#allocation15 + $0x9f8] sm:$0xff]  ;;  %v1192_v39 = vld [vmem:[#allocation15 + $0x9f0] sm:$0xff]  ;;  %v1191_v61 = vld [vmem:[#allocation15 + $0x9e8] sm:$0xff]  ;;  %s8877_s3 = scalar_lea.vmem %s11088_s18, 4096  ;;  %p11220_p1 = scmp.ne.s32.totalorder %s11180_s17, 0 }
  0xdd   : > { %7456 = vmatprep.subr.mxu0 %v2668_v3  ;;  %v9295_v10 = vstv %s721_s28  ;;  %v1632_v20 = vld [vmem:[#allocation15 + $0xe78] sm:$0xff]  ;;  %v1631_v40 = vld [vmem:[#allocation15 + $0xe70] sm:$0xff]  ;;  %v1630_v62 = vld [vmem:[#allocation15 + $0xe68] sm:$0xff]  ;;  %p8878_p7 = scmp.ne.s32.totalorder %s11088_s18, %s8877_s3  ;;  %s8982_s27 = smov [#allocation25]  }
  0xde   : > { %7457 = vmatpush3.msra.mxu0 %v2668_v3  ;;  %v9297_v11 = vstv %s1160_s26  ;;  %v899_v18 = vmul.f32 %v9295_v10, %v754_v15  ;;  %v2071_v21 = vld [vmem:[#allocation15 + $0x12f8] sm:$0xff]  ;;  %v898_v38 = vmul.f32 %v9295_v10, %v753_v34  ;;  %v2070_v41 = vld [vmem:[#allocation15 + $0x12f0] sm:$0xff]  ;;  %v897_v2 = vmul.f32 %v9295_v10, %v752_v60  ;;  %v2069_v4 = vld [vmem:[#allocation15 + $0x12e8] sm:$0xff]  ;;  %s8881_s4 = sshll.u32 %s8982_s27, 4  ;;  %s8882_s4 = int_to_ptr.vmem [resolvable:$false] %s8881_s4 }
  0xdf   : > { %7458 = vmatprep.subr.mxu0 %v2667_v5  ;;  %11197 = vst [vmem:[#allocation34_spill] sm:$0xff] %v9297_v11  ;;  %v9299_v17 = vstv %s1599_s16  ;;  %v1338_v19 = vmul.f32 %v9297_v11, %v1193_v16  ;;  %v590_v23 = vld [vmem:[#allocation15 + $0x78] sm:$0xff]  ;;  %v1337_v45 = vmul.f32 %v9297_v11, %v1192_v39  ;;  %v589_v46 = vld [vmem:[#allocation15 + $0x70] sm:$0xff]  ;;  %v1336_v3 = vmul.f32 %v9297_v11, %v1191_v61  ;;  %v735_v39 = vld [vmem:[#allocation15 + $0x4e0] sm:$0xff]  ;;  %p8879_p4 = pnand %p8878_p7, %p11220_p1  ;;  %s8883_s28 = scalar_lea.vmem %s8882_s4, 8192 }
  0xe0   : > { %7459 = vmatpush3.msra.mxu0 %v2667_v5  ;;  %11198 = vst [vmem:[#allocation35_spill] sm:$0xff] %v9299_v17  ;;  %v9303_v22 = vstv %s2038_s14  ;;  %v2660_v24 = vld [vmem:[#allocation10 + $0x20] sm:$0xff]  ;;  %v1043_v28 = vadd.f32 %v899_v18, %v606_v14  ;;  %v1777_v29 = vmul.f32 %v9299_v17, %v1632_v20  ;;  %v2659_v35 = vld [vmem:[#allocation10 + $0x18] sm:$0xff]  ;;  %v1042_v49 = vadd.f32 %v898_v38, %v605_v33  ;;  %v2658_v63 = vld [vmem:[#allocation10 + $0x10] sm:$0xff]  ;;  %p8884_p6 = scmp.lt.s32.totalorder %s11088_s18, %s8882_s4  ;;  %p8885_p10 = scmp.lt.s32.totalorder %s8883_s28, %s8877_s3 }
  0xe1   : > { %7460 = vmatprep.subr.mxu0 %v2666_v6  ;;  %11199 = vst [vmem:[#allocation36_spill] sm:$0xff] %v9303_v22  ;;  %v738_v25 = vld [vmem:[#allocation15 + $0x4f8] sm:$0xff]  ;;  %v2216_v36 = vmul.f32 %v9303_v22, %v2071_v21  ;;  %v737_v47 = vld [vmem:[#allocation15 + $0x4f0] sm:$0xff]  ;;  %v1776_v50 = vmul.f32 %v9299_v17, %v1631_v40  ;;  %v2215_v58 = vmul.f32 %v9303_v22, %v2070_v41  ;;  %v736_v5 = vld [vmem:[#allocation15 + $0x4e8] sm:$0xff]  ;;  %s11086_s7 = scalar_lea.hbm %s11219_s6, %s6885_s2  ;;  %p8880_p5 = pneg %p8879_p4 }
  0xe2   : > { %7461 = vmatpush3.msra.mxu0 %v2666_v6  ;;  %v1177_v26 = vld [vmem:[#allocation15 + $0x978] sm:$0xff]  ;;  %v883_v30 = vmul.f32 %v9295_v10, %v738_v25  ;;  %v1482_v42 = vadd.f32 %v1338_v19, %v1043_v28  ;;  %v1176_v48 = vld [vmem:[#allocation15 + $0x970] sm:$0xff]  ;;  %v882_v51 = vmul.f32 %v9295_v10, %v737_v47  ;;  %v1481_v0 = vadd.f32 %v1337_v45, %v1042_v49  ;;  %v2657_v6 = vld [vmem:[#allocation10 + $0x8] sm:$0xff]  ;;  %p8886_p11 = por %p8885_p10, %p8884_p6 }
  0xe3   : > { %7462 = vmatprep.subr.mxu0 %v2665_v7  ;;  %v1616_v27 = vld [vmem:[#allocation15 + $0xdf8] sm:$0xff]  ;;  %v1322_v31 = vmul.f32 %v9297_v11, %v1177_v26  ;;  %v1321_v52 = vmul.f32 %v9297_v11, %v1176_v48  ;;  %v1615_v53 = vld [vmem:[#allocation15 + $0xdf0] sm:$0xff]  ;;  %v1175_v14 = vld [vmem:[#allocation15 + $0x968] sm:$0xff]  ;;  %v1041_v18 = vadd.f32 %v897_v2, %v604_v55  ;;  %v881_v19 = vmul.f32 %v9295_v10, %v736_v5 }
  0xe4   : > { %7463 = vmatpush3.msra.mxu0 %v2665_v7  ;;  %v2055_v32 = vld [vmem:[#allocation15 + $0x1278] sm:$0xff]  ;;  %v1761_v37 = vmul.f32 %v9299_v17, %v1616_v27  ;;  %v1027_v43 = vadd.f32 %v883_v30, %v590_v23  ;;  %v2054_v54 = vld [vmem:[#allocation15 + $0x1270] sm:$0xff]  ;;  %v1921_v56 = vadd.f32 %v1777_v29, %v1482_v42  ;;  %v1760_v59 = vmul.f32 %v9299_v17, %v1615_v53  ;;  %v1614_v20 = vld [vmem:[#allocation15 + $0xde8] sm:$0xff]  ;;  %p8887_p13 = pnand %p8886_p11, %p8880_p5 }
  0xe5   : > { %7464 = vmatprep.subr.mxu0 %v2664_v8  ;;  %v2200_v44 = vmul.f32 %v9303_v22, %v2055_v32  ;;  %v1026_v1 = vadd.f32 %v882_v51, %v589_v46  ;;  %v1920_v15 = vadd.f32 %v1776_v50, %v1481_v0  ;;  %v751_v21 = vld [vmem:[#allocation15 + $0x560] sm:$0xff]  ;;  %v2214_v25 = vmul.f32 %v9303_v22, %v2069_v4  ;;  %v2053_v27 = vld [vmem:[#allocation15 + $0x1268] sm:$0xff]  ;;  %v750_v51 = vld [vmem:[#allocation15 + $0x558] sm:$0xff] }
  0xe6   : > { %7465 = vmatpush3.msra.mxu0 %v2664_v8  ;;  %v1466_v57 = vadd.f32 %v1322_v31, %v1027_v43  ;;  %v2360_v7 = vadd.f32 %v2216_v36, %v1921_v56  ;;  %v1190_v23 = vld [vmem:[#allocation15 + $0x9e0] sm:$0xff]  ;;  %v1320_v26 = vmul.f32 %v9297_v11, %v1175_v14  ;;  %v1480_v31 = vadd.f32 %v1336_v3, %v1041_v18  ;;  %v2626_v42 = vld [vmem:[%s9267_s0 + $0x10] sm:$0xff]  ;;  %v602_v61 = vld [vmem:[#allocation15 + $0xd8] sm:$0xff] }
  0xe7   : > { %7466 = vmatprep.subr.mxu0 %v2663_v9  ;;  %v1465_v16 = vadd.f32 %v1321_v52, %v1026_v1  ;;  %v2656_v28 = vld [vmem:[#allocation10] sm:$0xff]  ;;  %v2359_v29 = vadd.f32 %v2215_v58, %v1920_v15  ;;  %v896_v36 = vmul.f32 %v9295_v10, %v751_v21  ;;  %v2625_v41 = vld [vmem:[%s9267_s0 + $0x8] sm:$0xff]  ;;  %v2198_v45 = vmul.f32 %v9303_v22, %v2053_v27  ;;  %v749_v18 = vld [vmem:[#allocation15 + $0x550] sm:$0xff] }
  0xe8   : > { %7467 = vmatpush3.msra.mxu0 %v2663_v9  ;;  %v1905_v8 = vadd.f32 %v1761_v37, %v1466_v57  ;;  %v2199_v9 = vmul.f32 %v9303_v22, %v2054_v54  ;;  %7530 = vmatprep.subr.mxu1 %v2360_v7  ;;  %v603_v32 = vld [vmem:[#allocation15 + $0xe0] sm:$0xff]  ;;  %v1335_v37 = vmul.f32 %v9297_v11, %v1190_v23  ;;  %v1189_v52 = vld [vmem:[#allocation15 + $0x9d8] sm:$0xff] }
  0xe9   : > { %7468 = vmatprep.subr.mxu0 %v2662_v12  ;;  %7531 = vmatpush3.msra.mxu1 %v2360_v7  ;;  %v1904_v30 = vadd.f32 %v1760_v59, %v1465_v16  ;;  %v1629_v33 = vld [vmem:[#allocation15 + $0xe60] sm:$0xff]  ;;  %v1040_v48 = vadd.f32 %v896_v36, %v603_v32  ;;  %v880_v55 = vmul.f32 %v9295_v10, %v735_v39  ;;  %v734_v3 = vld [vmem:[#allocation15 + $0x4d8] sm:$0xff]  ;;  %v1172_v32 = vld [vmem:[#allocation15 + $0x950] sm:$0xff] }
  0xea   : > { %7469 = vmatpush3.msra.mxu0 %v2662_v12  ;;  %v1775_v12 = vmul.f32 %v9299_v17, %v1630_v62  ;;  %v2068_v38 = vld [vmem:[#allocation15 + $0x12e0] sm:$0xff]  ;;  %7532 = vmatprep.subr.mxu1 %v2359_v29  ;;  %v1774_v49 = vmul.f32 %v9299_v17, %v1629_v33  ;;  %v1628_v62 = vld [vmem:[#allocation15 + $0xe58] sm:$0xff]  ;;  %v895_v1 = vmul.f32 %v9295_v10, %v750_v51  ;;  %v2630_v33 = vld [vmem:[%s9267_s0 + $0x30] sm:$0xff] }
  0xeb   : > { %7470 = vmatprep.subr.mxu0 %v2661_v13  ;;  %v1174_v40 = vld [vmem:[#allocation15 + $0x960] sm:$0xff]  ;;  %v2343_v43 = vadd.f32 %v2199_v9, %v1904_v30  ;;  %7533 = vmatpush3.msra.mxu1 %v2359_v29  ;;  %v2213_v54 = vmul.f32 %v9303_v22, %v2068_v38  ;;  %v1479_v59 = vadd.f32 %v1335_v37, %v1040_v48  ;;  %v1173_v4 = vld [vmem:[#allocation15 + $0x958] sm:$0xff]  ;;  %v601_v30 = vld [vmem:[#allocation15 + $0xd0] sm:$0xff] }
  0xec   : > { %7471 = vmatpush3.msra.mxu0 %v2661_v13  ;;  %v588_v13 = vld [vmem:[#allocation15 + $0x68] sm:$0xff]  ;;  %v1613_v46 = vld [vmem:[#allocation15 + $0xde0] sm:$0xff]  ;;  %v1319_v56 = vmul.f32 %v9297_v11, %v1174_v40  ;;  %v1334_v2 = vmul.f32 %v9297_v11, %v1189_v52  ;;  %v2067_v9 = vld [vmem:[#allocation15 + $0x12d8] sm:$0xff]  ;;  %v1039_v14 = vadd.f32 %v895_v1, %v602_v61  ;;  %v1773_v15 = vmul.f32 %v9299_v17, %v1628_v62 }
  0xed   : > { %7472 = vmatprep.subr.mxu0 %v2660_v24  ;;  %v1025_v34 = vadd.f32 %v881_v19, %v588_v13  ;;  %v587_v50 = vld [vmem:[#allocation15 + $0x60] sm:$0xff]  ;;  %v1758_v60 = vmul.f32 %v9299_v17, %v1613_v46  ;;  %v1918_v7 = vadd.f32 %v1774_v49, %v1479_v59  ;;  %v1612_v16 = vld [vmem:[#allocation15 + $0xdd8] sm:$0xff]  ;;  %v1188_v19 = vld [vmem:[#allocation15 + $0x9d0] sm:$0xff]  ;;  %v879_v23 = vmul.f32 %v9295_v10, %v734_v3 }
  0xee   : > { %7473 = vmatpush3.msra.mxu0 %v2660_v24  ;;  %v2344_v24 = vadd.f32 %v2200_v44, %v1905_v8  ;;  %v1919_v44 = vadd.f32 %v1775_v12, %v1480_v31  ;;  %v2052_v57 = vld [vmem:[#allocation15 + $0x1260] sm:$0xff]  ;;  %v1024_v0 = vadd.f32 %v880_v55, %v587_v50  ;;  %v586_v12 = vld [vmem:[#allocation15 + $0x58] sm:$0xff]  ;;  %v2212_v29 = vmul.f32 %v9303_v22, %v2067_v9  ;;  %v733_v31 = vld [vmem:[#allocation15 + $0x4d0] sm:$0xff] }
  0xef   : > { %7474 = vmatprep.subr.mxu0 %v2659_v35  ;;  %v1464_v47 = vadd.f32 %v1320_v26, %v1025_v34  ;;  %v2628_v5 = vld [vmem:[%s9267_s0 + $0x20] sm:$0xff]  ;;  %v2197_v8 = vmul.f32 %v9303_v22, %v2052_v57  ;;  %v2357_v21 = vadd.f32 %v2213_v54, %v1918_v7  ;;  %v1627_v26 = vld [vmem:[#allocation15 + $0xe50] sm:$0xff]  ;;  %v1023_v34 = vadd.f32 %v879_v23, %v586_v12  ;;  %v748_v46 = vld [vmem:[#allocation15 + $0x548] sm:$0xff] }
  0xf0   : > { %7475 = vmatpush3.msra.mxu0 %v2659_v35  ;;  %v1759_v35 = vmul.f32 %v9299_v17, %v1614_v20  ;;  %v2358_v53 = vadd.f32 %v2214_v25, %v1919_v44  ;;  %v1463_v13 = vadd.f32 %v1319_v56, %v1024_v0  ;;  %v2629_v20 = vld [vmem:[%s9267_s0 + $0x28] sm:$0xff]  ;;  %v2051_v25 = vld [vmem:[#allocation15 + $0x1258] sm:$0xff]  ;;  %v894_v36 = vmul.f32 %v9295_v10, %v749_v18  ;;  %v2066_v38 = vld [vmem:[#allocation15 + $0x12d0] sm:$0xff] }
  0xf1   : > { %7476 = vmatprep.subr.mxu0 %v2658_v63  ;;  %v1333_v37 = vmul.f32 %v9297_v11, %v1188_v19  ;;  %v1611_v39 = vld [vmem:[#allocation15 + $0xdd0] sm:$0xff]  ;;  %v878_v49 = vmul.f32 %v9295_v10, %v733_v31  ;;  %v1317_v50 = vmul.f32 %v9297_v11, %v1172_v32  ;;  %v1187_v51 = vld [vmem:[#allocation15 + $0x9c8] sm:$0xff]  ;;  %v2632_v55 = vld [vmem:[%s9267_s0 + $0x40] sm:$0xff]  ;;  %v2211_v57 = vmul.f32 %v9303_v22, %v2066_v38 }
  0xf2   : > { %7477 = vmatpush3.msra.mxu0 %v2658_v63  ;;  %v1903_v58 = vadd.f32 %v1759_v35, %v1464_v47  ;;  %v2627_v63 = vld [vmem:[%s9267_s0 + $0x18] sm:$0xff]  ;;  %7534 = vmatprep.subr.mxu1 %v2358_v53  ;;  %v1902_v27 = vadd.f32 %v1758_v60, %v1463_v13  ;;  %v1757_v35 = vmul.f32 %v9299_v17, %v1612_v16  ;;  %v1626_v52 = vld [vmem:[#allocation15 + $0xe48] sm:$0xff]  ;;  %v599_v23 = vld [vmem:[#allocation15 + $0xc0] sm:$0xff] }
  0xf3   : > { %7478 = vmatprep.subr.mxu0 %v2657_v6  ;;  %7535 = vmatpush3.msra.mxu1 %v2358_v53  ;;  %v585_v44 = vld [vmem:[#allocation15 + $0x50] sm:$0xff]  ;;  %v1038_v48 = vadd.f32 %v894_v36, %v601_v30  ;;  %v732_v53 = vld [vmem:[#allocation15 + $0x4c8] sm:$0xff]  ;;  %v731_v30 = vld [vmem:[#allocation15 + $0x4c0] sm:$0xff] }
  0xf4   : > { %7479 = vmatpush3.msra.mxu0 %v2657_v6  ;;  %v2342_v6 = vadd.f32 %v2198_v45, %v1903_v58  ;;  %7536 = vmatprep.subr.mxu1 %v2357_v21  ;;  %v2341_v40 = vadd.f32 %v2197_v8, %v1902_v27  ;;  %v2050_v45 = vld [vmem:[#allocation15 + $0x1250] sm:$0xff]  ;;  %v1756_v58 = vmul.f32 %v9299_v17, %v1611_v39  ;;  %v600_v59 = vld [vmem:[#allocation15 + $0xc8] sm:$0xff]  ;;  %v747_v8 = vld [vmem:[#allocation15 + $0x540] sm:$0xff] }
  0xf5   : > { %7480 = vmatprep.subr.mxu0 %v2656_v28  ;;  %7537 = vmatpush3.msra.mxu1 %v2357_v21  ;;  %v2631_v54 = vld [vmem:[%s9267_s0 + $0x38] sm:$0xff]  ;;  %v1477_v61 = vadd.f32 %v1333_v37, %v1038_v48  ;;  %v1022_v62 = vadd.f32 %v878_v49, %v585_v44  ;;  %v584_v0 = vld [vmem:[#allocation15 + $0x48] sm:$0xff]  ;;  %v2195_v3 = vmul.f32 %v9303_v22, %v2050_v45  ;;  %v1170_v36 = vld [vmem:[#allocation15 + $0x940] sm:$0xff] }
  0xf6   : > { %7481 = vmatpush3.msra.mxu0 %v2656_v28  ;;  %v1478_v28 = vadd.f32 %v1334_v2, %v1039_v14  ;;  %v1171_v1 = vld [vmem:[#allocation15 + $0x948] sm:$0xff]  ;;  %v877_v7 = vmul.f32 %v9295_v10, %v732_v53  ;;  %v1609_v37 = vld [vmem:[#allocation15 + $0xdc0] sm:$0xff]  ;;  %v2635_v38 = vld [vmem:[%s9267_s0 + $0x58] sm:$0xff]  ;;  %v1315_v53 = vmul.f32 %v9297_v11, %v1170_v36 }
  0xf7   : > { %7483 = vmatmul.mubr.f32.vlgmr.msra.gmra.mxu0 %v2625_v41  ;;  %7616 = vmatprep.subr.mxu0 %v2344_v24  ;;  %v1610_v2 = vld [vmem:[#allocation15 + $0xdc8] sm:$0xff]  ;;  %v1461_v13 = vadd.f32 %v1317_v50, %v1022_v62  ;;  %v1185_v48 = vld [vmem:[#allocation15 + $0x9b8] sm:$0xff]  ;;  %v581_v36 = vld [vmem:[#allocation15 + $0x30] sm:$0xff] }
  0xf8   : > { %7485 = vmatprep.mubr.f32.mxu0 %v2626_v42  ;;  %7617 = vmatpush3.msra.mxu0 %v2344_v24  ;;  %v1318_v24 = vmul.f32 %v9297_v11, %v1173_v4  ;;  %v1917_v41 = vadd.f32 %v1773_v15, %v1478_v28  ;;  %v2196_v42 = vmul.f32 %v9303_v22, %v2051_v25  ;;  %v2049_v14 = vld [vmem:[#allocation15 + $0x1248] sm:$0xff]  ;;  %v1186_v15 = vld [vmem:[#allocation15 + $0x9c0] sm:$0xff]  ;;  %v1624_v49 = vld [vmem:[#allocation15 + $0xe38] sm:$0xff] }
  0xf9   : > { %7618 = vmatprep.subr.mxu0 %v2343_v43  ;;  %v1332_v4 = vmul.f32 %v9297_v11, %v1187_v51  ;;  %v2633_v16 = vld [vmem:[%s9267_s0 + $0x48] sm:$0xff]  ;;  %v1021_v19 = vadd.f32 %v877_v7, %v584_v0  ;;  %v1755_v21 = vmul.f32 %v9299_v17, %v1610_v2  ;;  %v2634_v25 = vld [vmem:[%s9267_s0 + $0x50] sm:$0xff]  ;;  %v1900_v27 = vadd.f32 %v1756_v58, %v1461_v13  ;;  %v2636_v50 = vld [vmem:[%s9267_s0 + $0x60] sm:$0xff] }
  0xfa   : > { %7619 = vmatpush3.msra.mxu0 %v2343_v43  ;;  %v1772_v43 = vmul.f32 %v9299_v17, %v1627_v26  ;;  %v1462_v47 = vadd.f32 %v1318_v24, %v1023_v34  ;;  %v2356_v56 = vadd.f32 %v2212_v29, %v1917_v41  ;;  %v1625_v24 = vld [vmem:[#allocation15 + $0xe40] sm:$0xff]  ;;  %v892_v29 = vmul.f32 %v9295_v10, %v747_v8  ;;  %v1169_v62 = vld [vmem:[#allocation15 + $0x938] sm:$0xff]  ;;  %v1184_v13 = vld [vmem:[#allocation15 + $0x9b0] sm:$0xff] }
  0xfb   : > { %7486 = vmatmul.mubr.f32.gmra.mxu0 %v2627_v63  ;;  %7620 = vmatprep.subr.mxu0 %v2342_v6  ;;  %v893_v63 = vmul.f32 %v9295_v10, %v748_v46  ;;  %v1331_v34 = vmul.f32 %v9297_v11, %v1186_v15  ;;  %v2339_v39 = vadd.f32 %v2195_v3, %v1900_v27  ;;  %v1168_v27 = vld [vmem:[#allocation15 + $0x930] sm:$0xff] }
  0xfc   : > { %7488 = vmatprep.mubr.f32.mxu0 %v2628_v5  ;;  %7621 = vmatpush3.msra.mxu0 %v2342_v6  ;;  %v1901_v60 = vadd.f32 %v1757_v35, %v1462_v47  ;;  %v1771_v5 = vmul.f32 %v9299_v17, %v1626_v52  ;;  %v2065_v6 = vld [vmem:[#allocation15 + $0x12c8] sm:$0xff]  ;;  %v1916_v12 = vadd.f32 %v1772_v43, %v1477_v61  ;;  %v2064_v35 = vld [vmem:[#allocation15 + $0x12c0] sm:$0xff]  ;;  %v746_v43 = vld [vmem:[#allocation15 + $0x538] sm:$0xff] }
  0xfd   : > { %7622 = vmatprep.subr.mxu0 %v2341_v40  ;;  %7538 = vmatprep.subr.mxu1 %v2356_v56  ;;  %v1037_v18 = vadd.f32 %v893_v63, %v600_v59  ;;  %v2210_v28 = vmul.f32 %v9303_v22, %v2065_v6  ;;  %v1770_v41 = vmul.f32 %v9299_v17, %v1625_v24  ;;  %v2048_v47 = vld [vmem:[#allocation15 + $0x1240] sm:$0xff]  ;;  %v2063_v61 = vld [vmem:[#allocation15 + $0x12b8] sm:$0xff] }
  0xfe   : > { %7623 = vmatpush3.msra.mxu0 %v2341_v40  ;;  %v2340_v9 = vadd.f32 %v2196_v42, %v1901_v60  ;;  %7539 = vmatpush3.msra.mxu1 %v2356_v56  ;;  %v2355_v26 = vadd.f32 %v2211_v57, %v1916_v12  ;;  %v1036_v40 = vadd.f32 %v892_v29, %v599_v23  ;;  %v583_v42 = vld [vmem:[#allocation15 + $0x40] sm:$0xff]  ;;  %v730_v56 = vld [vmem:[#allocation15 + $0x4b8] sm:$0xff]  ;;  %v745_v12 = vld [vmem:[#allocation15 + $0x530] sm:$0xff] }
  0xff   : > { %7489 = vmatmul.mubr.f32.gmra.mxu0 %v2629_v20  ;;  %v1316_v20 = vmul.f32 %v9297_v11, %v1171_v1  ;;  %v1476_v31 = vadd.f32 %v1332_v4, %v1037_v18  ;;  %v876_v46 = vmul.f32 %v9295_v10, %v731_v30  ;;  %v2209_v52 = vmul.f32 %v9303_v22, %v2064_v35  ;;  %v2637_v63 = vld [vmem:[%s9267_s0 + $0x68] sm:$0xff]  ;;  %v582_v4 = vld [vmem:[#allocation15 + $0x38] sm:$0xff]  ;;  %v2062_v35 = vld [vmem:[#allocation15 + $0x12b0] sm:$0xff] }
 0x100   : > { %7491 = vmatprep.mubr.f32.mxu0 %v2630_v33  ;;  %7624 = vmatprep.subr.mxu0 %v2340_v9  ;;  %v2194_v33 = vmul.f32 %v9303_v22, %v2049_v14  ;;  %v1475_v51 = vadd.f32 %v1331_v34, %v1036_v40  ;;  %v891_v60 = vmul.f32 %v9295_v10, %v746_v43  ;;  %v2638_v14 = vld [vmem:[%s9267_s0 + $0x70] sm:$0xff] }
 0x101   : > { %7625 = vmatpush3.msra.mxu0 %v2340_v9  ;;  %v1460_v32 = vadd.f32 %v1316_v20, %v1021_v19  ;;  %7540 = vmatprep.subr.mxu1 %v2355_v26  ;;  %v1915_v44 = vadd.f32 %v1771_v5, %v1476_v31  ;;  %v1020_v59 = vadd.f32 %v876_v46, %v583_v42  ;;  %v1608_v5 = vld [vmem:[#allocation15 + $0xdb8] sm:$0xff]  ;;  %v597_v19 = vld [vmem:[#allocation15 + $0xb0] sm:$0xff] }
 0x102   : > { %7541 = vmatpush3.msra.mxu1 %v2355_v26  ;;  %7626 = vmatprep.subr.mxu0 %v2339_v39  ;;  %v1914_v0 = vadd.f32 %v1770_v41, %v1475_v51  ;;  %v2193_v1 = vmul.f32 %v9303_v22, %v2048_v47  ;;  %v1330_v2 = vmul.f32 %v9297_v11, %v1185_v48  ;;  %v2047_v9 = vld [vmem:[#allocation15 + $0x1238] sm:$0xff]  ;;  %v729_v26 = vld [vmem:[#allocation15 + $0x4b0] sm:$0xff] }
 0x103   : > { %7492 = vmatmul.mubr.f32.gmra.mxu0 %v2631_v54  ;;  %v1899_v45 = vadd.f32 %v1755_v21, %v1460_v32  ;;  %v1754_v54 = vmul.f32 %v9299_v17, %v1609_v37  ;;  %v2354_v57 = vadd.f32 %v2210_v28, %v1915_v44  ;;  %v1769_v3 = vmul.f32 %v9299_v17, %v1624_v49  ;;  %v2639_v28 = vld [vmem:[%s9267_s0 + $0x78] sm:$0xff] }
 0x104   : > { %7494 = vmatprep.mubr.f32.mxu0 %v2632_v55  ;;  %v598_v55 = vld [vmem:[#allocation15 + $0xb8] sm:$0xff]  ;;  %7627 = vmatpush3.msra.mxu0 %v2339_v39  ;;  %v1459_v6 = vadd.f32 %v1315_v53, %v1020_v59  ;;  %v875_v8 = vmul.f32 %v9295_v10, %v730_v56  ;;  %v2353_v15 = vadd.f32 %v2209_v52, %v1914_v0  ;;  %v1607_v37 = vld [vmem:[#allocation15 + $0xdb0] sm:$0xff] }
 0x105   : > { %v2338_v58 = vadd.f32 %v2194_v33, %v1899_v45  ;;  %7542 = vmatprep.subr.mxu1 %v2354_v57  ;;  %v1035_v7 = vadd.f32 %v891_v60, %v598_v55  ;;  %v1314_v18 = vmul.f32 %v9297_v11, %v1169_v62  ;;  %v1753_v24 = vmul.f32 %v9299_v17, %v1608_v5  ;;  %v2046_v45 = vld [vmem:[#allocation15 + $0x1230] sm:$0xff]  ;;  %v2644_v59 = vld [vmem:[%s9267_s0 + $0xa0] sm:$0xff]  ;;  %v2653_v5 = vld [vmem:[%s9267_s0 + $0xe8] sm:$0xff] }
 0x106   : > { %7543 = vmatpush3.msra.mxu1 %v2354_v57  ;;  %v1898_v20 = vadd.f32 %v1754_v54, %v1459_v6  ;;  %v1019_v23 = vadd.f32 %v875_v8, %v582_v4  ;;  %v2192_v29 = vmul.f32 %v9303_v22, %v2047_v9  ;;  %v890_v30 = vmul.f32 %v9295_v10, %v745_v12  ;;  %v2642_v52 = vld [vmem:[%s9267_s0 + $0x90] sm:$0xff]  ;;  %v2648_v0 = vld [vmem:[%s9267_s0 + $0xc0] sm:$0xff] }
 0x107   : > { %7495 = vmatmul.mubr.f32.gmra.mxu0 %v2633_v16  ;;  %7628 = vmatprep.subr.mxu0 %v2338_v58  ;;  %v2208_v16 = vmul.f32 %v9303_v22, %v2063_v61  ;;  %v1474_v21 = vadd.f32 %v1330_v2, %v1035_v7  ;;  %v1329_v31 = vmul.f32 %v9297_v11, %v1184_v13  ;;  %v2645_v61 = vld [vmem:[%s9267_s0 + $0xa8] sm:$0xff]  ;;  %v2646_v62 = vld [vmem:[%s9267_s0 + $0xb0] sm:$0xff]  ;;  %v2652_v4 = vld [vmem:[%s9267_s0 + $0xe0] sm:$0xff] }
 0x108   : > { %7497 = vmatprep.mubr.f32.mxu0 %v2634_v25  ;;  %7629 = vmatpush3.msra.mxu0 %v2338_v58  ;;  %v1623_v25 = vld [vmem:[#allocation15 + $0xe30] sm:$0xff]  ;;  %v2337_v32 = vadd.f32 %v2193_v1, %v1898_v20  ;;  %v1458_v34 = vadd.f32 %v1314_v18, %v1019_v23  ;;  %v1034_v39 = vadd.f32 %v890_v30, %v597_v19  ;;  %v2649_v1 = vld [vmem:[%s9267_s0 + $0xc8] sm:$0xff] }
 0x109   : > { %7544 = vmatprep.subr.mxu1 %v2353_v15  ;;  %v1913_v33 = vadd.f32 %v1769_v3, %v1474_v21  ;;  %v1768_v40 = vmul.f32 %v9299_v17, %v1623_v25  ;;  %v874_v41 = vmul.f32 %v9295_v10, %v729_v26  ;;  %v1313_v42 = vmul.f32 %v9297_v11, %v1168_v27  ;;  %v2643_v58 = vld [vmem:[%s9267_s0 + $0x98] sm:$0xff]  ;;  %v2650_v2 = vld [vmem:[%s9267_s0 + $0xd0] sm:$0xff]  ;;  %v743_v23 = vld [vmem:[#allocation15 + $0x520] sm:$0xff] }
 0x10a   : > { %7545 = vmatpush3.msra.mxu1 %v2353_v15  ;;  %7630 = vmatprep.subr.mxu0 %v2337_v32  ;;  %v1897_v44 = vadd.f32 %v1753_v24, %v1458_v34  ;;  %v1473_v46 = vadd.f32 %v1329_v31, %v1034_v39  ;;  %v2207_v47 = vmul.f32 %v9303_v22, %v2062_v35  ;;  %v2651_v3 = vld [vmem:[%s9267_s0 + $0xd8] sm:$0xff]  ;;  %v744_v6 = vld [vmem:[#allocation15 + $0x528] sm:$0xff]  ;;  %v727_v24 = vld [vmem:[#allocation15 + $0x4a0] sm:$0xff] }
 0x10b   : > { %7498 = vmatmul.mubr.f32.gmra.mxu0 %v2635_v38  ;;  %v2640_v38 = vld [vmem:[%s9267_s0 + $0x80] sm:$0xff]  ;;  %v2352_v43 = vadd.f32 %v2208_v16, %v1913_v33  ;;  %v1018_v48 = vadd.f32 %v874_v41, %v581_v36  ;;  %v1752_v49 = vmul.f32 %v9299_v17, %v1607_v37  ;;  %v2191_v55 = vmul.f32 %v9303_v22, %v2046_v45  ;;  %v728_v7 = vld [vmem:[#allocation15 + $0x4a8] sm:$0xff]  ;;  %v2655_v13 = vld [vmem:[%s9267_s0 + $0xf8] sm:$0xff] }
 0x10c   : > { %7500 = vmatprep.mubr.f32.mxu0 %v2636_v50  ;;  %v2641_v50 = vld [vmem:[%s9267_s0 + $0x88] sm:$0xff]  ;;  %7631 = vmatpush3.msra.mxu0 %v2337_v32  ;;  %v2336_v51 = vadd.f32 %v2192_v29, %v1897_v44  ;;  %v1912_v53 = vadd.f32 %v1768_v40, %v1473_v46  ;;  %v2654_v8 = vld [vmem:[%s9267_s0 + $0xf0] sm:$0xff]  ;;  %v889_v9 = vmul.f32 %v9295_v10, %v744_v6  ;;  %v1165_v6 = vld [vmem:[#allocation15 + $0x918] sm:$0xff] }
 0x10d   : > { %7546 = vmatprep.subr.mxu1 %v2352_v43  ;;  %v1457_v54 = vadd.f32 %v1313_v42, %v1018_v48  ;;  %v873_v12 = vmul.f32 %v9295_v10, %v728_v7  ;;  %v1183_v15 = vld [vmem:[#allocation15 + $0x9a8] sm:$0xff]  ;;  %v888_v29 = vmul.f32 %v9295_v10, %v743_v23  ;;  %v872_v30 = vmul.f32 %v9295_v10, %v727_v24  ;;  %v1182_v34 = vld [vmem:[#allocation15 + $0x9a0] sm:$0xff]  ;;  %v1604_v7 = vld [vmem:[#allocation15 + $0xd98] sm:$0xff] }
 0x10e   : > { %7632 = vmatprep.subr.mxu0 %v2336_v51  ;;  %7547 = vmatpush3.msra.mxu1 %v2352_v43  ;;  %v2351_v56 = vadd.f32 %v2207_v47, %v1912_v53  ;;  %v580_v16 = vld [vmem:[#allocation15 + $0x28] sm:$0xff]  ;;  %v1328_v19 = vmul.f32 %v9297_v11, %v1183_v15  ;;  %v579_v35 = vld [vmem:[#allocation15 + $0x20] sm:$0xff]  ;;  %v1327_v41 = vmul.f32 %v9297_v11, %v1182_v34  ;;  %v1603_v34 = vld [vmem:[#allocation15 + $0xd90] sm:$0xff] }
 0x10f   : > { %7501 = vmatmul.mubr.f32.gmra.mxu0 %v2637_v63  ;;  %v1896_v57 = vadd.f32 %v1752_v49, %v1457_v54  ;;  %v2647_v63 = vld [vmem:[%s9267_s0 + $0xb8] sm:$0xff]  ;;  %v1017_v20 = vadd.f32 %v873_v12, %v580_v16  ;;  %v1167_v21 = vld [vmem:[#allocation15 + $0x928] sm:$0xff]  ;;  %v1166_v36 = vld [vmem:[#allocation15 + $0x920] sm:$0xff]  ;;  %v1016_v43 = vadd.f32 %v872_v30, %v579_v35  ;;  %v1310_v16 = vmul.f32 %v9297_v11, %v1165_v6 }
 0x110   : > { %7503 = vmatprep.mubr.f32.mxu0 %v2638_v14  ;;  %7633 = vmatpush3.msra.mxu0 %v2336_v51  ;;  %v596_v14 = vld [vmem:[#allocation15 + $0xa8] sm:$0xff]  ;;  %v1312_v26 = vmul.f32 %v9297_v11, %v1167_v21  ;;  %v1621_v42 = vld [vmem:[#allocation15 + $0xe20] sm:$0xff]  ;;  %v594_v49 = vld [vmem:[#allocation15 + $0x98] sm:$0xff]  ;;  %v1311_v54 = vmul.f32 %v9297_v11, %v1166_v36  ;;  %v9443_v24 = vmul.f32 %v9299_v17, %v1604_v7 }
 0x111   : > { %7548 = vmatprep.subr.mxu1 %v2351_v56  ;;  %v2335_v60 = vadd.f32 %v2191_v55, %v1896_v57  ;;  %v1033_v18 = vadd.f32 %v889_v9, %v596_v14  ;;  %v1622_v25 = vld [vmem:[#allocation15 + $0xe28] sm:$0xff]  ;;  %v1766_v47 = vmul.f32 %v9299_v17, %v1621_v42  ;;  %v1605_v48 = vld [vmem:[#allocation15 + $0xda0] sm:$0xff]  ;;  %v1181_v57 = vld [vmem:[#allocation15 + $0x998] sm:$0xff] }
 0x112   : > { %7549 = vmatpush3.msra.mxu1 %v2351_v56  ;;  %v1606_v27 = vld [vmem:[#allocation15 + $0xda8] sm:$0xff]  ;;  %v1767_v32 = vmul.f32 %v9299_v17, %v1622_v25  ;;  %v2060_v53 = vld [vmem:[#allocation15 + $0x12a0] sm:$0xff]  ;;  %v1750_v55 = vmul.f32 %v9299_v17, %v1605_v48  ;;  %v593_v25 = vld [vmem:[#allocation15 + $0x90] sm:$0xff] }
 0x113   : > { %7504 = vmatmul.mubr.f32.gmra.mxu0 %v2639_v28  ;;  %7634 = vmatprep.subr.mxu0 %v2335_v60  ;;  %v595_v28 = vld [vmem:[#allocation15 + $0xa0] sm:$0xff]  ;;  %v1472_v31 = vadd.f32 %v1328_v19, %v1033_v18  ;;  %v1751_v33 = vmul.f32 %v9299_v17, %v1606_v27  ;;  %v2061_v37 = vld [vmem:[#allocation15 + $0x12a8] sm:$0xff]  ;;  %v2043_v18 = vld [vmem:[#allocation15 + $0x1218] sm:$0xff] }
 0x114   : > { %7506 = vmatprep.mubr.f32.mxu0 %v2640_v38  ;;  %7635 = vmatpush3.msra.mxu0 %v2335_v60  ;;  %v1456_v38 = vadd.f32 %v1312_v26, %v1017_v20  ;;  %v2045_v39 = vld [vmem:[#allocation15 + $0x1228] sm:$0xff]  ;;  %v1032_v40 = vadd.f32 %v888_v29, %v595_v28  ;;  %v2206_v45 = vmul.f32 %v9303_v22, %v2061_v37  ;;  %v2044_v56 = vld [vmem:[#allocation15 + $0x1220] sm:$0xff]  ;;  %v741_v19 = vld [vmem:[#allocation15 + $0x510] sm:$0xff]  ;;  %v8981_v28 = vmov 0.0  }
 0x115   : > { %v1911_v44 = vadd.f32 %v1767_v32, %v1472_v31  ;;  %v2190_v46 = vmul.f32 %v9303_v22, %v2045_v39  ;;  %v9430_v60 = vmul.f32 %v9303_v22, %v2044_v56  ;;  %v1180_v20 = vld [vmem:[#allocation15 + $0x990] sm:$0xff]  ;;  %3010 = vst [vmem:[#allocation2 + $0x18] sm:$0xff] %v8981_v28  ;;  %3011 = vst [vmem:[#allocation2 + $0x20] sm:$0xff] %v8981_v28  ;;  %v1618_v48 = vld [vmem:[#allocation15 + $0xe08] sm:$0xff] }
 0x116   : > { %v1895_v51 = vadd.f32 %v1751_v33, %v1456_v38  ;;  %v1619_v26 = vld [vmem:[#allocation15 + $0xe10] sm:$0xff]  ;;  %3007 = vst [vmem:[#allocation2] sm:$0xff] %v8981_v28  ;;  %3008 = vst [vmem:[#allocation2 + $0x8] sm:$0xff] %v8981_v28  ;;  %v886_v30 = vmul.f32 %v9295_v10, %v741_v19  ;;  %v1325_v31 = vmul.f32 %v9297_v11, %v1180_v20  ;;  %v1162_v19 = vld [vmem:[#allocation15 + $0x900] sm:$0xff] }
 0x117   : > { %7507 = vmatmul.mubr.f32.gmra.mxu0 %v2641_v50  ;;  %v742_v50 = vld [vmem:[#allocation15 + $0x518] sm:$0xff]  ;;  %v2058_v27 = vld [vmem:[#allocation15 + $0x1290] sm:$0xff]  ;;  %3009 = vst [vmem:[#allocation2 + $0x10] sm:$0xff] %v8981_v28  ;;  %3012 = vst [vmem:[#allocation2 + $0x28] sm:$0xff] %v8981_v28  ;;  %v2188_v37 = vmul.f32 %v9303_v22, %v2043_v18  ;;  %v1764_v38 = vmul.f32 %v9299_v17, %v1619_v26 }
 0x118   : > { %7509 = vmatprep.mubr.f32.mxu0 %v2642_v52  ;;  %v1471_v52 = vadd.f32 %v1327_v41, %v1032_v40  ;;  %3013 = vst [vmem:[#allocation2 + $0x30] sm:$0xff] %v8981_v28  ;;  %3014 = vst [vmem:[#allocation2 + $0x38] sm:$0xff] %v8981_v28  ;;  %v725_v32 = vld [vmem:[#allocation15 + $0x490] sm:$0xff]  ;;  %v740_v41 = vld [vmem:[#allocation15 + $0x508] sm:$0xff]  ;;  %v1030_v42 = vadd.f32 %v886_v30, %v593_v25 }
 0x119   : > { %3015 = vst [vmem:[#allocation2 + $0x40] sm:$0xff] %v8981_v28  ;;  %3016 = vst [vmem:[#allocation2 + $0x48] sm:$0xff] %v8981_v28  ;;  %v1164_v33 = vld [vmem:[#allocation15 + $0x910] sm:$0xff]  ;;  %v723_v18 = vld [vmem:[#allocation15 + $0x480] sm:$0xff] }
 0x11a   : > { %3017 = vst [vmem:[#allocation2 + $0x50] sm:$0xff] %v8981_v28  ;;  %3018 = vst [vmem:[#allocation2 + $0x58] sm:$0xff] %v8981_v28  ;;  %v577_v39 = vld [vmem:[#allocation15 + $0x10] sm:$0xff]  ;;  %v1469_v56 = vadd.f32 %v1325_v31, %v1030_v42  ;;  %v2056_v25 = vld [vmem:[#allocation15 + $0x1280] sm:$0xff] }
 0x11b   : > { %7510 = vmatmul.mubr.f32.gmra.mxu0 %v2643_v58  ;;  %v2350_v58 = vadd.f32 %v2206_v45, %v1911_v44  ;;  %3019 = vst [vmem:[#allocation2 + $0x60] sm:$0xff] %v8981_v28  ;;  %3020 = vst [vmem:[#allocation2 + $0x68] sm:$0xff] %v8981_v28  ;;  %v2042_v40 = vld [vmem:[#allocation15 + $0x1210] sm:$0xff]  ;;  %v870_v44 = vmul.f32 %v9295_v10, %v725_v32  ;;  %v1309_v45 = vmul.f32 %v9297_v11, %v1164_v33  ;;  %v575_v32 = vld [vmem:[#allocation15] sm:$0xff] }
 0x11c   : > { %7512 = vmatprep.mubr.f32.mxu0 %v2644_v59  ;;  %v2205_v59 = vmul.f32 %v9303_v22, %v2060_v53  ;;  %3021 = vst [vmem:[#allocation2 + $0x70] sm:$0xff] %v8981_v28  ;;  %3022 = vst [vmem:[#allocation2 + $0x78] sm:$0xff] %v8981_v28  ;;  %v2057_v53 = vld [vmem:[#allocation15 + $0x1288] sm:$0xff]  ;;  %v1601_v33 = vld [vmem:[#allocation15 + $0xd80] sm:$0xff] }
 0x11d   : > { %7550 = vmatprep.subr.mxu1 %v2350_v58  ;;  %3023 = vst [vmem:[#allocation2 + $0x80] sm:$0xff] %v8981_v28  ;;  %3024 = vst [vmem:[#allocation2 + $0x88] sm:$0xff] %v8981_v28  ;;  %v2202_v7 = vmul.f32 %v9303_v22, %v2057_v53  ;;  %v3133_v26 = vld [vmem:[#allocation2 + $0x1] sm:$0xff]  ;;  %v1209_v53 = vld [vmem:[#allocation15 + $0xa78] sm:$0xff] }
 0x11e   : > { %7551 = vmatpush3.msra.mxu1 %v2350_v58  ;;  %3025 = vst [vmem:[#allocation2 + $0x90] sm:$0xff] %v8981_v28  ;;  %3026 = vst [vmem:[#allocation2 + $0x98] sm:$0xff] %v8981_v28  ;;  %v2187_v58 = vmul.f32 %v9303_v22, %v2042_v40  ;;  %7562 = vmatprep.mubr.f32.mxu1 %v3133_v26  ;;  %v2201_v40 = vmul.f32 %v9303_v22, %v2056_v25  ;;  %v619_v26 = vld [vmem:[#allocation15 + $0x160] sm:$0xff] }
 0x11f   : > { %7513 = vmatmul.mubr.f32.gmra.mxu0 %v2645_v61  ;;  %v887_v61 = vmul.f32 %v9295_v10, %v742_v50  ;;  %3027 = vst [vmem:[#allocation2 + $0xa0] sm:$0xff] %v8981_v28  ;;  %3028 = vst [vmem:[#allocation2 + $0xa8] sm:$0xff] %v8981_v28 }
 0x120   : > { %7515 = vmatprep.mubr.f32.mxu0 %v2646_v62  ;;  %v1620_v62 = vld [vmem:[#allocation15 + $0xe18] sm:$0xff]  ;;  %3029 = vst [vmem:[#allocation2 + $0xb0] sm:$0xff] %v8981_v28  ;;  %3030 = vst [vmem:[#allocation2 + $0xb8] sm:$0xff] %v8981_v28 }
 0x121   : > { %v9435_v9 = vmul.f32 %v9299_v17, %v1620_v62  ;;  %3031 = vst [vmem:[#allocation2 + $0xc0] sm:$0xff] %v8981_v28  ;;  %3032 = vst [vmem:[#allocation2 + $0xc8] sm:$0xff] %v8981_v28 }
 0x122   : > { %3033 = vst [vmem:[#allocation2 + $0xd0] sm:$0xff] %v8981_v28  ;;  %3034 = vst [vmem:[#allocation2 + $0xd8] sm:$0xff] %v8981_v28 }
 0x123   : > { %7516 = vmatmul.mubr.f32.gmra.mxu0 %v2647_v63  ;;  %v578_v63 = vld [vmem:[#allocation15 + $0x18] sm:$0xff]  ;;  %3035 = vst [vmem:[#allocation2 + $0xe0] sm:$0xff] %v8981_v28  ;;  %3036 = vst [vmem:[#allocation2 + $0xe8] sm:$0xff] %v8981_v28 }
 0x124   : > { %7518 = vmatprep.mubr.f32.mxu0 %v2648_v0  ;;  %v726_v0 = vld [vmem:[#allocation15 + $0x498] sm:$0xff]  ;;  %3037 = vst [vmem:[#allocation2 + $0xf0] sm:$0xff] %v8981_v28  ;;  %3038 = vst [vmem:[#allocation2 + $0xf8] sm:$0xff] %v8981_v28 }
 0x125   : > { %3039 = vst [vmem:[#allocation2 + $0x100] sm:$0xff] %v8981_v28  ;;  %3040 = vst [vmem:[#allocation2 + $0x108] sm:$0xff] %v8981_v28 }
 0x126   : > { %3041 = vst [vmem:[#allocation2 + $0x110] sm:$0xff] %v8981_v28  ;;  %3042 = vst [vmem:[#allocation2 + $0x118] sm:$0xff] %v8981_v28 }
 0x127   : > { %7519 = vmatmul.mubr.f32.gmra.mxu0 %v2649_v1  ;;  %v2334_v1 = vadd.f32 %v2190_v46, %v1895_v51  ;;  %3043 = vst [vmem:[#allocation2 + $0x120] sm:$0xff] %v8981_v28  ;;  %3044 = vst [vmem:[#allocation2 + $0x128] sm:$0xff] %v8981_v28  ;;  %v592_v46 = vld [vmem:[#allocation15 + $0x88] sm:$0xff]  ;;  %v1748_v51 = vmul.f32 %v9299_v17, %v1603_v34 }
 0x128   : > { %7521 = vmatprep.mubr.f32.mxu0 %v2650_v2  ;;  %v1910_v2 = vadd.f32 %v1766_v47, %v1471_v52  ;;  %3045 = vst [vmem:[#allocation2 + $0x130] sm:$0xff] %v8981_v28  ;;  %3046 = vst [vmem:[#allocation2 + $0x138] sm:$0xff] %v8981_v28  ;;  %v1179_v47 = vld [vmem:[#allocation15 + $0x988] sm:$0xff]  ;;  %v885_v52 = vmul.f32 %v9295_v10, %v740_v41  ;;  %v2040_v41 = vld [vmem:[#allocation15 + $0x1200] sm:$0xff] }
 0x129   : > { %7636 = vmatprep.subr.mxu0 %v2334_v1  ;;  %3047 = vst [vmem:[#allocation2 + $0x140] sm:$0xff] %v8981_v28 }
 0x12a   : > { %v2349_v14 = vadd.f32 %v2205_v59, %v1910_v2  ;;  %7637 = vmatpush3.msra.mxu0 %v2334_v1  ;;  %v1324_v59 = vmul.f32 %v9297_v11, %v1179_v47  ;;  %v2041_v2 = vld [vmem:[#allocation15 + $0x1208] sm:$0xff]  ;;  %v2185_v47 = vmul.f32 %v9303_v22, %v2040_v41  ;;  %v766_v41 = vld [vmem:[#allocation15 + $0x5d8] sm:$0xff] }
 0x12b   : > { %7522 = vmatmul.mubr.f32.gmra.mxu0 %v2651_v3  ;;  %v1455_v3 = vadd.f32 %v1311_v54, %v1016_v43  ;;  %v2203_v43 = vmul.f32 %v9303_v22, %v2058_v27  ;;  %v724_v54 = vld [vmem:[#allocation15 + $0x488] sm:$0xff] }
 0x12c   : > { %7524 = vmatprep.mubr.f32.mxu0 %v2652_v4  ;;  %v1326_v4 = vmul.f32 %v9297_v11, %v1181_v57  ;;  %7552 = vmatprep.subr.mxu1 %v2349_v14  ;;  %v1014_v57 = vadd.f32 %v870_v44, %v577_v39  ;;  %v869_v1 = vmul.f32 %v9295_v10, %v724_v54 }
 0x12d   : > { %v1894_v15 = vadd.f32 %v1750_v55, %v1455_v3  ;;  %7553 = vmatpush3.msra.mxu1 %v2349_v14  ;;  %v1163_v55 = vld [vmem:[#allocation15 + $0x908] sm:$0xff]  ;;  %v739_v3 = vld [vmem:[#allocation15 + $0x500] sm:$0xff] }
 0x12e   : > { %v1453_v6 = vadd.f32 %v1309_v45, %v1014_v57 }
 0x12f   : > { %7525 = vmatmul.mubr.f32.gmra.mxu0 %v2653_v5  ;;  %v2059_v5 = vld [vmem:[#allocation15 + $0x1298] sm:$0xff]  ;;  %v2333_v29 = vadd.f32 %v9430_v60, %v1894_v15  ;;  %v576_v60 = vld [vmem:[#allocation15 + $0x8] sm:$0xff] }
 0x130   : > { %7527 = vmatprep.mubr.f32.mxu0 %v2654_v8  ;;  %v1031_v8 = vadd.f32 %v887_v61, %v594_v49  ;;  %v9438_v12 = vmul.f32 %v9303_v22, %v2059_v5  ;;  %v1602_v61 = vld [vmem:[#allocation15 + $0xd88] sm:$0xff]  ;;  %v1908_v5 = vadd.f32 %v1764_v38, %v1469_v56  ;;  %v1013_v14 = vadd.f32 %v869_v1, %v576_v60  ;;  %v1648_v56 = vld [vmem:[#allocation15 + $0xef8] sm:$0xff]  ;;  %v1208_v1 = vld [vmem:[#allocation15 + $0xa70] sm:$0xff] }
 0x131   : > { %7638 = vmatprep.subr.mxu0 %v2333_v29  ;;  %v1747_v15 = vmul.f32 %v9299_v17, %v1602_v61  ;;  %v1793_v60 = vmul.f32 %v9299_v17, %v1648_v56  ;;  %v765_v56 = vld [vmem:[#allocation15 + $0x5d0] sm:$0xff] }
 0x132   : > { %v1470_v21 = vadd.f32 %v1326_v4, %v1031_v8  ;;  %7639 = vmatpush3.msra.mxu0 %v2333_v29  ;;  %v1178_v4 = vld [vmem:[#allocation15 + $0x980] sm:$0xff]  ;;  %v1308_v8 = vmul.f32 %v9297_v11, %v1163_v55  ;;  %v2347_v20 = vadd.f32 %v2203_v43, %v1908_v5  ;;  %v1746_v43 = vmul.f32 %v9299_v17, %v1601_v33  ;;  %v1647_v5 = vld [vmem:[#allocation15 + $0xef0] sm:$0xff] }
 0x133   : > { %7528 = vmatmul.mubr.f32.gmra.mxu0 %v2655_v13  ;;  %v871_v13 = vmul.f32 %v9295_v10, %v726_v0  ;;  %v1763_v0 = vmul.f32 %v9299_v17, %v1618_v48  ;;  %v1354_v55 = vmul.f32 %v9297_v11, %v1209_v53 }
 0x134   : > { %v1909_v35 = vadd.f32 %v9435_v9, %v1470_v21  ;;  %7648 = vmatprep.mubr.f32.mxu0 %v8981_v28  ;;  %v591_v9 = vld [vmem:[#allocation15 + $0x80] sm:$0xff]  ;;  %v1892_v21 = vadd.f32 %v1748_v51, %v1453_v6  ;;  %v1452_v29 = vadd.f32 %v1308_v8, %v1013_v14  ;;  %v622_v51 = vld [vmem:[#allocation15 + $0x178] sm:$0xff]  ;;  %v2086_v6 = vld [vmem:[#allocation15 + $0x1370] sm:$0xff] }
 0x135   : > { %v1015_v23 = vadd.f32 %v871_v13, %v578_v63  ;;  %v1029_v63 = vadd.f32 %v885_v52, %v592_v46  ;;  %v770_v52 = vld [vmem:[#allocation15 + $0x5f8] sm:$0xff]  ;;  %v1207_v14 = vld [vmem:[#allocation15 + $0xa68] sm:$0xff] }
 0x136   : > { %v2348_v49 = vadd.f32 %v9438_v12, %v1909_v35  ;;  %v1617_v12 = vld [vmem:[#allocation15 + $0xe00] sm:$0xff]  ;;  %v2331_v34 = vadd.f32 %v2187_v58, %v1892_v21  ;;  %v868_v35 = vmul.f32 %v9295_v10, %v723_v18  ;;  %v1891_v38 = vadd.f32 %v1747_v15, %v1452_v29  ;;  %v2087_v58 = vld [vmem:[#allocation15 + $0x1378] sm:$0xff] }
 0x137   : > { %v1454_v36 = vadd.f32 %v1310_v16, %v1015_v23  ;;  %v1468_v13 = vadd.f32 %v1324_v59, %v1029_v63  ;;  %v884_v16 = vmul.f32 %v9295_v10, %v739_v3  ;;  %v2186_v23 = vmul.f32 %v9303_v22, %v2041_v2  ;;  %v621_v63 = vld [vmem:[#allocation15 + $0x170] sm:$0xff]  ;;  %v1206_v29 = vld [vmem:[#allocation15 + $0xa60] sm:$0xff] }
 0x138   : > { %7554 = vmatprep.subr.mxu1 %v2348_v49  ;;  %v1762_v31 = vmul.f32 %v9299_v17, %v1617_v12  ;;  %v1012_v42 = vadd.f32 %v868_v35, %v575_v32  ;;  %v915_v54 = vmul.f32 %v9295_v10, %v770_v52  ;;  %v620_v12 = vld [vmem:[#allocation15 + $0x168] sm:$0xff]  ;;  %v1352_v18 = vmul.f32 %v9297_v11, %v1207_v14  ;;  %v2084_v35 = vld [vmem:[#allocation15 + $0x1360] sm:$0xff] }
 0x139   : > { %v1893_v50 = vadd.f32 %v9443_v24, %v1454_v36  ;;  %7555 = vmatpush3.msra.mxu1 %v2348_v49  ;;  %v1323_v24 = vmul.f32 %v9297_v11, %v1178_v4  ;;  %v1907_v27 = vadd.f32 %v1763_v0, %v1468_v13  ;;  %v1028_v30 = vadd.f32 %v884_v16, %v591_v9  ;;  %v3134_v49 = vld [vmem:[#allocation2 + $0x9] sm:$0xff]  ;;  %v768_v13 = vld [vmem:[#allocation15 + $0x5e8] sm:$0xff] }
 0x13a   : > { %7556 = vmatprep.subr.mxu1 %v2347_v20  ;;  %v1307_v36 = vmul.f32 %v9297_v11, %v1162_v19  ;;  %v2330_v44 = vadd.f32 %v2186_v23, %v1891_v38  ;;  %v1059_v59 = vadd.f32 %v915_v54, %v622_v51  ;;  %v769_v0 = vld [vmem:[#allocation15 + $0x5f0] sm:$0xff]  ;;  %v1353_v4 = vmul.f32 %v9297_v11, %v1208_v1  ;;  %v1646_v19 = vld [vmem:[#allocation15 + $0xee8] sm:$0xff] }
 0x13b   : > { %v2332_v62 = vadd.f32 %v2188_v37, %v1893_v50  ;;  %7557 = vmatpush3.msra.mxu1 %v2347_v20  ;;  %v2346_v37 = vadd.f32 %v2202_v7, %v1907_v27  ;;  %v1467_v39 = vadd.f32 %v1323_v24, %v1028_v30  ;;  %v914_v3 = vmul.f32 %v9295_v10, %v769_v0  ;;  %v2085_v20 = vld [vmem:[#allocation15 + $0x1368] sm:$0xff]  ;;  %v767_v27 = vld [vmem:[#allocation15 + $0x5e0] sm:$0xff] }
 0x13c   : > { %v1451_v46 = vadd.f32 %v1307_v36, %v1012_v42  ;;  %v1498_v61 = vadd.f32 %v1354_v55, %v1059_v59  ;;  %v1792_v9 = vmul.f32 %v9299_v17, %v1647_v5  ;;  %v913_v16 = vmul.f32 %v9295_v10, %v768_v13  ;;  %v1205_v42 = vld [vmem:[#allocation15 + $0xa58] sm:$0xff]  ;;  %v617_v55 = vld [vmem:[#allocation15 + $0x150] sm:$0xff] }
 0x13d   : > { %7640 = vmatprep.subr.mxu0 %v2332_v62  ;;  %7558 = vmatprep.subr.mxu1 %v2346_v37  ;;  %v1906_v45 = vadd.f32 %v1762_v31, %v1467_v39  ;;  %v1058_v8 = vadd.f32 %v914_v3, %v621_v63  ;;  %v1791_v24 = vmul.f32 %v9299_v17, %v1646_v19  ;;  %v2082_v63 = vld [vmem:[#allocation15 + $0x1350] sm:$0xff]  ;;  %v1225_v5 = vld [vmem:[#allocation15 + $0xaf8] sm:$0xff]  ;;  %v1642_v19 = vld [vmem:[#allocation15 + $0xec8] sm:$0xff] }
 0x13e   : > { %7641 = vmatpush3.msra.mxu0 %v2332_v62  ;;  %7559 = vmatpush3.msra.mxu1 %v2346_v37  ;;  %v1890_v50 = vadd.f32 %v1746_v43, %v1451_v46  ;;  %v2232_v62 = vmul.f32 %v9303_v22, %v2087_v58  ;;  %v1937_v2 = vadd.f32 %v1793_v60, %v1498_v61  ;;  %v1643_v61 = vld [vmem:[#allocation15 + $0xed0] sm:$0xff] }
 0x13f   : > { %7642 = vmatprep.subr.mxu0 %v2331_v34  ;;  %v2345_v48 = vadd.f32 %v2201_v40, %v1906_v45  ;;  %v1497_v15 = vadd.f32 %v1353_v4, %v1058_v8  ;;  %v1057_v23 = vadd.f32 %v913_v16, %v620_v12  ;;  %v2230_v25 = vmul.f32 %v9303_v22, %v2085_v20  ;;  %v618_v40 = vld [vmem:[#allocation15 + $0x158] sm:$0xff]  ;;  %v764_v8 = vld [vmem:[#allocation15 + $0x5c8] sm:$0xff] }
 0x140   : > { %7643 = vmatpush3.msra.mxu0 %v2331_v34  ;;  %v2329_v57 = vadd.f32 %v2185_v47, %v1890_v50  ;;  %v2376_v7 = vadd.f32 %v2232_v62, %v1937_v2  ;;  %v912_v32 = vmul.f32 %v9295_v10, %v767_v27  ;;  %v1351_v33 = vmul.f32 %v9297_v11, %v1206_v29  ;;  %v1645_v34 = vld [vmem:[#allocation15 + $0xee0] sm:$0xff]  ;;  %v1644_v47 = vld [vmem:[#allocation15 + $0xed8] sm:$0xff]  ;;  %v2081_v20 = vld [vmem:[#allocation15 + $0x1348] sm:$0xff] }
 0x141   : > { %7644 = vmatprep.subr.mxu0 %v2330_v44  ;;  %7560 = vmatprep.subr.mxu1 %v2345_v48  ;;  %v1936_v21 = vadd.f32 %v1792_v9, %v1497_v15  ;;  %v1496_v31 = vadd.f32 %v1352_v18, %v1057_v23  ;;  %v1790_v38 = vmul.f32 %v9299_v17, %v1645_v34  ;;  %v786_v62 = vld [vmem:[#allocation15 + $0x678] sm:$0xff]  ;;  %v1203_v9 = vld [vmem:[#allocation15 + $0xa48] sm:$0xff]  ;;  %v637_v27 = vld [vmem:[#allocation15 + $0x1f0] sm:$0xff] }
 0x142   : > { %7645 = vmatpush3.msra.mxu0 %v2330_v44  ;;  %7561 = vmatpush3.msra.mxu1 %v2345_v48  ;;  %v1056_v37 = vadd.f32 %v912_v32, %v619_v26  ;;  %v2229_v39 = vmul.f32 %v9303_v22, %v2084_v35  ;;  %v911_v45 = vmul.f32 %v9295_v10, %v766_v41  ;;  %v2083_v48 = vld [vmem:[#allocation15 + $0x1358] sm:$0xff]  ;;  %v1224_v29 = vld [vmem:[#allocation15 + $0xaf0] sm:$0xff] }
 0x143   : > { %7563 = vmatmul.mubr.f32.vlgmr.msra.gmra.mxu1 %v3134_v49  ;;  %7646 = vmatprep.subr.mxu0 %v2329_v57  ;;  %v1935_v36 = vadd.f32 %v1791_v24, %v1496_v31  ;;  %v1350_v46 = vmul.f32 %v9297_v11, %v1205_v42  ;;  %v1789_v51 = vmul.f32 %v9299_v17, %v1644_v47  ;;  %v638_v4 = vld [vmem:[#allocation15 + $0x1f8] sm:$0xff] }
 0x144   : > { %7647 = vmatpush3.msra.mxu0 %v2329_v57  ;;  %7702 = vmatprep.subr.mxu1 %v2376_v7  ;;  %v1495_v44 = vadd.f32 %v1351_v33, %v1056_v37  ;;  %v1055_v50 = vadd.f32 %v911_v45, %v618_v40  ;;  %v2228_v54 = vmul.f32 %v9303_v22, %v2083_v48  ;;  %v1204_v57 = vld [vmem:[#allocation15 + $0xa50] sm:$0xff]  ;;  %v2103_v33 = vld [vmem:[#allocation15 + $0x13f8] sm:$0xff]  ;;  %v636_v37 = vld [vmem:[#allocation15 + $0x1e8] sm:$0xff] }
 0x145   : > { %7649 = vmatmul.mubr.f32.vlgmr.msra.gmra.mxu0 %v8981_v28  ;;  %v2231_v28 = vmul.f32 %v9303_v22, %v2086_v6  ;;  %7703 = vmatpush3.msra.mxu1 %v2376_v7  ;;  %v2374_v43 = vadd.f32 %v2230_v25, %v1935_v36  ;;  %v910_v59 = vmul.f32 %v9295_v10, %v765_v56  ;;  %v785_v6 = vld [vmem:[#allocation15 + $0x670] sm:$0xff]  ;;  %v616_v7 = vld [vmem:[#allocation15 + $0x148] sm:$0xff]  ;;  %v1202_v40 = vld [vmem:[#allocation15 + $0xa40] sm:$0xff] }
 0x146   : > { %v1934_v49 = vadd.f32 %v1790_v38, %v1495_v44  ;;  %v1494_v53 = vadd.f32 %v1350_v46, %v1055_v50  ;;  %v1349_v60 = vmul.f32 %v9297_v11, %v1204_v57  ;;  %v931_v0 = vmul.f32 %v9295_v10, %v786_v62  ;;  %v1663_v36 = vld [vmem:[#allocation15 + $0xf70] sm:$0xff]  ;;  %v615_v38 = vld [vmem:[#allocation15 + $0x140] sm:$0xff]  ;;  %v1223_v56 = vld [vmem:[#allocation15 + $0xae8] sm:$0xff] }
 0x147   : > { %v2375_v30 = vadd.f32 %v2231_v28, %v1936_v21  ;;  %v1054_v2 = vadd.f32 %v910_v59, %v617_v55  ;;  %v1788_v3 = vmul.f32 %v9299_v17, %v1643_v61  ;;  %v1370_v13 = vmul.f32 %v9297_v11, %v1225_v5  ;;  %v1664_v21 = vld [vmem:[#allocation15 + $0xf78] sm:$0xff]  ;;  %v2080_v50 = vld [vmem:[#allocation15 + $0x1340] sm:$0xff]  ;;  %v1662_v57 = vld [vmem:[#allocation15 + $0xf68] sm:$0xff] }
 0x148   : > { %v2373_v52 = vadd.f32 %v2229_v39, %v1934_v49  ;;  %v1933_v58 = vadd.f32 %v1789_v51, %v1494_v53  ;;  %v1075_v12 = vadd.f32 %v931_v0, %v638_v4  ;;  %v930_v14 = vmul.f32 %v9295_v10, %v785_v6  ;;  %v763_v39 = vld [vmem:[#allocation15 + $0x5c0] sm:$0xff]  ;;  %v2102_v51 = vld [vmem:[#allocation15 + $0x13f0] sm:$0xff]  ;;  %v2101_v62 = vld [vmem:[#allocation15 + $0x13e8] sm:$0xff] }
 0x149   : > { %7704 = vmatprep.subr.mxu1 %v2375_v30  ;;  %v1493_v15 = vadd.f32 %v1349_v60, %v1054_v2  ;;  %v2227_v28 = vmul.f32 %v9303_v22, %v2082_v63  ;;  %v909_v16 = vmul.f32 %v9295_v10, %v764_v8  ;;  %v1348_v18 = vmul.f32 %v9297_v11, %v1203_v9  ;;  %v1641_v49 = vld [vmem:[#allocation15 + $0xec0] sm:$0xff]  ;;  %v762_v2 = vld [vmem:[#allocation15 + $0x5b8] sm:$0xff] }
 0x14a   : > { %7705 = vmatpush3.msra.mxu1 %v2375_v30  ;;  %v2372_v1 = vadd.f32 %v2228_v54, %v1933_v58  ;;  %v1787_v23 = vmul.f32 %v9299_v17, %v1642_v19  ;;  %v2226_v24 = vmul.f32 %v9303_v22, %v2081_v20  ;;  %v1514_v25 = vadd.f32 %v1370_v13, %v1075_v12  ;;  %v784_v30 = vld [vmem:[#allocation15 + $0x668] sm:$0xff]  ;;  %v783_v63 = vld [vmem:[#allocation15 + $0x660] sm:$0xff]  ;;  %v1640_v13 = vld [vmem:[#allocation15 + $0xeb8] sm:$0xff] }
 0x14b   : > { %7706 = vmatprep.subr.mxu1 %v2374_v43  ;;  %v1809_v26 = vmul.f32 %v9299_v17, %v1664_v21  ;;  %v1932_v31 = vadd.f32 %v1788_v3, %v1493_v15  ;;  %v1053_v32 = vadd.f32 %v909_v16, %v616_v7  ;;  %v1074_v34 = vadd.f32 %v930_v14, %v637_v27  ;;  %v1222_v0 = vld [vmem:[#allocation15 + $0xae0] sm:$0xff]  ;;  %v1201_v3 = vld [vmem:[#allocation15 + $0xa38] sm:$0xff] }
 0x14c   : > { %7707 = vmatpush3.msra.mxu1 %v2374_v43  ;;  %v1369_v35 = vmul.f32 %v9297_v11, %v1224_v29  ;;  %v2248_v42 = vmul.f32 %v9303_v22, %v2103_v33  ;;  %v1808_v43 = vmul.f32 %v9299_v17, %v1663_v36  ;;  %v929_v44 = vmul.f32 %v9295_v10, %v784_v30  ;;  %v2079_v14 = vld [vmem:[#allocation15 + $0x1338] sm:$0xff]  ;;  %v1661_v15 = vld [vmem:[#allocation15 + $0xf60] sm:$0xff] }
 0x14d   : > { %7708 = vmatprep.subr.mxu1 %v2373_v52  ;;  %v1953_v41 = vadd.f32 %v1809_v26, %v1514_v25  ;;  %v2371_v45 = vadd.f32 %v2227_v28, %v1932_v31  ;;  %v1492_v46 = vadd.f32 %v1348_v18, %v1053_v32  ;;  %v908_v47 = vmul.f32 %v9295_v10, %v763_v39  ;;  %v635_v20 = vld [vmem:[#allocation15 + $0x1e0] sm:$0xff]  ;;  %v782_v27 = vld [vmem:[#allocation15 + $0x658] sm:$0xff] }
 0x14e   : > { %7709 = vmatpush3.msra.mxu1 %v2373_v52  ;;  %v1347_v48 = vmul.f32 %v9297_v11, %v1202_v40  ;;  %v1786_v52 = vmul.f32 %v9299_v17, %v1641_v49  ;;  %v2225_v53 = vmul.f32 %v9303_v22, %v2080_v50  ;;  %v1513_v55 = vadd.f32 %v1369_v35, %v1074_v34  ;;  %v2100_v21 = vld [vmem:[#allocation15 + $0x13e0] sm:$0xff]  ;;  %v1221_v29 = vld [vmem:[#allocation15 + $0xad8] sm:$0xff]  ;;  %v781_v40 = vld [vmem:[#allocation15 + $0x650] sm:$0xff] }
 0x14f   : > { %7710 = vmatprep.subr.mxu1 %v2372_v1  ;;  %v2392_v54 = vadd.f32 %v2248_v42, %v1953_v41  ;;  %v1931_v58 = vadd.f32 %v1787_v23, %v1492_v46  ;;  %v1052_v59 = vadd.f32 %v908_v47, %v615_v38  ;;  %v2247_v60 = vmul.f32 %v9303_v22, %v2102_v51  ;;  %v1660_v30 = vld [vmem:[#allocation15 + $0xf58] sm:$0xff]  ;;  %v613_v41 = vld [vmem:[#allocation15 + $0x130] sm:$0xff] }
 0x150   : > { %7711 = vmatpush3.msra.mxu1 %v2372_v1  ;;  %v1073_v61 = vadd.f32 %v929_v44, %v636_v37  ;;  %v614_v1 = vld [vmem:[#allocation15 + $0x138] sm:$0xff]  ;;  %v1952_v4 = vadd.f32 %v1808_v43, %v1513_v55  ;;  %v1368_v5 = vmul.f32 %v9297_v11, %v1223_v56  ;;  %v1807_v6 = vmul.f32 %v9299_v17, %v1662_v57  ;;  %v761_v42 = vld [vmem:[#allocation15 + $0x5b0] sm:$0xff] }
 0x151   : > { %7712 = vmatprep.subr.mxu1 %v2371_v45  ;;  %7788 = vmatprep.subr.mxu0 %v2392_v54  ;;  %v2370_v7 = vadd.f32 %v2226_v24, %v1931_v58  ;;  %v1491_v8 = vadd.f32 %v1347_v48, %v1052_v59  ;;  %v907_v9 = vmul.f32 %v9295_v10, %v762_v2  ;;  %v634_v38 = vld [vmem:[#allocation15 + $0x1d8] sm:$0xff]  ;;  %v1200_v43 = vld [vmem:[#allocation15 + $0xa30] sm:$0xff]  ;;  %v612_v2 = vld [vmem:[#allocation15 + $0x128] sm:$0xff] }
 0x152   : > { %7713 = vmatpush3.msra.mxu1 %v2371_v45  ;;  %v1346_v12 = vmul.f32 %v9297_v11, %v1201_v3  ;;  %7789 = vmatpush3.msra.mxu0 %v2392_v54  ;;  %v1785_v28 = vmul.f32 %v9299_v17, %v1640_v13  ;;  %v2224_v16 = vmul.f32 %v9303_v22, %v2079_v14  ;;  %v2099_v39 = vld [vmem:[#allocation15 + $0x13d8] sm:$0xff]  ;;  %v1639_v51 = vld [vmem:[#allocation15 + $0xeb0] sm:$0xff]  ;;  %v2077_v14 = vld [vmem:[#allocation15 + $0x1328] sm:$0xff] }
 0x153   : > { %v2391_v18 = vadd.f32 %v2247_v60, %v1952_v4  ;;  %v1512_v19 = vadd.f32 %v1368_v5, %v1073_v61  ;;  %7714 = vmatprep.subr.mxu1 %v2370_v7  ;;  %v1930_v23 = vadd.f32 %v1786_v52, %v1491_v8  ;;  %v1051_v24 = vadd.f32 %v907_v9, %v614_v1  ;;  %v2078_v52 = vld [vmem:[#allocation15 + $0x1330] sm:$0xff]  ;;  %v760_v61 = vld [vmem:[#allocation15 + $0x5a8] sm:$0xff] }
 0x154   : > { %v2246_v25 = vmul.f32 %v9303_v22, %v2101_v62  ;;  %v928_v26 = vmul.f32 %v9295_v10, %v783_v63  ;;  %7715 = vmatpush3.msra.mxu1 %v2370_v7  ;;  %v1367_v32 = vmul.f32 %v9297_v11, %v1222_v0  ;;  %v1806_v33 = vmul.f32 %v9299_v17, %v1661_v15  ;;  %v1220_v54 = vld [vmem:[#allocation15 + $0xad0] sm:$0xff]  ;;  %v1199_v4 = vld [vmem:[#allocation15 + $0xa28] sm:$0xff] }
 0x155   : > { %7790 = vmatprep.subr.mxu0 %v2391_v18  ;;  %v1951_v31 = vadd.f32 %v1807_v6, %v1512_v19  ;;  %v2369_v34 = vadd.f32 %v2225_v53, %v1930_v23  ;;  %v1490_v35 = vadd.f32 %v1346_v12, %v1051_v24  ;;  %v2245_v37 = vmul.f32 %v9303_v22, %v2100_v21  ;;  %v633_v58 = vld [vmem:[#allocation15 + $0x1d0] sm:$0xff]  ;;  %v1638_v5 = vld [vmem:[#allocation15 + $0xea8] sm:$0xff]  ;;  %v611_v24 = vld [vmem:[#allocation15 + $0x120] sm:$0xff] }
 0x156   : > { %7791 = vmatpush3.msra.mxu0 %v2391_v18  ;;  %v1072_v36 = vadd.f32 %v928_v26, %v635_v20  ;;  %v927_v45 = vmul.f32 %v9295_v10, %v782_v27  ;;  %v1366_v46 = vmul.f32 %v9297_v11, %v1221_v29  ;;  %v1805_v47 = vmul.f32 %v9299_v17, %v1660_v30  ;;  %v1659_v0 = vld [vmem:[#allocation15 + $0xf50] sm:$0xff]  ;;  %v780_v21 = vld [vmem:[#allocation15 + $0x648] sm:$0xff] }
 0x157   : > { %v2390_v44 = vadd.f32 %v2246_v25, %v1951_v31  ;;  %7716 = vmatprep.subr.mxu1 %v2369_v34  ;;  %v1929_v48 = vadd.f32 %v1785_v28, %v1490_v35  ;;  %v906_v49 = vmul.f32 %v9295_v10, %v761_v42  ;;  %v1345_v50 = vmul.f32 %v9297_v11, %v1200_v43  ;;  %v2098_v1 = vld [vmem:[#allocation15 + $0x13d0] sm:$0xff]  ;;  %v759_v28 = vld [vmem:[#allocation15 + $0x5a0] sm:$0xff]  ;;  %v1219_v30 = vld [vmem:[#allocation15 + $0xac8] sm:$0xff] }
 0x158   : > { %v1511_v53 = vadd.f32 %v1367_v32, %v1072_v36  ;;  %7717 = vmatpush3.msra.mxu1 %v2369_v34  ;;  %v1784_v55 = vmul.f32 %v9299_v17, %v1639_v51  ;;  %v2223_v56 = vmul.f32 %v9303_v22, %v2078_v52  ;;  %v1071_v57 = vadd.f32 %v927_v45, %v634_v38  ;;  %v1198_v25 = vld [vmem:[#allocation15 + $0xa20] sm:$0xff]  ;;  %v632_v42 = vld [vmem:[#allocation15 + $0x1c8] sm:$0xff]  ;;  %v758_v43 = vld [vmem:[#allocation15 + $0x598] sm:$0xff] }
 0x159   : > { %7792 = vmatprep.subr.mxu0 %v2390_v44  ;;  %v2368_v59 = vadd.f32 %v2224_v16, %v1929_v48  ;;  %v1050_v60 = vadd.f32 %v906_v49, %v613_v41  ;;  %v2244_v63 = vmul.f32 %v9303_v22, %v2099_v39  ;;  %v905_v3 = vmul.f32 %v9295_v10, %v760_v61  ;;  %v1637_v35 = vld [vmem:[#allocation15 + $0xea0] sm:$0xff]  ;;  %v2097_v48 = vld [vmem:[#allocation15 + $0x13c8] sm:$0xff]  ;;  %v1197_v49 = vld [vmem:[#allocation15 + $0xa18] sm:$0xff] }
 0x15a   : > { %7793 = vmatpush3.msra.mxu0 %v2390_v44  ;;  %v1950_v62 = vadd.f32 %v1806_v33, %v1511_v53  ;;  %v1510_v6 = vadd.f32 %v1366_v46, %v1071_v57  ;;  %v926_v7 = vmul.f32 %v9295_v10, %v781_v40  ;;  %v1365_v8 = vmul.f32 %v9297_v11, %v1220_v54  ;;  %v2076_v36 = vld [vmem:[#allocation15 + $0x1320] sm:$0xff]  ;;  %v610_v53 = vld [vmem:[#allocation15 + $0x118] sm:$0xff] }
 0x15b   : > { %7718 = vmatprep.subr.mxu1 %v2368_v59  ;;  %v1489_v9 = vadd.f32 %v1345_v50, %v1050_v60  ;;  %v1344_v12 = vmul.f32 %v9297_v11, %v1199_v4  ;;  %v1783_v13 = vmul.f32 %v9299_v17, %v1638_v5  ;;  %v1049_v16 = vadd.f32 %v905_v3, %v612_v2  ;;  %v1636_v50 = vld [vmem:[#allocation15 + $0xe98] sm:$0xff]  ;;  %v779_v54 = vld [vmem:[#allocation15 + $0x640] sm:$0xff] }
 0x15c   : > { %v2389_v15 = vadd.f32 %v2245_v37, %v1950_v62  ;;  %7719 = vmatpush3.msra.mxu1 %v2368_v59  ;;  %v2222_v18 = vmul.f32 %v9303_v22, %v2077_v14  ;;  %v1949_v19 = vadd.f32 %v1805_v47, %v1510_v6  ;;  %v904_v20 = vmul.f32 %v9295_v10, %v759_v28  ;;  %v1658_v37 = vld [vmem:[#allocation15 + $0xf48] sm:$0xff]  ;;  %v2075_v59 = vld [vmem:[#allocation15 + $0x1318] sm:$0xff]  ;;  %v1218_v60 = vld [vmem:[#allocation15 + $0xac0] sm:$0xff] }
 0x15d   : > { %v1928_v23 = vadd.f32 %v1784_v55, %v1489_v9  ;;  %v1070_v26 = vadd.f32 %v926_v7, %v633_v58  ;;  %v1804_v27 = vmul.f32 %v9299_v17, %v1659_v0  ;;  %v2243_v29 = vmul.f32 %v9303_v22, %v2098_v1  ;;  %v1657_v61 = vld [vmem:[#allocation15 + $0xf40] sm:$0xff]  ;;  %v1217_v9 = vld [vmem:[#allocation15 + $0xab8] sm:$0xff] }
 0x15e   : > { %7794 = vmatprep.subr.mxu0 %v2389_v15  ;;  %v1488_v31 = vadd.f32 %v1344_v12, %v1049_v16  ;;  %v2388_v32 = vadd.f32 %v2244_v63, %v1949_v19  ;;  %v1048_v33 = vadd.f32 %v904_v20, %v611_v24  ;;  %v1343_v34 = vmul.f32 %v9297_v11, %v1198_v25  ;;  %v631_v2 = vld [vmem:[#allocation15 + $0x1c0] sm:$0xff]  ;;  %v1656_v12 = vld [vmem:[#allocation15 + $0xf38] sm:$0xff]  ;;  %v757_v16 = vld [vmem:[#allocation15 + $0x590] sm:$0xff] }
 0x15f   : > { %7795 = vmatpush3.msra.mxu0 %v2389_v15  ;;  %v2367_v38 = vadd.f32 %v2223_v56, %v1928_v23  ;;  %v1782_v39 = vmul.f32 %v9299_v17, %v1637_v35  ;;  %v2221_v40 = vmul.f32 %v9303_v22, %v2076_v36  ;;  %v1509_v41 = vadd.f32 %v1365_v8, %v1070_v26  ;;  %v2096_v3 = vld [vmem:[#allocation15 + $0x13c0] sm:$0xff]  ;;  %v778_v8 = vld [vmem:[#allocation15 + $0x638] sm:$0xff]  ;;  %v1196_v23 = vld [vmem:[#allocation15 + $0xa10] sm:$0xff] }
 0x160   : > { %v1927_v44 = vadd.f32 %v1783_v13, %v1488_v31  ;;  %7796 = vmatprep.subr.mxu0 %v2388_v32  ;;  %v1487_v45 = vadd.f32 %v1343_v34, %v1048_v33  ;;  %v925_v46 = vmul.f32 %v9295_v10, %v780_v21  ;;  %v1364_v47 = vmul.f32 %v9297_v11, %v1219_v30  ;;  %v630_v28 = vld [vmem:[#allocation15 + $0x1b8] sm:$0xff]  ;;  %v1635_v24 = vld [vmem:[#allocation15 + $0xe90] sm:$0xff] }
 0x161   : > { %7720 = vmatprep.subr.mxu1 %v2367_v38  ;;  %7797 = vmatpush3.msra.mxu0 %v2388_v32  ;;  %v1948_v51 = vadd.f32 %v1804_v27, %v1509_v41  ;;  %v1803_v52 = vmul.f32 %v9299_v17, %v1658_v37  ;;  %v903_v58 = vmul.f32 %v9295_v10, %v758_v43  ;;  %v2095_v21 = vld [vmem:[#allocation15 + $0x13b8] sm:$0xff]  ;;  %v609_v30 = vld [vmem:[#allocation15 + $0x110] sm:$0xff] }
 0x162   : > { %7721 = vmatpush3.msra.mxu1 %v2367_v38  ;;  %v2366_v55 = vadd.f32 %v2222_v18, %v1927_v44  ;;  %v1926_v56 = vadd.f32 %v1782_v39, %v1487_v45  ;;  %v1069_v57 = vadd.f32 %v925_v46, %v632_v42  ;;  %v2242_v63 = vmul.f32 %v9303_v22, %v2097_v48  ;;  %v777_v31 = vld [vmem:[#allocation15 + $0x630] sm:$0xff]  ;;  %v776_v44 = vld [vmem:[#allocation15 + $0x628] sm:$0xff] }
 0x163   : > { %v2387_v62 = vadd.f32 %v2243_v29, %v1948_v51  ;;  %v1342_v0 = vmul.f32 %v9297_v11, %v1197_v49  ;;  %v1781_v1 = vmul.f32 %v9299_v17, %v1636_v50  ;;  %v1047_v6 = vadd.f32 %v903_v58, %v610_v53  ;;  %v2074_v36 = vld [vmem:[#allocation15 + $0x1310] sm:$0xff]  ;;  %v1215_v50 = vld [vmem:[#allocation15 + $0xaa8] sm:$0xff] }
 0x164   : > { %7722 = vmatprep.subr.mxu1 %v2366_v55  ;;  %v2365_v4 = vadd.f32 %v2221_v40, %v1926_v56  ;;  %v1508_v5 = vadd.f32 %v1364_v47, %v1069_v57  ;;  %v924_v7 = vmul.f32 %v9295_v10, %v779_v54  ;;  %v2220_v13 = vmul.f32 %v9303_v22, %v2075_v59  ;;  %v1216_v37 = vld [vmem:[#allocation15 + $0xab0] sm:$0xff]  ;;  %v1654_v51 = vld [vmem:[#allocation15 + $0xf28] sm:$0xff] }
 0x165   : > { %7723 = vmatpush3.msra.mxu1 %v2366_v55  ;;  %7798 = vmatprep.subr.mxu0 %v2387_v62  ;;  %v1363_v14 = vmul.f32 %v9297_v11, %v1218_v60  ;;  %v1802_v15 = vmul.f32 %v9299_v17, %v1657_v61  ;;  %v1486_v19 = vadd.f32 %v1342_v0, %v1047_v6  ;;  %v1655_v38 = vld [vmem:[#allocation15 + $0xf30] sm:$0xff]  ;;  %v628_v56 = vld [vmem:[#allocation15 + $0x1a8] sm:$0xff] }
 0x166   : > { %7724 = vmatprep.subr.mxu1 %v2365_v4  ;;  %7799 = vmatpush3.msra.mxu0 %v2387_v62  ;;  %v1947_v18 = vadd.f32 %v1803_v52, %v1508_v5  ;;  %v1068_v20 = vadd.f32 %v924_v7, %v631_v2  ;;  %v2241_v25 = vmul.f32 %v9303_v22, %v2096_v3  ;;  %v629_v43 = vld [vmem:[#allocation15 + $0x1b0] sm:$0xff]  ;;  %v756_v57 = vld [vmem:[#allocation15 + $0x588] sm:$0xff] }
 0x167   : > { %7725 = vmatpush3.msra.mxu1 %v2365_v4  ;;  %v923_v26 = vmul.f32 %v9295_v10, %v778_v8  ;;  %v1362_v27 = vmul.f32 %v9297_v11, %v1217_v9  ;;  %v1801_v29 = vmul.f32 %v9299_v17, %v1656_v12  ;;  %v1925_v33 = vadd.f32 %v1781_v1, %v1486_v19  ;;  %v2094_v49 = vld [vmem:[#allocation15 + $0x13b0] sm:$0xff]  ;;  %v2093_v62 = vld [vmem:[#allocation15 + $0x13a8] sm:$0xff] }
 0x168   : > { %v2386_v32 = vadd.f32 %v2242_v63, %v1947_v18  ;;  %v1507_v34 = vadd.f32 %v1363_v14, %v1068_v20  ;;  %v902_v35 = vmul.f32 %v9295_v10, %v757_v16  ;;  %v2240_v40 = vmul.f32 %v9303_v22, %v2095_v21  ;;  %v1195_v63 = vld [vmem:[#allocation15 + $0xa08] sm:$0xff]  ;;  %v1214_v14 = vld [vmem:[#allocation15 + $0xaa0] sm:$0xff] }
 0x169   : > { %v1067_v39 = vadd.f32 %v923_v26, %v630_v28  ;;  %v1341_v41 = vmul.f32 %v9297_v11, %v1196_v23  ;;  %v1780_v42 = vmul.f32 %v9299_v17, %v1635_v24  ;;  %v2364_v45 = vadd.f32 %v2220_v13, %v1925_v33  ;;  %v1634_v0 = vld [vmem:[#allocation15 + $0xe88] sm:$0xff]  ;;  %v775_v13 = vld [vmem:[#allocation15 + $0x620] sm:$0xff] }
 0x16a   : > { %7800 = vmatprep.subr.mxu0 %v2386_v32  ;;  %v1946_v46 = vadd.f32 %v1802_v15, %v1507_v34  ;;  %v1046_v47 = vadd.f32 %v902_v35, %v609_v30  ;;  %v922_v48 = vmul.f32 %v9295_v10, %v777_v31  ;;  %v2219_v53 = vmul.f32 %v9303_v22, %v2074_v36  ;;  %v608_v5 = vld [vmem:[#allocation15 + $0x108] sm:$0xff]  ;;  %v1653_v15 = vld [vmem:[#allocation15 + $0xf20] sm:$0xff]  ;;  %v1652_v34 = vld [vmem:[#allocation15 + $0xf18] sm:$0xff] }
 0x16b   : > { %7801 = vmatpush3.msra.mxu0 %v2386_v32  ;;  %v1506_v52 = vadd.f32 %v1362_v27, %v1067_v39  ;;  %v1361_v54 = vmul.f32 %v9297_v11, %v1216_v37  ;;  %v1800_v55 = vmul.f32 %v9299_v17, %v1655_v38  ;;  %7726 = vmatprep.subr.mxu1 %v2364_v45  ;;  %v2073_v6 = vld [vmem:[#allocation15 + $0x1308] sm:$0xff]  ;;  %v627_v20 = vld [vmem:[#allocation15 + $0x1a0] sm:$0xff]  ;;  %v774_v27 = vld [vmem:[#allocation15 + $0x618] sm:$0xff] }
 0x16c   : > { %v2385_v58 = vadd.f32 %v2241_v25, %v1946_v46  ;;  %v1485_v59 = vadd.f32 %v1341_v41, %v1046_v47  ;;  %v1066_v60 = vadd.f32 %v922_v48, %v629_v43  ;;  %v921_v61 = vmul.f32 %v9295_v10, %v776_v44  ;;  %7727 = vmatpush3.msra.mxu1 %v2364_v45  ;;  %v2092_v26 = vld [vmem:[#allocation15 + $0x13a0] sm:$0xff]  ;;  %v773_v35 = vld [vmem:[#allocation15 + $0x610] sm:$0xff]  ;;  %v626_v39 = vld [vmem:[#allocation15 + $0x198] sm:$0xff] }
 0x16d   : > { %v1945_v1 = vadd.f32 %v1801_v29, %v1506_v52  ;;  %v2239_v2 = vmul.f32 %v9303_v22, %v2094_v49  ;;  %v1360_v3 = vmul.f32 %v9297_v11, %v1215_v50  ;;  %v1799_v4 = vmul.f32 %v9299_v17, %v1654_v51  ;;  %v1213_v29 = vld [vmem:[#allocation15 + $0xa98] sm:$0xff]  ;;  %v1212_v41 = vld [vmem:[#allocation15 + $0xa90] sm:$0xff]  ;;  %v755_v48 = vld [vmem:[#allocation15 + $0x580] sm:$0xff] }
 0x16e   : > { %7802 = vmatprep.subr.mxu0 %v2385_v58  ;;  %v1924_v7 = vadd.f32 %v1780_v42, %v1485_v59  ;;  %v1505_v8 = vadd.f32 %v1361_v54, %v1066_v60  ;;  %v1065_v9 = vadd.f32 %v921_v61, %v628_v56  ;;  %v901_v12 = vmul.f32 %v9295_v10, %v756_v57  ;;  %v625_v46 = vld [vmem:[#allocation15 + $0x190] sm:$0xff]  ;;  %v1194_v54 = vld [vmem:[#allocation15 + $0xa00] sm:$0xff]  ;;  %v772_v61 = vld [vmem:[#allocation15 + $0x608] sm:$0xff] }
 0x16f   : > { %7803 = vmatpush3.msra.mxu0 %v2385_v58  ;;  %v2384_v28 = vadd.f32 %v2240_v40, %v1945_v1  ;;  %v2238_v16 = vmul.f32 %v9303_v22, %v2093_v62  ;;  %v1340_v18 = vmul.f32 %v9297_v11, %v1195_v63  ;;  %v1779_v19 = vmul.f32 %v9299_v17, %v1634_v0  ;;  %v2091_v40 = vld [vmem:[#allocation15 + $0x1398] sm:$0xff]  ;;  %v1651_v47 = vld [vmem:[#allocation15 + $0xf10] sm:$0xff]  ;;  %v607_v59 = vld [vmem:[#allocation15 + $0x100] sm:$0xff] }
 0x170   : > { %v2363_v21 = vadd.f32 %v2219_v53, %v1924_v7  ;;  %v1944_v23 = vadd.f32 %v1800_v55, %v1505_v8  ;;  %v1504_v24 = vadd.f32 %v1360_v3, %v1065_v9  ;;  %v1045_v25 = vadd.f32 %v901_v12, %v608_v5  ;;  %v2090_v53 = vld [vmem:[#allocation15 + $0x1390] sm:$0xff]  ;;  %v1633_v60 = vld [vmem:[#allocation15 + $0xe80] sm:$0xff]  ;;  %v1211_v3 = vld [vmem:[#allocation15 + $0xa88] sm:$0xff] }
 0x171   : > { %7804 = vmatprep.subr.mxu0 %v2384_v28  ;;  %v2218_v30 = vmul.f32 %v9303_v22, %v2073_v6  ;;  %v920_v31 = vmul.f32 %v9295_v10, %v775_v13  ;;  %v1359_v32 = vmul.f32 %v9297_v11, %v1214_v14  ;;  %v1798_v33 = vmul.f32 %v9299_v17, %v1653_v15  ;;  %v624_v8 = vld [vmem:[#allocation15 + $0x188] sm:$0xff] }
 0x172   : > { %7805 = vmatpush3.msra.mxu0 %v2384_v28  ;;  %7728 = vmatprep.subr.mxu1 %v2363_v21  ;;  %v2383_v36 = vadd.f32 %v2239_v2, %v1944_v23  ;;  %v1943_v37 = vadd.f32 %v1799_v4, %v1504_v24  ;;  %v1484_v38 = vadd.f32 %v1340_v18, %v1045_v25  ;;  %v2072_v2 = vld [vmem:[#allocation15 + $0x1300] sm:$0xff]  ;;  %v1650_v9 = vld [vmem:[#allocation15 + $0xf08] sm:$0xff] }
 0x173   : > { %7729 = vmatpush3.msra.mxu1 %v2363_v21  ;;  %v1064_v42 = vadd.f32 %v920_v31, %v627_v20  ;;  %v2237_v43 = vmul.f32 %v9303_v22, %v2092_v26  ;;  %v919_v44 = vmul.f32 %v9295_v10, %v774_v27  ;;  %v1358_v45 = vmul.f32 %v9297_v11, %v1213_v29  ;;  %v771_v28 = vld [vmem:[#allocation15 + $0x600] sm:$0xff]  ;;  %v2089_v23 = vld [vmem:[#allocation15 + $0x1388] sm:$0xff]  ;;  %v802_v31 = vld [vmem:[#allocation15 + $0x6f8] sm:$0xff] }
 0x174   : > { %7806 = vmatprep.subr.mxu0 %v2383_v36  ;;  %v2382_v49 = vadd.f32 %v2238_v16, %v1943_v37  ;;  %v1923_v50 = vadd.f32 %v1779_v19, %v1484_v38  ;;  %v1797_v51 = vmul.f32 %v9299_v17, %v1652_v34  ;;  %v918_v52 = vmul.f32 %v9295_v10, %v773_v35  ;;  %v1210_v16 = vld [vmem:[#allocation15 + $0xa80] sm:$0xff] }
 0x175   : > { %7807 = vmatpush3.msra.mxu0 %v2383_v36  ;;  %v1503_v55 = vadd.f32 %v1359_v32, %v1064_v42  ;;  %v1063_v56 = vadd.f32 %v919_v44, %v626_v39  ;;  %v2236_v57 = vmul.f32 %v9303_v22, %v2091_v40  ;;  %v1357_v58 = vmul.f32 %v9297_v11, %v1212_v41  ;;  %v623_v24 = vld [vmem:[#allocation15 + $0x180] sm:$0xff]  ;;  %v1241_v32 = vld [vmem:[#allocation15 + $0xb78] sm:$0xff] }
 0x176   : > { %7808 = vmatprep.subr.mxu0 %v2382_v49  ;;  %v2362_v62 = vadd.f32 %v2218_v30, %v1923_v50  ;;  %v1062_v63 = vadd.f32 %v918_v52, %v625_v46  ;;  %v1796_v0 = vmul.f32 %v9299_v17, %v1651_v47  ;;  %v900_v1 = vmul.f32 %v9295_v10, %v755_v48  ;;  %v1649_v30 = vld [vmem:[#allocation15 + $0xf00] sm:$0xff]  ;;  %v654_v41 = vld [vmem:[#allocation15 + $0x278] sm:$0xff] }
 0x177   : > { %7809 = vmatpush3.msra.mxu0 %v2382_v49  ;;  %v1942_v4 = vadd.f32 %v1798_v33, %v1503_v55  ;;  %v1502_v5 = vadd.f32 %v1358_v45, %v1063_v56  ;;  %v2235_v6 = vmul.f32 %v9303_v22, %v2090_v53  ;;  %v1339_v7 = vmul.f32 %v9297_v11, %v1194_v54  ;;  %v2088_v40 = vld [vmem:[#allocation15 + $0x1380] sm:$0xff]  ;;  %v1680_v42 = vld [vmem:[#allocation15 + $0xff8] sm:$0xff] }
 0x178   : > { %7730 = vmatprep.subr.mxu1 %v2362_v62  ;;  %v1501_v12 = vadd.f32 %v1357_v58, %v1062_v63  ;;  %v1044_v13 = vadd.f32 %v900_v1, %v607_v59  ;;  %v1778_v14 = vmul.f32 %v9299_v17, %v1633_v60  ;;  %v917_v15 = vmul.f32 %v9295_v10, %v772_v61  ;;  %v2119_v49 = vld [vmem:[#allocation15 + $0x1478] sm:$0xff] }
 0x179   : > { %v2381_v18 = vadd.f32 %v2237_v43, %v1942_v4  ;;  %7731 = vmatpush3.msra.mxu1 %v2362_v62  ;;  %v1941_v19 = vadd.f32 %v1797_v51, %v1502_v5  ;;  %v2217_v20 = vmul.f32 %v9303_v22, %v2072_v2  ;;  %v1356_v21 = vmul.f32 %v9297_v11, %v1211_v3  ;;  %v818_v61 = vld [vmem:[#allocation15 + $0x778] sm:$0xff] }
 0x17a   : > { %v1940_v25 = vadd.f32 %v1796_v0, %v1501_v12  ;;  %v1483_v26 = vadd.f32 %v1339_v7, %v1044_v13  ;;  %v1061_v27 = vadd.f32 %v917_v15, %v624_v8  ;;  %v1795_v29 = vmul.f32 %v9299_v17, %v1650_v9  ;;  %v670_v63 = vld [vmem:[#allocation15 + $0x2f8] sm:$0xff] }
 0x17b   : > { %7810 = vmatprep.subr.mxu0 %v2381_v18  ;;  %v2380_v33 = vadd.f32 %v2236_v57, %v1941_v19  ;;  %v916_v34 = vmul.f32 %v9295_v10, %v771_v28  ;;  %v1355_v35 = vmul.f32 %v9297_v11, %v1210_v16  ;;  %v2234_v39 = vmul.f32 %v9303_v22, %v2089_v23  ;;  %v1257_v0 = vld [vmem:[#allocation15 + $0xbf8] sm:$0xff] }
 0x17c   : > { %7811 = vmatpush3.msra.mxu0 %v2381_v18  ;;  %v2379_v36 = vadd.f32 %v2235_v6, %v1940_v25  ;;  %v1922_v37 = vadd.f32 %v1778_v14, %v1483_v26  ;;  %v1500_v38 = vadd.f32 %v1356_v21, %v1061_v27  ;;  %v1794_v44 = vmul.f32 %v9299_v17, %v1649_v30  ;;  %v1696_v3 = vld [vmem:[#allocation15 + $0x1078] sm:$0xff] }
 0x17d   : > { %7812 = vmatprep.subr.mxu0 %v2380_v33  ;;  %v1060_v43 = vadd.f32 %v916_v34, %v623_v24  ;;  %v947_v45 = vmul.f32 %v9295_v10, %v802_v31  ;;  %v1386_v46 = vmul.f32 %v9297_v11, %v1241_v32  ;;  %v2233_v51 = vmul.f32 %v9303_v22, %v2088_v40  ;;  %v2135_v6 = vld [vmem:[#allocation15 + $0x14f8] sm:$0xff] }
 0x17e   : > { %7813 = vmatpush3.msra.mxu0 %v2380_v33  ;;  %v2361_v47 = vadd.f32 %v2217_v20, %v1922_v37  ;;  %v1939_v48 = vadd.f32 %v1795_v29, %v1500_v38  ;;  %v1825_v53 = vmul.f32 %v9299_v17, %v1680_v42  ;;  %v2264_v57 = vmul.f32 %v9303_v22, %v2119_v49  ;;  %v9658_v12 = vld [vmem:[#allocation12] ss:$0 sm:$0xff]  ;;  %v9661_v14 = vld [vmem:[#allocation13] ss:$0 sm:$0xff] }
 0x17f   : > { %7814 = vmatprep.subr.mxu0 %v2379_v36  ;;  %v1499_v50 = vadd.f32 %v1355_v35, %v1060_v43  ;;  %v1091_v52 = vadd.f32 %v947_v45, %v654_v41  ;;  %v963_v62 = vmul.f32 %v9295_v10, %v818_v61  ;;  %v1402_v2 = vmul.f32 %v9297_v11, %v1257_v0 }
 0x180   : > { %7732 = vmatprep.subr.mxu1 %v2361_v47  ;;  %7815 = vmatpush3.msra.mxu0 %v2379_v36  ;;  %v2378_v54 = vadd.f32 %v2234_v39, %v1939_v48  ;;  %v1841_v5 = vmul.f32 %v9299_v17, %v1696_v3  ;;  %v2280_v8 = vmul.f32 %v9303_v22, %v2135_v6 }
 0x181   : > { %7733 = vmatpush3.msra.mxu1 %v2361_v47  ;;  %v1938_v55 = vadd.f32 %v1794_v44, %v1499_v50  ;;  %v1530_v56 = vadd.f32 %v1386_v46, %v1091_v52  ;;  %v1107_v1 = vadd.f32 %v963_v62, %v670_v63 }
 0x182   : > { %7816 = vmatprep.subr.mxu0 %v2378_v54 }
 0x183   : > { %7817 = vmatpush3.msra.mxu0 %v2378_v54  ;;  %v2377_v58 = vadd.f32 %v2233_v51, %v1938_v55  ;;  %v1969_v59 = vadd.f32 %v1825_v53, %v1530_v56  ;;  %v1546_v4 = vadd.f32 %v1402_v2, %v1107_v1 }
 0x185   : > { %7818 = vmatprep.subr.mxu0 %v2377_v58  ;;  %v9649_v60 = vadd.f32 %v2264_v57, %v1969_v59  ;;  %v1985_v7 = vadd.f32 %v1841_v5, %v1546_v4 }
 0x186   : > { %7819 = vmatpush3.msra.mxu0 %v2377_v58 }
 0x187   : > { %7874 = vmatprep.subr.mxu1 %v9649_v60  ;;  %v9656_v9 = vadd.f32 %v2280_v8, %v1985_v7 }
 0x189   : > { %7960 = vmatprep.subr.mxu0 %v9656_v9 }
 0x1b7   : > { %v7484_v13 = vpop.f32.mrf.mxu0 }
 0x1b8   : > { %v2905_v15 = vmul.f32 %v7484_v13, %v9658_v12 }
 0x1b9   : > { %v2738_v28 = vpop.f32.mrf.mxu0 }
 0x1ba   : > { %v2944_v16 = vadd.f32 %v9661_v14, %v2905_v15  ;;  %v2904_v18 = vmul.f32 %v9658_v12, %v2738_v28 }
 0x1bb   : > { %v7487_v19 = vpop.f32.mrf.mxu0 }
 0x1bc   : > { %v2976_v20 = vmax.f32 %v2944_v16, 0.0  ;;  %v2943_v21 = vadd.f32 %v9661_v14, %v2904_v18  ;;  %v2907_v23 = vmul.f32 %v7487_v19, %v9658_v12 }
 0x1bd   : > { %v2748_v24 = vpop.f32.mrf.mxu0 }
 0x1be   : > { %3050 = vst [vmem:[#allocation2 + $0x1b] sm:$0xff] %v2976_v20  ;;  %v2975_v25 = vmax.f32 %v2943_v21, 0.0  ;;  %v2946_v26 = vadd.f32 %v9661_v14, %v2907_v23  ;;  %v2906_v27 = vmul.f32 %v9658_v12, %v2748_v24 }
 0x1bf   : > { %v7490_v29 = vpop.f32.mrf.mxu0 }
 0x1c0   : > { %3049 = vst [vmem:[#allocation2 + $0x13] sm:$0xff] %v2975_v25  ;;  %v2978_v30 = vmax.f32 %v2946_v26, 0.0  ;;  %v2945_v31 = vadd.f32 %v9661_v14, %v2906_v27  ;;  %v2909_v32 = vmul.f32 %v7490_v29, %v9658_v12 }
 0x1c1   : > { %v2758_v33 = vpop.f32.mrf.mxu0 }
 0x1c2   : > { %3052 = vst [vmem:[#allocation2 + $0x2d] sm:$0xff] %v2978_v30  ;;  %v2977_v34 = vmax.f32 %v2945_v31, 0.0  ;;  %v2948_v35 = vadd.f32 %v9661_v14, %v2909_v32  ;;  %v2908_v36 = vmul.f32 %v9658_v12, %v2758_v33 }
 0x1c3   : > { %v7493_v37 = vpop.f32.mrf.mxu0 }
 0x1c4   : > { %3051 = vst [vmem:[#allocation2 + $0x25] sm:$0xff] %v2977_v34  ;;  %v2980_v38 = vmax.f32 %v2948_v35, 0.0  ;;  %v2947_v39 = vadd.f32 %v9661_v14, %v2908_v36  ;;  %v2911_v40 = vmul.f32 %v7493_v37, %v9658_v12 }
 0x1c5   : > { %v2768_v41 = vpop.f32.mrf.mxu0 }
 0x1c6   : > { %3054 = vst [vmem:[#allocation2 + $0x3f] sm:$0xff] %v2980_v38  ;;  %v2979_v42 = vmax.f32 %v2947_v39, 0.0  ;;  %v9677_v43 = vadd.f32 %v9661_v14, %v2911_v40  ;;  %v2910_v44 = vmul.f32 %v9658_v12, %v2768_v41 }
 0x1c7   : > { %v7496_v45 = vpop.f32.mrf.mxu0  ;;  %v3135_v46 = vld [vmem:[#allocation2 + $0x11] sm:$0xff]  ;;  %v3136_v48 = vld [vmem:[#allocation2 + $0x19] sm:$0xff] }
 0x1c8   : > { %v3083_v47 = vld [vmem:[#allocation2 + $0x10] sm:$0xff]  ;;  %3053 = vst [vmem:[#allocation2 + $0x37] sm:$0xff] %v2979_v42  ;;  %v2982_v49 = vmax.f32 %v9677_v43, 0.0  ;;  %v2949_v50 = vadd.f32 %v9661_v14, %v2910_v44  ;;  %v2913_v51 = vmul.f32 %v7496_v45, %v9658_v12  ;;  %7565 = vmatprep.mubr.f32.mxu1 %v3135_v46  ;;  %v3084_v52 = vld [vmem:[#allocation2 + $0x18] sm:$0xff]  ;;  %v801_v44 = vld [vmem:[#allocation15 + $0x6f0] sm:$0xff] }
 0x1c9   : > { %7651 = vmatprep.mubr.f32.mxu0 %v3083_v47  ;;  %v2778_v53 = vpop.f32.mrf.mxu0  ;;  %7566 = vmatmul.mubr.f32.gmra.mxu1 %v3136_v48 }
 0x1ca   : > { %7652 = vmatmul.mubr.f32.gmra.mxu0 %v3084_v52  ;;  %3056 = vst [vmem:[#allocation2 + $0x51] sm:$0xff] %v2982_v49  ;;  %v2981_v54 = vmax.f32 %v2949_v50, 0.0  ;;  %v2952_v55 = vadd.f32 %v9661_v14, %v2913_v51  ;;  %v2912_v56 = vmul.f32 %v9658_v12, %v2778_v53  ;;  %v946_v53 = vmul.f32 %v9295_v10, %v801_v44  ;;  %v2117_v44 = vld [vmem:[#allocation15 + $0x1468] sm:$0xff] }
 0x1cb   : > { %v7499_v57 = vpop.f32.mrf.mxu0  ;;  %v3137_v58 = vld [vmem:[#allocation2 + $0x21] sm:$0xff]  ;;  %v3138_v61 = vld [vmem:[#allocation2 + $0x29] sm:$0xff] }
 0x1cc   : > { %v3085_v59 = vld [vmem:[#allocation2 + $0x20] sm:$0xff]  ;;  %3055 = vst [vmem:[#allocation2 + $0x49] sm:$0xff] %v2981_v54  ;;  %v2984_v62 = vmax.f32 %v2952_v55, 0.0  ;;  %v2951_v63 = vadd.f32 %v9661_v14, %v2912_v56  ;;  %v2915_v0 = vmul.f32 %v7499_v57, %v9658_v12  ;;  %7568 = vmatprep.mubr.f32.mxu1 %v3137_v58  ;;  %v3086_v1 = vld [vmem:[#allocation2 + $0x28] sm:$0xff] }
 0x1cd   : > { %7654 = vmatprep.mubr.f32.mxu0 %v3085_v59  ;;  %v2788_v2 = vpop.f32.mrf.mxu0  ;;  %7569 = vmatmul.mubr.f32.gmra.mxu1 %v3138_v61  ;;  %v3141_v20 = vld [vmem:[#allocation2 + $0x41] sm:$0xff] }
 0x1ce   : > { %7655 = vmatmul.mubr.f32.gmra.mxu0 %v3086_v1  ;;  %3058 = vst [vmem:[#allocation2 + $0x63] sm:$0xff] %v2984_v62  ;;  %v2983_v3 = vmax.f32 %v2951_v63, 0.0  ;;  %v2954_v4 = vadd.f32 %v9661_v14, %v2915_v0  ;;  %v2914_v5 = vmul.f32 %v9658_v12, %v2788_v2  ;;  %v3089_v21 = vld [vmem:[#allocation2 + $0x40] sm:$0xff] }
 0x1cf   : > { %v7502_v6 = vpop.f32.mrf.mxu0  ;;  %v3139_v7 = vld [vmem:[#allocation2 + $0x31] sm:$0xff]  ;;  %v3140_v13 = vld [vmem:[#allocation2 + $0x39] sm:$0xff]  ;;  %v653_v57 = vld [vmem:[#allocation15 + $0x270] sm:$0xff] }
 0x1d0   : > { %v3087_v8 = vld [vmem:[#allocation2 + $0x30] sm:$0xff]  ;;  %3057 = vst [vmem:[#allocation2 + $0x5b] sm:$0xff] %v2983_v3  ;;  %v2986_v15 = vmax.f32 %v2954_v4, 0.0  ;;  %v2953_v28 = vadd.f32 %v9661_v14, %v2914_v5  ;;  %v2917_v16 = vmul.f32 %v7502_v6, %v9658_v12  ;;  %7571 = vmatprep.mubr.f32.mxu1 %v3139_v7  ;;  %v3088_v18 = vld [vmem:[#allocation2 + $0x38] sm:$0xff]  ;;  %v1240_v58 = vld [vmem:[#allocation15 + $0xb70] sm:$0xff]  ;;  %v1090_v7 = vadd.f32 %v946_v53, %v653_v57 }
 0x1d1   : > { %7657 = vmatprep.mubr.f32.mxu0 %v3087_v8  ;;  %v2798_v19 = vpop.f32.mrf.mxu0  ;;  %7572 = vmatmul.mubr.f32.gmra.mxu1 %v3140_v13  ;;  %v800_v2 = vld [vmem:[#allocation15 + $0x6e8] sm:$0xff]  ;;  %v799_v3 = vld [vmem:[#allocation15 + $0x6e0] sm:$0xff]  ;;  %v1385_v8 = vmul.f32 %v9297_v11, %v1240_v58 }
 0x1d2   : > { %7658 = vmatmul.mubr.f32.gmra.mxu0 %v3088_v18  ;;  %3060 = vst [vmem:[#allocation2 + $0x75] sm:$0xff] %v2986_v15  ;;  %v2985_v23 = vmax.f32 %v2953_v28, 0.0  ;;  %v2956_v24 = vadd.f32 %v9661_v14, %v2917_v16  ;;  %v2916_v25 = vmul.f32 %v9658_v12, %v2798_v19  ;;  %7574 = vmatprep.mubr.f32.mxu1 %v3141_v20  ;;  %v1679_v16 = vld [vmem:[#allocation15 + $0xff0] sm:$0xff]  ;;  %v1239_v18 = vld [vmem:[#allocation15 + $0xb68] sm:$0xff] }
 0x1d3   : > { %7660 = vmatprep.mubr.f32.mxu0 %v3089_v21  ;;  %v7505_v26 = vpop.f32.mrf.mxu0  ;;  %v3090_v27 = vld [vmem:[#allocation2 + $0x48] sm:$0xff]  ;;  %v3091_v33 = vld [vmem:[#allocation2 + $0x50] sm:$0xff] }
 0x1d4   : > { %3059 = vst [vmem:[#allocation2 + $0x6d] sm:$0xff] %v2985_v23  ;;  %v2988_v29 = vmax.f32 %v2956_v24, 0.0  ;;  %v2955_v30 = vadd.f32 %v9661_v14, %v2916_v25  ;;  %v2919_v31 = vmul.f32 %v7505_v26, %v9658_v12  ;;  %v2118_v23 = vld [vmem:[#allocation15 + $0x1470] sm:$0xff]  ;;  %v945_v24 = vmul.f32 %v9295_v10, %v800_v2  ;;  %v798_v26 = vld [vmem:[#allocation15 + $0x6d8] sm:$0xff] }
 0x1d5   : > { %v2808_v32 = vpop.f32.mrf.mxu0  ;;  %7575 = vmatmul.mubr.f32.gmra.mxu1 %v2981_v54  ;;  %v944_v25 = vmul.f32 %v9295_v10, %v799_v3  ;;  %v9742_v3 = vmul.f32 %v9303_v22, %v2117_v44 }
 0x1d6   : > { %7661 = vmatmul.mubr.f32.gmra.mxu0 %v3090_v27  ;;  %3062 = vst [vmem:[#allocation2 + $0x87] sm:$0xff] %v2988_v29  ;;  %v2987_v34 = vmax.f32 %v2955_v30, 0.0  ;;  %v9698_v35 = vadd.f32 %v9661_v14, %v2919_v31  ;;  %v2918_v36 = vmul.f32 %v9658_v12, %v2808_v32  ;;  %7577 = vmatprep.mubr.f32.mxu1 %v2982_v49  ;;  %v652_v31 = vld [vmem:[#allocation15 + $0x268] sm:$0xff]  ;;  %v651_v32 = vld [vmem:[#allocation15 + $0x260] sm:$0xff] }
 0x1d7   : > { %7663 = vmatprep.mubr.f32.mxu0 %v3091_v33  ;;  %v7508_v37 = vpop.f32.mrf.mxu0  ;;  %v3144_v38 = vld [vmem:[#allocation2 + $0x59] sm:$0xff]  ;;  %v3145_v46 = vld [vmem:[#allocation2 + $0x61] sm:$0xff]  ;;  %v1089_v53 = vadd.f32 %v945_v24, %v652_v31 }
 0x1d8   : > { %v3092_v39 = vld [vmem:[#allocation2 + $0x58] sm:$0xff]  ;;  %3061 = vst [vmem:[#allocation2 + $0x7f] sm:$0xff] %v2987_v34  ;;  %v2990_v40 = vmax.f32 %v9698_v35, 0.0  ;;  %v9705_v41 = vadd.f32 %v9661_v14, %v2918_v36  ;;  %v2921_v42 = vmul.f32 %v7508_v37, %v9658_v12  ;;  %v3093_v47 = vld [vmem:[#allocation2 + $0x60] sm:$0xff]  ;;  %v1529_v37 = vadd.f32 %v1385_v8, %v1090_v7 }
 0x1d9   : > { %v2818_v45 = vpop.f32.mrf.mxu0  ;;  %7578 = vmatmul.mubr.f32.gmra.mxu1 %v3144_v38  ;;  %v1238_v33 = vld [vmem:[#allocation15 + $0xb60] sm:$0xff]  ;;  %v1824_v38 = vmul.f32 %v9299_v17, %v1679_v16 }
 0x1da   : > { %7664 = vmatmul.mubr.f32.gmra.mxu0 %v3092_v39  ;;  %3064 = vst [vmem:[#allocation2 + $0x99] sm:$0xff] %v2990_v40  ;;  %v2989_v43 = vmax.f32 %v9705_v41, 0.0  ;;  %v2960_v48 = vadd.f32 %v9661_v14, %v2921_v42  ;;  %v2920_v49 = vmul.f32 %v9658_v12, %v2818_v45  ;;  %7580 = vmatprep.mubr.f32.mxu1 %v3145_v46  ;;  %v1678_v42 = vld [vmem:[#allocation15 + $0xfe8] sm:$0xff] }
 0x1db   : > { %7666 = vmatprep.mubr.f32.mxu0 %v3093_v47  ;;  %v7511_v50 = vpop.f32.mrf.mxu0  ;;  %v3146_v51 = vld [vmem:[#allocation2 + $0x69] sm:$0xff]  ;;  %v3147_v61 = vld [vmem:[#allocation2 + $0x71] sm:$0xff]  ;;  %v1384_v39 = vmul.f32 %v9297_v11, %v1239_v18  ;;  %v1823_v2 = vmul.f32 %v9299_v17, %v1678_v42 }
 0x1dc   : > { %v3094_v52 = vld [vmem:[#allocation2 + $0x68] sm:$0xff]  ;;  %3063 = vst [vmem:[#allocation2 + $0x91] sm:$0xff] %v2989_v43  ;;  %v2992_v54 = vmax.f32 %v2960_v48, 0.0  ;;  %v2959_v55 = vadd.f32 %v9661_v14, %v2920_v49  ;;  %v2923_v56 = vmul.f32 %v7511_v50, %v9658_v12  ;;  %v3095_v62 = vld [vmem:[#allocation2 + $0x70] sm:$0xff]  ;;  %v943_v50 = vmul.f32 %v9295_v10, %v798_v26 }
 0x1dd   : > { %v2828_v59 = vpop.f32.mrf.mxu0  ;;  %7581 = vmatmul.mubr.f32.gmra.mxu1 %v3146_v51  ;;  %v3150_v48 = vld [vmem:[#allocation2 + $0x89] sm:$0xff] }
 0x1de   : > { %7667 = vmatmul.mubr.f32.gmra.mxu0 %v3094_v52  ;;  %3066 = vst [vmem:[#allocation2 + $0xab] sm:$0xff] %v2992_v54  ;;  %v2991_v63 = vmax.f32 %v2959_v55, 0.0  ;;  %v2962_v0 = vadd.f32 %v9661_v14, %v2923_v56  ;;  %v2922_v1 = vmul.f32 %v9658_v12, %v2828_v59  ;;  %7583 = vmatprep.mubr.f32.mxu1 %v3147_v61  ;;  %v3098_v49 = vld [vmem:[#allocation2 + $0x88] sm:$0xff] }
 0x1df   : > { %7669 = vmatprep.mubr.f32.mxu0 %v3095_v62  ;;  %v7514_v4 = vpop.f32.mrf.mxu0  ;;  %v3148_v5 = vld [vmem:[#allocation2 + $0x79] sm:$0xff]  ;;  %v3149_v20 = vld [vmem:[#allocation2 + $0x81] sm:$0xff]  ;;  %v1237_v51 = vld [vmem:[#allocation15 + $0xb58] sm:$0xff]  ;;  %v1088_v54 = vadd.f32 %v944_v25, %v651_v32  ;;  %v1383_v55 = vmul.f32 %v9297_v11, %v1238_v33  ;;  %v2263_v61 = vmul.f32 %v9303_v22, %v2118_v23 }
 0x1e0   : > { %v3096_v6 = vld [vmem:[#allocation2 + $0x78] sm:$0xff]  ;;  %3065 = vst [vmem:[#allocation2 + $0xa3] sm:$0xff] %v2991_v63  ;;  %v2994_v13 = vmax.f32 %v2962_v0, 0.0  ;;  %v2961_v15 = vadd.f32 %v9661_v14, %v2922_v1  ;;  %v2925_v28 = vmul.f32 %v7514_v4, %v9658_v12  ;;  %v3097_v21 = vld [vmem:[#allocation2 + $0x80] sm:$0xff]  ;;  %v650_v56 = vld [vmem:[#allocation15 + $0x258] sm:$0xff]  ;;  %v1968_v1 = vadd.f32 %v1824_v38, %v1529_v37 }
 0x1e1   : > { %v2838_v19 = vpop.f32.mrf.mxu0  ;;  %7584 = vmatmul.mubr.f32.gmra.mxu1 %v3148_v5  ;;  %v1677_v62 = vld [vmem:[#allocation15 + $0xfe0] sm:$0xff]  ;;  %v1382_v5 = vmul.f32 %v9297_v11, %v1237_v51  ;;  %v649_v26 = vld [vmem:[#allocation15 + $0x250] sm:$0xff] }
 0x1e2   : > { %7670 = vmatmul.mubr.f32.gmra.mxu0 %v3096_v6  ;;  %3068 = vst [vmem:[#allocation2 + $0xbd] sm:$0xff] %v2994_v13  ;;  %v2993_v27 = vmax.f32 %v2961_v15, 0.0  ;;  %v2964_v29 = vadd.f32 %v9661_v14, %v2925_v28  ;;  %v2924_v30 = vmul.f32 %v9658_v12, %v2838_v19  ;;  %7586 = vmatprep.mubr.f32.mxu1 %v3149_v20  ;;  %v2116_v4 = vld [vmem:[#allocation15 + $0x1460] sm:$0xff]  ;;  %v1676_v6 = vld [vmem:[#allocation15 + $0xfd8] sm:$0xff]  ;;  %v797_v15 = vld [vmem:[#allocation15 + $0x6d0] sm:$0xff] }
 0x1e3   : > { %7672 = vmatprep.mubr.f32.mxu0 %v3097_v21  ;;  %v7517_v34 = vpop.f32.mrf.mxu0  ;;  %v3099_v36 = vld [vmem:[#allocation2 + $0x90] sm:$0xff]  ;;  %v3100_v8 = vld [vmem:[#allocation2 + $0x98] sm:$0xff]  ;;  %v1087_v13 = vadd.f32 %v943_v50, %v650_v56  ;;  %v1528_v19 = vadd.f32 %v1384_v39, %v1089_v53  ;;  %v1527_v20 = vadd.f32 %v1383_v55, %v1088_v54  ;;  %v1822_v21 = vmul.f32 %v9299_v17, %v1677_v62  ;;  %v1236_v32 = vld [vmem:[#allocation15 + $0xb50] sm:$0xff] }
 0x1e4   : > { %3067 = vst [vmem:[#allocation2 + $0xb5] sm:$0xff] %v2993_v27  ;;  %v2996_v45 = vmax.f32 %v2964_v29, 0.0  ;;  %v2963_v46 = vadd.f32 %v9661_v14, %v2924_v30  ;;  %v2927_v47 = vmul.f32 %v7517_v34, %v9658_v12  ;;  %v796_v28 = vld [vmem:[#allocation15 + $0x6c8] sm:$0xff]  ;;  %v2261_v35 = vmul.f32 %v9303_v22, %v2116_v4  ;;  %v1675_v33 = vld [vmem:[#allocation15 + $0xfd0] sm:$0xff] }
 0x1e5   : > { %v2848_v52 = vpop.f32.mrf.mxu0  ;;  %7587 = vmatmul.mubr.f32.gmra.mxu1 %v3150_v48  ;;  %v9759_v29 = vadd.f32 %v2263_v61, %v1968_v1  ;;  %v1821_v30 = vmul.f32 %v9299_v17, %v1676_v6  ;;  %v942_v31 = vmul.f32 %v9295_v10, %v797_v15  ;;  %v648_v34 = vld [vmem:[#allocation15 + $0x248] sm:$0xff]  ;;  %v1967_v50 = vadd.f32 %v1823_v2, %v1528_v19  ;;  %v795_v2 = vld [vmem:[#allocation15 + $0x6c0] sm:$0xff] }
 0x1e6   : > { %7673 = vmatmul.mubr.f32.gmra.mxu0 %v3098_v49  ;;  %3070 = vst [vmem:[#allocation2 + $0xcf] sm:$0xff] %v2996_v45  ;;  %v2995_v57 = vmax.f32 %v2963_v46, 0.0  ;;  %v9734_v58 = vadd.f32 %v9661_v14, %v2927_v47  ;;  %v2926_v59 = vmul.f32 %v9658_v12, %v2848_v52  ;;  %7589 = vmatprep.mubr.f32.mxu1 %v2989_v43  ;;  %v1235_v46 = vld [vmem:[#allocation15 + $0xb48] sm:$0xff] }
 0x1e7   : > { %7675 = vmatprep.mubr.f32.mxu0 %v3099_v36  ;;  %v7520_v63 = vpop.f32.mrf.mxu0  ;;  %v3153_v0 = vld [vmem:[#allocation2 + $0xa1] sm:$0xff]  ;;  %v941_v36 = vmul.f32 %v9295_v10, %v796_v28  ;;  %v3154_v42 = vld [vmem:[#allocation2 + $0xa9] sm:$0xff]  ;;  %v1526_v45 = vadd.f32 %v1382_v5, %v1087_v13  ;;  %v1966_v51 = vadd.f32 %v1822_v21, %v1527_v20  ;;  %v1381_v56 = vmul.f32 %v9297_v11, %v1236_v32 }
 0x1e8   : > { %3069 = vst [vmem:[#allocation2 + $0xc7] sm:$0xff] %v2995_v57  ;;  %v2998_v41 = vmax.f32 %v9734_v58, 0.0  ;;  %v9747_v43 = vadd.f32 %v9661_v14, %v2926_v59  ;;  %v2929_v7 = vmul.f32 %v7520_v63, %v9658_v12  ;;  %v3101_v18 = vld [vmem:[#allocation2 + $0xa0] sm:$0xff]  ;;  %v3102_v44 = vld [vmem:[#allocation2 + $0xa8] sm:$0xff]  ;;  %v1086_v61 = vadd.f32 %v942_v31, %v649_v26 }
 0x1e9   : > { %v2858_v16 = vpop.f32.mrf.mxu0  ;;  %7590 = vmatmul.mubr.f32.gmra.mxu1 %v2990_v40  ;;  %v2115_v40 = vld [vmem:[#allocation15 + $0x1458] sm:$0xff]  ;;  %v2114_v57 = vld [vmem:[#allocation15 + $0x1450] sm:$0xff]  ;;  %v9773_v62 = vmul.f32 %v9299_v17, %v1675_v33  ;;  %v1085_v63 = vadd.f32 %v941_v36, %v648_v34  ;;  %v1674_v1 = vld [vmem:[#allocation15 + $0xfc8] sm:$0xff]  ;;  %v1965_v13 = vadd.f32 %v1821_v30, %v1526_v45  ;;  %v9779_v19 = vadd.f32 %v9742_v3, %v1967_v50 }
 0x1ea   : > { %7676 = vmatmul.mubr.f32.gmra.mxu0 %v3100_v8  ;;  %3072 = vst [vmem:[#allocation2 + $0xe1] sm:$0xff] %v2998_v41  ;;  %v2997_v23 = vmax.f32 %v9747_v43, 0.0  ;;  %v2968_v24 = vadd.f32 %v9661_v14, %v2929_v7  ;;  %v2928_v25 = vmul.f32 %v9658_v12, %v2858_v16  ;;  %7592 = vmatprep.mubr.f32.mxu1 %v3153_v0  ;;  %v2113_v15 = vld [vmem:[#allocation15 + $0x1448] sm:$0xff]  ;;  %v794_v30 = vld [vmem:[#allocation15 + $0x6b8] sm:$0xff]  ;;  %v817_v31 = vld [vmem:[#allocation15 + $0x770] sm:$0xff] }
 0x1eb   : > { %7678 = vmatprep.mubr.f32.mxu0 %v3101_v18  ;;  %v7523_v27 = vpop.f32.mrf.mxu0  ;;  %v3155_v48 = vld [vmem:[#allocation2 + $0xb1] sm:$0xff]  ;;  %v2260_v52 = vmul.f32 %v9303_v22, %v2115_v40  ;;  %v1380_v0 = vmul.f32 %v9297_v11, %v1235_v46  ;;  %v3156_v7 = vld [vmem:[#allocation2 + $0xb9] sm:$0xff]  ;;  %v9781_v20 = vadd.f32 %v2261_v35, %v1966_v51  ;;  %v9784_v21 = vmul.f32 %v9303_v22, %v2114_v57  ;;  %v1695_v43 = vld [vmem:[#allocation15 + $0x1070] sm:$0xff] }
 0x1ec   : > { %3071 = vst [vmem:[#allocation2 + $0xd9] sm:$0xff] %v2997_v23  ;;  %v3000_v37 = vmax.f32 %v2968_v24, 0.0  ;;  %v2967_v38 = vadd.f32 %v9661_v14, %v2928_v25  ;;  %v2931_v39 = vmul.f32 %v7523_v27, %v9658_v12  ;;  %v3103_v49 = vld [vmem:[#allocation2 + $0xb0] sm:$0xff]  ;;  %v3104_v8 = vld [vmem:[#allocation2 + $0xb8] sm:$0xff]  ;;  %v940_v26 = vmul.f32 %v9295_v10, %v795_v2  ;;  %v1256_v2 = vld [vmem:[#allocation15 + $0xbf0] sm:$0xff] }
 0x1ed   : > { %v2868_v47 = vpop.f32.mrf.mxu0  ;;  %7593 = vmatmul.mubr.f32.gmra.mxu1 %v3154_v42  ;;  %v1234_v27 = vld [vmem:[#allocation15 + $0xb40] sm:$0xff]  ;;  %v1525_v32 = vadd.f32 %v1381_v56, %v1086_v61  ;;  %v1524_v35 = vadd.f32 %v1380_v0, %v1085_v63  ;;  %v1819_v33 = vmul.f32 %v9299_v17, %v1674_v1  ;;  %v9791_v34 = vmul.f32 %v9303_v22, %v2113_v15  ;;  %v793_v56 = vld [vmem:[#allocation15 + $0x6b0] sm:$0xff]  ;;  %v646_v0 = vld [vmem:[#allocation15 + $0x238] sm:$0xff] }
 0x1ee   : > { %7679 = vmatmul.mubr.f32.gmra.mxu0 %v3102_v44  ;;  %3074 = vst [vmem:[#allocation2 + $0xf3] sm:$0xff] %v3000_v37  ;;  %v2999_v53 = vmax.f32 %v2967_v38, 0.0  ;;  %v2970_v54 = vadd.f32 %v9661_v14, %v2931_v39  ;;  %v2930_v55 = vmul.f32 %v9658_v12, %v2868_v47  ;;  %7595 = vmatprep.mubr.f32.mxu1 %v3155_v48  ;;  %v647_v36 = vld [vmem:[#allocation15 + $0x240] sm:$0xff]  ;;  %v1233_v38 = vld [vmem:[#allocation15 + $0xb38] sm:$0xff]  ;;  %v816_v48 = vld [vmem:[#allocation15 + $0x768] sm:$0xff] }
 0x1ef   : > { %7681 = vmatprep.mubr.f32.mxu0 %v3103_v49  ;;  %v7526_v59 = vpop.f32.mrf.mxu0  ;;  %v3157_v16 = vld [vmem:[#allocation2 + $0xc1] sm:$0xff]  ;;  %v1673_v37 = vld [vmem:[#allocation15 + $0xfc0] sm:$0xff]  ;;  %v3158_v45 = vld [vmem:[#allocation2 + $0xc9] sm:$0xff]  ;;  %v9795_v47 = vadd.f32 %v2260_v52, %v1965_v13  ;;  %v962_v57 = vmul.f32 %v9295_v10, %v817_v31  ;;  %v1084_v63 = vadd.f32 %v940_v26, %v647_v36 }
 0x1f0   : > { %3073 = vst [vmem:[#allocation2 + $0xeb] sm:$0xff] %v2999_v53  ;;  %v3002_v4 = vmax.f32 %v2970_v54, 0.0  ;;  %v2969_v5 = vadd.f32 %v9661_v14, %v2930_v55  ;;  %v2933_v6 = vmul.f32 %v7526_v59, %v9658_v12  ;;  %v3105_v18 = vld [vmem:[#allocation2 + $0xc0] sm:$0xff]  ;;  %v3106_v46 = vld [vmem:[#allocation2 + $0xc8] sm:$0xff]  ;;  %v3159_v50 = vld [vmem:[#allocation2 + $0xd1] sm:$0xff]  ;;  %v1379_v53 = vmul.f32 %v9297_v11, %v1234_v27 }
 0x1f1   : > { %v2878_v28 = vpop.f32.mrf.mxu0  ;;  %7596 = vmatmul.mubr.f32.gmra.mxu1 %v3156_v7  ;;  %v3107_v51 = vld [vmem:[#allocation2 + $0xd0] sm:$0xff]  ;;  %v939_v55 = vmul.f32 %v9295_v10, %v794_v30  ;;  %v669_v1 = vld [vmem:[#allocation15 + $0x2f0] sm:$0xff]  ;;  %v1378_v7 = vmul.f32 %v9297_v11, %v1233_v38  ;;  %v668_v13 = vld [vmem:[#allocation15 + $0x2e8] sm:$0xff] }
 0x1f2   : > { %7682 = vmatmul.mubr.f32.gmra.mxu0 %v3104_v8  ;;  %3076 = vst [vmem:[#allocation2 + $0x105] sm:$0xff] %v3002_v4  ;;  %v3001_v24 = vmax.f32 %v2969_v5, 0.0  ;;  %v2972_v25 = vadd.f32 %v9661_v14, %v2933_v6  ;;  %v2932_v40 = vmul.f32 %v9658_v12, %v2878_v28  ;;  %7598 = vmatprep.mubr.f32.mxu1 %v3157_v16  ;;  %v2112_v54 = vld [vmem:[#allocation15 + $0x1440] sm:$0xff]  ;;  %v1672_v8 = vld [vmem:[#allocation15 + $0xfb8] sm:$0xff]  ;;  %v645_v27 = vld [vmem:[#allocation15 + $0x230] sm:$0xff] }
 0x1f3   : > { %7684 = vmatprep.mubr.f32.mxu0 %v3105_v18  ;;  %v7529_v3 = vpop.f32.mrf.mxu0  ;;  %v1964_v4 = vadd.f32 %v9773_v62, %v1525_v32  ;;  %v1963_v5 = vadd.f32 %v1819_v33, %v1524_v35  ;;  %v1818_v6 = vmul.f32 %v9299_v17, %v1673_v37  ;;  %v815_v15 = vld [vmem:[#allocation15 + $0x760] sm:$0xff]  ;;  %v938_v18 = vmul.f32 %v9295_v10, %v793_v56  ;;  %v3109_v62 = vld [vmem:[#allocation2 + $0xe0] sm:$0xff]  ;;  %v2111_v33 = vld [vmem:[#allocation15 + $0x1438] sm:$0xff] }
 0x1f4   : > { %3075 = vst [vmem:[#allocation2 + $0xfd] sm:$0xff] %v3001_v24  ;;  %v3004_v39 = vmax.f32 %v2972_v25, 0.0  ;;  %v2971_v42 = vadd.f32 %v9661_v14, %v2932_v40  ;;  %v2935_v44 = vmul.f32 %v7529_v3, %v9658_v12  ;;  %v3108_v16 = vld [vmem:[#allocation2 + $0xd8] sm:$0xff]  ;;  %v961_v25 = vmul.f32 %v9295_v10, %v816_v48  ;;  %v1232_v30 = vld [vmem:[#allocation15 + $0xb30] sm:$0xff] }
 0x1f5   : > { %v2888_v49 = vpop.f32.mrf.mxu0  ;;  %7599 = vmatmul.mubr.f32.gmra.mxu1 %v3158_v45  ;;  %v792_v24 = vld [vmem:[#allocation15 + $0x6a8] sm:$0xff]  ;;  %v1083_v26 = vadd.f32 %v939_v55, %v646_v0  ;;  %v1106_v31 = vadd.f32 %v962_v57, %v669_v1  ;;  %v1401_v3 = vmul.f32 %v9297_v11, %v1256_v2  ;;  %v1523_v32 = vadd.f32 %v1379_v53, %v1084_v63  ;;  %v814_v45 = vld [vmem:[#allocation15 + $0x758] sm:$0xff]  ;;  %v1671_v56 = vld [vmem:[#allocation15 + $0xfb0] sm:$0xff] }
 0x1f6   : > { %7685 = vmatmul.mubr.f32.gmra.mxu0 %v3106_v46  ;;  %3078 = vst [vmem:[#allocation2 + $0x117] sm:$0xff] %v3004_v39  ;;  %v3003_v59 = vmax.f32 %v2971_v42, 0.0  ;;  %v2974_v61 = vadd.f32 %v9661_v14, %v2935_v44  ;;  %v2934_v52 = vmul.f32 %v9658_v12, %v2888_v49  ;;  %7601 = vmatprep.mubr.f32.mxu1 %v3159_v50  ;;  %v1255_v40 = vld [vmem:[#allocation15 + $0xbe8] sm:$0xff]  ;;  %v1254_v44 = vld [vmem:[#allocation15 + $0xbe0] sm:$0xff]  ;;  %v2110_v2 = vld [vmem:[#allocation15 + $0x1430] sm:$0xff] }
 0x1f7   : > { %7687 = vmatprep.mubr.f32.mxu0 %v3107_v51  ;;  %v2257_v35 = vmul.f32 %v9303_v22, %v2112_v54  ;;  %v960_v36 = vmul.f32 %v9295_v10, %v815_v15  ;;  %v9816_v37 = vadd.f32 %v9784_v21, %v1964_v4  ;;  %v9819_v38 = vadd.f32 %v9791_v34, %v1963_v5  ;;  %v644_v42 = vld [vmem:[#allocation15 + $0x228] sm:$0xff]  ;;  %v3162_v46 = vld [vmem:[#allocation2 + $0xe9] sm:$0xff]  ;;  %v3163_v34 = vld [vmem:[#allocation2 + $0xf1] sm:$0xff] }
 0x1f8   : > { %3077 = vst [vmem:[#allocation2 + $0x10f] sm:$0xff] %v3003_v59  ;;  %v3006_v28 = vmax.f32 %v2974_v61, 0.0  ;;  %v2973_v12 = vadd.f32 %v9661_v14, %v2934_v52  ;;  %v1817_v39 = vmul.f32 %v9299_v17, %v1672_v8  ;;  %v937_v58 = vmul.f32 %v9295_v10, %v792_v24  ;;  %v3110_v48 = vld [vmem:[#allocation2 + $0xe8] sm:$0xff]  ;;  %v1231_v51 = vld [vmem:[#allocation15 + $0xb28] sm:$0xff]  ;;  %v3111_v54 = vld [vmem:[#allocation2 + $0xf0] sm:$0xff] }
 0x1f9   : > { %7602 = vmatmul.mubr.f32.gmra.mxu1 %v2997_v23  ;;  %v667_v23 = vld [vmem:[#allocation15 + $0x2e0] sm:$0xff]  ;;  %v1082_v49 = vadd.f32 %v938_v18, %v645_v27  ;;  %v1377_v50 = vmul.f32 %v9297_v11, %v1232_v30  ;;  %v1105_v21 = vadd.f32 %v961_v25, %v668_v13  ;;  %v1400_v53 = vmul.f32 %v9297_v11, %v1255_v40  ;;  %v2134_v52 = vld [vmem:[#allocation15 + $0x14f0] sm:$0xff]  ;;  %v666_v13 = vld [vmem:[#allocation15 + $0x2d8] sm:$0xff] }
 0x1fa   : > { %7688 = vmatmul.mubr.f32.gmra.mxu0 %v3108_v16  ;;  %3080 = vst [vmem:[#allocation2 + $0x129] sm:$0xff] %v3006_v28  ;;  %v3005_v14 = vmax.f32 %v2973_v12, 0.0  ;;  %7604 = vmatprep.mubr.f32.mxu1 %v2998_v41  ;;  %v1694_v41 = vld [vmem:[#allocation15 + $0x1068] sm:$0xff]  ;;  %v1522_v55 = vadd.f32 %v1378_v7, %v1083_v26  ;;  %v1545_v57 = vadd.f32 %v1401_v3, %v1106_v31  ;;  %v1693_v8 = vld [vmem:[#allocation15 + $0x1060] sm:$0xff]  ;;  %v1253_v15 = vld [vmem:[#allocation15 + $0xbd8] sm:$0xff] }
 0x1fb   : > { %7690 = vmatprep.mubr.f32.mxu0 %v3109_v62  ;;  %v1840_v59 = vmul.f32 %v9299_v17, %v1695_v43  ;;  %v1962_v61 = vadd.f32 %v1818_v6, %v1523_v32  ;;  %v1104_v63 = vadd.f32 %v960_v36, %v667_v23  ;;  %v1399_v0 = vmul.f32 %v9297_v11, %v1254_v44  ;;  %v3164_v28 = vld [vmem:[#allocation2 + $0xf9] sm:$0xff]  ;;  %v3165_v40 = vld [vmem:[#allocation2 + $0x101] sm:$0xff] }
 0x1fc   : > { %3079 = vst [vmem:[#allocation2 + $0x121] sm:$0xff] %v3005_v14  ;;  %v2256_v1 = vmul.f32 %v9303_v22, %v2111_v33  ;;  %v1081_v4 = vadd.f32 %v937_v58, %v644_v42  ;;  %v1376_v5 = vmul.f32 %v9297_v11, %v1231_v51  ;;  %v959_v7 = vmul.f32 %v9295_v10, %v814_v45  ;;  %v3112_v12 = vld [vmem:[#allocation2 + $0xf8] sm:$0xff]  ;;  %v3113_v62 = vld [vmem:[#allocation2 + $0x100] sm:$0xff]  ;;  %v2131_v51 = vld [vmem:[#allocation15 + $0x14d8] sm:$0xff] }
 0x1fd   : > { %7605 = vmatmul.mubr.f32.gmra.mxu1 %v3162_v46  ;;  %v1521_v16 = vadd.f32 %v1377_v50, %v1082_v49  ;;  %v1816_v6 = vmul.f32 %v9299_v17, %v1671_v56  ;;  %v1670_v18 = vld [vmem:[#allocation15 + $0xfa8] sm:$0xff]  ;;  %v1544_v24 = vadd.f32 %v1400_v53, %v1105_v21  ;;  %v1839_v25 = vmul.f32 %v9299_v17, %v1694_v41  ;;  %v2132_v33 = vld [vmem:[#allocation15 + $0x14e0] sm:$0xff]  ;;  %v1692_v41 = vld [vmem:[#allocation15 + $0x1058] sm:$0xff] }
 0x1fe   : > { %7691 = vmatmul.mubr.f32.gmra.mxu0 %v3110_v48  ;;  %7607 = vmatprep.mubr.f32.mxu1 %v3163_v34  ;;  %v1961_v26 = vadd.f32 %v1817_v39, %v1522_v55  ;;  %v1984_v27 = vadd.f32 %v1840_v59, %v1545_v57  ;;  %v2279_v30 = vmul.f32 %v9303_v22, %v2134_v52  ;;  %v2133_v31 = vld [vmem:[#allocation15 + $0x14e8] sm:$0xff]  ;;  %v791_v43 = vld [vmem:[#allocation15 + $0x6a0] sm:$0xff]  ;;  %v813_v44 = vld [vmem:[#allocation15 + $0x750] sm:$0xff] }
 0x1ff   : > { %7693 = vmatprep.mubr.f32.mxu0 %v3111_v54  ;;  %v9833_v3 = vadd.f32 %v2257_v35, %v1962_v61  ;;  %v1543_v14 = vadd.f32 %v1399_v0, %v1104_v63  ;;  %v1838_v32 = vmul.f32 %v9299_v17, %v1693_v8  ;;  %v1520_v23 = vadd.f32 %v1376_v5, %v1081_v4  ;;  %v2109_v42 = vld [vmem:[#allocation15 + $0x1428] sm:$0xff]  ;;  %v3166_v45 = vld [vmem:[#allocation2 + $0x109] sm:$0xff]  ;;  %v3167_v21 = vld [vmem:[#allocation2 + $0x111] sm:$0xff] }
 0x200   : > { %v1815_v36 = vmul.f32 %v9299_v17, %v1670_v18  ;;  %v1103_v58 = vadd.f32 %v959_v7, %v666_v13  ;;  %v1398_v39 = vmul.f32 %v9297_v11, %v1253_v15  ;;  %v3114_v46 = vld [vmem:[#allocation2 + $0x108] sm:$0xff]  ;;  %v1960_v48 = vadd.f32 %v1816_v6, %v1521_v16  ;;  %v3115_v53 = vld [vmem:[#allocation2 + $0x110] sm:$0xff]  ;;  %v812_v61 = vld [vmem:[#allocation15 + $0x748] sm:$0xff] }
 0x201   : > { %7608 = vmatmul.mubr.f32.gmra.mxu1 %v3164_v28  ;;  %v2255_v35 = vmul.f32 %v9303_v22, %v2110_v2  ;;  %v1983_v49 = vadd.f32 %v1839_v25, %v1544_v24  ;;  %v2278_v50 = vmul.f32 %v9303_v22, %v2133_v31  ;;  %v3675_v34 = vld [vmem:[#allocation2 + $0x2] sm:$0xff]  ;;  %v9840_v54 = vadd.f32 %v2256_v1, %v1961_v26  ;;  %v643_v0 = vld [vmem:[#allocation15 + $0x220] sm:$0xff]  ;;  %v790_v5 = vld [vmem:[#allocation15 + $0x698] sm:$0xff] }
 0x202   : > { %7694 = vmatmul.mubr.f32.gmra.mxu0 %v3112_v12  ;;  %7610 = vmatprep.mubr.f32.mxu1 %v3165_v40  ;;  %v9842_v55 = vadd.f32 %v2279_v30, %v1984_v27  ;;  %v936_v56 = vmul.f32 %v9295_v10, %v791_v43  ;;  %v665_v57 = vld [vmem:[#allocation15 + $0x2d0] sm:$0xff]  ;;  %v1982_v52 = vadd.f32 %v1838_v32, %v1543_v14  ;;  %v1230_v2 = vld [vmem:[#allocation15 + $0xb20] sm:$0xff]  ;;  %v664_v28 = vld [vmem:[#allocation15 + $0x2c8] sm:$0xff] }
 0x203   : > { %7696 = vmatprep.mubr.f32.mxu0 %v3113_v62  ;;  %v1252_v59 = vld [vmem:[#allocation15 + $0xbd0] sm:$0xff]  ;;  %v2277_v63 = vmul.f32 %v9303_v22, %v2132_v33  ;;  %v958_v4 = vmul.f32 %v9295_v10, %v813_v44  ;;  %v1959_v8 = vadd.f32 %v1815_v36, %v1520_v23  ;;  %v2254_v1 = vmul.f32 %v9303_v22, %v2109_v42  ;;  %v1669_v15 = vld [vmem:[#allocation15 + $0xfa0] sm:$0xff]  ;;  %v1251_v12 = vld [vmem:[#allocation15 + $0xbc8] sm:$0xff] }
 0x204   : > { %v1542_v13 = vadd.f32 %v1398_v39, %v1103_v58  ;;  %v1837_v7 = vmul.f32 %v9299_v17, %v1692_v41  ;;  %v3168_v16 = vld [vmem:[#allocation2 + $0x119] sm:$0xff]  ;;  %v9849_v18 = vadd.f32 %v2255_v35, %v1960_v48  ;;  %v9851_v24 = vadd.f32 %v2278_v50, %v1983_v49  ;;  %v810_v32 = vld [vmem:[#allocation15 + $0x738] sm:$0xff] }
 0x205   : > { %7611 = vmatmul.mubr.f32.gmra.mxu1 %v3166_v45  ;;  %v3116_v6 = vld [vmem:[#allocation2 + $0x118] sm:$0xff]  ;;  %v9854_v25 = vmul.f32 %v9303_v22, %v2131_v51  ;;  %v957_v40 = vmul.f32 %v9295_v10, %v812_v61  ;;  %v1080_v27 = vadd.f32 %v936_v56, %v643_v0  ;;  %v1375_v30 = vmul.f32 %v9297_v11, %v1230_v2  ;;  %v3676_v33 = vld [vmem:[#allocation2 + $0xa] sm:$0xff]  ;;  %v4010_v0 = vld [vmem:[#allocation2 + $0x22] sm:$0xff] }
 0x206   : > { %7697 = vmatmul.mubr.f32.gmra.mxu0 %v3114_v46  ;;  %7613 = vmatprep.mubr.f32.mxu1 %v3167_v21  ;;  %v811_v62 = vld [vmem:[#allocation15 + $0x740] sm:$0xff]  ;;  %v935_v14 = vmul.f32 %v9295_v10, %v790_v5  ;;  %v9859_v43 = vadd.f32 %v2277_v63, %v1982_v52  ;;  %v1102_v23 = vadd.f32 %v958_v4, %v665_v57  ;;  %v642_v42 = vld [vmem:[#allocation15 + $0x218] sm:$0xff]  ;;  %v1691_v45 = vld [vmem:[#allocation15 + $0x1050] sm:$0xff] }
 0x207   : > { %7699 = vmatprep.mubr.f32.mxu0 %v3115_v53  ;;  %v4008_v26 = vld [vmem:[#allocation2 + $0x12] sm:$0xff]  ;;  %v1397_v36 = vmul.f32 %v9297_v11, %v1252_v59  ;;  %v9862_v39 = vadd.f32 %v2254_v1, %v1959_v8  ;;  %v9864_v41 = vadd.f32 %v1837_v7, %v1542_v13  ;;  %v1814_v44 = vmul.f32 %v9299_v17, %v1669_v15  ;;  %v2130_v46 = vld [vmem:[#allocation15 + $0x14d0] sm:$0xff]  ;;  %v1690_v48 = vld [vmem:[#allocation15 + $0x1048] sm:$0xff] }
 0x208   : > { %v2108_v31 = vld [vmem:[#allocation15 + $0x1420] sm:$0xff]  ;;  %v1229_v58 = vld [vmem:[#allocation15 + $0xb18] sm:$0xff]  ;;  %v956_v35 = vmul.f32 %v9295_v10, %v811_v62  ;;  %v1101_v51 = vadd.f32 %v957_v40, %v664_v28  ;;  %v1396_v21 = vmul.f32 %v9297_v11, %v1251_v12  ;;  %v955_v56 = vmul.f32 %v9295_v10, %v810_v32  ;;  %v2129_v13 = vld [vmem:[#allocation15 + $0x14c8] sm:$0xff] }
 0x209   : > { %7614 = vmatmul.mubr.f32.gmra.mxu1 %v3168_v16  ;;  %v4009_v49 = vld [vmem:[#allocation2 + $0x1a] sm:$0xff]  ;;  %v9869_v50 = vmul.f32 %v9303_v22, %v2108_v31  ;;  %v1519_v57 = vadd.f32 %v1375_v30, %v1080_v27  ;;  %v1079_v59 = vadd.f32 %v935_v14, %v642_v42  ;;  %v1374_v61 = vmul.f32 %v9297_v11, %v1229_v58  ;;  %v662_v52 = vld [vmem:[#allocation15 + $0x2b8] sm:$0xff]  ;;  %v789_v28 = vld [vmem:[#allocation15 + $0x690] sm:$0xff] }
 0x20a   : > { %7700 = vmatmul.mubr.f32.gmra.mxu0 %v3116_v6  ;;  %7734 = vmatprep.mubr.f32.mxu1 %v3675_v34  ;;  %v663_v53 = vld [vmem:[#allocation15 + $0x2c0] sm:$0xff]  ;;  %v1249_v63 = vld [vmem:[#allocation15 + $0xbb8] sm:$0xff]  ;;  %v1541_v2 = vadd.f32 %v1397_v36, %v1102_v23  ;;  %v1836_v4 = vmul.f32 %v9299_v17, %v1691_v45  ;;  %v2275_v5 = vmul.f32 %v9303_v22, %v2130_v46  ;;  %v7650_v23 = vpop.f32.mrf.mxu0  ;;  %v641_v58 = vld [vmem:[#allocation15 + $0x210] sm:$0xff] }
 0x20b   : > { %7820 = vmatprep.mubr.f32.mxu0 %v4008_v26  ;;  %v1250_v34 = vld [vmem:[#allocation15 + $0xbc0] sm:$0xff]  ;;  %v1668_v8 = vld [vmem:[#allocation15 + $0xf98] sm:$0xff]  ;;  %v1835_v1 = vmul.f32 %v9299_v17, %v1690_v48  ;;  %v1100_v7 = vadd.f32 %v956_v35, %v663_v53  ;;  %v1099_v6 = vadd.f32 %v955_v56, %v662_v52  ;;  %v1394_v40 = vmul.f32 %v9297_v11, %v1249_v63  ;;  %v808_v52 = vld [vmem:[#allocation15 + $0x728] sm:$0xff] }
 0x20c   : > { %v1395_v15 = vmul.f32 %v9297_v11, %v1250_v34  ;;  %v4011_v12 = vld [vmem:[#allocation2 + $0x2a] sm:$0xff]  ;;  %v1689_v16 = vld [vmem:[#allocation15 + $0x1040] sm:$0xff]  ;;  %v1518_v27 = vadd.f32 %v1374_v61, %v1079_v59  ;;  %v1813_v30 = vmul.f32 %v9299_v17, %v1668_v8  ;;  %v1980_v14 = vadd.f32 %v1836_v4, %v1541_v2  ;;  %v788_v2 = vld [vmem:[#allocation15 + $0x688] sm:$0xff] }
 0x20d   : > { %7735 = vmatmul.mubr.f32.vlgmr.msra.gmra.mxu1 %v3676_v33  ;;  %v4012_v62 = vld [vmem:[#allocation2 + $0x32] sm:$0xff]  ;;  %v7564_v33 = vpop.f32.mrf.mxu1  ;;  %v1834_v42 = vmul.f32 %v9299_v17, %v1689_v16  ;;  %v4013_v46 = vld [vmem:[#allocation2 + $0x3a] sm:$0xff]  ;;  %v9896_v53 = vadd.f32 %v9854_v25, %v9864_v41  ;;  %v809_v61 = vld [vmem:[#allocation15 + $0x730] sm:$0xff] }
 0x20e   : > { %7821 = vmatmul.mubr.f32.vlgmr.msra.gmra.mxu0 %v4009_v49  ;;  %7875 = vmatpush3.msra.mxu1 %v9649_v60  ;;  %v1540_v60 = vadd.f32 %v1396_v21, %v1101_v51  ;;  %v1688_v31 = vld [vmem:[#allocation15 + $0x1038] sm:$0xff]  ;;  %v1539_v36 = vadd.f32 %v1395_v15, %v1100_v7  ;;  %v9889_v45 = vadd.f32 %v7650_v23, %v7564_v33  ;;  %v2128_v35 = vld [vmem:[#allocation15 + $0x14c0] sm:$0xff]  ;;  %v4014_v21 = vld [vmem:[#allocation2 + $0x42] sm:$0xff] }
 0x20f   : > { %7737 = vmatprep.mubr.f32.mxu1 %v4008_v26  ;;  %7823 = vmatprep.mubr.f32.mxu0 %v4010_v0  ;;  %v1958_v26 = vadd.f32 %v1814_v44, %v1519_v57  ;;  %v2107_v32 = vld [vmem:[#allocation15 + $0x1418] sm:$0xff]  ;;  %v1228_v44 = vld [vmem:[#allocation15 + $0xb10] sm:$0xff]  ;;  %v1833_v51 = vmul.f32 %v9299_v17, %v1688_v31  ;;  %v1957_v34 = vadd.f32 %v1813_v30, %v1518_v27  ;;  %v807_v15 = vld [vmem:[#allocation15 + $0x720] sm:$0xff] }
 0x210   : > { %7876 = vmatprep.subr.mxu1 %v9759_v29  ;;  %7961 = vmatpush3.msra.mxu0 %v9656_v9  ;;  %v934_v9 = vmul.f32 %v9295_v10, %v789_v28  ;;  %v1979_v48 = vadd.f32 %v1835_v1, %v1540_v60  ;;  %v2252_v56 = vmul.f32 %v9303_v22, %v2107_v32  ;;  %v2127_v57 = vld [vmem:[#allocation15 + $0x14b8] sm:$0xff]  ;;  %v661_v7 = vld [vmem:[#allocation15 + $0x2b0] sm:$0xff]  ;;  %v659_v32 = vld [vmem:[#allocation15 + $0x2a0] sm:$0xff] }
 0x211   : > { %7877 = vmatpush3.msra.mxu1 %v9759_v29  ;;  %v2274_v29 = vmul.f32 %v9303_v22, %v2129_v13  ;;  %7962 = vmatprep.subr.mxu0 %v9842_v55  ;;  %v1373_v59 = vmul.f32 %v9297_v11, %v1228_v44  ;;  %v9905_v25 = vadd.f32 %v2275_v5, %v1980_v14  ;;  %v4015_v4 = vld [vmem:[#allocation2 + $0x4a] sm:$0xff]  ;;  %v4016_v5 = vld [vmem:[#allocation2 + $0x52] sm:$0xff]  ;;  %v640_v14 = vld [vmem:[#allocation15 + $0x208] sm:$0xff] }
 0x212   : > { %7738 = vmatmul.mubr.f32.gmra.mxu1 %v4009_v49  ;;  %7824 = vmatmul.mubr.f32.gmra.mxu0 %v4011_v12  ;;  %v1538_v49 = vadd.f32 %v1394_v40, %v1099_v6  ;;  %v1978_v41 = vadd.f32 %v1834_v42, %v1539_v36  ;;  %v2273_v63 = vmul.f32 %v9303_v22, %v2128_v35  ;;  %v2106_v13 = vld [vmem:[#allocation15 + $0x1410] sm:$0xff]  ;;  %v806_v16 = vld [vmem:[#allocation15 + $0x718] sm:$0xff]  ;;  %v4017_v33 = vld [vmem:[#allocation2 + $0x5a] sm:$0xff] }
 0x213   : > { %7740 = vmatprep.mubr.f32.mxu1 %v4010_v0  ;;  %7826 = vmatprep.mubr.f32.mxu0 %v4012_v62  ;;  %v1667_v0 = vld [vmem:[#allocation15 + $0xf90] sm:$0xff]  ;;  %v2272_v1 = vmul.f32 %v9303_v22, %v2127_v57  ;;  %v9913_v28 = vadd.f32 %v2252_v56, %v1957_v34  ;;  %v933_v27 = vmul.f32 %v9295_v10, %v788_v2  ;;  %v1246_v42 = vld [vmem:[#allocation15 + $0xba0] sm:$0xff] }
 0x214   : > { %7878 = vmatprep.subr.mxu1 %v9779_v19  ;;  %7963 = vmatpush3.msra.mxu0 %v9842_v55  ;;  %v1078_v55 = vadd.f32 %v934_v9, %v641_v58  ;;  %v1977_v8 = vadd.f32 %v1833_v51, %v1538_v49  ;;  %v1248_v60 = vld [vmem:[#allocation15 + $0xbb0] sm:$0xff]  ;;  %v1812_v6 = vmul.f32 %v9299_v17, %v1667_v0  ;;  %v658_v58 = vld [vmem:[#allocation15 + $0x298] sm:$0xff] }
 0x215   : > { %7879 = vmatpush3.msra.mxu1 %v9779_v19  ;;  %v9900_v19 = vadd.f32 %v9869_v50, %v1958_v26  ;;  %7964 = vmatprep.subr.mxu0 %v9851_v24  ;;  %v9910_v50 = vadd.f32 %v2274_v29, %v1979_v48  ;;  %v1687_v40 = vld [vmem:[#allocation15 + $0x1030] sm:$0xff]  ;;  %v1247_v26 = vld [vmem:[#allocation15 + $0xba8] sm:$0xff]  ;;  %v9921_v30 = vadd.f32 %v2273_v63, %v1978_v41  ;;  %v1245_v51 = vld [vmem:[#allocation15 + $0xb98] sm:$0xff] }
 0x216   : > { %7741 = vmatmul.mubr.f32.gmra.mxu1 %v4011_v12  ;;  %7827 = vmatmul.mubr.f32.gmra.mxu0 %v4013_v46  ;;  %v954_v12 = vmul.f32 %v9295_v10, %v809_v61  ;;  %v9924_v31 = vmul.f32 %v9303_v22, %v2106_v13  ;;  %v1227_v29 = vld [vmem:[#allocation15 + $0xb08] sm:$0xff]  ;;  %v952_v9 = vmul.f32 %v9295_v10, %v807_v15  ;;  %v4019_v41 = vld [vmem:[#allocation2 + $0x6a] sm:$0xff]  ;;  %v1685_v63 = vld [vmem:[#allocation15 + $0x1020] sm:$0xff] }
 0x217   : > { %7743 = vmatprep.mubr.f32.mxu1 %v4012_v62  ;;  %7829 = vmatprep.mubr.f32.mxu0 %v4014_v21  ;;  %v660_v62 = vld [vmem:[#allocation15 + $0x2a8] sm:$0xff]  ;;  %v9929_v23 = vadd.f32 %v2272_v1, %v1977_v8  ;;  %v1393_v36 = vmul.f32 %v9297_v11, %v1248_v60  ;;  %v951_v44 = vmul.f32 %v9295_v10, %v806_v16  ;;  %v4020_v1 = vld [vmem:[#allocation2 + $0x72] sm:$0xff] }
 0x218   : > { %7880 = vmatprep.subr.mxu1 %v9781_v20  ;;  %7965 = vmatpush3.msra.mxu0 %v9851_v24  ;;  %v1517_v24 = vadd.f32 %v1373_v59, %v1078_v55  ;;  %v1098_v48 = vadd.f32 %v954_v12, %v661_v7  ;;  %v1392_v49 = vmul.f32 %v9297_v11, %v1247_v26  ;;  %v2126_v55 = vld [vmem:[#allocation15 + $0x14b0] sm:$0xff]  ;;  %v1666_v59 = vld [vmem:[#allocation15 + $0xf88] sm:$0xff] }
 0x219   : > { %7881 = vmatpush3.msra.mxu1 %v9781_v20  ;;  %v953_v20 = vmul.f32 %v9295_v10, %v808_v52  ;;  %7966 = vmatprep.subr.mxu0 %v9859_v43  ;;  %v1077_v34 = vadd.f32 %v933_v27, %v640_v14  ;;  %v1372_v56 = vmul.f32 %v9297_v11, %v1227_v29  ;;  %v1244_v12 = vld [vmem:[#allocation15 + $0xb90] sm:$0xff]  ;;  %v2105_v16 = vld [vmem:[#allocation15 + $0x1408] sm:$0xff]  ;;  %v2124_v27 = vld [vmem:[#allocation15 + $0x14a0] sm:$0xff] }
 0x21a   : > { %7744 = vmatmul.mubr.f32.gmra.mxu1 %v4013_v46  ;;  %7830 = vmatmul.mubr.f32.gmra.mxu0 %v4015_v4  ;;  %v4018_v46 = vld [vmem:[#allocation2 + $0x62] sm:$0xff]  ;;  %v1832_v57 = vmul.f32 %v9299_v17, %v1687_v40  ;;  %v1096_v61 = vadd.f32 %v952_v9, %v659_v32  ;;  %v1391_v52 = vmul.f32 %v9297_v11, %v1246_v42  ;;  %v4021_v26 = vld [vmem:[#allocation2 + $0x7a] sm:$0xff]  ;;  %v2123_v29 = vld [vmem:[#allocation15 + $0x1498] sm:$0xff] }
 0x21b   : > { %7746 = vmatprep.mubr.f32.mxu1 %v4014_v21  ;;  %7832 = vmatprep.mubr.f32.mxu0 %v4016_v5  ;;  %v1097_v35 = vadd.f32 %v953_v20, %v660_v62  ;;  %v805_v21 = vld [vmem:[#allocation15 + $0x710] sm:$0xff]  ;;  %v1095_v0 = vadd.f32 %v951_v44, %v658_v58  ;;  %v1390_v2 = vmul.f32 %v9297_v11, %v1245_v51  ;;  %v787_v62 = vld [vmem:[#allocation15 + $0x680] sm:$0xff] }
 0x21c   : > { %7882 = vmatprep.subr.mxu1 %v9795_v47  ;;  %7967 = vmatpush3.msra.mxu0 %v9859_v43  ;;  %v1686_v43 = vld [vmem:[#allocation15 + $0x1028] sm:$0xff]  ;;  %v950_v8 = vmul.f32 %v9295_v10, %v805_v21  ;;  %v1537_v13 = vadd.f32 %v1393_v36, %v1098_v48  ;;  %v1516_v60 = vadd.f32 %v1372_v56, %v1077_v34  ;;  %v1683_v44 = vld [vmem:[#allocation15 + $0x1010] sm:$0xff]  ;;  %v639_v51 = vld [vmem:[#allocation15 + $0x200] sm:$0xff] }
 0x21d   : > { %7883 = vmatpush3.msra.mxu1 %v9795_v47  ;;  %v9934_v47 = vadd.f32 %v1812_v6, %v1517_v24  ;;  %7968 = vmatprep.subr.mxu0 %v9896_v53  ;;  %v1536_v7 = vadd.f32 %v1392_v49, %v1097_v35  ;;  %v1831_v15 = vmul.f32 %v9299_v17, %v1686_v43  ;;  %v1226_v21 = vld [vmem:[#allocation15 + $0xb00] sm:$0xff]  ;;  %v804_v43 = vld [vmem:[#allocation15 + $0x708] sm:$0xff]  ;;  %v4023_v34 = vld [vmem:[#allocation2 + $0x8a] sm:$0xff] }
 0x21e   : > { %7747 = vmatmul.mubr.f32.gmra.mxu1 %v4015_v4  ;;  %7833 = vmatmul.mubr.f32.gmra.mxu0 %v4017_v33  ;;  %v1684_v4 = vld [vmem:[#allocation15 + $0x1018] sm:$0xff]  ;;  %v1811_v20 = vmul.f32 %v9299_v17, %v1666_v59  ;;  %v1535_v24 = vadd.f32 %v1391_v52, %v1096_v61  ;;  %v1830_v6 = vmul.f32 %v9299_v17, %v1685_v63  ;;  %v803_v59 = vld [vmem:[#allocation15 + $0x700] sm:$0xff] }
 0x21f   : > { %7749 = vmatprep.mubr.f32.mxu1 %v4016_v5  ;;  %7835 = vmatprep.mubr.f32.mxu0 %v4018_v46  ;;  %v657_v5 = vld [vmem:[#allocation15 + $0x290] sm:$0xff]  ;;  %v1829_v40 = vmul.f32 %v9299_v17, %v1684_v4  ;;  %v1534_v14 = vadd.f32 %v1390_v2, %v1095_v0  ;;  %v1389_v9 = vmul.f32 %v9297_v11, %v1244_v12  ;;  %v4024_v61 = vld [vmem:[#allocation2 + $0x92] sm:$0xff] }
 0x220   : > { %7884 = vmatprep.subr.mxu1 %v9816_v37  ;;  %7969 = vmatpush3.msra.mxu0 %v9896_v53  ;;  %v2125_v53 = vld [vmem:[#allocation15 + $0x14a8] sm:$0xff]  ;;  %v1094_v32 = vadd.f32 %v950_v8, %v657_v5  ;;  %v1976_v36 = vadd.f32 %v1832_v57, %v1537_v13  ;;  %v1975_v42 = vadd.f32 %v1831_v15, %v1536_v7  ;;  %v2122_v0 = vld [vmem:[#allocation15 + $0x1490] sm:$0xff]  ;;  %v1665_v2 = vld [vmem:[#allocation15 + $0xf80] sm:$0xff] }
 0x221   : > { %7885 = vmatpush3.msra.mxu1 %v9816_v37  ;;  %v2271_v37 = vmul.f32 %v9303_v22, %v2126_v55  ;;  %7970 = vmatprep.subr.mxu0 %v9905_v25  ;;  %v2270_v58 = vmul.f32 %v9303_v22, %v2125_v53  ;;  %v1974_v48 = vadd.f32 %v1830_v6, %v1535_v24  ;;  %v2104_v4 = vld [vmem:[#allocation15 + $0x1400] sm:$0xff]  ;;  %v656_v7 = vld [vmem:[#allocation15 + $0x288] sm:$0xff] }
 0x222   : > { %7750 = vmatmul.mubr.f32.gmra.mxu1 %v4017_v33  ;;  %7836 = vmatmul.mubr.f32.gmra.mxu0 %v4019_v41  ;;  %v4022_v33 = vld [vmem:[#allocation2 + $0x82] sm:$0xff]  ;;  %v2269_v35 = vmul.f32 %v9303_v22, %v2124_v27  ;;  %v2268_v49 = vmul.f32 %v9303_v22, %v2123_v29  ;;  %v1973_v56 = vadd.f32 %v1829_v40, %v1534_v14  ;;  %v4025_v13 = vld [vmem:[#allocation2 + $0x9a] sm:$0xff]  ;;  %v686_v29 = vld [vmem:[#allocation15 + $0x378] sm:$0xff] }
 0x223   : > { %7752 = vmatprep.mubr.f32.mxu1 %v4018_v46  ;;  %7838 = vmatprep.mubr.f32.mxu0 %v4020_v1  ;;  %v1955_v46 = vadd.f32 %v1811_v20, %v1516_v60  ;;  %v1533_v57 = vadd.f32 %v1389_v9, %v1094_v32  ;;  %v1828_v55 = vmul.f32 %v9299_v17, %v1683_v44  ;;  %v1243_v15 = vld [vmem:[#allocation15 + $0xb88] sm:$0xff]  ;;  %v655_v60 = vld [vmem:[#allocation15 + $0x280] sm:$0xff]  ;;  %v1273_v32 = vld [vmem:[#allocation15 + $0xc78] sm:$0xff] }
 0x224   : > { %7886 = vmatprep.subr.mxu1 %v9819_v38  ;;  %7971 = vmatpush3.msra.mxu0 %v9905_v25  ;;  %v932_v25 = vmul.f32 %v9295_v10, %v787_v62  ;;  %v9967_v52 = vadd.f32 %v9924_v31, %v9934_v47  ;;  %v9971_v63 = vadd.f32 %v2270_v58, %v1975_v42  ;;  %v1242_v20 = vld [vmem:[#allocation15 + $0xb80] sm:$0xff]  ;;  %v4026_v24 = vld [vmem:[#allocation2 + $0xa2] sm:$0xff] }
 0x225   : > { %7887 = vmatpush3.msra.mxu1 %v9819_v38  ;;  %v2250_v38 = vmul.f32 %v9303_v22, %v2105_v16  ;;  %7972 = vmatprep.subr.mxu0 %v9910_v50  ;;  %v949_v8 = vmul.f32 %v9295_v10, %v804_v43  ;;  %v9979_v47 = vadd.f32 %v2269_v35, %v1974_v48  ;;  %v833_v16 = vld [vmem:[#allocation15 + $0x7f0] sm:$0xff]  ;;  %v1682_v62 = vld [vmem:[#allocation15 + $0x1008] sm:$0xff]  ;;  %v831_v9 = vld [vmem:[#allocation15 + $0x7e0] sm:$0xff] }
 0x226   : > { %7753 = vmatmul.mubr.f32.gmra.mxu1 %v4019_v41  ;;  %7839 = vmatmul.mubr.f32.gmra.mxu0 %v4021_v26  ;;  %v9969_v41 = vadd.f32 %v2271_v37, %v1976_v36  ;;  %v948_v5 = vmul.f32 %v9295_v10, %v803_v59  ;;  %v9984_v12 = vadd.f32 %v2268_v49, %v1973_v56  ;;  %v1681_v58 = vld [vmem:[#allocation15 + $0x1000] sm:$0xff]  ;;  %v685_v48 = vld [vmem:[#allocation15 + $0x370] sm:$0xff]  ;;  %v1271_v56 = vld [vmem:[#allocation15 + $0xc68] sm:$0xff] }
 0x227   : > { %7755 = vmatprep.mubr.f32.mxu1 %v4020_v1  ;;  %7841 = vmatprep.mubr.f32.mxu0 %v4022_v33  ;;  %v834_v1 = vld [vmem:[#allocation15 + $0x7f8] sm:$0xff]  ;;  %v9977_v31 = vadd.f32 %v2250_v38, %v1955_v46  ;;  %v1972_v37 = vadd.f32 %v1828_v55, %v1533_v57  ;;  %v2267_v53 = vmul.f32 %v9303_v22, %v2122_v0  ;;  %v1272_v35 = vld [vmem:[#allocation15 + $0xc70] sm:$0xff]  ;;  %v683_v59 = vld [vmem:[#allocation15 + $0x360] sm:$0xff] }
 0x228   : > { %7888 = vmatprep.subr.mxu1 %v9833_v3  ;;  %7973 = vmatpush3.msra.mxu0 %v9910_v50  ;;  %v1371_v50 = vmul.f32 %v9297_v11, %v1226_v21  ;;  %v1810_v6 = vmul.f32 %v9299_v17, %v1665_v2  ;;  %v9989_v40 = vmul.f32 %v9303_v22, %v2104_v4  ;;  %v2121_v0 = vld [vmem:[#allocation15 + $0x1488] sm:$0xff] }
 0x229   : > { %7889 = vmatpush3.msra.mxu1 %v9833_v3  ;;  %v1076_v3 = vadd.f32 %v932_v25, %v639_v51  ;;  %7974 = vmatprep.subr.mxu0 %v9921_v30  ;;  %v1093_v27 = vadd.f32 %v949_v8, %v656_v7  ;;  %v1388_v14 = vmul.f32 %v9297_v11, %v1243_v15  ;;  %v1712_v25 = vld [vmem:[#allocation15 + $0x10f8] sm:$0xff]  ;;  %v4029_v8 = vld [vmem:[#allocation2 + $0xba] sm:$0xff]  ;;  %v1711_v7 = vld [vmem:[#allocation15 + $0x10f0] sm:$0xff] }
 0x22a   : > { %7756 = vmatmul.mubr.f32.gmra.mxu1 %v4021_v26  ;;  %7842 = vmatmul.mubr.f32.gmra.mxu0 %v4023_v34  ;;  %v1092_v36 = vadd.f32 %v948_v5, %v655_v60  ;;  %v1387_v42 = vmul.f32 %v9297_v11, %v1242_v20  ;;  %v978_v44 = vmul.f32 %v9295_v10, %v833_v16  ;;  %v4028_v51 = vld [vmem:[#allocation2 + $0xb2] sm:$0xff]  ;;  %v1710_v60 = vld [vmem:[#allocation15 + $0x10e8] sm:$0xff] }
 0x22b   : > { %7758 = vmatprep.mubr.f32.mxu1 %v4022_v33  ;;  %7844 = vmatprep.mubr.f32.mxu0 %v4024_v61  ;;  %v1515_v26 = vadd.f32 %v1371_v50, %v1076_v3  ;;  %v4027_v33 = vld [vmem:[#allocation2 + $0xaa] sm:$0xff]  ;;  %v9999_v46 = vadd.f32 %v2267_v53, %v1972_v37  ;;  %v1827_v38 = vmul.f32 %v9299_v17, %v1682_v62  ;;  %v2120_v50 = vld [vmem:[#allocation15 + $0x1480] sm:$0xff]  ;;  %v4030_v37 = vld [vmem:[#allocation2 + $0xc2] sm:$0xff] }
 0x22c   : > { %7890 = vmatprep.subr.mxu1 %v9840_v54  ;;  %7975 = vmatpush3.msra.mxu0 %v9921_v30  ;;  %v832_v30 = vld [vmem:[#allocation15 + $0x7e8] sm:$0xff]  ;;  %v1418_v43 = vmul.f32 %v9297_v11, %v1273_v32  ;;  %v1532_v57 = vadd.f32 %v1388_v14, %v1093_v27  ;;  %v1826_v55 = vmul.f32 %v9299_v17, %v1681_v58  ;;  %v4031_v27 = vld [vmem:[#allocation2 + $0xca] sm:$0xff] }
 0x22d   : > { %7891 = vmatpush3.msra.mxu1 %v9840_v54  ;;  %v979_v54 = vmul.f32 %v9295_v10, %v834_v1  ;;  %7976 = vmatprep.subr.mxu0 %v9929_v23  ;;  %v977_v49 = vmul.f32 %v9295_v10, %v832_v30  ;;  %v1531_v3 = vadd.f32 %v1387_v42, %v1092_v36  ;;  %v4032_v36 = vld [vmem:[#allocation2 + $0xd2] sm:$0xff]  ;;  %v2149_v58 = vld [vmem:[#allocation15 + $0x1568] sm:$0xff] }
 0x22e   : > { %7759 = vmatmul.mubr.f32.gmra.mxu1 %v4023_v34  ;;  %7845 = vmatmul.mubr.f32.gmra.mxu0 %v4025_v13  ;;  %v684_v34 = vld [vmem:[#allocation15 + $0x368] sm:$0xff]  ;;  %v1122_v2 = vadd.f32 %v978_v44, %v685_v48  ;;  %v1417_v4 = vmul.f32 %v9297_v11, %v1272_v35  ;;  %v1857_v1 = vmul.f32 %v9299_v17, %v1712_v25  ;;  %v2148_v25 = vld [vmem:[#allocation15 + $0x1560] sm:$0xff] }
 0x22f   : > { %7761 = vmatprep.mubr.f32.mxu1 %v4024_v61  ;;  %7847 = vmatprep.mubr.f32.mxu0 %v4026_v24  ;;  %v1123_v21 = vadd.f32 %v979_v54, %v686_v29  ;;  %v1270_v61 = vld [vmem:[#allocation15 + $0xc60] sm:$0xff]  ;;  %v1121_v15 = vadd.f32 %v977_v49, %v684_v34  ;;  %v1416_v5 = vmul.f32 %v9297_v11, %v1271_v56  ;;  %v2150_v29 = vld [vmem:[#allocation15 + $0x1570] sm:$0xff] }
 0x230   : > { %7892 = vmatprep.subr.mxu1 %v9849_v18  ;;  %7977 = vmatpush3.msra.mxu0 %v9929_v23  ;;  %v1954_v23 = vadd.f32 %v1810_v6, %v1515_v26  ;;  %v1415_v16 = vmul.f32 %v9297_v11, %v1270_v61  ;;  %v1709_v6 = vld [vmem:[#allocation15 + $0x10e0] sm:$0xff]  ;;  %v1561_v54 = vadd.f32 %v1417_v4, %v1122_v2  ;;  %v830_v26 = vld [vmem:[#allocation15 + $0x7d8] sm:$0xff]  ;;  %v828_v2 = vld [vmem:[#allocation15 + $0x7c8] sm:$0xff] }
 0x231   : > { %7893 = vmatpush3.msra.mxu1 %v9849_v18  ;;  %v976_v18 = vmul.f32 %v9295_v10, %v831_v9  ;;  %7978 = vmatprep.subr.mxu0 %v9969_v41  ;;  %v1562_v53 = vadd.f32 %v1418_v43, %v1123_v21  ;;  %v1856_v30 = vmul.f32 %v9299_v17, %v1711_v7  ;;  %v1269_v21 = vld [vmem:[#allocation15 + $0xc58] sm:$0xff]  ;;  %v829_v43 = vld [vmem:[#allocation15 + $0x7d0] sm:$0xff]  ;;  %v4033_v56 = vld [vmem:[#allocation2 + $0xda] sm:$0xff] }
 0x232   : > { %7762 = vmatmul.mubr.f32.gmra.mxu1 %v4025_v13  ;;  %7848 = vmatmul.mubr.f32.gmra.mxu0 %v4027_v33  ;;  %v2151_v13 = vld [vmem:[#allocation15 + $0x1578] sm:$0xff]  ;;  %v1970_v14 = vadd.f32 %v1826_v55, %v1531_v3  ;;  %v1560_v32 = vadd.f32 %v1416_v5, %v1121_v15  ;;  %v1855_v9 = vmul.f32 %v9299_v17, %v1710_v60  ;;  %v681_v15 = vld [vmem:[#allocation15 + $0x350] sm:$0xff] }
 0x233   : > { %7764 = vmatprep.mubr.f32.mxu1 %v4026_v24  ;;  %7850 = vmatprep.mubr.f32.mxu0 %v4028_v51  ;;  %v1120_v20 = vadd.f32 %v976_v18, %v683_v59  ;;  %v2265_v24 = vmul.f32 %v9303_v22, %v2120_v50  ;;  %v2296_v62 = vmul.f32 %v9303_v22, %v2151_v13  ;;  %v1289_v55 = vld [vmem:[#allocation15 + $0xcf8] sm:$0xff]  ;;  %v4034_v59 = vld [vmem:[#allocation2 + $0xe2] sm:$0xff] }
 0x234   : > { %7894 = vmatprep.subr.mxu1 %v9862_v39  ;;  %7979 = vmatpush3.msra.mxu0 %v9969_v41  ;;  %v2266_v41 = vmul.f32 %v9303_v22, %v2121_v0  ;;  %v2001_v42 = vadd.f32 %v1857_v1, %v1562_v53  ;;  %v975_v48 = vmul.f32 %v9295_v10, %v830_v26  ;;  %v1708_v50 = vld [vmem:[#allocation15 + $0x10d8] sm:$0xff]  ;;  %v827_v1 = vld [vmem:[#allocation15 + $0x7c0] sm:$0xff]  ;;  %v1268_v5 = vld [vmem:[#allocation15 + $0xc50] sm:$0xff] }
 0x235   : > { %7895 = vmatpush3.msra.mxu1 %v9862_v39  ;;  %v1971_v39 = vadd.f32 %v1827_v38, %v1532_v57  ;;  %7980 = vmatprep.subr.mxu0 %v9971_v63  ;;  %v1559_v44 = vadd.f32 %v1415_v16, %v1120_v20  ;;  %v1854_v38 = vmul.f32 %v9299_v17, %v1709_v6  ;;  %v702_v57 = vld [vmem:[#allocation15 + $0x3f8] sm:$0xff] }
 0x236   : > { %7765 = vmatmul.mubr.f32.gmra.mxu1 %v4027_v33  ;;  %7851 = vmatmul.mubr.f32.gmra.mxu0 %v4029_v8  ;;  %v850_v33 = vld [vmem:[#allocation15 + $0x878] sm:$0xff]  ;;  %v2000_v35 = vadd.f32 %v1856_v30, %v1561_v54  ;;  %v2295_v49 = vmul.f32 %v9303_v22, %v2150_v29  ;;  %v1999_v18 = vadd.f32 %v1855_v9, %v1560_v32  ;;  %v680_v54 = vld [vmem:[#allocation15 + $0x348] sm:$0xff]  ;;  %v2146_v29 = vld [vmem:[#allocation15 + $0x1550] sm:$0xff] }
 0x237   : > { %7767 = vmatprep.mubr.f32.mxu1 %v4028_v51  ;;  %7853 = vmatprep.mubr.f32.mxu0 %v4030_v37  ;;  %v682_v51 = vld [vmem:[#allocation15 + $0x358] sm:$0xff]  ;;  %v995_v34 = vmul.f32 %v9295_v10, %v850_v33  ;;  %v10039_v61 = vadd.f32 %v2296_v62, %v2001_v42  ;;  %v1998_v0 = vadd.f32 %v1854_v38, %v1559_v44  ;;  %v1267_v30 = vld [vmem:[#allocation15 + $0xc48] sm:$0xff]  ;;  %v679_v32 = vld [vmem:[#allocation15 + $0x340] sm:$0xff] }
 0x238   : > { %7896 = vmatprep.subr.mxu1 %v9900_v19  ;;  %7981 = vmatpush3.msra.mxu0 %v9971_v63  ;;  %v10027_v63 = vadd.f32 %v2266_v41, %v1971_v39  ;;  %v2293_v3 = vmul.f32 %v9303_v22, %v2148_v25  ;;  %v2147_v4 = vld [vmem:[#allocation15 + $0x1558] sm:$0xff]  ;;  %v10046_v7 = vadd.f32 %v2295_v49, %v2000_v35  ;;  %v1707_v39 = vld [vmem:[#allocation15 + $0x10d0] sm:$0xff]  ;;  %v1266_v9 = vld [vmem:[#allocation15 + $0xc40] sm:$0xff] }
 0x239   : > { %7897 = vmatpush3.msra.mxu1 %v9900_v19  ;;  %v10025_v19 = vadd.f32 %v9989_v40, %v1954_v23  ;;  %7982 = vmatprep.subr.mxu0 %v9979_v47  ;;  %v10036_v40 = vadd.f32 %v2265_v24, %v1970_v14  ;;  %v2294_v23 = vmul.f32 %v9303_v22, %v2149_v58  ;;  %v4035_v13 = vld [vmem:[#allocation2 + $0xea] sm:$0xff]  ;;  %v4036_v60 = vld [vmem:[#allocation2 + $0xf2] sm:$0xff]  ;;  %v4037_v44 = vld [vmem:[#allocation2 + $0xfa] sm:$0xff] }
 0x23a   : > { %7768 = vmatmul.mubr.f32.gmra.mxu1 %v4029_v8  ;;  %7854 = vmatmul.mubr.f32.gmra.mxu0 %v4031_v27  ;;  %v974_v8 = vmul.f32 %v9295_v10, %v829_v43  ;;  %v1434_v53 = vmul.f32 %v9297_v11, %v1289_v55  ;;  %v1853_v16 = vmul.f32 %v9299_v17, %v1708_v50  ;;  %v1728_v24 = vld [vmem:[#allocation15 + $0x1178] sm:$0xff]  ;;  %v849_v49 = vld [vmem:[#allocation15 + $0x870] sm:$0xff]  ;;  %v848_v55 = vld [vmem:[#allocation15 + $0x868] sm:$0xff] }
 0x23b   : > { %7770 = vmatprep.mubr.f32.mxu1 %v4030_v37  ;;  %7856 = vmatprep.mubr.f32.mxu0 %v4032_v36  ;;  %v1139_v37 = vadd.f32 %v995_v34, %v702_v57  ;;  %v10051_v20 = vadd.f32 %v2294_v23, %v1999_v18  ;;  %v973_v41 = vmul.f32 %v9295_v10, %v828_v2  ;;  %v2167_v35 = vld [vmem:[#allocation15 + $0x15f8] sm:$0xff]  ;;  %v1705_v57 = vld [vmem:[#allocation15 + $0x10c0] sm:$0xff] }
 0x23c   : > { %7898 = vmatprep.subr.mxu1 %v9913_v28  ;;  %7983 = vmatpush3.msra.mxu0 %v9979_v47  ;;  %v1414_v47 = vmul.f32 %v9297_v11, %v1269_v21  ;;  %v10055_v6 = vadd.f32 %v2293_v3, %v1998_v0  ;;  %v10058_v62 = vmul.f32 %v9303_v22, %v2147_v4  ;;  %v825_v0 = vld [vmem:[#allocation15 + $0x7b0] sm:$0xff] }
 0x23d   : > { %7899 = vmatpush3.msra.mxu1 %v9913_v28  ;;  %v1119_v28 = vadd.f32 %v975_v48, %v682_v51  ;;  %7984 = vmatprep.subr.mxu0 %v9984_v12  ;;  %v1413_v14 = vmul.f32 %v9297_v11, %v1268_v5  ;;  %v1852_v33 = vmul.f32 %v9299_v17, %v1707_v39  ;;  %v4038_v51 = vld [vmem:[#allocation2 + $0x102] sm:$0xff] }
 0x23e   : > { %7771 = vmatmul.mubr.f32.gmra.mxu1 %v4031_v27  ;;  %7857 = vmatmul.mubr.f32.gmra.mxu0 %v4033_v56  ;;  %v1118_v27 = vadd.f32 %v974_v8, %v681_v15  ;;  %v1578_v42 = vadd.f32 %v1434_v53, %v1139_v37  ;;  %v1873_v58 = vmul.f32 %v9299_v17, %v1728_v24  ;;  %v4040_v15 = vld [vmem:[#allocation2 + $0x112] sm:$0xff]  ;;  %v1287_v24 = vld [vmem:[#allocation15 + $0xce8] sm:$0xff] }
 0x23f   : > { %7773 = vmatprep.mubr.f32.mxu1 %v4032_v36  ;;  %7859 = vmatprep.mubr.f32.mxu0 %v4034_v59  ;;  %v1558_v26 = vadd.f32 %v1414_v47, %v1119_v28  ;;  %v1706_v36 = vld [vmem:[#allocation15 + $0x10c8] sm:$0xff]  ;;  %v1117_v38 = vadd.f32 %v973_v41, %v680_v54  ;;  %v1412_v25 = vmul.f32 %v9297_v11, %v1267_v30  ;;  %v4039_v28 = vld [vmem:[#allocation2 + $0x10a] sm:$0xff]  ;;  %v2144_v53 = vld [vmem:[#allocation15 + $0x1540] sm:$0xff] }
 0x240   : > { %7900 = vmatprep.subr.mxu1 %v9967_v52  ;;  %7985 = vmatpush3.msra.mxu0 %v9984_v12  ;;  %v826_v12 = vld [vmem:[#allocation15 + $0x7b8] sm:$0xff]  ;;  %v10071_v21 = vmul.f32 %v9303_v22, %v2146_v29  ;;  %v1411_v34 = vmul.f32 %v9297_v11, %v1266_v9  ;;  %v1557_v18 = vadd.f32 %v1413_v14, %v1118_v27  ;;  %v700_v41 = vld [vmem:[#allocation15 + $0x3e8] sm:$0xff]  ;;  %v847_v27 = vld [vmem:[#allocation15 + $0x860] sm:$0xff] }
 0x241   : > { %7901 = vmatpush3.msra.mxu1 %v9967_v52  ;;  %v972_v52 = vmul.f32 %v9295_v10, %v827_v1  ;;  %7986 = vmatprep.subr.mxu0 %v9999_v46  ;;  %v971_v48 = vmul.f32 %v9295_v10, %v826_v12  ;;  %v1851_v23 = vmul.f32 %v9299_v17, %v1706_v36  ;;  %v701_v1 = vld [vmem:[#allocation15 + $0x3f0] sm:$0xff]  ;;  %v4041_v54 = vld [vmem:[#allocation2 + $0x11a] sm:$0xff] }
 0x242   : > { %7774 = vmatmul.mubr.f32.gmra.mxu1 %v4033_v56  ;;  %7860 = vmatmul.mubr.f32.gmra.mxu0 %v4035_v13  ;;  %v678_v56 = vld [vmem:[#allocation15 + $0x338] sm:$0xff]  ;;  %v2017_v3 = vadd.f32 %v1873_v58, %v1578_v42  ;;  %v2312_v50 = vmul.f32 %v9303_v22, %v2167_v35  ;;  %v994_v2 = vmul.f32 %v9295_v10, %v849_v49  ;;  %v4042_v30 = vld [vmem:[#allocation2 + $0x122] sm:$0xff] }
 0x243   : > { %7776 = vmatprep.mubr.f32.mxu1 %v4034_v59  ;;  %7862 = vmatprep.mubr.f32.mxu0 %v4036_v60  ;;  %v1116_v43 = vadd.f32 %v972_v52, %v679_v32  ;;  %v2145_v59 = vld [vmem:[#allocation15 + $0x1548] sm:$0xff]  ;;  %v1556_v47 = vadd.f32 %v1412_v25, %v1117_v38  ;;  %v1115_v4 = vadd.f32 %v971_v48, %v678_v56  ;;  %v1264_v36 = vld [vmem:[#allocation15 + $0xc30] sm:$0xff] }
 0x244   : > { %7902 = vmatprep.subr.mxu1 %v9977_v31  ;;  %7987 = vmatpush3.msra.mxu0 %v9999_v46  ;;  %v1997_v46 = vadd.f32 %v1853_v16, %v1558_v26  ;;  %v1850_v37 = vmul.f32 %v9299_v17, %v1705_v57  ;;  %v993_v16 = vmul.f32 %v9295_v10, %v848_v55  ;;  %v1727_v42 = vld [vmem:[#allocation15 + $0x1170] sm:$0xff]  ;;  %v824_v38 = vld [vmem:[#allocation15 + $0x7a8] sm:$0xff]  ;;  %v699_v57 = vld [vmem:[#allocation15 + $0x3e0] sm:$0xff] }
 0x245   : > { %7903 = vmatpush3.msra.mxu1 %v9977_v31  ;;  %v1265_v31 = vld [vmem:[#allocation15 + $0xc38] sm:$0xff]  ;;  %7988 = vmatprep.subr.mxu0 %v10027_v63  ;;  %v1555_v5 = vadd.f32 %v1411_v34, %v1116_v43  ;;  %v970_v39 = vmul.f32 %v9295_v10, %v825_v0  ;;  %v10088_v52 = vadd.f32 %v2312_v50, %v2017_v3  ;;  %v1726_v49 = vld [vmem:[#allocation15 + $0x1168] sm:$0xff]  ;;  %v4674_v34 = vld [vmem:[#allocation2 + $0x14] sm:$0xff] }
 0x246   : > { %7777 = vmatmul.mubr.f32.gmra.mxu1 %v4035_v13  ;;  %7863 = vmatmul.mubr.f32.gmra.mxu0 %v4037_v44  ;;  %v1410_v8 = vmul.f32 %v9297_v11, %v1265_v31  ;;  %v1288_v13 = vld [vmem:[#allocation15 + $0xcf0] sm:$0xff]  ;;  %v1138_v12 = vadd.f32 %v994_v2, %v701_v1  ;;  %v1995_v14 = vadd.f32 %v1851_v23, %v1556_v47  ;;  %v4341_v43 = vld [vmem:[#allocation2 + $0x13] sm:$0xff] }
 0x247   : > { %7779 = vmatprep.mubr.f32.mxu1 %v4036_v60  ;;  %7865 = vmatprep.mubr.f32.mxu0 %v4038_v51  ;;  %v1704_v60 = vld [vmem:[#allocation15 + $0x10b8] sm:$0xff]  ;;  %v1433_v26 = vmul.f32 %v9297_v11, %v1288_v13  ;;  %v2289_v29 = vmul.f32 %v9303_v22, %v2144_v53  ;;  %v1994_v58 = vadd.f32 %v1850_v37, %v1555_v5  ;;  %v1286_v55 = vld [vmem:[#allocation15 + $0xce0] sm:$0xff]  ;;  %v1703_v3 = vld [vmem:[#allocation15 + $0x10b0] sm:$0xff] }
 0x248   : > { %7904 = vmatprep.subr.mxu1 %v10025_v19  ;;  %7989 = vmatpush3.msra.mxu0 %v10027_v63  ;;  %v2290_v63 = vmul.f32 %v9303_v22, %v2145_v59  ;;  %v1554_v32 = vadd.f32 %v1410_v8, %v1115_v4  ;;  %v1849_v9 = vmul.f32 %v9299_v17, %v1704_v60  ;;  %v2166_v50 = vld [vmem:[#allocation15 + $0x15f0] sm:$0xff]  ;;  %v676_v4 = vld [vmem:[#allocation15 + $0x328] sm:$0xff]  ;;  %v1725_v53 = vld [vmem:[#allocation15 + $0x1160] sm:$0xff] }
 0x249   : > { %7905 = vmatpush3.msra.mxu1 %v10025_v19  ;;  %v1996_v19 = vadd.f32 %v1852_v33, %v1557_v18  ;;  %7990 = vmatprep.subr.mxu0 %v10036_v40  ;;  %v677_v33 = vld [vmem:[#allocation15 + $0x330] sm:$0xff]  ;;  %v1137_v25 = vadd.f32 %v993_v16, %v700_v41  ;;  %v1432_v48 = vmul.f32 %v9297_v11, %v1287_v24  ;;  %v1263_v8 = vld [vmem:[#allocation15 + $0xc28] sm:$0xff]  ;;  %v698_v24 = vld [vmem:[#allocation15 + $0x3d8] sm:$0xff] }
 0x24a   : > { %7780 = vmatmul.mubr.f32.gmra.mxu1 %v4037_v44  ;;  %7866 = vmatmul.mubr.f32.gmra.mxu0 %v4039_v28  ;;  %v2143_v44 = vld [vmem:[#allocation15 + $0x1538] sm:$0xff]  ;;  %v1114_v56 = vadd.f32 %v970_v39, %v677_v33  ;;  %v1409_v31 = vmul.f32 %v9297_v11, %v1264_v36  ;;  %v1577_v18 = vadd.f32 %v1433_v26, %v1138_v12  ;;  %v2142_v47 = vld [vmem:[#allocation15 + $0x1530] sm:$0xff]  ;;  %v4342_v16 = vld [vmem:[#allocation2 + $0x1b] sm:$0xff] }
 0x24b   : > { %7782 = vmatprep.mubr.f32.mxu1 %v4038_v51  ;;  %7868 = vmatprep.mubr.f32.mxu0 %v4040_v15  ;;  %v10099_v35 = vadd.f32 %v10071_v21, %v1996_v19  ;;  %v992_v51 = vmul.f32 %v9295_v10, %v847_v27  ;;  %v1872_v23 = vmul.f32 %v9299_v17, %v1727_v42  ;;  %v4343_v12 = vld [vmem:[#allocation2 + $0x23] sm:$0xff] }
 0x24c   : > { %8046 = vmatprep.subr.mxu1 %v10039_v61  ;;  %7991 = vmatpush3.msra.mxu0 %v10036_v40  ;;  %v10096_v40 = vadd.f32 %v10058_v62, %v1997_v46  ;;  %v846_v62 = vld [vmem:[#allocation15 + $0x858] sm:$0xff]  ;;  %v10105_v59 = vadd.f32 %v2290_v63, %v1995_v14  ;;  %v1993_v21 = vadd.f32 %v1849_v9, %v1554_v32  ;;  %v845_v32 = vld [vmem:[#allocation15 + $0x850] sm:$0xff]  ;;  %v1702_v33 = vld [vmem:[#allocation15 + $0x10a8] sm:$0xff] }
 0x24d   : > { %8132 = vmatprep.subr.mxu0 %v10088_v52  ;;  %v4043_v46 = vld [vmem:[#allocation2 + $0x12a] sm:$0xff]  ;;  %v2288_v0 = vmul.f32 %v9303_v22, %v2143_v44  ;;  %v969_v2 = vmul.f32 %v9295_v10, %v824_v38  ;;  %v1576_v1 = vadd.f32 %v1432_v48, %v1137_v25  ;;  %v1871_v13 = vmul.f32 %v9299_v17, %v1726_v49  ;;  %v823_v44 = vld [vmem:[#allocation15 + $0x7a0] sm:$0xff]  ;;  %v2141_v38 = vld [vmem:[#allocation15 + $0x1528] sm:$0xff] }
 0x24e   : > { %7783 = vmatmul.mubr.f32.gmra.mxu1 %v4039_v28  ;;  %7869 = vmatmul.mubr.f32.gmra.mxu0 %v4041_v54  ;;  %v10109_v28 = vadd.f32 %v2289_v29, %v1994_v58  ;;  %v1136_v5 = vadd.f32 %v992_v51, %v699_v57  ;;  %v1431_v37 = vmul.f32 %v9297_v11, %v1286_v55  ;;  %v4676_v9 = vld [vmem:[#allocation2 + $0x24] sm:$0xff]  ;;  %v2164_v48 = vld [vmem:[#allocation15 + $0x15e0] sm:$0xff] }
 0x24f   : > { %7785 = vmatprep.mubr.f32.mxu1 %v4040_v15  ;;  %7871 = vmatprep.mubr.f32.mxu0 %v4042_v30  ;;  %v2165_v15 = vld [vmem:[#allocation15 + $0x15e8] sm:$0xff]  ;;  %v991_v60 = vmul.f32 %v9295_v10, %v846_v62  ;;  %v1553_v19 = vadd.f32 %v1409_v31, %v1114_v56  ;;  %v1848_v63 = vmul.f32 %v9299_v17, %v1703_v3  ;;  %v4677_v56 = vld [vmem:[#allocation2 + $0x2c] sm:$0xff]  ;;  %v4678_v3 = vld [vmem:[#allocation2 + $0x34] sm:$0xff] }
 0x250   : > { %v2016_v39 = vadd.f32 %v1872_v23, %v1577_v18  ;;  %v2311_v41 = vmul.f32 %v9303_v22, %v2166_v50  ;;  %v4675_v30 = vld [vmem:[#allocation2 + $0x1c] sm:$0xff]  ;;  %v10116_v26 = vadd.f32 %v2288_v0, %v1993_v21  ;;  %v10119_v27 = vmul.f32 %v9303_v22, %v2142_v47  ;;  %v4345_v31 = vld [vmem:[#allocation2 + $0x33] sm:$0xff]  ;;  %v1284_v21 = vld [vmem:[#allocation15 + $0xcd0] sm:$0xff] }
 0x251   : > { %v1113_v14 = vadd.f32 %v969_v2, %v676_v4  ;;  %v1408_v29 = vmul.f32 %v9297_v11, %v1263_v8  ;;  %v2015_v36 = vadd.f32 %v1871_v13, %v1576_v1  ;;  %v2310_v42 = vmul.f32 %v9303_v22, %v2165_v15  ;;  %v844_v0 = vld [vmem:[#allocation15 + $0x848] sm:$0xff]  ;;  %v1262_v4 = vld [vmem:[#allocation15 + $0xc20] sm:$0xff]  ;;  %v2163_v13 = vld [vmem:[#allocation15 + $0x15d8] sm:$0xff] }
 0x252   : > { %7786 = vmatmul.mubr.f32.gmra.mxu1 %v4041_v54  ;;  %7872 = vmatmul.mubr.f32.gmra.mxu0 %v4043_v46  ;;  %v1285_v54 = vld [vmem:[#allocation15 + $0xcd8] sm:$0xff]  ;;  %v1870_v58 = vmul.f32 %v9299_v17, %v1725_v53  ;;  %v1575_v25 = vadd.f32 %v1431_v37, %v1136_v5  ;;  %v1135_v49 = vadd.f32 %v991_v60, %v698_v24  ;;  %v697_v46 = vld [vmem:[#allocation15 + $0x3d0] sm:$0xff]  ;;  %v843_v15 = vld [vmem:[#allocation15 + $0x840] sm:$0xff] }
 0x253   : > { %7906 = vmatprep.mubr.f32.mxu1 %v4341_v43  ;;  %7992 = vmatprep.mubr.f32.mxu0 %v4674_v34  ;;  %v1430_v51 = vmul.f32 %v9297_v11, %v1285_v54  ;;  %v1724_v43 = vld [vmem:[#allocation15 + $0x1158] sm:$0xff]  ;;  %v1992_v18 = vadd.f32 %v1848_v63, %v1553_v19  ;;  %v2455_v23 = vadd.f32 %v2311_v41, %v2016_v39  ;;  %v4346_v5 = vld [vmem:[#allocation2 + $0x3b] sm:$0xff]  ;;  %v1723_v60 = vld [vmem:[#allocation15 + $0x1150] sm:$0xff] }
 0x254   : > { %v4344_v34 = vld [vmem:[#allocation2 + $0x2b] sm:$0xff]  ;;  %v990_v57 = vmul.f32 %v9295_v10, %v845_v32  ;;  %v1847_v55 = vmul.f32 %v9299_v17, %v1702_v33  ;;  %v968_v62 = vmul.f32 %v9295_v10, %v823_v44  ;;  %v2286_v50 = vmul.f32 %v9303_v22, %v2141_v38  ;;  %v4679_v19 = vld [vmem:[#allocation2 + $0x3c] sm:$0xff]  ;;  %v1701_v32 = vld [vmem:[#allocation15 + $0x10a0] sm:$0xff] }
 0x255   : > { %v2309_v2 = vmul.f32 %v9303_v22, %v2164_v48  ;;  %v1869_v47 = vmul.f32 %v9299_v17, %v1724_v43  ;;  %v2014_v8 = vadd.f32 %v1870_v58, %v1575_v25  ;;  %v1574_v1 = vadd.f32 %v1430_v51, %v1135_v49  ;;  %v696_v24 = vld [vmem:[#allocation15 + $0x3c8] sm:$0xff]  ;;  %v1282_v58 = vld [vmem:[#allocation15 + $0xcc0] sm:$0xff]  ;;  %v842_v44 = vld [vmem:[#allocation15 + $0x838] sm:$0xff] }
 0x256   : > { %7907 = vmatmul.mubr.f32.vlgmr.msra.gmra.mxu1 %v4342_v16  ;;  %7993 = vmatmul.mubr.f32.vlgmr.msra.gmra.mxu0 %v4675_v30  ;;  %v1134_v37 = vadd.f32 %v990_v57, %v697_v46  ;;  %v1429_v53 = vmul.f32 %v9297_v11, %v1284_v21  ;;  %v989_v16 = vmul.f32 %v9295_v10, %v844_v0  ;;  %v1283_v54 = vld [vmem:[#allocation15 + $0xcc8] sm:$0xff]  ;;  %v4348_v38 = vld [vmem:[#allocation2 + $0x4b] sm:$0xff]  ;;  %v4682_v57 = vld [vmem:[#allocation2 + $0x54] sm:$0xff] }
 0x257   : > { %8047 = vmatpush3.msra.mxu1 %v10039_v61  ;;  %7909 = vmatprep.mubr.f32.mxu1 %v4343_v12  ;;  %v1552_v61 = vadd.f32 %v1408_v29, %v1113_v14  ;;  %v1407_v41 = vmul.f32 %v9297_v11, %v1262_v4  ;;  %v4347_v30 = vld [vmem:[#allocation2 + $0x43] sm:$0xff]  ;;  %v10141_v14 = vadd.f32 %v10119_v27, %v1992_v18  ;;  %v2140_v27 = vld [vmem:[#allocation15 + $0x1520] sm:$0xff]  ;;  %v4681_v43 = vld [vmem:[#allocation2 + $0x4c] sm:$0xff] }
 0x258   : > { %7995 = vmatprep.mubr.f32.mxu0 %v4676_v9  ;;  %8048 = vmatprep.subr.mxu1 %v10046_v7  ;;  %v4680_v12 = vld [vmem:[#allocation2 + $0x44] sm:$0xff]  ;;  %v2308_v29 = vmul.f32 %v9303_v22, %v2163_v13  ;;  %v988_v9 = vmul.f32 %v9295_v10, %v843_v15  ;;  %v2013_v33 = vadd.f32 %v1869_v47, %v1574_v1  ;;  %v1721_v46 = vld [vmem:[#allocation15 + $0x1140] sm:$0xff]  ;;  %v4683_v0 = vld [vmem:[#allocation2 + $0x5c] sm:$0xff] }
 0x259   : > { %8049 = vmatpush3.msra.mxu1 %v10046_v7  ;;  %8133 = vmatpush3.msra.mxu0 %v10088_v52  ;;  %v675_v7 = vld [vmem:[#allocation15 + $0x320] sm:$0xff]  ;;  %v2454_v52 = vadd.f32 %v2310_v42, %v2015_v36  ;;  %v1991_v63 = vadd.f32 %v1847_v55, %v1552_v61  ;;  %v1868_v36 = vmul.f32 %v9299_v17, %v1723_v60  ;;  %v2162_v48 = vld [vmem:[#allocation15 + $0x15d0] sm:$0xff]  ;;  %v822_v61 = vld [vmem:[#allocation15 + $0x798] sm:$0xff] }
 0x25a   : > { %7910 = vmatmul.mubr.f32.gmra.mxu1 %v4344_v34  ;;  %7996 = vmatmul.mubr.f32.gmra.mxu0 %v4677_v56  ;;  %v1112_v39 = vadd.f32 %v968_v62, %v675_v7  ;;  %v695_v42 = vld [vmem:[#allocation15 + $0x3c0] sm:$0xff]  ;;  %v1573_v25 = vadd.f32 %v1429_v53, %v1134_v37  ;;  %v1133_v49 = vadd.f32 %v989_v16, %v696_v24  ;;  %v694_v47 = vld [vmem:[#allocation15 + $0x3b8] sm:$0xff]  ;;  %v2161_v1 = vld [vmem:[#allocation15 + $0x15c8] sm:$0xff] }
 0x25b   : > { %7912 = vmatprep.mubr.f32.mxu1 %v4345_v31  ;;  %7998 = vmatprep.mubr.f32.mxu0 %v4678_v3  ;;  %v1428_v51 = vmul.f32 %v9297_v11, %v1283_v54  ;;  %v4349_v34 = vld [vmem:[#allocation2 + $0x53] sm:$0xff]  ;;  %v10149_v56 = vadd.f32 %v2286_v50, %v1991_v63  ;;  %v1846_v18 = vmul.f32 %v9299_v17, %v1701_v32  ;;  %v821_v13 = vld [vmem:[#allocation15 + $0x790] sm:$0xff] }
 0x25c   : > { %8050 = vmatprep.subr.mxu1 %v10051_v20  ;;  %8134 = vmatprep.subr.mxu0 %v2455_v23  ;;  %v1551_v31 = vadd.f32 %v1407_v41, %v1112_v39  ;;  %v1132_v55 = vadd.f32 %v988_v9, %v695_v42  ;;  %v1427_v62 = vmul.f32 %v9297_v11, %v1282_v58  ;;  %v1281_v7 = vld [vmem:[#allocation15 + $0xcb8] sm:$0xff]  ;;  %v841_v15 = vld [vmem:[#allocation15 + $0x830] sm:$0xff]  ;;  %v2160_v41 = vld [vmem:[#allocation15 + $0x15c0] sm:$0xff] }
 0x25d   : > { %8051 = vmatpush3.msra.mxu1 %v10051_v20  ;;  %8135 = vmatpush3.msra.mxu0 %v2455_v23  ;;  %v2453_v20 = vadd.f32 %v2309_v2, %v2014_v8  ;;  %v1722_v23 = vld [vmem:[#allocation15 + $0x1148] sm:$0xff]  ;;  %v987_v21 = vmul.f32 %v9295_v10, %v842_v44  ;;  %v2452_v3 = vadd.f32 %v2308_v29, %v2013_v33  ;;  %v4684_v37 = vld [vmem:[#allocation2 + $0x64] sm:$0xff]  ;;  %v1261_v16 = vld [vmem:[#allocation15 + $0xc18] sm:$0xff] }
 0x25e   : > { %7913 = vmatmul.mubr.f32.gmra.mxu1 %v4346_v5  ;;  %7999 = vmatmul.mubr.f32.gmra.mxu0 %v4679_v19  ;;  %v10155_v50 = vmul.f32 %v9303_v22, %v2140_v27  ;;  %v2307_v2 = vmul.f32 %v9303_v22, %v2162_v48  ;;  %v2012_v4 = vadd.f32 %v1868_v36, %v1573_v25  ;;  %v4351_v5 = vld [vmem:[#allocation2 + $0x63] sm:$0xff]  ;;  %v674_v63 = vld [vmem:[#allocation15 + $0x318] sm:$0xff] }
 0x25f   : > { %7915 = vmatprep.mubr.f32.mxu1 %v4347_v30  ;;  %8001 = vmatprep.mubr.f32.mxu0 %v4680_v12  ;;  %v1867_v8 = vmul.f32 %v9299_v17, %v1722_v23  ;;  %v1990_v53 = vadd.f32 %v1846_v18, %v1551_v31  ;;  %v967_v60 = vmul.f32 %v9295_v10, %v822_v61  ;;  %v1720_v30 = vld [vmem:[#allocation15 + $0x1138] sm:$0xff]  ;;  %v1260_v32 = vld [vmem:[#allocation15 + $0xc10] sm:$0xff]  ;;  %v4354_v61 = vld [vmem:[#allocation2 + $0x7b] sm:$0xff] }
 0x260   : > { %8052 = vmatprep.subr.mxu1 %v10055_v6  ;;  %8136 = vmatprep.subr.mxu0 %v2454_v52  ;;  %v1866_v19 = vmul.f32 %v9299_v17, %v1721_v46  ;;  %v1571_v39 = vadd.f32 %v1427_v62, %v1132_v55  ;;  %v1131_v24 = vadd.f32 %v987_v21, %v694_v47  ;;  %v4352_v12 = vld [vmem:[#allocation2 + $0x6b] sm:$0xff]  ;;  %v4353_v27 = vld [vmem:[#allocation2 + $0x73] sm:$0xff]  ;;  %v4687_v21 = vld [vmem:[#allocation2 + $0x7c] sm:$0xff] }
 0x261   : > { %8053 = vmatpush3.msra.mxu1 %v10055_v6  ;;  %8137 = vmatpush3.msra.mxu0 %v2454_v52  ;;  %v4350_v6 = vld [vmem:[#allocation2 + $0x5b] sm:$0xff]  ;;  %v1572_v52 = vadd.f32 %v1428_v51, %v1133_v49  ;;  %v1426_v54 = vmul.f32 %v9297_v11, %v1281_v7  ;;  %v966_v29 = vmul.f32 %v9295_v10, %v821_v13  ;;  %v673_v42 = vld [vmem:[#allocation15 + $0x310] sm:$0xff]  ;;  %v2159_v23 = vld [vmem:[#allocation15 + $0x15b8] sm:$0xff] }
 0x262   : > { %7916 = vmatmul.mubr.f32.gmra.mxu1 %v4348_v38  ;;  %8002 = vmatmul.mubr.f32.gmra.mxu0 %v4681_v43  ;;  %v986_v9 = vmul.f32 %v9295_v10, %v841_v15  ;;  %v1406_v36 = vmul.f32 %v9297_v11, %v1261_v16  ;;  %v693_v58 = vld [vmem:[#allocation15 + $0x3b0] sm:$0xff]  ;;  %v4685_v38 = vld [vmem:[#allocation2 + $0x6c] sm:$0xff]  ;;  %v1111_v25 = vadd.f32 %v967_v60, %v674_v63  ;;  %v840_v51 = vld [vmem:[#allocation15 + $0x828] sm:$0xff] }
 0x263   : > { %7918 = vmatprep.mubr.f32.mxu1 %v4349_v34  ;;  %8004 = vmatprep.mubr.f32.mxu0 %v4682_v57  ;;  %v2011_v33 = vadd.f32 %v1867_v8, %v1572_v52  ;;  %v1280_v44 = vld [vmem:[#allocation15 + $0xcb0] sm:$0xff]  ;;  %v2305_v48 = vmul.f32 %v9303_v22, %v2160_v41  ;;  %v1865_v49 = vmul.f32 %v9299_v17, %v1720_v30  ;;  %v4686_v43 = vld [vmem:[#allocation2 + $0x74] sm:$0xff]  ;;  %v1700_v34 = vld [vmem:[#allocation15 + $0x1098] sm:$0xff] }
 0x264   : > { %8054 = vmatprep.subr.mxu1 %v10096_v40  ;;  %8138 = vmatprep.subr.mxu0 %v2453_v20  ;;  %v2010_v31 = vadd.f32 %v1866_v19, %v1571_v39  ;;  %v1570_v18 = vadd.f32 %v1426_v54, %v1131_v24  ;;  %v1405_v57 = vmul.f32 %v9297_v11, %v1260_v32  ;;  %v1699_v55 = vld [vmem:[#allocation15 + $0x1090] sm:$0xff]  ;;  %v692_v8 = vld [vmem:[#allocation15 + $0x3a8] sm:$0xff]  ;;  %v839_v13 = vld [vmem:[#allocation15 + $0x820] sm:$0xff] }
 0x265   : > { %8055 = vmatpush3.msra.mxu1 %v10096_v40  ;;  %8139 = vmatpush3.msra.mxu0 %v2453_v20  ;;  %v2306_v40 = vmul.f32 %v9303_v22, %v2161_v1  ;;  %v2451_v20 = vadd.f32 %v2307_v2, %v2012_v4  ;;  %v1130_v62 = vadd.f32 %v986_v9, %v693_v58  ;;  %v1719_v2 = vld [vmem:[#allocation15 + $0x1130] sm:$0xff]  ;;  %v1279_v1 = vld [vmem:[#allocation15 + $0xca8] sm:$0xff]  ;;  %v2139_v15 = vld [vmem:[#allocation15 + $0x1518] sm:$0xff] }
 0x266   : > { %7919 = vmatmul.mubr.f32.gmra.mxu1 %v4350_v6  ;;  %8005 = vmatmul.mubr.f32.gmra.mxu0 %v4683_v0  ;;  %v1425_v46 = vmul.f32 %v9297_v11, %v1280_v44  ;;  %v4355_v6 = vld [vmem:[#allocation2 + $0x83] sm:$0xff]  ;;  %v10176_v0 = vadd.f32 %v10155_v50, %v1990_v53  ;;  %v985_v47 = vmul.f32 %v9295_v10, %v840_v51  ;;  %v838_v39 = vld [vmem:[#allocation15 + $0x818] sm:$0xff] }
 0x267   : > { %7921 = vmatprep.mubr.f32.mxu1 %v4351_v5  ;;  %8007 = vmatprep.mubr.f32.mxu0 %v4684_v37  ;;  %v1550_v7 = vadd.f32 %v1406_v36, %v1111_v25  ;;  %v1845_v4 = vmul.f32 %v9299_v17, %v1700_v34  ;;  %v2304_v52 = vmul.f32 %v9303_v22, %v2159_v23  ;;  %v4688_v50 = vld [vmem:[#allocation2 + $0x84] sm:$0xff]  ;;  %v4689_v24 = vld [vmem:[#allocation2 + $0x8c] sm:$0xff]  ;;  %v1278_v36 = vld [vmem:[#allocation15 + $0xca0] sm:$0xff] }
 0x268   : > { %8056 = vmatprep.subr.mxu1 %v10099_v35  ;;  %8140 = vmatprep.subr.mxu0 %v2452_v3  ;;  %v2449_v5 = vadd.f32 %v2305_v48, %v2010_v31  ;;  %v2009_v37 = vadd.f32 %v1865_v49, %v1570_v18  ;;  %v1844_v53 = vmul.f32 %v9299_v17, %v1699_v55  ;;  %v2138_v60 = vld [vmem:[#allocation15 + $0x1510] sm:$0xff]  ;;  %v690_v51 = vld [vmem:[#allocation15 + $0x398] sm:$0xff]  ;;  %v4358_v31 = vld [vmem:[#allocation2 + $0x9b] sm:$0xff] }
 0x269   : > { %8057 = vmatpush3.msra.mxu1 %v10099_v35  ;;  %8141 = vmatpush3.msra.mxu0 %v2452_v3  ;;  %v1110_v35 = vadd.f32 %v966_v29, %v673_v42  ;;  %v2450_v3 = vadd.f32 %v2306_v40, %v2011_v33  ;;  %v1569_v16 = vadd.f32 %v1425_v46, %v1130_v62  ;;  %v2158_v63 = vld [vmem:[#allocation15 + $0x15b0] sm:$0xff]  ;;  %v4357_v29 = vld [vmem:[#allocation2 + $0x93] sm:$0xff]  ;;  %v4691_v18 = vld [vmem:[#allocation2 + $0x9c] sm:$0xff] }
 0x26a   : > { %7922 = vmatmul.mubr.f32.gmra.mxu1 %v4352_v12  ;;  %8008 = vmatmul.mubr.f32.gmra.mxu0 %v4685_v38  ;;  %v1864_v19 = vmul.f32 %v9299_v17, %v1719_v2  ;;  %v4356_v41 = vld [vmem:[#allocation2 + $0x8b] sm:$0xff]  ;;  %v1129_v54 = vadd.f32 %v985_v47, %v692_v8  ;;  %v1424_v30 = vmul.f32 %v9297_v11, %v1279_v1  ;;  %v1718_v12 = vld [vmem:[#allocation15 + $0x1128] sm:$0xff]  ;;  %v691_v33 = vld [vmem:[#allocation15 + $0x3a0] sm:$0xff] }
 0x26b   : > { %7924 = vmatprep.mubr.f32.mxu1 %v4353_v27  ;;  %8010 = vmatprep.mubr.f32.mxu0 %v4686_v43  ;;  %v984_v40 = vmul.f32 %v9295_v10, %v839_v13  ;;  %v1989_v32 = vadd.f32 %v1845_v4, %v1550_v7  ;;  %v2284_v9 = vmul.f32 %v9303_v22, %v2139_v15  ;;  %v4690_v42 = vld [vmem:[#allocation2 + $0x94] sm:$0xff]  ;;  %v2157_v38 = vld [vmem:[#allocation15 + $0x15a8] sm:$0xff]  ;;  %v1277_v43 = vld [vmem:[#allocation15 + $0xc98] sm:$0xff] }
 0x26c   : > { %8058 = vmatprep.subr.mxu1 %v10105_v59  ;;  %8142 = vmatprep.subr.mxu0 %v2451_v20  ;;  %v2448_v58 = vadd.f32 %v2304_v52, %v2009_v37  ;;  %v2303_v44 = vmul.f32 %v9303_v22, %v2158_v63  ;;  %v820_v27 = vld [vmem:[#allocation15 + $0x788] sm:$0xff]  ;;  %v983_v25 = vmul.f32 %v9295_v10, %v838_v39  ;;  %v837_v34 = vld [vmem:[#allocation15 + $0x810] sm:$0xff]  ;;  %v1716_v52 = vld [vmem:[#allocation15 + $0x1118] sm:$0xff] }
 0x26d   : > { %8059 = vmatpush3.msra.mxu1 %v10105_v59  ;;  %8143 = vmatpush3.msra.mxu0 %v2451_v20  ;;  %v1549_v59 = vadd.f32 %v1405_v57, %v1110_v35  ;;  %v2283_v20 = vmul.f32 %v9303_v22, %v2138_v60  ;;  %v2008_v48 = vadd.f32 %v1864_v19, %v1569_v16  ;;  %v1259_v57 = vld [vmem:[#allocation15 + $0xc08] sm:$0xff]  ;;  %v4692_v62 = vld [vmem:[#allocation2 + $0xa4] sm:$0xff]  ;;  %v819_v16 = vld [vmem:[#allocation15 + $0x780] sm:$0xff] }
 0x26e   : > { %7925 = vmatmul.mubr.f32.gmra.mxu1 %v4354_v61  ;;  %8011 = vmatmul.mubr.f32.gmra.mxu0 %v4687_v21  ;;  %v1863_v49 = vmul.f32 %v9299_v17, %v1718_v12  ;;  %v1568_v23 = vadd.f32 %v1424_v30, %v1129_v54  ;;  %v1128_v61 = vadd.f32 %v984_v40, %v691_v33  ;;  %v4359_v55 = vld [vmem:[#allocation2 + $0xa3] sm:$0xff]  ;;  %v4693_v63 = vld [vmem:[#allocation2 + $0xac] sm:$0xff]  ;;  %v2156_v54 = vld [vmem:[#allocation15 + $0x15a0] sm:$0xff] }
 0x26f   : > { %7927 = vmatprep.mubr.f32.mxu1 %v4355_v6  ;;  %8013 = vmatprep.mubr.f32.mxu0 %v4688_v50  ;;  %v1423_v35 = vmul.f32 %v9297_v11, %v1278_v36  ;;  %v10196_v46 = vadd.f32 %v2284_v9, %v1989_v32  ;;  %v2302_v21 = vmul.f32 %v9303_v22, %v2157_v38  ;;  %v672_v2 = vld [vmem:[#allocation15 + $0x308] sm:$0xff]  ;;  %v689_v15 = vld [vmem:[#allocation15 + $0x390] sm:$0xff]  ;;  %v4361_v39 = vld [vmem:[#allocation2 + $0xb3] sm:$0xff] }
 0x270   : > { %8060 = vmatprep.subr.mxu1 %v10109_v28  ;;  %8144 = vmatprep.subr.mxu0 %v2450_v3  ;;  %v965_v6 = vmul.f32 %v9295_v10, %v820_v27  ;;  %v1698_v47 = vld [vmem:[#allocation15 + $0x1088] sm:$0xff]  ;;  %v1127_v7 = vadd.f32 %v983_v25, %v690_v51  ;;  %v1422_v4 = vmul.f32 %v9297_v11, %v1277_v43  ;;  %v4694_v12 = vld [vmem:[#allocation2 + $0xb4] sm:$0xff] }
 0x271   : > { %8061 = vmatpush3.msra.mxu1 %v10109_v28  ;;  %8145 = vmatpush3.msra.mxu0 %v2450_v3  ;;  %v1988_v28 = vadd.f32 %v1844_v53, %v1549_v59  ;;  %v1717_v3 = vld [vmem:[#allocation15 + $0x1120] sm:$0xff]  ;;  %v982_v8 = vmul.f32 %v9295_v10, %v837_v34  ;;  %v2447_v13 = vadd.f32 %v2303_v44, %v2008_v48  ;;  %v2137_v53 = vld [vmem:[#allocation15 + $0x1508] sm:$0xff] }
 0x272   : > { %7928 = vmatmul.mubr.f32.gmra.mxu1 %v4356_v41  ;;  %8014 = vmatmul.mubr.f32.gmra.mxu0 %v4689_v24  ;;  %v1404_v50 = vmul.f32 %v9297_v11, %v1259_v57  ;;  %v2007_v37 = vadd.f32 %v1863_v49, %v1568_v23  ;;  %v1567_v60 = vadd.f32 %v1423_v35, %v1128_v61  ;;  %v836_v19 = vld [vmem:[#allocation15 + $0x808] sm:$0xff]  ;;  %v866_v23 = vld [vmem:[#allocation15 + $0x8f8] sm:$0xff]  ;;  %v4696_v57 = vld [vmem:[#allocation2 + $0xc4] sm:$0xff] }
 0x273   : > { %7930 = vmatprep.mubr.f32.mxu1 %v4357_v29  ;;  %8016 = vmatprep.mubr.f32.mxu0 %v4690_v42  ;;  %v10202_v1 = vadd.f32 %v2283_v20, %v1988_v28  ;;  %v1862_v59 = vmul.f32 %v9299_v17, %v1717_v3  ;;  %v1109_v41 = vadd.f32 %v965_v6, %v672_v2  ;;  %v2155_v29 = vld [vmem:[#allocation15 + $0x1598] sm:$0xff]  ;;  %v1715_v20 = vld [vmem:[#allocation15 + $0x1110] sm:$0xff]  ;;  %v4362_v33 = vld [vmem:[#allocation2 + $0xbb] sm:$0xff] }
 0x274   : > { %8062 = vmatprep.subr.mxu1 %v10116_v26  ;;  %8146 = vmatprep.subr.mxu0 %v2449_v5  ;;  %v1843_v24 = vmul.f32 %v9299_v17, %v1698_v47  ;;  %v1861_v30 = vmul.f32 %v9299_v17, %v1716_v52  ;;  %v1566_v40 = vadd.f32 %v1422_v4, %v1127_v7  ;;  %v671_v28 = vld [vmem:[#allocation15 + $0x300] sm:$0xff]  ;;  %v688_v48 = vld [vmem:[#allocation15 + $0x388] sm:$0xff]  ;;  %v4364_v47 = vld [vmem:[#allocation2 + $0xcb] sm:$0xff] }
 0x275   : > { %8063 = vmatpush3.msra.mxu1 %v10116_v26  ;;  %8147 = vmatpush3.msra.mxu0 %v2449_v5  ;;  %v4360_v26 = vld [vmem:[#allocation2 + $0xab] sm:$0xff]  ;;  %v1126_v32 = vadd.f32 %v982_v8, %v689_v15  ;;  %v10212_v36 = vmul.f32 %v9303_v22, %v2137_v53  ;;  %v964_v42 = vmul.f32 %v9295_v10, %v819_v16  ;;  %v1275_v49 = vld [vmem:[#allocation15 + $0xc88] sm:$0xff]  ;;  %v1274_v8 = vld [vmem:[#allocation15 + $0xc80] sm:$0xff] }
 0x276   : > { %7931 = vmatmul.mubr.f32.gmra.mxu1 %v4358_v31  ;;  %8017 = vmatmul.mubr.f32.gmra.mxu0 %v4691_v18  ;;  %v1276_v5 = vld [vmem:[#allocation15 + $0xc90] sm:$0xff]  ;;  %v981_v44 = vmul.f32 %v9295_v10, %v836_v19  ;;  %v2446_v38 = vadd.f32 %v2302_v21, %v2007_v37  ;;  %v2006_v27 = vadd.f32 %v1862_v59, %v1567_v60  ;;  %v835_v18 = vld [vmem:[#allocation15 + $0x800] sm:$0xff]  ;;  %v1714_v2 = vld [vmem:[#allocation15 + $0x1108] sm:$0xff] }
 0x277   : > { %7933 = vmatprep.mubr.f32.mxu1 %v4359_v55  ;;  %8019 = vmatprep.mubr.f32.mxu0 %v4692_v62  ;;  %v1421_v9 = vmul.f32 %v9297_v11, %v1276_v5  ;;  %v2301_v25 = vmul.f32 %v9303_v22, %v2156_v54  ;;  %v4363_v51 = vld [vmem:[#allocation2 + $0xc3] sm:$0xff]  ;;  %v1548_v43 = vadd.f32 %v1404_v50, %v1109_v41  ;;  %v1697_v21 = vld [vmem:[#allocation15 + $0x1080] sm:$0xff]  ;;  %v4697_v7 = vld [vmem:[#allocation2 + $0xcc] sm:$0xff] }
 0x278   : > { %8064 = vmatprep.subr.mxu1 %v10141_v14  ;;  %8148 = vmatprep.subr.mxu0 %v2448_v58  ;;  %v2300_v34 = vmul.f32 %v9303_v22, %v2155_v29  ;;  %v1860_v31 = vmul.f32 %v9299_v17, %v1715_v20  ;;  %v2005_v61 = vadd.f32 %v1861_v30, %v1566_v40  ;;  %v2154_v55 = vld [vmem:[#allocation15 + $0x1590] sm:$0xff]  ;;  %v687_v5 = vld [vmem:[#allocation15 + $0x380] sm:$0xff]  ;;  %v718_v37 = vld [vmem:[#allocation15 + $0x478] sm:$0xff] }
 0x279   : > { %8065 = vmatpush3.msra.mxu1 %v10141_v14  ;;  %8149 = vmatpush3.msra.mxu0 %v2448_v58  ;;  %v4695_v14 = vld [vmem:[#allocation2 + $0xbc] sm:$0xff]  ;;  %v1258_v58 = vld [vmem:[#allocation15 + $0xc00] sm:$0xff]  ;;  %v1565_v35 = vadd.f32 %v1421_v9, %v1126_v32  ;;  %v1125_v6 = vadd.f32 %v981_v44, %v688_v48  ;;  %v1420_v3 = vmul.f32 %v9297_v11, %v1275_v49  ;;  %v1305_v53 = vld [vmem:[#allocation15 + $0xd78] sm:$0xff]  ;;  %v10241_v49 = vpop.f32.mrf.mxu0 }
 0x27a   : > { %7934 = vmatmul.mubr.f32.gmra.mxu1 %v4360_v26  ;;  %8020 = vmatmul.mubr.f32.gmra.mxu0 %v4693_v63  ;;  %v1403_v62 = vmul.f32 %v9297_v11, %v1258_v58  ;;  %v2445_v4 = vadd.f32 %v2301_v25, %v2006_v27  ;;  %v980_v52 = vmul.f32 %v9295_v10, %v835_v18  ;;  %v4365_v60 = vld [vmem:[#allocation2 + $0xd3] sm:$0xff]  ;;  %v4366_v9 = vld [vmem:[#allocation2 + $0xdb] sm:$0xff]  ;;  %v4368_v18 = vld [vmem:[#allocation2 + $0xeb] sm:$0xff] }
 0x27b   : > { %7936 = vmatprep.mubr.f32.mxu1 %v4361_v39  ;;  %8022 = vmatprep.mubr.f32.mxu0 %v4694_v12  ;;  %v1011_v26 = vmul.f32 %v9295_v10, %v866_v23  ;;  %v2299_v50 = vmul.f32 %v9303_v22, %v2154_v55  ;;  %v1842_v15 = vmul.f32 %v9299_v17, %v1697_v21  ;;  %v4698_v59 = vld [vmem:[#allocation2 + $0xd4] sm:$0xff]  ;;  %v1744_v32 = vld [vmem:[#allocation15 + $0x11f8] sm:$0xff]  ;;  %v4699_v20 = vld [vmem:[#allocation2 + $0xdc] sm:$0xff] }
 0x27c   : > { %8066 = vmatprep.subr.mxu1 %v10149_v56  ;;  %8150 = vmatprep.subr.mxu0 %v2447_v13  ;;  %v2444_v16 = vadd.f32 %v2300_v34, %v2005_v61  ;;  %v2004_v19 = vadd.f32 %v1860_v31, %v1565_v35  ;;  %v1859_v63 = vmul.f32 %v9299_v17, %v1714_v2  ;;  %v2136_v39 = vld [vmem:[#allocation15 + $0x1500] sm:$0xff]  ;;  %v2183_v48 = vld [vmem:[#allocation15 + $0x1678] sm:$0xff]  ;;  %v865_v31 = vld [vmem:[#allocation15 + $0x8f0] sm:$0xff] }
 0x27d   : > { %8067 = vmatpush3.msra.mxu1 %v10149_v56  ;;  %8151 = vmatpush3.msra.mxu0 %v2447_v13  ;;  %v1108_v56 = vadd.f32 %v964_v42, %v671_v28  ;;  %v1987_v13 = vadd.f32 %v1843_v24, %v1548_v43  ;;  %v1564_v41 = vadd.f32 %v1420_v3, %v1125_v6  ;;  %v2153_v24 = vld [vmem:[#allocation15 + $0x1588] sm:$0xff]  ;;  %v1713_v12 = vld [vmem:[#allocation15 + $0x1100] sm:$0xff]  ;;  %v4700_v42 = vld [vmem:[#allocation2 + $0xe4] sm:$0xff] }
 0x27e   : > { %7937 = vmatmul.mubr.f32.gmra.mxu1 %v4362_v33  ;;  %8023 = vmatmul.mubr.f32.gmra.mxu0 %v4695_v14  ;;  %v1419_v54 = vmul.f32 %v9297_v11, %v1274_v8  ;;  %v1124_v30 = vadd.f32 %v980_v52, %v687_v5  ;;  %v1155_v40 = vadd.f32 %v1011_v26, %v718_v37  ;;  %v4367_v14 = vld [vmem:[#allocation2 + $0xe3] sm:$0xff]  ;;  %v2152_v28 = vld [vmem:[#allocation15 + $0x1580] sm:$0xff]  ;;  %v4701_v23 = vld [vmem:[#allocation2 + $0xec] sm:$0xff] }
 0x27f   : > { %7939 = vmatprep.mubr.f32.mxu1 %v4363_v51  ;;  %8025 = vmatprep.mubr.f32.mxu0 %v4696_v57  ;;  %v1450_v29 = vmul.f32 %v9297_v11, %v1305_v53  ;;  %v2426_v33 = vadd.f32 %v10212_v36, %v1987_v13  ;;  %v2443_v58 = vadd.f32 %v2299_v50, %v2004_v19  ;;  %v10239_v36 = vpop.f32.mrf.mxu1  ;;  %v4369_v35 = vld [vmem:[#allocation2 + $0xf3] sm:$0xff]  ;;  %v864_v2 = vld [vmem:[#allocation15 + $0x8e8] sm:$0xff]  ;;  %v1304_v8 = vld [vmem:[#allocation15 + $0xd70] sm:$0xff] }
 0x280   : > { %8068 = vmatprep.subr.mxu1 %v10176_v0  ;;  %8152 = vmatprep.subr.mxu0 %v2446_v38  ;;  %v2281_v44 = vmul.f32 %v9303_v22, %v2136_v39  ;;  %v1858_v25 = vmul.f32 %v9299_v17, %v1713_v12  ;;  %11200 = vst [vmem:[#allocation37_spill] sm:$0xff] %v10239_v36  ;;  %11201 = vst [vmem:[#allocation38_spill] sm:$0xff] %v10241_v49  ;;  %v4702_v55 = vld [vmem:[#allocation2 + $0xf4] sm:$0xff]  ;;  %v4703_v50 = vld [vmem:[#allocation2 + $0xfc] sm:$0xff] }
 0x281   : > { %8069 = vmatpush3.msra.mxu1 %v10176_v0  ;;  %8153 = vmatpush3.msra.mxu0 %v2446_v38  ;;  %v1547_v0 = vadd.f32 %v1403_v62, %v1108_v56  ;;  %v2298_v38 = vmul.f32 %v9303_v22, %v2153_v24  ;;  %v2003_v51 = vadd.f32 %v1859_v63, %v1564_v41  ;;  %v4370_v13 = vld [vmem:[#allocation2 + $0xfb] sm:$0xff]  ;;  %v4371_v53 = vld [vmem:[#allocation2 + $0x103] sm:$0xff] }
 0x282   : > { %7940 = vmatmul.mubr.f32.gmra.mxu1 %v4364_v47  ;;  %8026 = vmatmul.mubr.f32.gmra.mxu0 %v4697_v7  ;;  %v1563_v43 = vadd.f32 %v1419_v54, %v1124_v30  ;;  %v1594_v34 = vadd.f32 %v1450_v29, %v1155_v40  ;;  %v2297_v62 = vmul.f32 %v9303_v22, %v2152_v28  ;;  %v716_v63 = vld [vmem:[#allocation15 + $0x468] sm:$0xff]  ;;  %v863_v12 = vld [vmem:[#allocation15 + $0x8e0] sm:$0xff]  ;;  %v4372_v29 = vld [vmem:[#allocation2 + $0x10b] sm:$0xff] }
 0x283   : > { %7942 = vmatprep.mubr.f32.mxu1 %v4365_v60  ;;  %8028 = vmatprep.mubr.f32.mxu0 %v4698_v59  ;;  %v1986_v27 = vadd.f32 %v1842_v15, %v1547_v0  ;;  %v2328_v21 = vmul.f32 %v9303_v22, %v2183_v48  ;;  %v1010_v3 = vmul.f32 %v9295_v10, %v865_v31  ;;  %v717_v15 = vld [vmem:[#allocation15 + $0x470] sm:$0xff]  ;;  %v1303_v0 = vld [vmem:[#allocation15 + $0xd68] sm:$0xff]  ;;  %v1302_v31 = vld [vmem:[#allocation15 + $0xd60] sm:$0xff] }
 0x284   : > { %8070 = vmatprep.subr.mxu1 %v10196_v46  ;;  %8154 = vmatprep.subr.mxu0 %v2445_v4  ;;  %v2442_v7 = vadd.f32 %v2298_v38, %v2003_v51  ;;  %v4704_v60 = vld [vmem:[#allocation2 + $0x104] sm:$0xff]  ;;  %v1009_v59 = vmul.f32 %v9295_v10, %v864_v2  ;;  %v1449_v19 = vmul.f32 %v9297_v11, %v1304_v8  ;;  %v4374_v48 = vld [vmem:[#allocation2 + $0x11b] sm:$0xff] }
 0x285   : > { %8071 = vmatpush3.msra.mxu1 %v10196_v46  ;;  %8155 = vmatpush3.msra.mxu0 %v2445_v4  ;;  %v1889_v46 = vmul.f32 %v9299_v17, %v1744_v32  ;;  %v2425_v6 = vadd.f32 %v2281_v44, %v1986_v27  ;;  %v2002_v4 = vadd.f32 %v1858_v25, %v1563_v43  ;;  %v4705_v32 = vld [vmem:[#allocation2 + $0x10c] sm:$0xff]  ;;  %v1742_v27 = vld [vmem:[#allocation15 + $0x11e8] sm:$0xff] }
 0x286   : > { %7943 = vmatmul.mubr.f32.gmra.mxu1 %v4366_v9  ;;  %8029 = vmatmul.mubr.f32.gmra.mxu0 %v4699_v20  ;;  %v1154_v30 = vadd.f32 %v1010_v3, %v717_v15  ;;  %v1743_v9 = vld [vmem:[#allocation15 + $0x11f0] sm:$0xff]  ;;  %v1448_v44 = vmul.f32 %v9297_v11, %v1303_v0  ;;  %v1008_v25 = vmul.f32 %v9295_v10, %v863_v12  ;;  %v1730_v36 = vld [vmem:[#allocation15 + $0x1188] sm:$0xff] }
 0x287   : > { %7945 = vmatprep.mubr.f32.mxu1 %v4367_v14  ;;  %8031 = vmatprep.mubr.f32.mxu0 %v4700_v42  ;;  %v2033_v52 = vadd.f32 %v1889_v46, %v1594_v34  ;;  %v2441_v24 = vadd.f32 %v2297_v62, %v2002_v4  ;;  %v4373_v14 = vld [vmem:[#allocation2 + $0x113] sm:$0xff]  ;;  %v1888_v43 = vmul.f32 %v9299_v17, %v1743_v9  ;;  %v4375_v62 = vld [vmem:[#allocation2 + $0x123] sm:$0xff]  ;;  %v4376_v8 = vld [vmem:[#allocation2 + $0x12b] sm:$0xff] }
 0x288   : > { %8072 = vmatprep.subr.mxu1 %v10202_v1  ;;  %8156 = vmatprep.subr.mxu0 %v2444_v16  ;;  %v4706_v42 = vld [vmem:[#allocation2 + $0x114] sm:$0xff]  ;;  %v1593_v51 = vadd.f32 %v1449_v19, %v1154_v30  ;;  %v1887_v3 = vmul.f32 %v9299_v17, %v1742_v27  ;;  %v861_v19 = vld [vmem:[#allocation15 + $0x8d0] sm:$0xff] }
 0x289   : > { %8073 = vmatpush3.msra.mxu1 %v10202_v1  ;;  %8157 = vmatpush3.msra.mxu0 %v2444_v16  ;;  %v7567_v57 = vpop.f32.mrf.mxu1  ;;  %v10256_v54 = vadd.f32 %v2328_v21, %v2033_v52  ;;  %v715_v34 = vld [vmem:[#allocation15 + $0x460] sm:$0xff]  ;;  %v4708_v21 = vld [vmem:[#allocation2 + $0x124] sm:$0xff] }
 0x28a   : > { %v7653_v61 = vpop.f32.mrf.mxu0  ;;  %7946 = vmatmul.mubr.f32.gmra.mxu1 %v4368_v18  ;;  %8032 = vmatmul.mubr.f32.gmra.mxu0 %v4701_v23  ;;  %v4707_v23 = vld [vmem:[#allocation2 + $0x11c] sm:$0xff]  ;;  %v2180_v9 = vld [vmem:[#allocation15 + $0x1660] sm:$0xff] }
 0x28b   : > { %v10247_v56 = vadd.f32 %v7653_v61, %v7567_v57  ;;  %7948 = vmatprep.mubr.f32.mxu1 %v4369_v35  ;;  %8034 = vmatprep.mubr.f32.mxu0 %v4702_v55  ;;  %v3261_v1 = vpop.f32.mrf.mxu1  ;;  %v2182_v57 = vld [vmem:[#allocation15 + $0x1670] sm:$0xff]  ;;  %v862_v61 = vld [vmem:[#allocation15 + $0x8d8] sm:$0xff] }
 0x28c   : > { %v3506_v47 = vpop.f32.mrf.mxu0  ;;  %8074 = vmatprep.subr.mxu1 %v2426_v33  ;;  %8158 = vmatprep.subr.mxu0 %v2443_v58  ;;  %v2327_v15 = vmul.f32 %v9303_v22, %v2182_v57 }
 0x28d   : > { %v10250_v26 = vadd.f32 %v3506_v47, %v3261_v1  ;;  %8075 = vmatpush3.msra.mxu1 %v2426_v33  ;;  %8159 = vmatpush3.msra.mxu0 %v2443_v58  ;;  %v7570_v5 = vpop.f32.mrf.mxu1  ;;  %v1153_v58 = vadd.f32 %v1009_v59, %v716_v63  ;;  %v2181_v1 = vld [vmem:[#allocation15 + $0x1668] sm:$0xff]  ;;  %v1152_v47 = vadd.f32 %v1008_v25, %v715_v34  ;;  %v1301_v59 = vld [vmem:[#allocation15 + $0xd58] sm:$0xff] }
 0x28e   : > { %v7656_v37 = vpop.f32.mrf.mxu0  ;;  %7949 = vmatmul.mubr.f32.gmra.mxu1 %v4370_v13  ;;  %8035 = vmatmul.mubr.f32.gmra.mxu0 %v4703_v50  ;;  %v10272_v13 = vld [vmem:[#allocation2 + $0x12c] sm:$0xff]  ;;  %v2032_v50 = vadd.f32 %v1888_v43, %v1593_v51  ;;  %v2326_v30 = vmul.f32 %v9303_v22, %v2181_v1  ;;  %v1446_v27 = vmul.f32 %v9297_v11, %v1301_v59  ;;  %v713_v51 = vld [vmem:[#allocation15 + $0x450] sm:$0xff]  ;;  %v1299_v1 = vld [vmem:[#allocation15 + $0xd48] sm:$0xff] }
 0x28f   : > { %v10253_v16 = vadd.f32 %v7656_v37, %v7570_v5  ;;  %7951 = vmatprep.mubr.f32.mxu1 %v4371_v53  ;;  %8037 = vmatprep.mubr.f32.mxu0 %v4704_v60  ;;  %v3271_v39 = vpop.f32.mrf.mxu1  ;;  %v1741_v5 = vld [vmem:[#allocation15 + $0x11e0] sm:$0xff]  ;;  %v1007_v37 = vmul.f32 %v9295_v10, %v862_v61  ;;  %v714_v60 = vld [vmem:[#allocation15 + $0x458] sm:$0xff]  ;;  %v1006_v25 = vmul.f32 %v9295_v10, %v861_v19  ;;  %v1300_v43 = vld [vmem:[#allocation15 + $0xd50] sm:$0xff] }
 0x290   : > { %v3516_v41 = vpop.f32.mrf.mxu0  ;;  %8076 = vmatprep.subr.mxu1 %v2425_v6  ;;  %8160 = vmatprep.subr.mxu0 %v2442_v7  ;;  %v2325_v61 = vmul.f32 %v9303_v22, %v2180_v9  ;;  %v1298_v9 = vld [vmem:[#allocation15 + $0xd40] sm:$0xff] }
 0x291   : > { %v10258_v40 = vadd.f32 %v3516_v41, %v3271_v39  ;;  %8077 = vmatpush3.msra.mxu1 %v2425_v6  ;;  %8161 = vmatpush3.msra.mxu0 %v2442_v7  ;;  %v7573_v20 = vpop.f32.mrf.mxu1  ;;  %v1592_v6 = vadd.f32 %v1448_v44, %v1153_v58  ;;  %v1447_v7 = vmul.f32 %v9297_v11, %v1302_v31  ;;  %v5007_v39 = vld [vmem:[#allocation2 + $0x24] sm:$0xff] }
 0x292   : > { %v7659_v33 = vpop.f32.mrf.mxu0  ;;  %7952 = vmatmul.mubr.f32.gmra.mxu1 %v4372_v29  ;;  %8038 = vmatmul.mubr.f32.gmra.mxu0 %v4705_v32  ;;  %v5340_v41 = vld [vmem:[#allocation2 + $0x25] sm:$0xff]  ;;  %v1886_v32 = vmul.f32 %v9299_v17, %v1741_v5  ;;  %v2471_v58 = vadd.f32 %v2327_v15, %v2032_v50  ;;  %v1151_v44 = vadd.f32 %v1007_v37, %v714_v60  ;;  %v712_v50 = vld [vmem:[#allocation15 + $0x448] sm:$0xff]  ;;  %v859_v15 = vld [vmem:[#allocation15 + $0x8c0] sm:$0xff] }
 0x293   : > { %v10261_v38 = vadd.f32 %v7659_v33, %v7573_v20  ;;  %7954 = vmatprep.mubr.f32.mxu1 %v4373_v14  ;;  %8040 = vmatprep.mubr.f32.mxu0 %v4706_v42  ;;  %v3281_v28 = vpop.f32.mrf.mxu1  ;;  %v1591_v29 = vadd.f32 %v1447_v7, %v1152_v47  ;;  %v1740_v20 = vld [vmem:[#allocation15 + $0x11d8] sm:$0xff]  ;;  %v5343_v37 = vld [vmem:[#allocation2 + $0x3d] sm:$0xff] }
 0x294   : > { %v3526_v46 = vpop.f32.mrf.mxu0  ;;  %8162 = vmatprep.subr.mxu0 %v2441_v24  ;;  %8218 = vmatprep.subr.mxu1 %v10256_v54  ;;  %v5008_v42 = vld [vmem:[#allocation2 + $0x2c] sm:$0xff]  ;;  %v1739_v60 = vld [vmem:[#allocation15 + $0x11d0] sm:$0xff] }
 0x295   : > { %v10266_v18 = vadd.f32 %v3526_v46, %v3281_v28  ;;  %8163 = vmatpush3.msra.mxu0 %v2441_v24  ;;  %v7576_v35 = vpop.f32.mrf.mxu1  ;;  %v2031_v24 = vadd.f32 %v1887_v3, %v1592_v6  ;;  %v860_v28 = vld [vmem:[#allocation15 + $0x8c8] sm:$0xff]  ;;  %v2179_v6 = vld [vmem:[#allocation15 + $0x1658] sm:$0xff] }
 0x296   : > { %v7662_v55 = vpop.f32.mrf.mxu0  ;;  %7955 = vmatmul.mubr.f32.gmra.mxu1 %v4374_v48  ;;  %8041 = vmatmul.mubr.f32.gmra.mxu0 %v4707_v23  ;;  %v5341_v48 = vld [vmem:[#allocation2 + $0x2d] sm:$0xff]  ;;  %v1005_v3 = vmul.f32 %v9295_v10, %v860_v28 }
 0x297   : > { %v10269_v2 = vadd.f32 %v7662_v55, %v7576_v35  ;;  %7957 = vmatprep.mubr.f32.mxu1 %v4375_v62  ;;  %8043 = vmatprep.mubr.f32.mxu0 %v4708_v21  ;;  %v3291_v4 = vpop.f32.mrf.mxu1  ;;  %v5009_v23 = vld [vmem:[#allocation2 + $0x34] sm:$0xff]  ;;  %v2470_v57 = vadd.f32 %v2326_v30, %v2031_v24  ;;  %v1885_v35 = vmul.f32 %v9299_v17, %v1740_v20 }
 0x298   : > { %v3536_v52 = vpop.f32.mrf.mxu0  ;;  %v5342_v62 = vld [vmem:[#allocation2 + $0x35] sm:$0xff]  ;;  %v2030_v21 = vadd.f32 %v1886_v32, %v1591_v29  ;;  %v1149_v30 = vadd.f32 %v1005_v3, %v712_v50  ;;  %v1004_v32 = vmul.f32 %v9295_v10, %v859_v15 }
 0x299   : > { %v10276_v53 = vadd.f32 %v3536_v52, %v3291_v4  ;;  %v7579_v63 = vpop.f32.mrf.mxu1  ;;  %v1590_v4 = vadd.f32 %v1446_v27, %v1151_v44  ;;  %v1150_v52 = vadd.f32 %v1006_v25, %v713_v51  ;;  %v1738_v29 = vld [vmem:[#allocation15 + $0x11c8] sm:$0xff]  ;;  %v1884_v27 = vmul.f32 %v9299_v17, %v1739_v60  ;;  %v711_v25 = vld [vmem:[#allocation15 + $0x440] sm:$0xff]  ;;  %v2178_v51 = vld [vmem:[#allocation15 + $0x1650] sm:$0xff] }
 0x29a   : > { %v7665_v0 = vpop.f32.mrf.mxu0  ;;  %7958 = vmatmul.mubr.f32.gmra.mxu1 %v4376_v8  ;;  %8044 = vmatmul.mubr.f32.gmra.mxu0 %v10272_v13  ;;  %v1445_v8 = vmul.f32 %v9297_v11, %v1300_v43  ;;  %v858_v43 = vld [vmem:[#allocation15 + $0x8b8] sm:$0xff]  ;;  %v2177_v3 = vld [vmem:[#allocation15 + $0x1648] sm:$0xff]  ;;  %v2323_v15 = vmul.f32 %v9303_v22, %v2178_v51 }
 0x29b   : > { %v10280_v12 = vadd.f32 %v7665_v0, %v7579_v63  ;;  %8078 = vmatprep.mubr.f32.mxu1 %v5007_v39  ;;  %8164 = vmatprep.mubr.f32.mxu0 %v5340_v41  ;;  %v3301_v33 = vpop.f32.mrf.mxu1  ;;  %v5011_v63 = vld [vmem:[#allocation2 + $0x44] sm:$0xff]  ;;  %v2324_v39 = vmul.f32 %v9303_v22, %v2179_v6  ;;  %v1444_v41 = vmul.f32 %v9297_v11, %v1299_v1  ;;  %v710_v60 = vld [vmem:[#allocation15 + $0x438] sm:$0xff] }
 0x29c   : > { %v3546_v14 = vpop.f32.mrf.mxu0  ;;  %v5344_v0 = vld [vmem:[#allocation2 + $0x45] sm:$0xff]  ;;  %v1589_v44 = vadd.f32 %v1445_v8, %v1150_v52  ;;  %v1883_v6 = vmul.f32 %v9299_v17, %v1738_v29  ;;  %v1148_v1 = vadd.f32 %v1004_v32, %v711_v25  ;;  %v5347_v52 = vld [vmem:[#allocation2 + $0x5d] sm:$0xff]  ;;  %v2322_v29 = vmul.f32 %v9303_v22, %v2177_v3  ;;  %v5350_v3 = vld [vmem:[#allocation2 + $0x75] sm:$0xff] }
 0x29d   : > { %v10285_v46 = vadd.f32 %v3546_v14, %v3301_v33  ;;  %v7582_v34 = vpop.f32.mrf.mxu1  ;;  %v5012_v14 = vld [vmem:[#allocation2 + $0x4c] sm:$0xff] }
 0x29e   : > { %v7668_v31 = vpop.f32.mrf.mxu0  ;;  %8079 = vmatmul.mubr.f32.vlgmr.msra.gmra.mxu1 %v5008_v42  ;;  %8165 = vmatmul.mubr.f32.vlgmr.msra.gmra.mxu0 %v5341_v48  ;;  %v2469_v42 = vadd.f32 %v2325_v61, %v2030_v21  ;;  %v5345_v48 = vld [vmem:[#allocation2 + $0x4d] sm:$0xff]  ;;  %v1443_v61 = vmul.f32 %v9297_v11, %v1298_v9  ;;  %v1588_v21 = vadd.f32 %v1444_v41, %v1149_v30  ;;  %v5015_v41 = vld [vmem:[#allocation2 + $0x64] sm:$0xff] }
 0x29f   : > { %v10289_v55 = vadd.f32 %v7668_v31, %v7582_v34  ;;  %8219 = vmatpush3.msra.mxu1 %v10256_v54  ;;  %8081 = vmatprep.mubr.f32.mxu1 %v5009_v23  ;;  %v3311_v47 = vpop.f32.mrf.mxu1  ;;  %v5010_v54 = vld [vmem:[#allocation2 + $0x3c] sm:$0xff]  ;;  %v5013_v23 = vld [vmem:[#allocation2 + $0x54] sm:$0xff]  ;;  %v2028_v50 = vadd.f32 %v1884_v27, %v1589_v44  ;;  %v5348_v30 = vld [vmem:[#allocation2 + $0x65] sm:$0xff] }
 0x2a0   : > { %8167 = vmatprep.mubr.f32.mxu0 %v5342_v62  ;;  %v3556_v7 = vpop.f32.mrf.mxu0  ;;  %8220 = vmatprep.subr.mxu1 %v2471_v58  ;;  %v5346_v62 = vld [vmem:[#allocation2 + $0x55] sm:$0xff]  ;;  %v2027_v9 = vadd.f32 %v1883_v6, %v1588_v21  ;;  %v5016_v44 = vld [vmem:[#allocation2 + $0x6c] sm:$0xff] }
 0x2a1   : > { %v10294_v5 = vadd.f32 %v3556_v7, %v3311_v47  ;;  %8221 = vmatpush3.msra.mxu1 %v2471_v58  ;;  %v7585_v59 = vpop.f32.mrf.mxu1  ;;  %v2029_v58 = vadd.f32 %v1885_v35, %v1590_v4  ;;  %v5014_v4 = vld [vmem:[#allocation2 + $0x5c] sm:$0xff]  ;;  %v5349_v27 = vld [vmem:[#allocation2 + $0x6d] sm:$0xff]  ;;  %v2467_v25 = vadd.f32 %v2323_v15, %v2028_v50 }
 0x2a2   : > { %v7671_v19 = vpop.f32.mrf.mxu0  ;;  %8082 = vmatmul.mubr.f32.gmra.mxu1 %v5010_v54  ;;  %8168 = vmatmul.mubr.f32.gmra.mxu0 %v5343_v37  ;;  %v1003_v54 = vmul.f32 %v9295_v10, %v858_v43  ;;  %v5017_v21 = vld [vmem:[#allocation2 + $0x74] sm:$0xff] }
 0x2a3   : > { %v10298_v24 = vadd.f32 %v7671_v19, %v7585_v59  ;;  %8084 = vmatprep.mubr.f32.mxu1 %v5011_v63  ;;  %8170 = vmatprep.mubr.f32.mxu0 %v5344_v0  ;;  %v3321_v20 = vpop.f32.mrf.mxu1  ;;  %v2468_v8 = vadd.f32 %v2324_v39, %v2029_v58  ;;  %v1297_v59 = vld [vmem:[#allocation15 + $0xd38] sm:$0xff]  ;;  %v857_v19 = vld [vmem:[#allocation15 + $0x8b0] sm:$0xff] }
 0x2a4   : > { %v3566_v33 = vpop.f32.mrf.mxu0  ;;  %8222 = vmatprep.subr.mxu1 %v2470_v57  ;;  %v1442_v51 = vmul.f32 %v9297_v11, %v1297_v59  ;;  %v1002_v43 = vmul.f32 %v9295_v10, %v857_v19 }
 0x2a5   : > { %v10302_v28 = vadd.f32 %v3566_v33, %v3321_v20  ;;  %8223 = vmatpush3.msra.mxu1 %v2470_v57  ;;  %v7588_v34 = vpop.f32.mrf.mxu1  ;;  %v1737_v57 = vld [vmem:[#allocation15 + $0x11c0] sm:$0xff]  ;;  %v1587_v20 = vadd.f32 %v1443_v61, %v1148_v1 }
 0x2a6   : > { %v7674_v31 = vpop.f32.mrf.mxu0  ;;  %8085 = vmatmul.mubr.f32.gmra.mxu1 %v5012_v14  ;;  %8171 = vmatmul.mubr.f32.gmra.mxu0 %v5345_v48  ;;  %v1882_v39 = vmul.f32 %v9299_v17, %v1737_v57  ;;  %v2176_v33 = vld [vmem:[#allocation15 + $0x1640] sm:$0xff]  ;;  %v1736_v14 = vld [vmem:[#allocation15 + $0x11b8] sm:$0xff]  ;;  %v1147_v48 = vadd.f32 %v1003_v54, %v710_v60  ;;  %v5018_v54 = vld [vmem:[#allocation2 + $0x7c] sm:$0xff] }
 0x2a7   : > { %v10306_v35 = vadd.f32 %v7674_v31, %v7588_v34  ;;  %8087 = vmatprep.mubr.f32.mxu1 %v5013_v23  ;;  %8173 = vmatprep.mubr.f32.mxu0 %v5346_v62  ;;  %v3331_v47 = vpop.f32.mrf.mxu1  ;;  %v709_v31 = vld [vmem:[#allocation15 + $0x430] sm:$0xff]  ;;  %v856_v62 = vld [vmem:[#allocation15 + $0x8a8] sm:$0xff]  ;;  %v2321_v1 = vmul.f32 %v9303_v22, %v2176_v33  ;;  %v1881_v57 = vmul.f32 %v9299_v17, %v1736_v14 }
 0x2a8   : > { %v3576_v7 = vpop.f32.mrf.mxu0  ;;  %8224 = vmatprep.subr.mxu1 %v2469_v42  ;;  %v1296_v23 = vld [vmem:[#allocation15 + $0xd30] sm:$0xff]  ;;  %v1586_v60 = vadd.f32 %v1442_v51, %v1147_v48  ;;  %v1146_v59 = vadd.f32 %v1002_v43, %v709_v31  ;;  %v708_v33 = vld [vmem:[#allocation15 + $0x428] sm:$0xff]  ;;  %v1294_v51 = vld [vmem:[#allocation15 + $0xd20] sm:$0xff] }
 0x2a9   : > { %v10310_v37 = vadd.f32 %v3576_v7, %v3331_v47  ;;  %8225 = vmatpush3.msra.mxu1 %v2469_v42  ;;  %v7591_v63 = vpop.f32.mrf.mxu1  ;;  %v2466_v7 = vadd.f32 %v2322_v29, %v2027_v9  ;;  %v1441_v19 = vmul.f32 %v9297_v11, %v1296_v23  ;;  %v1295_v29 = vld [vmem:[#allocation15 + $0xd28] sm:$0xff]  ;;  %v5352_v14 = vld [vmem:[#allocation2 + $0x85] sm:$0xff] }
 0x2aa   : > { %v7677_v0 = vpop.f32.mrf.mxu0  ;;  %8088 = vmatmul.mubr.f32.gmra.mxu1 %v5014_v4  ;;  %8174 = vmatmul.mubr.f32.gmra.mxu0 %v5347_v52  ;;  %v2026_v4 = vadd.f32 %v1882_v39, %v1587_v20  ;;  %v2175_v52 = vld [vmem:[#allocation15 + $0x1638] sm:$0xff]  ;;  %v5019_v20 = vld [vmem:[#allocation2 + $0x84] sm:$0xff]  ;;  %v2025_v23 = vadd.f32 %v1881_v57, %v1586_v60  ;;  %v1439_v60 = vmul.f32 %v9297_v11, %v1294_v51 }
 0x2ab   : > { %v10314_v32 = vadd.f32 %v7677_v0, %v7591_v63  ;;  %8090 = vmatprep.mubr.f32.mxu1 %v5015_v41  ;;  %8176 = vmatprep.mubr.f32.mxu0 %v5348_v30  ;;  %v3341_v42 = vpop.f32.mrf.mxu1  ;;  %v1001_v63 = vmul.f32 %v9295_v10, %v856_v62  ;;  %v855_v0 = vld [vmem:[#allocation15 + $0x8a0] sm:$0xff]  ;;  %v5351_v30 = vld [vmem:[#allocation2 + $0x7d] sm:$0xff]  ;;  %v1585_v62 = vadd.f32 %v1441_v19, %v1146_v59 }
 0x2ac   : > { %v3586_v58 = vpop.f32.mrf.mxu0  ;;  %8226 = vmatprep.subr.mxu1 %v2468_v8  ;;  %v2174_v48 = vld [vmem:[#allocation15 + $0x1630] sm:$0xff] }
 0x2ad   : > { %v10318_v34 = vadd.f32 %v3586_v58, %v3341_v42  ;;  %8227 = vmatpush3.msra.mxu1 %v2468_v8  ;;  %v7594_v6 = vpop.f32.mrf.mxu1  ;;  %v1735_v8 = vld [vmem:[#allocation15 + $0x11b0] sm:$0xff]  ;;  %v2320_v42 = vmul.f32 %v9303_v22, %v2175_v52  ;;  %v2319_v57 = vmul.f32 %v9303_v22, %v2174_v48 }
 0x2ae   : > { %v7680_v61 = vpop.f32.mrf.mxu0  ;;  %8091 = vmatmul.mubr.f32.gmra.mxu1 %v5016_v44  ;;  %8177 = vmatmul.mubr.f32.gmra.mxu0 %v5349_v27  ;;  %v1880_v58 = vmul.f32 %v9299_v17, %v1735_v8  ;;  %v2465_v27 = vadd.f32 %v2321_v1, %v2026_v4  ;;  %v5020_v8 = vld [vmem:[#allocation2 + $0x8c] sm:$0xff]  ;;  %v1734_v1 = vld [vmem:[#allocation15 + $0x11a8] sm:$0xff] }
 0x2af   : > { %v10322_v47 = vadd.f32 %v7680_v61, %v7594_v6  ;;  %8093 = vmatprep.mubr.f32.mxu1 %v5017_v21  ;;  %8179 = vmatprep.mubr.f32.mxu0 %v5350_v3  ;;  %v3351_v50 = vpop.f32.mrf.mxu1  ;;  %v1145_v6 = vadd.f32 %v1001_v63, %v708_v33  ;;  %v1440_v61 = vmul.f32 %v9297_v11, %v1295_v29  ;;  %v707_v21 = vld [vmem:[#allocation15 + $0x420] sm:$0xff]  ;;  %v854_v3 = vld [vmem:[#allocation15 + $0x898] sm:$0xff] }
 0x2b0   : > { %v3596_v15 = vpop.f32.mrf.mxu0  ;;  %8228 = vmatprep.subr.mxu1 %v2467_v25  ;;  %v1733_v63 = vld [vmem:[#allocation15 + $0x11a0] sm:$0xff]  ;;  %v1879_v48 = vmul.f32 %v9299_v17, %v1734_v1 }
 0x2b1   : > { %v10326_v41 = vadd.f32 %v3596_v15, %v3351_v50  ;;  %8229 = vmatpush3.msra.mxu1 %v2467_v25  ;;  %v7597_v39 = vpop.f32.mrf.mxu1  ;;  %v1000_v25 = vmul.f32 %v9295_v10, %v855_v0  ;;  %v5353_v50 = vld [vmem:[#allocation2 + $0x8d] sm:$0xff]  ;;  %v5354_v0 = vld [vmem:[#allocation2 + $0x95] sm:$0xff] }
 0x2b2   : > { %v7683_v9 = vpop.f32.mrf.mxu0  ;;  %8094 = vmatmul.mubr.f32.gmra.mxu1 %v5018_v54  ;;  %8180 = vmatmul.mubr.f32.gmra.mxu0 %v5351_v30  ;;  %v5021_v54 = vld [vmem:[#allocation2 + $0x94] sm:$0xff]  ;;  %v999_v30 = vmul.f32 %v9295_v10, %v854_v3  ;;  %v5023_v3 = vld [vmem:[#allocation2 + $0xa4] sm:$0xff] }
 0x2b3   : > { %v10330_v44 = vadd.f32 %v7683_v9, %v7597_v39  ;;  %8096 = vmatprep.mubr.f32.mxu1 %v5019_v20  ;;  %8182 = vmatprep.mubr.f32.mxu0 %v5352_v14  ;;  %v3361_v43 = vpop.f32.mrf.mxu1  ;;  %v1144_v19 = vadd.f32 %v1000_v25, %v707_v21  ;;  %v5022_v39 = vld [vmem:[#allocation2 + $0x9c] sm:$0xff]  ;;  %v2464_v9 = vadd.f32 %v2320_v42, %v2025_v23  ;;  %v853_v25 = vld [vmem:[#allocation15 + $0x890] sm:$0xff] }
 0x2b4   : > { %v3606_v31 = vpop.f32.mrf.mxu0  ;;  %8230 = vmatprep.subr.mxu1 %v2466_v7  ;;  %v2024_v20 = vadd.f32 %v1880_v58, %v1585_v62  ;;  %v1584_v14 = vadd.f32 %v1440_v61, %v1145_v6  ;;  %v2172_v62 = vld [vmem:[#allocation15 + $0x1620] sm:$0xff] }
 0x2b5   : > { %v10334_v52 = vadd.f32 %v3606_v31, %v3361_v43  ;;  %8231 = vmatpush3.msra.mxu1 %v2466_v7  ;;  %v7600_v4 = vpop.f32.mrf.mxu1  ;;  %v1293_v7 = vld [vmem:[#allocation15 + $0xd18] sm:$0xff]  ;;  %v5355_v31 = vld [vmem:[#allocation2 + $0x9d] sm:$0xff]  ;;  %v1583_v23 = vadd.f32 %v1439_v60, %v1144_v19 }
 0x2b6   : > { %v7686_v15 = vpop.f32.mrf.mxu0  ;;  %8097 = vmatmul.mubr.f32.gmra.mxu1 %v5020_v8  ;;  %8183 = vmatmul.mubr.f32.gmra.mxu0 %v5353_v50  ;;  %v706_v43 = vld [vmem:[#allocation15 + $0x418] sm:$0xff]  ;;  %v2173_v8 = vld [vmem:[#allocation15 + $0x1628] sm:$0xff]  ;;  %v1438_v42 = vmul.f32 %v9297_v11, %v1293_v7 }
 0x2b7   : > { %v10338_v59 = vadd.f32 %v7686_v15, %v7600_v4  ;;  %8099 = vmatprep.mubr.f32.mxu1 %v5021_v54  ;;  %8185 = vmatprep.mubr.f32.mxu0 %v5354_v0  ;;  %v3371_v33 = vpop.f32.mrf.mxu1  ;;  %v5356_v4 = vld [vmem:[#allocation2 + $0xa5] sm:$0xff]  ;;  %v1878_v15 = vmul.f32 %v9299_v17, %v1733_v63  ;;  %v1143_v6 = vadd.f32 %v999_v30, %v706_v43  ;;  %v5357_v0 = vld [vmem:[#allocation2 + $0xad] sm:$0xff]  ;;  %v852_v60 = vld [vmem:[#allocation15 + $0x888] sm:$0xff] }
 0x2b8   : > { %v3616_v29 = vpop.f32.mrf.mxu0  ;;  %8232 = vmatprep.subr.mxu1 %v2465_v27  ;;  %v5024_v54 = vld [vmem:[#allocation2 + $0xac] sm:$0xff]  ;;  %v998_v63 = vmul.f32 %v9295_v10, %v853_v25  ;;  %v5025_v43 = vld [vmem:[#allocation2 + $0xb4] sm:$0xff] }
 0x2b9   : > { %v10342_v51 = vadd.f32 %v3616_v29, %v3371_v33  ;;  %8233 = vmatpush3.msra.mxu1 %v2465_v27  ;;  %v7603_v21 = vpop.f32.mrf.mxu1  ;;  %v1732_v27 = vld [vmem:[#allocation15 + $0x1198] sm:$0xff]  ;;  %v2463_v33 = vadd.f32 %v2319_v57, %v2024_v20  ;;  %v2023_v29 = vadd.f32 %v1879_v48, %v1584_v14  ;;  %v2022_v14 = vadd.f32 %v1878_v15, %v1583_v23  ;;  %v851_v15 = vld [vmem:[#allocation15 + $0x880] sm:$0xff] }
 0x2ba   : > { %v7689_v50 = vpop.f32.mrf.mxu0  ;;  %8100 = vmatmul.mubr.f32.gmra.mxu1 %v5022_v39  ;;  %8186 = vmatmul.mubr.f32.gmra.mxu0 %v5355_v31  ;;  %v2318_v39 = vmul.f32 %v9303_v22, %v2173_v8  ;;  %v705_v31 = vld [vmem:[#allocation15 + $0x410] sm:$0xff]  ;;  %v1877_v57 = vmul.f32 %v9299_v17, %v1732_v27  ;;  %v1582_v48 = vadd.f32 %v1438_v42, %v1143_v6 }
 0x2bb   : > { %v10346_v58 = vadd.f32 %v7689_v50, %v7603_v21  ;;  %8102 = vmatprep.mubr.f32.mxu1 %v5023_v3  ;;  %8188 = vmatprep.mubr.f32.mxu0 %v5356_v4  ;;  %v3381_v61 = vpop.f32.mrf.mxu1  ;;  %v1292_v21 = vld [vmem:[#allocation15 + $0xd10] sm:$0xff]  ;;  %v5358_v50 = vld [vmem:[#allocation2 + $0xb5] sm:$0xff]  ;;  %v2317_v3 = vmul.f32 %v9303_v22, %v2172_v62  ;;  %v997_v62 = vmul.f32 %v9295_v10, %v852_v60 }
 0x2bc   : > { %v3626_v1 = vpop.f32.mrf.mxu0  ;;  %8234 = vmatprep.subr.mxu1 %v2464_v9  ;;  %v1731_v8 = vld [vmem:[#allocation15 + $0x1190] sm:$0xff]  ;;  %v1437_v49 = vmul.f32 %v9297_v11, %v1292_v21 }
 0x2bd   : > { %v10350_v7 = vadd.f32 %v3626_v1, %v3381_v61  ;;  %8235 = vmatpush3.msra.mxu1 %v2464_v9  ;;  %v7606_v19 = vpop.f32.mrf.mxu1  ;;  %v2171_v9 = vld [vmem:[#allocation15 + $0x1618] sm:$0xff]  ;;  %v5026_v61 = vld [vmem:[#allocation2 + $0xbc] sm:$0xff]  ;;  %v5027_v6 = vld [vmem:[#allocation2 + $0xc4] sm:$0xff] }
 0x2be   : > { %v7692_v30 = vpop.f32.mrf.mxu0  ;;  %8103 = vmatmul.mubr.f32.gmra.mxu1 %v5024_v54  ;;  %8189 = vmatmul.mubr.f32.gmra.mxu0 %v5357_v0  ;;  %v5359_v1 = vld [vmem:[#allocation2 + $0xbd] sm:$0xff]  ;;  %v2462_v54 = vadd.f32 %v2318_v39, %v2023_v29  ;;  %v1142_v0 = vadd.f32 %v998_v63, %v705_v31  ;;  %v1876_v29 = vmul.f32 %v9299_v17, %v1731_v8  ;;  %v5361_v8 = vld [vmem:[#allocation2 + $0xcd] sm:$0xff] }
 0x2bf   : > { %v10354_v20 = vadd.f32 %v7692_v30, %v7606_v19  ;;  %8105 = vmatprep.mubr.f32.mxu1 %v5025_v43  ;;  %8191 = vmatprep.mubr.f32.mxu0 %v5358_v50  ;;  %v3391_v25 = vpop.f32.mrf.mxu1  ;;  %v704_v19 = vld [vmem:[#allocation15 + $0x408] sm:$0xff]  ;;  %v5360_v43 = vld [vmem:[#allocation2 + $0xc5] sm:$0xff]  ;;  %v2316_v50 = vmul.f32 %v9303_v22, %v2171_v9  ;;  %v2461_v63 = vadd.f32 %v2317_v3, %v2022_v14  ;;  %v5029_v14 = vld [vmem:[#allocation2 + $0xd4] sm:$0xff] }
 0x2c0   : > { %v3636_v4 = vpop.f32.mrf.mxu0  ;;  %8236 = vmatprep.subr.mxu1 %v2463_v33  ;;  %v1291_v30 = vld [vmem:[#allocation15 + $0xd08] sm:$0xff]  ;;  %v2021_v31 = vadd.f32 %v1877_v57, %v1582_v48  ;;  %v996_v9 = vmul.f32 %v9295_v10, %v851_v15 }
 0x2c1   : > { %v10358_v27 = vadd.f32 %v3636_v4, %v3391_v25  ;;  %8237 = vmatpush3.msra.mxu1 %v2463_v33  ;;  %v7609_v42 = vpop.f32.mrf.mxu1  ;;  %v2170_v33 = vld [vmem:[#allocation15 + $0x1610] sm:$0xff]  ;;  %v5028_v25 = vld [vmem:[#allocation2 + $0xcc] sm:$0xff]  ;;  %v1581_v4 = vadd.f32 %v1437_v49, %v1142_v0  ;;  %v5362_v48 = vld [vmem:[#allocation2 + $0xd5] sm:$0xff] }
 0x2c2   : > { %v7695_v23 = vpop.f32.mrf.mxu0  ;;  %8106 = vmatmul.mubr.f32.gmra.mxu1 %v5026_v61  ;;  %8192 = vmatmul.mubr.f32.gmra.mxu0 %v5359_v1  ;;  %v1141_v61 = vadd.f32 %v997_v62, %v704_v19  ;;  %v1436_v1 = vmul.f32 %v9297_v11, %v1291_v30  ;;  %v2315_v49 = vmul.f32 %v9303_v22, %v2170_v33  ;;  %v5363_v33 = vld [vmem:[#allocation2 + $0xdd] sm:$0xff] }
 0x2c3   : > { %11202 = vst [vmem:[#allocation39_spill] sm:$0xff] %v10358_v27  ;;  %v10362_v39 = vadd.f32 %v7695_v23, %v7609_v42  ;;  %8108 = vmatprep.mubr.f32.mxu1 %v5027_v6  ;;  %8194 = vmatprep.mubr.f32.mxu0 %v5360_v43  ;;  %v3401_v21 = vpop.f32.mrf.mxu1  ;;  %v703_v42 = vld [vmem:[#allocation15 + $0x400] sm:$0xff]  ;;  %v2460_v62 = vadd.f32 %v2316_v50, %v2021_v31  ;;  %v2169_v43 = vld [vmem:[#allocation15 + $0x1608] sm:$0xff]  ;;  %v5364_v50 = vld [vmem:[#allocation2 + $0xe5] sm:$0xff] }
 0x2c4   : > { %v3646_v60 = vpop.f32.mrf.mxu0  ;;  %8238 = vmatprep.subr.mxu1 %v2462_v54  ;;  %v1290_v23 = vld [vmem:[#allocation15 + $0xd00] sm:$0xff]  ;;  %v1875_v19 = vmul.f32 %v9299_v17, %v1730_v36  ;;  %v2020_v15 = vadd.f32 %v1876_v29, %v1581_v4  ;;  %v1580_v6 = vadd.f32 %v1436_v1, %v1141_v61  ;;  %v5031_v36 = vld [vmem:[#allocation2 + $0xe4] sm:$0xff]  ;;  %v2314_v29 = vmul.f32 %v9303_v22, %v2169_v43 }
 0x2c5   : > { %v10366_v27 = vadd.f32 %v3646_v60, %v3401_v21  ;;  %8239 = vmatpush3.msra.mxu1 %v2462_v54  ;;  %v7612_v3 = vpop.f32.mrf.mxu1  ;;  %v1140_v21 = vadd.f32 %v996_v9, %v703_v42  ;;  %v1435_v60 = vmul.f32 %v9297_v11, %v1290_v23  ;;  %v5032_v23 = vld [vmem:[#allocation2 + $0xec] sm:$0xff]  ;;  %v5366_v43 = vld [vmem:[#allocation2 + $0xf5] sm:$0xff] }
 0x2c6   : > { %v7698_v57 = vpop.f32.mrf.mxu0  ;;  %8109 = vmatmul.mubr.f32.gmra.mxu1 %v5028_v25  ;;  %8195 = vmatmul.mubr.f32.gmra.mxu0 %v5361_v8  ;;  %v5030_v25 = vld [vmem:[#allocation2 + $0xdc] sm:$0xff]  ;;  %v1729_v8 = vld [vmem:[#allocation15 + $0x1180] sm:$0xff]  ;;  %v2459_v1 = vadd.f32 %v2315_v49, %v2020_v15  ;;  %v5697_v11 = vld [vmem:[#allocation2 + $0xe6] sm:$0xff] }
 0x2c7   : > { %v10369_v0 = vadd.f32 %v7698_v57, %v7612_v3  ;;  %8111 = vmatprep.mubr.f32.mxu1 %v5029_v14  ;;  %8197 = vmatprep.mubr.f32.mxu0 %v5362_v48  ;;  %v10372_v30 = vpop.f32.mrf.mxu1  ;;  %v1579_v9 = vadd.f32 %v1435_v60, %v1140_v21  ;;  %v1874_v42 = vmul.f32 %v9299_v17, %v1729_v8  ;;  %v5365_v14 = vld [vmem:[#allocation2 + $0xed] sm:$0xff]  ;;  %v5034_v21 = vld [vmem:[#allocation2 + $0xfc] sm:$0xff] }
 0x2c8   : > { %v10374_v54 = vpop.f32.mrf.mxu0  ;;  %8240 = vmatprep.subr.mxu1 %v2461_v63  ;;  %v2168_v48 = vld [vmem:[#allocation15 + $0x1600] sm:$0xff]  ;;  %v5367_v60 = vld [vmem:[#allocation2 + $0xfd] sm:$0xff] }
 0x2c9   : > { %8241 = vmatpush3.msra.mxu1 %v2461_v63  ;;  %v7615_v3 = vpop.f32.mrf.mxu1  ;;  %v2019_v63 = vadd.f32 %v1875_v19, %v1580_v6  ;;  %v2018_v15 = vadd.f32 %v1874_v42, %v1579_v9 }
 0x2ca   : > { %v7701_v57 = vpop.f32.mrf.mxu0  ;;  %8112 = vmatmul.mubr.f32.gmra.mxu1 %v5030_v25  ;;  %8198 = vmatmul.mubr.f32.gmra.mxu0 %v5363_v33 }
 0x2cb   : > { %v10377_v31 = vadd.f32 %v7701_v57, %v7615_v3  ;;  %8114 = vmatprep.mubr.f32.mxu1 %v5031_v36  ;;  %8200 = vmatprep.mubr.f32.mxu0 %v5364_v50  ;;  %v10380_v4 = vpop.f32.mrf.mxu1  ;;  %v5033_v3 = vld [vmem:[#allocation2 + $0xf4] sm:$0xff]  ;;  %v2458_v19 = vadd.f32 %v2314_v29, %v2019_v63 }
 0x2cc   : > { %v10382_v61 = vpop.f32.mrf.mxu0  ;;  %8242 = vmatprep.subr.mxu1 %v2460_v62 }
 0x2cd   : > { %8243 = vmatpush3.msra.mxu1 %v2460_v62  ;;  %v7736_v25 = vpop.f32.mrf.mxu1  ;;  %v2313_v62 = vmul.f32 %v9303_v22, %v2168_v48  ;;  %v5369_v48 = vld [vmem:[#allocation2 + $0x10d] sm:$0xff] }
 0x2ce   : > { %v7822_v33 = vpop.f32.mrf.mxu0  ;;  %8115 = vmatmul.mubr.f32.gmra.mxu1 %v5032_v23  ;;  %8201 = vmatmul.mubr.f32.gmra.mxu0 %v5365_v14  ;;  %v3973_v57 = vadd.f32 %v7736_v25, %v9889_v45  ;;  %v5035_v45 = vld [vmem:[#allocation2 + $0x104] sm:$0xff] }
 0x2cf   : > { %8117 = vmatprep.mubr.f32.mxu1 %v5033_v3  ;;  %8203 = vmatprep.mubr.f32.mxu0 %v5366_v43  ;;  %v10386_v36 = vpop.f32.mrf.mxu1  ;;  %v5368_v23 = vld [vmem:[#allocation2 + $0x105] sm:$0xff]  ;;  %v2457_v63 = vadd.f32 %v2313_v62, %v2018_v15  ;;  %v5370_v43 = vld [vmem:[#allocation2 + $0x115] sm:$0xff] }
 0x2d0   : > { %v10388_v49 = vpop.f32.mrf.mxu0  ;;  %8244 = vmatprep.subr.mxu1 %v2459_v1  ;;  %v10391_v6 = vadd.f32 %v7822_v33, %v3973_v57 }
 0x2d1   : > { %8245 = vmatpush3.msra.mxu1 %v2459_v1  ;;  %v5036_v1 = vld [vmem:[#allocation2 + $0x10c] sm:$0xff] }
 0x2d2   : > { %v7739_v8 = vpop.f32.mrf.mxu1  ;;  %v7825_v50 = vpop.f32.mrf.mxu0  ;;  %8118 = vmatmul.mubr.f32.gmra.mxu1 %v5034_v21  ;;  %8204 = vmatmul.mubr.f32.gmra.mxu0 %v5367_v60  ;;  %v5371_v60 = vld [vmem:[#allocation2 + $0x11d] sm:$0xff] }
 0x2d3   : > { %v3975_v14 = vadd.f32 %v7739_v8, %v10247_v56  ;;  %8120 = vmatprep.mubr.f32.mxu1 %v5035_v45  ;;  %8206 = vmatprep.mubr.f32.mxu0 %v5368_v23  ;;  %v5037_v56 = vld [vmem:[#allocation2 + $0x114] sm:$0xff]  ;;  %v5039_v45 = vld [vmem:[#allocation2 + $0x124] sm:$0xff] }
 0x2d4   : > { %v3803_v25 = vpop.f32.mrf.mxu1  ;;  %v10394_v29 = vpop.f32.mrf.mxu0  ;;  %8246 = vmatprep.subr.mxu1 %v2458_v19 }
 0x2d5   : > { %v10396_v9 = vadd.f32 %v7825_v50, %v3975_v14  ;;  %v10399_v42 = vadd.f32 %v3803_v25, %v10250_v26  ;;  %8247 = vmatpush3.msra.mxu1 %v2458_v19  ;;  %v5038_v19 = vld [vmem:[#allocation2 + $0x11c] sm:$0xff] }
 0x2d6   : > { %v7742_v33 = vpop.f32.mrf.mxu1  ;;  %v7828_v3 = vpop.f32.mrf.mxu0  ;;  %8121 = vmatmul.mubr.f32.gmra.mxu1 %v5036_v1  ;;  %8207 = vmatmul.mubr.f32.gmra.mxu0 %v5369_v48  ;;  %v5041_v1 = vld [vmem:[#allocation2 + $0x134] sm:$0xff] }
 0x2d7   : > { %v3977_v57 = vadd.f32 %v7742_v33, %v10253_v16  ;;  %8123 = vmatprep.mubr.f32.mxu1 %v5037_v56  ;;  %8209 = vmatprep.mubr.f32.mxu0 %v5370_v43  ;;  %v5372_v16 = vld [vmem:[#allocation2 + $0x125] sm:$0xff]  ;;  %v5374_v48 = vld [vmem:[#allocation2 + $0x135] sm:$0xff] }
 0x2d8   : > { %v3813_v21 = vpop.f32.mrf.mxu1  ;;  %v10402_v15 = vpop.f32.mrf.mxu0  ;;  %8248 = vmatprep.subr.mxu1 %v2457_v63  ;;  %v5042_v43 = vld [vmem:[#allocation2 + $0x13c] sm:$0xff] }
 0x2d9   : > { %v10404_v62 = vadd.f32 %v7828_v3, %v3977_v57  ;;  %v10407_v26 = vadd.f32 %v3813_v21, %v10258_v40  ;;  %8249 = vmatpush3.msra.mxu1 %v2457_v63  ;;  %v5373_v63 = vld [vmem:[#allocation2 + $0x12d] sm:$0xff]  ;;  %v5375_v57 = vld [vmem:[#allocation2 + $0x13d] sm:$0xff] }
 0x2da   : > { %v7745_v8 = vpop.f32.mrf.mxu1  ;;  %v7831_v50 = vpop.f32.mrf.mxu0  ;;  %8124 = vmatmul.mubr.f32.gmra.mxu1 %v5038_v19  ;;  %8210 = vmatmul.mubr.f32.gmra.mxu0 %v5371_v60 }
 0x2db   : > { %v3979_v23 = vadd.f32 %v7745_v8, %v10261_v38  ;;  %8126 = vmatprep.mubr.f32.mxu1 %v5039_v45  ;;  %8212 = vmatprep.mubr.f32.mxu0 %v5372_v16  ;;  %v5673_v45 = vld [vmem:[#allocation2 + $0x26] sm:$0xff] }
 0x2dc   : > { %v3823_v14 = vpop.f32.mrf.mxu1  ;;  %v10410_v25 = vpop.f32.mrf.mxu0 }
 0x2dd   : > { %v10412_v40 = vadd.f32 %v7831_v50, %v3979_v23  ;;  %v10415_v33 = vadd.f32 %v3823_v14, %v10266_v18 }
 0x2de   : > { %v7748_v3 = vpop.f32.mrf.mxu1  ;;  %v7834_v56 = vpop.f32.mrf.mxu0  ;;  %8127 = vmatmul.mubr.f32.gmra.mxu1 %v10272_v13  ;;  %8213 = vmatmul.mubr.f32.gmra.mxu0 %v5373_v63  ;;  %v5675_v63 = vld [vmem:[#allocation2 + $0x36] sm:$0xff] }
 0x2df   : > { %v3981_v38 = vadd.f32 %v7748_v3, %v10269_v2  ;;  %8129 = vmatprep.mubr.f32.mxu1 %v5041_v1  ;;  %8215 = vmatprep.mubr.f32.mxu0 %v5374_v48  ;;  %v5674_v1 = vld [vmem:[#allocation2 + $0x2e] sm:$0xff] }
 0x2e0   : > { %v3833_v21 = vpop.f32.mrf.mxu1  ;;  %v10419_v19 = vpop.f32.mrf.mxu0 }
 0x2e1   : > { %v10421_v60 = vadd.f32 %v7834_v56, %v3981_v38  ;;  %v10424_v18 = vadd.f32 %v3833_v21, %v10276_v53 }
 0x2e2   : > { %v7751_v8 = vpop.f32.mrf.mxu1  ;;  %v7837_v50 = vpop.f32.mrf.mxu0  ;;  %8130 = vmatmul.mubr.f32.gmra.mxu1 %v5042_v43  ;;  %8216 = vmatmul.mubr.f32.gmra.mxu0 %v5375_v57  ;;  %v5676_v57 = vld [vmem:[#allocation2 + $0x3e] sm:$0xff] }
 0x2e3   : > { %v3983_v13 = vadd.f32 %v7751_v8, %v10280_v12  ;;  %8250 = vmatprep.mubr.f32.mxu1 %v5673_v45  ;;  %v5677_v8 = vld [vmem:[#allocation2 + $0x46] sm:$0xff] }
 0x2e4   : > { %v3843_v2 = vpop.f32.mrf.mxu1  ;;  %v10427_v16 = vpop.f32.mrf.mxu0 }
 0x2e5   : > { %v10429_v23 = vadd.f32 %v7837_v50, %v3983_v13  ;;  %v10432_v14 = vadd.f32 %v3843_v2, %v10285_v46 }
 0x2e6   : > { %v7754_v48 = vpop.f32.mrf.mxu1  ;;  %v7840_v53 = vpop.f32.mrf.mxu0  ;;  %8251 = vmatmul.mubr.f32.vlgmr.msra.gmra.mxu1 %v5674_v1  ;;  %v5678_v1 = vld [vmem:[#allocation2 + $0x4e] sm:$0xff] }
 0x2e7   : > { %v3985_v3 = vadd.f32 %v7754_v48, %v10289_v55  ;;  %8253 = vmatprep.mubr.f32.mxu1 %v5675_v63 }
 0x2e8   : > { %v3853_v56 = vpop.f32.mrf.mxu1  ;;  %v10435_v38 = vpop.f32.mrf.mxu0 }
 0x2e9   : > { %v10437_v12 = vadd.f32 %v7840_v53, %v3985_v3  ;;  %v10440_v43 = vadd.f32 %v3853_v56, %v10294_v5  ;;  %v5679_v5 = vld [vmem:[#allocation2 + $0x56] sm:$0xff] }
 0x2ea   : > { %v7757_v21 = vpop.f32.mrf.mxu1  ;;  %v7843_v46 = vpop.f32.mrf.mxu0  ;;  %8254 = vmatmul.mubr.f32.gmra.mxu1 %v5676_v57 }
 0x2eb   : > { %v3987_v50 = vadd.f32 %v7757_v21, %v10298_v24  ;;  %8256 = vmatprep.mubr.f32.mxu1 %v5677_v8 }
 0x2ec   : > { %v3863_v45 = vpop.f32.mrf.mxu1  ;;  %v4196_v13 = vpop.f32.mrf.mxu0 }
 0x2ed   : > { %v10443_v55 = vadd.f32 %v7843_v46, %v3987_v50  ;;  %v3986_v2 = vadd.f32 %v3863_v45, %v10302_v28  ;;  %v5680_v46 = vld [vmem:[#allocation2 + $0x5e] sm:$0xff]  ;;  %v5681_v28 = vld [vmem:[#allocation2 + $0x66] sm:$0xff] }
 0x2ee   : > { %v7760_v48 = vpop.f32.mrf.mxu1  ;;  %v7846_v53 = vpop.f32.mrf.mxu0  ;;  %8257 = vmatmul.mubr.f32.gmra.mxu1 %v5678_v1 }
 0x2ef   : > { %v10446_v63 = vadd.f32 %v4196_v13, %v3986_v2  ;;  %v3989_v3 = vadd.f32 %v7760_v48, %v10306_v35  ;;  %8259 = vmatprep.mubr.f32.mxu1 %v5679_v5 }
 0x2f0   : > { %v3873_v56 = vpop.f32.mrf.mxu1  ;;  %v4206_v57 = vpop.f32.mrf.mxu0 }
 0x2f1   : > { %v10449_v24 = vadd.f32 %v7846_v53, %v3989_v3  ;;  %v3988_v21 = vadd.f32 %v3873_v56, %v10310_v37  ;;  %v5682_v53 = vld [vmem:[#allocation2 + $0x6e] sm:$0xff]  ;;  %v5683_v37 = vld [vmem:[#allocation2 + $0x76] sm:$0xff] }
 0x2f2   : > { %v7763_v8 = vpop.f32.mrf.mxu1  ;;  %v7849_v50 = vpop.f32.mrf.mxu0  ;;  %8260 = vmatmul.mubr.f32.gmra.mxu1 %v5680_v46 }
 0x2f3   : > { %v10452_v45 = vadd.f32 %v4206_v57, %v3988_v21  ;;  %v3991_v1 = vadd.f32 %v7763_v8, %v10314_v32  ;;  %8262 = vmatprep.mubr.f32.mxu1 %v5681_v28 }
 0x2f4   : > { %v3883_v13 = vpop.f32.mrf.mxu1  ;;  %v4216_v2 = vpop.f32.mrf.mxu0 }
 0x2f5   : > { %v10455_v35 = vadd.f32 %v7849_v50, %v3991_v1  ;;  %v3990_v48 = vadd.f32 %v3883_v13, %v10318_v34  ;;  %v5684_v50 = vld [vmem:[#allocation2 + $0x7e] sm:$0xff]  ;;  %v5685_v34 = vld [vmem:[#allocation2 + $0x86] sm:$0xff] }
 0x2f6   : > { %v7766_v5 = vpop.f32.mrf.mxu1  ;;  %v7852_v3 = vpop.f32.mrf.mxu0  ;;  %8263 = vmatmul.mubr.f32.gmra.mxu1 %v5682_v53 }
 0x2f7   : > { %v10458_v56 = vadd.f32 %v4216_v2, %v3990_v48  ;;  %v3993_v46 = vadd.f32 %v7766_v5, %v10322_v47  ;;  %8265 = vmatprep.mubr.f32.mxu1 %v5683_v37 }
 0x2f8   : > { %v3893_v57 = vpop.f32.mrf.mxu1  ;;  %v4226_v21 = vpop.f32.mrf.mxu0 }
 0x2f9   : > { %v10461_v32 = vadd.f32 %v7852_v3, %v3993_v46  ;;  %v3992_v8 = vadd.f32 %v3893_v57, %v10326_v41  ;;  %v5686_v3 = vld [vmem:[#allocation2 + $0x8e] sm:$0xff]  ;;  %v5687_v41 = vld [vmem:[#allocation2 + $0x96] sm:$0xff] }
 0x2fa   : > { %v7769_v28 = vpop.f32.mrf.mxu1  ;;  %v7855_v1 = vpop.f32.mrf.mxu0  ;;  %8266 = vmatmul.mubr.f32.gmra.mxu1 %v5684_v50 }
 0x2fb   : > { %v10464_v13 = vadd.f32 %v4226_v21, %v3992_v8  ;;  %v3995_v53 = vadd.f32 %v7769_v28, %v10330_v44  ;;  %8268 = vmatprep.mubr.f32.mxu1 %v5685_v34 }
 0x2fc   : > { %v3903_v2 = vpop.f32.mrf.mxu1  ;;  %v4236_v48 = vpop.f32.mrf.mxu0 }
 0x2fd   : > { %v10467_v47 = vadd.f32 %v7855_v1, %v3995_v53  ;;  %v3994_v5 = vadd.f32 %v3903_v2, %v10334_v52  ;;  %v5688_v1 = vld [vmem:[#allocation2 + $0x9e] sm:$0xff]  ;;  %v5689_v52 = vld [vmem:[#allocation2 + $0xa6] sm:$0xff] }
 0x2fe   : > { %v7772_v37 = vpop.f32.mrf.mxu1  ;;  %v7858_v46 = vpop.f32.mrf.mxu0  ;;  %8269 = vmatmul.mubr.f32.gmra.mxu1 %v5686_v3 }
 0x2ff   : > { %v10470_v57 = vadd.f32 %v4236_v48, %v3994_v5  ;;  %v3997_v50 = vadd.f32 %v7772_v37, %v10338_v59  ;;  %8271 = vmatprep.mubr.f32.mxu1 %v5687_v41 }
 0x300   : > { %v3913_v21 = vpop.f32.mrf.mxu1  ;;  %v4246_v8 = vpop.f32.mrf.mxu0 }
 0x301   : > { %v10473_v44 = vadd.f32 %v7858_v46, %v3997_v50  ;;  %v3996_v28 = vadd.f32 %v3913_v21, %v10342_v51  ;;  %v5690_v46 = vld [vmem:[#allocation2 + $0xae] sm:$0xff]  ;;  %v5691_v51 = vld [vmem:[#allocation2 + $0xb6] sm:$0xff] }
 0x302   : > { %v7775_v34 = vpop.f32.mrf.mxu1  ;;  %v7861_v53 = vpop.f32.mrf.mxu0  ;;  %8272 = vmatmul.mubr.f32.gmra.mxu1 %v5688_v1 }
 0x303   : > { %v10476_v2 = vadd.f32 %v4246_v8, %v3996_v28  ;;  %v3999_v3 = vadd.f32 %v7775_v34, %v10346_v58  ;;  %8274 = vmatprep.mubr.f32.mxu1 %v5689_v52  ;;  %v11203_v34 = vld [vmem:[#allocation39_spill] sm:$0xff] }
 0x304   : > { %v3923_v48 = vpop.f32.mrf.mxu1  ;;  %v4256_v5 = vpop.f32.mrf.mxu0 }
 0x305   : > { %v10479_v59 = vadd.f32 %v7861_v53, %v3999_v3  ;;  %v3998_v37 = vadd.f32 %v3923_v48, %v10350_v7  ;;  %v5692_v53 = vld [vmem:[#allocation2 + $0xbe] sm:$0xff]  ;;  %v5693_v7 = vld [vmem:[#allocation2 + $0xc6] sm:$0xff] }
 0x306   : > { %v7778_v41 = vpop.f32.mrf.mxu1  ;;  %v7864_v50 = vpop.f32.mrf.mxu0  ;;  %8275 = vmatmul.mubr.f32.gmra.mxu1 %v5690_v46 }
 0x307   : > { %v10482_v21 = vadd.f32 %v4256_v5, %v3998_v37  ;;  %v4001_v1 = vadd.f32 %v7778_v41, %v10354_v20  ;;  %8277 = vmatprep.mubr.f32.mxu1 %v5691_v51 }
 0x308   : > { %v3933_v8 = vpop.f32.mrf.mxu1  ;;  %v4266_v28 = vpop.f32.mrf.mxu0 }
 0x309   : > { %v10485_v58 = vadd.f32 %v7864_v50, %v4001_v1  ;;  %v4000_v52 = vadd.f32 %v3933_v8, %v11203_v34  ;;  %v5694_v50 = vld [vmem:[#allocation2 + $0xce] sm:$0xff]  ;;  %v5695_v8 = vld [vmem:[#allocation2 + $0xd6] sm:$0xff]  ;;  %v3657_v34 = vadd.f32 %v10374_v54, %v10372_v30  ;;  %v3667_v30 = vadd.f32 %v10382_v61, %v10380_v4 }
 0x30a   : > { %v7781_v3 = vpop.f32.mrf.mxu1  ;;  %v7867_v22 = vpop.f32.mrf.mxu0  ;;  %8278 = vmatmul.mubr.f32.gmra.mxu1 %v5692_v53 }
 0x30b   : > { %v10488_v48 = vadd.f32 %v4266_v28, %v4000_v52  ;;  %v4003_v46 = vadd.f32 %v7781_v3, %v10362_v39  ;;  %8280 = vmatprep.mubr.f32.mxu1 %v5693_v7  ;;  %v11204_v3 = vld [vmem:[#allocation37_spill] sm:$0xff] }
 0x30c   : > { %v3943_v5 = vpop.f32.mrf.mxu1  ;;  %v4276_v37 = vpop.f32.mrf.mxu0 }
 0x30d   : > { %v10491_v20 = vadd.f32 %v7867_v22, %v4003_v46  ;;  %v4002_v41 = vadd.f32 %v3943_v5, %v10366_v27  ;;  %v11205_v22 = vld [vmem:[#allocation38_spill] sm:$0xff] }
 0x30e   : > { %v7784_v51 = vpop.f32.mrf.mxu1  ;;  %v7870_v1 = vpop.f32.mrf.mxu0  ;;  %8281 = vmatmul.mubr.f32.gmra.mxu1 %v5694_v50  ;;  %v3497_v7 = vadd.f32 %v11205_v22, %v11204_v3  ;;  %v5696_v5 = vld [vmem:[#allocation2 + $0xde] sm:$0xff]  ;;  %v5699_v3 = vld [vmem:[#allocation2 + $0xf6] sm:$0xff] }
 0x30f   : > { %v10496_v53 = vadd.f32 %v4276_v37, %v4002_v41  ;;  %v4005_v28 = vadd.f32 %v7784_v51, %v10369_v0  ;;  %8283 = vmatprep.mubr.f32.mxu1 %v5695_v8 }
 0x310   : > { %v3953_v39 = vpop.f32.mrf.mxu1  ;;  %v4286_v52 = vpop.f32.mrf.mxu0  ;;  %v3972_v54 = vadd.f32 %v10386_v36, %v3497_v7  ;;  %v6216_v36 = vld [vmem:[#allocation21 + $0x78] sm:$0xff] }
 0x311   : > { %v10501_v46 = vadd.f32 %v7870_v1, %v4005_v28  ;;  %v4004_v27 = vadd.f32 %v3953_v39, %v3657_v34  ;;  %v5698_v34 = vld [vmem:[#allocation2 + $0xee] sm:$0xff]  ;;  %8304 = vmatprep.subr.mxu0 %v6216_v36  ;;  %8384 = vmatprep.subr.mxu1 %v6216_v36  ;;  %v5700_v7 = vld [vmem:[#allocation2 + $0xfe] sm:$0xff] }
 0x312   : > { %v7787_v17 = vpop.f32.mrf.mxu1  ;;  %v7873_v50 = vpop.f32.mrf.mxu0  ;;  %8284 = vmatmul.mubr.f32.gmra.mxu1 %v5696_v5  ;;  %v4305_v22 = vadd.f32 %v10388_v49, %v3972_v54  ;;  %8305 = vmatpush3.msra.mxu0 %v6216_v36  ;;  %v5701_v49 = vld [vmem:[#allocation2 + $0x106] sm:$0xff] }
 0x313   : > { %v10506_v0 = vadd.f32 %v4286_v52, %v4004_v27  ;;  %v4007_v37 = vadd.f32 %v7787_v17, %v10377_v31  ;;  %8286 = vmatprep.mubr.f32.mxu1 %v5697_v11  ;;  %8400 = vmatpush3.msra.mxu1 %v6216_v36 }
 0x314   : > { %v3963_v41 = vpop.f32.mrf.mxu1  ;;  %v4296_v51 = vpop.f32.mrf.mxu0 }
 0x315   : > { %v10509_v1 = vadd.f32 %v7873_v50, %v4007_v37  ;;  %v4006_v8 = vadd.f32 %v3963_v41, %v3667_v30  ;;  %v4307_v50 = vadd.f32 %v10394_v29, %v10399_v42  ;;  %v4309_v29 = vadd.f32 %v10402_v15, %v10407_v26 }
 0x316   : > { %v7908_v28 = vpop.f32.mrf.mxu1  ;;  %v7994_v39 = vpop.f32.mrf.mxu0  ;;  %8287 = vmatmul.mubr.f32.gmra.mxu1 %v5698_v34  ;;  %v6215_v34 = vld [vmem:[#allocation21 + $0x70] sm:$0xff]  ;;  %v4311_v15 = vadd.f32 %v10410_v25, %v10415_v33 }
 0x317   : > { %v10512_v4 = vadd.f32 %v4296_v51, %v4006_v8  ;;  %v4639_v61 = vadd.f32 %v7908_v28, %v10391_v6  ;;  %8289 = vmatprep.mubr.f32.mxu1 %v5699_v3  ;;  %v5702_v8 = vld [vmem:[#allocation2 + $0x10e] sm:$0xff]  ;;  %v5703_v3 = vld [vmem:[#allocation2 + $0x116] sm:$0xff]  ;;  %8306 = vmatprep.subr.mxu0 %v6215_v34 }
 0x318   : > { %v4459_v17 = vpop.f32.mrf.mxu1  ;;  %v4792_v11 = vpop.f32.mrf.mxu0  ;;  %8307 = vmatpush3.msra.mxu0 %v6215_v34  ;;  %8385 = vmatprep.subr.mxu1 %v6215_v34 }
 0x319   : > { %v10515_v31 = vadd.f32 %v7994_v39, %v4639_v61  ;;  %v4638_v52 = vadd.f32 %v4459_v17, %v4305_v22  ;;  %8401 = vmatpush3.msra.mxu1 %v6215_v34  ;;  %v5706_v34 = vld [vmem:[#allocation2 + $0x12e] sm:$0xff] }
 0x31a   : > { %v7911_v27 = vpop.f32.mrf.mxu1  ;;  %v7997_v5 = vpop.f32.mrf.mxu0  ;;  %8290 = vmatmul.mubr.f32.gmra.mxu1 %v5700_v7 }
 0x31b   : > { %v10519_v6 = vadd.f32 %v4792_v11, %v4638_v52  ;;  %v4641_v30 = vadd.f32 %v7911_v27, %v10396_v9  ;;  %8292 = vmatprep.mubr.f32.mxu1 %v5701_v49  ;;  %v5704_v11 = vld [vmem:[#allocation2 + $0x11e] sm:$0xff]  ;;  %v6214_v52 = vld [vmem:[#allocation21 + $0x68] sm:$0xff] }
 0x31c   : > { %v4469_v54 = vpop.f32.mrf.mxu1  ;;  %v4802_v37 = vpop.f32.mrf.mxu0  ;;  %8308 = vmatprep.subr.mxu0 %v6214_v52  ;;  %v6213_v49 = vld [vmem:[#allocation21 + $0x60] sm:$0xff]  ;;  %8386 = vmatprep.subr.mxu1 %v6214_v52 }
 0x31d   : > { %v10522_v41 = vadd.f32 %v7997_v5, %v4641_v30  ;;  %v4640_v51 = vadd.f32 %v4469_v54, %v4307_v50  ;;  %v5705_v5 = vld [vmem:[#allocation2 + $0x126] sm:$0xff]  ;;  %8309 = vmatpush3.msra.mxu0 %v6214_v52  ;;  %v6212_v50 = vld [vmem:[#allocation21 + $0x58] sm:$0xff]  ;;  %8402 = vmatpush3.msra.mxu1 %v6214_v52 }
 0x31e   : > { %v7914_v28 = vpop.f32.mrf.mxu1  ;;  %v8000_v39 = vpop.f32.mrf.mxu0  ;;  %8293 = vmatmul.mubr.f32.gmra.mxu1 %v5702_v8  ;;  %8310 = vmatprep.subr.mxu0 %v6213_v49 }
 0x31f   : > { %v10526_v42 = vadd.f32 %v4802_v37, %v4640_v51  ;;  %v4643_v9 = vadd.f32 %v7914_v28, %v10404_v62  ;;  %8295 = vmatprep.mubr.f32.mxu1 %v5703_v3  ;;  %v5707_v37 = vld [vmem:[#allocation2 + $0x136] sm:$0xff]  ;;  %8311 = vmatpush3.msra.mxu0 %v6213_v49 }
 0x320   : > { %v4479_v22 = vpop.f32.mrf.mxu1  ;;  %v4812_v61 = vpop.f32.mrf.mxu0  ;;  %v6211_v28 = vld [vmem:[#allocation21 + $0x50] sm:$0xff]  ;;  %8312 = vmatprep.subr.mxu0 %v6212_v50  ;;  %8387 = vmatprep.subr.mxu1 %v6213_v49 }
 0x321   : > { %v10529_v36 = vadd.f32 %v8000_v39, %v4643_v9  ;;  %v4642_v17 = vadd.f32 %v4479_v22, %v4309_v29  ;;  %v5708_v29 = vld [vmem:[#allocation2 + $0x13e] sm:$0xff]  ;;  %8313 = vmatpush3.msra.mxu0 %v6212_v50  ;;  %8403 = vmatpush3.msra.mxu1 %v6213_v49 }
 0x322   : > { %v7917_v7 = vpop.f32.mrf.mxu1  ;;  %v8003_v27 = vpop.f32.mrf.mxu0  ;;  %8296 = vmatmul.mubr.f32.gmra.mxu1 %v5704_v11  ;;  %8314 = vmatprep.subr.mxu0 %v6211_v28 }
 0x323   : > { %v10533_v62 = vadd.f32 %v4812_v61, %v4642_v17  ;;  %v4645_v26 = vadd.f32 %v7917_v7, %v10412_v40  ;;  %8298 = vmatprep.mubr.f32.mxu1 %v5705_v5  ;;  %v4313_v40 = vadd.f32 %v10419_v19, %v10424_v18  ;;  %8315 = vmatpush3.msra.mxu0 %v6211_v28 }
 0x324   : > { %v4489_v30 = vpop.f32.mrf.mxu1  ;;  %v4822_v54 = vpop.f32.mrf.mxu0  ;;  %v4315_v19 = vadd.f32 %v10427_v16, %v10432_v14  ;;  %8388 = vmatprep.subr.mxu1 %v6212_v50  ;;  %v6210_v14 = vld [vmem:[#allocation21 + $0x48] sm:$0xff] }
 0x325   : > { %v10536_v51 = vadd.f32 %v8003_v27, %v4645_v26  ;;  %v4644_v8 = vadd.f32 %v4489_v30, %v4311_v15  ;;  %8404 = vmatpush3.msra.mxu1 %v6212_v50  ;;  %8316 = vmatprep.subr.mxu0 %v6210_v14  ;;  %v6209_v50 = vld [vmem:[#allocation21 + $0x40] sm:$0xff] }
 0x326   : > { %v7920_v25 = vpop.f32.mrf.mxu1  ;;  %v8006_v33 = vpop.f32.mrf.mxu0  ;;  %8299 = vmatmul.mubr.f32.gmra.mxu1 %v5706_v34  ;;  %8389 = vmatprep.subr.mxu1 %v6211_v28 }
 0x327   : > { %v10540_v39 = vadd.f32 %v4822_v54, %v4644_v8  ;;  %v4647_v3 = vadd.f32 %v7920_v25, %v10421_v60  ;;  %8301 = vmatprep.mubr.f32.mxu1 %v5707_v37  ;;  %v4317_v54 = vadd.f32 %v10435_v38, %v10440_v43  ;;  %8405 = vmatpush3.msra.mxu1 %v6211_v28  ;;  %v6208_v43 = vld [vmem:[#allocation21 + $0x38] sm:$0xff] }
 0x328   : > { %v4499_v9 = vpop.f32.mrf.mxu1  ;;  %v4832_v22 = vpop.f32.mrf.mxu0  ;;  %8390 = vmatprep.subr.mxu1 %v6210_v14  ;;  %8317 = vmatpush3.msra.mxu0 %v6210_v14 }
 0x329   : > { %v10543_v61 = vadd.f32 %v8006_v33, %v4647_v3  ;;  %v4646_v17 = vadd.f32 %v4499_v9, %v4313_v40  ;;  %8406 = vmatpush3.msra.mxu1 %v6210_v14  ;;  %8318 = vmatprep.subr.mxu0 %v6209_v50  ;;  %v6207_v9 = vld [vmem:[#allocation21 + $0x30] sm:$0xff] }
 0x32a   : > { %v7923_v11 = vpop.f32.mrf.mxu1  ;;  %v8009_v52 = vpop.f32.mrf.mxu0  ;;  %8302 = vmatmul.mubr.f32.gmra.mxu1 %v5708_v29  ;;  %8391 = vmatprep.subr.mxu1 %v6209_v50 }
 0x32b   : > { %v10547_v18 = vadd.f32 %v4832_v22, %v4646_v17  ;;  %v4649_v60 = vadd.f32 %v7923_v11, %v10429_v23  ;;  %8319 = vmatpush3.msra.mxu0 %v6209_v50  ;;  %8407 = vmatpush3.msra.mxu1 %v6209_v50 }
 0x32c   : > { %v4509_v7 = vpop.f32.mrf.mxu1  ;;  %v4842_v27 = vpop.f32.mrf.mxu0  ;;  %8320 = vmatprep.subr.mxu0 %v6208_v43  ;;  %8392 = vmatprep.subr.mxu1 %v6208_v43 }
 0x32d   : > { %v10550_v5 = vadd.f32 %v8009_v52, %v4649_v60  ;;  %v4648_v15 = vadd.f32 %v4509_v7, %v4315_v19  ;;  %8321 = vmatpush3.msra.mxu0 %v6208_v43  ;;  %8408 = vmatpush3.msra.mxu1 %v6208_v43  ;;  %v6206_v52 = vld [vmem:[#allocation21 + $0x28] sm:$0xff] }
 0x32e   : > { %v7926_v26 = vpop.f32.mrf.mxu1  ;;  %v8012_v30 = vpop.f32.mrf.mxu0  ;;  %8322 = vmatprep.subr.mxu0 %v6207_v9  ;;  %8393 = vmatprep.subr.mxu1 %v6207_v9 }
 0x32f   : > { %v10554_v37 = vadd.f32 %v4842_v27, %v4648_v15  ;;  %v4651_v16 = vadd.f32 %v7926_v26, %v10437_v12  ;;  %8323 = vmatpush3.msra.mxu0 %v6207_v9  ;;  %8409 = vmatpush3.msra.mxu1 %v6207_v9  ;;  %v6205_v27 = vld [vmem:[#allocation21 + $0x20] sm:$0xff] }
 0x330   : > { %v4519_v23 = vpop.f32.mrf.mxu1  ;;  %v4852_v49 = vpop.f32.mrf.mxu0  ;;  %8324 = vmatprep.subr.mxu0 %v6206_v52  ;;  %8394 = vmatprep.subr.mxu1 %v6206_v52 }
 0x331   : > { %v10557_v8 = vadd.f32 %v8012_v30, %v4651_v16  ;;  %v4650_v34 = vadd.f32 %v4519_v23, %v4317_v54  ;;  %8325 = vmatpush3.msra.mxu0 %v6206_v52  ;;  %8410 = vmatpush3.msra.mxu1 %v6206_v52  ;;  %v6204_v54 = vld [vmem:[#allocation21 + $0x18] sm:$0xff] }
 0x332   : > { %v7929_v25 = vpop.f32.mrf.mxu1  ;;  %v8015_v33 = vpop.f32.mrf.mxu0  ;;  %8326 = vmatprep.subr.mxu0 %v6205_v27  ;;  %8395 = vmatprep.subr.mxu1 %v6205_v27 }
 0x333   : > { %v10559_v38 = vadd.f32 %v4852_v49, %v4650_v34  ;;  %v4653_v12 = vadd.f32 %v7929_v25, %v10443_v55  ;;  %8327 = vmatpush3.msra.mxu0 %v6205_v27  ;;  %8411 = vmatpush3.msra.mxu1 %v6205_v27  ;;  %v6203_v49 = vld [vmem:[#allocation21 + $0x10] sm:$0xff] }
 0x334   : > { %v4529_v28 = vpop.f32.mrf.mxu1  ;;  %v4862_v40 = vpop.f32.mrf.mxu0  ;;  %8328 = vmatprep.subr.mxu0 %v6204_v54  ;;  %8396 = vmatprep.subr.mxu1 %v6204_v54 }
 0x335   : > { %v10562_v3 = vadd.f32 %v8015_v33, %v4653_v12  ;;  %v4652_v29 = vadd.f32 %v4529_v28, %v10446_v63  ;;  %8329 = vmatpush3.msra.mxu0 %v6204_v54  ;;  %8412 = vmatpush3.msra.mxu1 %v6204_v54  ;;  %v6202_v33 = vld [vmem:[#allocation21 + $0x8] sm:$0xff] }
 0x336   : > { %v7932_v22 = vpop.f32.mrf.mxu1  ;;  %v8018_v17 = vpop.f32.mrf.mxu0  ;;  %8330 = vmatprep.subr.mxu0 %v6203_v49  ;;  %8397 = vmatprep.subr.mxu1 %v6203_v49 }
 0x337   : > { %v10565_v11 = vadd.f32 %v4862_v40, %v4652_v29  ;;  %v4655_v55 = vadd.f32 %v7932_v22, %v10449_v24  ;;  %8331 = vmatpush3.msra.mxu0 %v6203_v49  ;;  %8413 = vmatpush3.msra.mxu1 %v6203_v49  ;;  %v6201_v40 = vld [vmem:[#allocation21] sm:$0xff] }
 0x338   : > { %v4539_v19 = vpop.f32.mrf.mxu1  ;;  %v4872_v60 = vpop.f32.mrf.mxu0  ;;  %8332 = vmatprep.subr.mxu0 %v6202_v33  ;;  %8398 = vmatprep.subr.mxu1 %v6202_v33 }
 0x339   : > { %v10568_v7 = vadd.f32 %v8018_v17, %v4655_v55  ;;  %v4654_v63 = vadd.f32 %v4539_v19, %v10452_v45  ;;  %8333 = vmatpush3.msra.mxu0 %v6202_v33  ;;  %8414 = vmatpush3.msra.mxu1 %v6202_v33 }
 0x33a   : > { %v7935_v15 = vpop.f32.mrf.mxu1  ;;  %v8021_v26 = vpop.f32.mrf.mxu0  ;;  %8334 = vmatprep.subr.mxu0 %v6201_v40  ;;  %8399 = vmatprep.subr.mxu1 %v6201_v40 }
 0x33b   : > { %v10571_v30 = vadd.f32 %v4872_v60, %v4654_v63  ;;  %v4657_v24 = vadd.f32 %v7935_v15, %v10455_v35  ;;  %8335 = vmatpush3.msra.mxu0 %v6201_v40  ;;  %8415 = vmatpush3.msra.mxu1 %v6201_v40 }
 0x33c   : > { %v4549_v16 = vpop.f32.mrf.mxu1  ;;  %v4882_v14 = vpop.f32.mrf.mxu0 }
 0x33d   : > { %v10574_v23 = vadd.f32 %v8021_v26, %v4657_v24  ;;  %v4656_v45 = vadd.f32 %v4549_v16, %v10458_v56 }
 0x33e   : > { %v7938_v34 = vpop.f32.mrf.mxu1  ;;  %v8024_v50 = vpop.f32.mrf.mxu0 }
 0x33f   : > { %v10577_v25 = vadd.f32 %v4882_v14, %v4656_v45  ;;  %v4659_v35 = vadd.f32 %v7938_v34, %v10461_v32 }
 0x340   : > { %v4559_v12 = vpop.f32.mrf.mxu1  ;;  %v4892_v43 = vpop.f32.mrf.mxu0 }
 0x341   : > { %v10580_v28 = vadd.f32 %v8024_v50, %v4659_v35  ;;  %v4658_v56 = vadd.f32 %v4559_v12, %v10464_v13 }
 0x342   : > { %v7941_v29 = vpop.f32.mrf.mxu1  ;;  %v8027_v9 = vpop.f32.mrf.mxu0 }
 0x343   : > { %v10583_v22 = vadd.f32 %v4892_v43, %v4658_v56  ;;  %v4661_v32 = vadd.f32 %v7941_v29, %v10467_v47 }
 0x344   : > { %v4569_v17 = vpop.f32.mrf.mxu1  ;;  %v4902_v55 = vpop.f32.mrf.mxu0 }
 0x345   : > { %v10586_v52 = vadd.f32 %v8027_v9, %v4661_v32  ;;  %v4660_v19 = vadd.f32 %v4569_v17, %v10470_v57 }
 0x346   : > { %v7944_v13 = vpop.f32.mrf.mxu1  ;;  %v8030_v60 = vpop.f32.mrf.mxu0 }
 0x347   : > { %v10589_v63 = vadd.f32 %v4902_v55, %v4660_v19  ;;  %v4663_v27 = vadd.f32 %v7944_v13, %v10473_v44 }
 0x348   : > { %v4579_v15 = vpop.f32.mrf.mxu1  ;;  %v4912_v26 = vpop.f32.mrf.mxu0 }
 0x349   : > { %v10592_v24 = vadd.f32 %v8030_v60, %v4663_v27  ;;  %v4662_v47 = vadd.f32 %v4579_v15, %v10476_v2 }
 0x34a   : > { %v7947_v54 = vpop.f32.mrf.mxu1  ;;  %v8033_v16 = vpop.f32.mrf.mxu0 }
 0x34b   : > { %v10595_v14 = vadd.f32 %v4912_v26, %v4662_v47  ;;  %v4665_v45 = vadd.f32 %v7947_v54, %v10479_v59 }
 0x34c   : > { %v4589_v49 = vpop.f32.mrf.mxu1  ;;  %v4922_v57 = vpop.f32.mrf.mxu0 }
 0x34d   : > { %v10598_v34 = vadd.f32 %v8033_v16, %v4665_v45  ;;  %v4664_v50 = vadd.f32 %v4589_v49, %v10482_v21 }
 0x34e   : > { %v7950_v35 = vpop.f32.mrf.mxu1  ;;  %v8036_v44 = vpop.f32.mrf.mxu0 }
 0x34f   : > { %v10601_v33 = vadd.f32 %v4922_v57, %v4664_v50  ;;  %v4667_v12 = vadd.f32 %v7950_v35, %v10485_v58 }
 0x350   : > { %v4599_v43 = vpop.f32.mrf.mxu1  ;;  %v4932_v2 = vpop.f32.mrf.mxu0 }
 0x351   : > { %v10604_v56 = vadd.f32 %v8036_v44, %v4667_v12  ;;  %v4666_v40 = vadd.f32 %v4599_v43, %v10488_v48 }
 0x352   : > { %v7953_v29 = vpop.f32.mrf.mxu1  ;;  %v8039_v59 = vpop.f32.mrf.mxu0 }
 0x353   : > { %v10607_v9 = vadd.f32 %v4932_v2, %v4666_v40  ;;  %v4669_v32 = vadd.f32 %v7953_v29, %v10491_v20 }
 0x354   : > { %v4609_v17 = vpop.f32.mrf.mxu1  ;;  %v4942_v21 = vpop.f32.mrf.mxu0 }
 0x355   : > { %v10610_v55 = vadd.f32 %v8039_v59, %v4669_v32  ;;  %v4668_v19 = vadd.f32 %v4609_v17, %v10496_v53 }
 0x356   : > { %v7956_v13 = vpop.f32.mrf.mxu1  ;;  %v8042_v58 = vpop.f32.mrf.mxu0 }
 0x357   : > { %v10613_v60 = vadd.f32 %v4942_v21, %v4668_v19  ;;  %v4671_v27 = vadd.f32 %v7956_v13, %v10501_v46 }
 0x358   : > { %v4619_v15 = vpop.f32.mrf.mxu1  ;;  %v4952_v48 = vpop.f32.mrf.mxu0 }
 0x359   : > { %v10616_v26 = vadd.f32 %v8042_v58, %v4671_v27  ;;  %v4670_v47 = vadd.f32 %v4619_v15, %v10506_v0 }
 0x35a   : > { %v7959_v54 = vpop.f32.mrf.mxu1  ;;  %v8045_v20 = vpop.f32.mrf.mxu0 }
 0x35b   : > { %v10619_v16 = vadd.f32 %v4952_v48, %v4670_v47  ;;  %v4673_v45 = vadd.f32 %v7959_v54, %v10509_v1 }
 0x35c   : > { %v4629_v49 = vpop.f32.mrf.mxu1  ;;  %v4962_v53 = vpop.f32.mrf.mxu0 }
 0x35d   : > { %v10622_v57 = vadd.f32 %v8045_v20, %v4673_v45  ;;  %v4672_v50 = vadd.f32 %v4629_v49, %v10512_v4 }
 0x35e   : > { %v8080_v35 = vpop.f32.mrf.mxu1  ;;  %v10625_v46 = vpop.f32.mrf.mxu0 }
 0x35f   : > { %v10627_v44 = vadd.f32 %v4962_v53, %v4672_v50  ;;  %v10630_v12 = vadd.f32 %v8080_v35, %v10515_v31 }
 0x360   : > { %v5125_v0 = vpop.f32.mrf.mxu1  ;;  %v10635_v2 = vpop.f32.mrf.mxu0 }
 0x361   : > { %v10633_v43 = vadd.f32 %v5125_v0, %v10519_v6 }
 0x362   : > { %v8083_v1 = vpop.f32.mrf.mxu1  ;;  %v10640_v4 = vpop.f32.mrf.mxu0 }
 0x363   : > { %v10638_v40 = vadd.f32 %v8083_v1, %v10522_v41 }
 0x364   : > { %v5135_v29 = vpop.f32.mrf.mxu1  ;;  %v10648_v21 = vpop.f32.mrf.mxu0 }
 0x365   : > { %v10643_v59 = vadd.f32 %v5135_v29, %v10526_v42 }
 0x366   : > { %v8086_v32 = vpop.f32.mrf.mxu1  ;;  %v10656_v58 = vpop.f32.mrf.mxu0 }
 0x367   : > { %v10646_v31 = vadd.f32 %v8086_v32, %v10529_v36 }
 0x368   : > { %v5145_v17 = vpop.f32.mrf.mxu1  ;;  %v10664_v48 = vpop.f32.mrf.mxu0 }
 0x369   : > { %v10651_v6 = vadd.f32 %v5145_v17, %v10533_v62 }
 0x36a   : > { %v8089_v19 = vpop.f32.mrf.mxu1  ;;  %v10672_v20 = vpop.f32.mrf.mxu0 }
 0x36b   : > { %v10654_v41 = vadd.f32 %v8089_v19, %v10536_v51 }
 0x36c   : > { %v5155_v13 = vpop.f32.mrf.mxu1  ;;  %v10680_v53 = vpop.f32.mrf.mxu0 }
 0x36d   : > { %v10659_v42 = vadd.f32 %v5155_v13, %v10540_v39 }
 0x36e   : > { %v8092_v27 = vpop.f32.mrf.mxu1  ;;  %v10688_v0 = vpop.f32.mrf.mxu0 }
 0x36f   : > { %v10662_v36 = vadd.f32 %v8092_v27, %v10543_v61 }
 0x370   : > { %v5165_v15 = vpop.f32.mrf.mxu1  ;;  %v10696_v32 = vpop.f32.mrf.mxu0 }
 0x371   : > { %v10667_v62 = vadd.f32 %v5165_v15, %v10547_v18 }
 0x372   : > { %v8095_v47 = vpop.f32.mrf.mxu1  ;;  %v10704_v13 = vpop.f32.mrf.mxu0 }
 0x373   : > { %v10670_v51 = vadd.f32 %v8095_v47, %v10550_v5  ;;  %v1156_v47 = vld [vmem:[#allocation16 + $0x1] sm:$0x1] }
 0x374   : > { %v5175_v54 = vpop.f32.mrf.mxu1 }
 0x375   : > { %v10675_v39 = vadd.f32 %v5175_v54, %v10554_v37  ;;  %v10712_v54 = vpop.f32.mrf.mxu0 }
 0x376   : > { %v8098_v45 = vpop.f32.mrf.mxu1 }
 0x377   : > { %v10678_v61 = vadd.f32 %v8098_v45, %v10557_v8 }
 0x378   : > { %v5185_v49 = vpop.f32.mrf.mxu1 }
 0x379   : > { %v10683_v18 = vadd.f32 %v5185_v49, %v10559_v38  ;;  %v1157_v49 = vmul.f32 %v1156_v47, %v9295_v10 }
 0x37a   : > { %v8101_v50 = vpop.f32.mrf.mxu1 }
 0x37b   : > { %v10686_v5 = vadd.f32 %v8101_v50, %v10562_v3 }
 0x37c   : > { %v5195_v35 = vpop.f32.mrf.mxu1 }
 0x37d   : > { %v10691_v37 = vadd.f32 %v5195_v35, %v10565_v11  ;;  %v1595_v35 = vld [vmem:[#allocation16 + $0x2] sm:$0x1] }
 0x37e   : > { %v8104_v1 = vpop.f32.mrf.mxu1 }
 0x37f   : > { %v10694_v8 = vadd.f32 %v8104_v1, %v10568_v7  ;;  %v10721_v1 = vpop.f32.mrf.mxu0 }
 0x380   : > { %v5205_v29 = vpop.f32.mrf.mxu1 }
 0x381   : > { %v10699_v38 = vadd.f32 %v5205_v29, %v10571_v30 }
 0x382   : > { %v8107_v17 = vpop.f32.mrf.mxu1 }
 0x383   : > { %v10702_v3 = vadd.f32 %v8107_v17, %v10574_v23 }
 0x384   : > { %v5215_v19 = vpop.f32.mrf.mxu1 }
 0x385   : > { %v10707_v11 = vadd.f32 %v5215_v19, %v10577_v25  ;;  %v719_v25 = vld [vmem:[#allocation16] sm:$0x1]  ;;  %v11209_v19 = vld [vmem:[#allocation34_spill] sm:$0xff] }
 0x386   : > { %v8110_v27 = vpop.f32.mrf.mxu1 }
 0x387   : > { %v10710_v7 = vadd.f32 %v8110_v27, %v10580_v28  ;;  %v1596_v27 = vmul.f32 %v1595_v35, %v11209_v19  ;;  %v11213_v19 = vld [vmem:[#allocation36_spill] sm:$0xff] }
 0x388   : > { %v5225_v15 = vpop.f32.mrf.mxu1 }
 0x389   : > { %v10715_v30 = vadd.f32 %v5225_v15, %v10583_v22  ;;  %v1158_v22 = vadd.f32 %v1157_v49, %v719_v25 }
 0x38a   : > { %v8113_v45 = vpop.f32.mrf.mxu1 }
 0x38b   : > { %11206 = vst [vmem:[#allocation39_spill] sm:$0xff] %v10715_v30  ;;  %v10718_v23 = vadd.f32 %v8113_v45, %v10586_v52  ;;  %v2034_v52 = vld [vmem:[#allocation16 + $0x3] sm:$0x1]  ;;  %v10730_v45 = vpop.f32.mrf.mxu0 }
 0x38c   : > { %v5235_v50 = vpop.f32.mrf.mxu1 }
 0x38d   : > { %11207 = vst [vmem:[#allocation37_spill] sm:$0xff] %v10718_v23  ;;  %v10724_v28 = vadd.f32 %v5235_v50, %v10589_v63  ;;  %v1597_v63 = vadd.f32 %v1596_v27, %v1158_v22  ;;  %v11211_v50 = vld [vmem:[#allocation35_spill] sm:$0xff] }
 0x38e   : > { %v8116_v29 = vpop.f32.mrf.mxu1 }
 0x38f   : > { %11208 = vst [vmem:[#allocation38_spill] sm:$0xff] %v10724_v28  ;;  %v10727_v17 = vadd.f32 %v8116_v29, %v10592_v24  ;;  %v2035_v28 = vmul.f32 %v2034_v52, %v11211_v50  ;;  %v2473_v24 = vld [vmem:[#allocation16 + $0x4] sm:$0x1]  ;;  %v10739_v29 = vpop.f32.mrf.mxu0  ;;  %v2620_v50 = vld [vmem:[#allocation18] sm:$0x1] }
 0x390   : > { %v5245_v15 = vpop.f32.mrf.mxu1 }
 0x391   : > { %v10733_v10 = vadd.f32 %v5245_v15, %v10595_v14  ;;  %v2036_v14 = vadd.f32 %v2035_v28, %v1597_v63  ;;  %v2474_v15 = vmul.f32 %v2473_v24, %v11213_v19 }
 0x392   : > { %v8119_v47 = vpop.f32.mrf.mxu1 }
 0x393   : > { %11210 = vst [vmem:[#allocation34_spill] sm:$0xff] %v10733_v10  ;;  %v10736_v23 = vadd.f32 %v8119_v47, %v10598_v34  ;;  %v10748_v34 = vpop.f32.mrf.mxu0  ;;  %v2475_v47 = vadd.f32 %v2474_v15, %v2036_v14 }
 0x394   : > { %v5255_v30 = vpop.f32.mrf.mxu1 }
 0x395   : > { %v10742_v49 = vadd.f32 %v5255_v30, %v10601_v33  ;;  %v6049_v33 = vlaneseq  ;;  %v2621_v24 = vmul.f32 %v2620_v50, %v2475_v47  ;;  %v10779_v50 = vld [vmem:[#allocation18] ss:$0 sm:$0xff] }
 0x396   : > { %v8122_v25 = vpop.f32.mrf.mxu1 }
 0x397   : > { %11212 = vst [vmem:[#allocation35_spill] sm:$0xff] %v10742_v49  ;;  %v10745_v35 = vadd.f32 %v8122_v25, %v10604_v56  ;;  %v10756_v49 = vpop.f32.mrf.mxu0  ;;  %v2622_v25 = vld [vmem:[#allocation19] sm:$0x1] }
 0x398   : > { %v5265_v10 = vpop.f32.mrf.mxu1 }
 0x399   : > { %v10751_v22 = vadd.f32 %v5265_v10, %v10607_v9  ;;  %v6050_v9 = vshrl.u32 %v6049_v33, 7  ;;  %v10764_v19 = vpop.f32.mrf.mxu0 }
 0x39a   : > { %v8125_v27 = vpop.f32.mrf.mxu1 }
 0x39b   : > { %v10754_v52 = vadd.f32 %v8125_v27, %v10610_v55  ;;  %v2623_v27 = vadd.f32 %v2622_v25, %v2621_v24 }
 0x39c   : > { %v5275_v30 = vpop.f32.mrf.mxu1 }
 0x39d   : > { %v10759_v56 = vadd.f32 %v5275_v30, %v10613_v60  ;;  %v6051_v60 = vsub.s32 0, %v6050_v9  ;;  %v5640_v9 = vadd.f32 %v10640_v4, %v10638_v40 }
 0x39e   : > { %v8128_v28 = vpop.f32.mrf.mxu1 }
 0x39f   : > { %v10762_v63 = vadd.f32 %v8128_v28, %v10616_v26  ;;  %v5638_v26 = vadd.f32 %v10625_v46, %v10630_v12  ;;  %v10774_v28 = vpop.f32.mrf.mxu0 }
 0x3a0   : > { %v5285_v10 = vpop.f32.mrf.mxu1 }
 0x3a1   : > { %v10767_v55 = vadd.f32 %v5285_v10, %v10619_v16  ;;  %v5637_v16 = vadd.f32 %v10635_v2, %v10633_v43  ;;  %v10787_v25 = vpop.f32.mrf.mxu0 }
 0x3a2   : > { %v8131_v14 = vpop.f32.mrf.mxu1 }
 0x3a3   : > { %v10770_v15 = vadd.f32 %v8131_v14, %v10622_v57  ;;  %v10783_v57 = vrot.slane %v2623_v27, %v6051_v60  ;;  %v5639_v14 = vadd.f32 %v10648_v21, %v10643_v59  ;;  %v5642_v27 = vadd.f32 %v10656_v58, %v10646_v31 }
 0x3a4   : > { %v5295_v30 = vpop.f32.mrf.mxu1  ;;  %v5641_v59 = vadd.f32 %v10664_v48, %v10651_v6  ;;  %v5644_v31 = vadd.f32 %v10672_v20, %v10654_v41  ;;  %v5643_v6 = vadd.f32 %v10680_v53, %v10659_v42 }
 0x3a5   : > { %v10777_v47 = vadd.f32 %v5295_v30, %v10627_v44 }
 0x3a6   : > { %v8252_v33 = vpop.f32.mrf.mxu1 }
 0x3a7   : > { %v5971_v10 = vadd.f32 %v8252_v33, %v5638_v26  ;;  %v10796_v26 = vpop.f32.mrf.mxu0 }
 0x3a8   : > { %v5791_v24 = vpop.f32.mrf.mxu1 }
 0x3a9   : > { %v6014_v46 = vmul.f32 %v10779_v50, %v5971_v10  ;;  %v5970_v12 = vadd.f32 %v5791_v24, %v5637_v16 }
 0x3aa   : > { %v8255_v44 = vpop.f32.mrf.mxu1 }
 0x3ab   : > { %v6054_v30 = vadd.f32 %v10783_v57, %v6014_v46  ;;  %v6013_v43 = vmul.f32 %v10779_v50, %v5970_v12  ;;  %v5973_v2 = vadd.f32 %v8255_v44, %v5640_v9  ;;  %v10806_v12 = vpop.f32.mrf.mxu0 }
 0x3ac   : > { %v5801_v60 = vpop.f32.mrf.mxu1 }
 0x3ad   : > { %v6090_v40 = vmax.f32 %v6054_v30, 0.0  ;;  %v6053_v4 = vadd.f32 %v10783_v57, %v6013_v43  ;;  %v6016_v33 = vmul.f32 %v10779_v50, %v5973_v2  ;;  %v5972_v16 = vadd.f32 %v5801_v60, %v5639_v14 }
 0x3ae   : > { %v8258_v21 = vpop.f32.mrf.mxu1  ;;  %v5646_v60 = vadd.f32 %v10688_v0, %v10662_v36 }
 0x3af   : > { %v6089_v10 = vmax.f32 %v6053_v4, 0.0  ;;  %v6056_v24 = vadd.f32 %v10783_v57, %v6016_v33  ;;  %v6015_v9 = vmul.f32 %v10779_v50, %v5972_v16  ;;  %v5975_v46 = vadd.f32 %v8258_v21, %v5642_v27  ;;  %v10816_v33 = vpop.f32.mrf.mxu0 }
 0x3b0   : > { %v5811_v58 = vpop.f32.mrf.mxu1 }
 0x3b1   : > { %v6092_v44 = vmax.f32 %v6056_v24, 0.0  ;;  %v6055_v30 = vadd.f32 %v10783_v57, %v6015_v9  ;;  %v6018_v14 = vmul.f32 %v10779_v50, %v5975_v46  ;;  %v5974_v43 = vadd.f32 %v5811_v58, %v5641_v59  ;;  %8336 = vmatprep.mubr.f32.mxu0 %v6089_v10 }
 0x3b2   : > { %v8261_v48 = vpop.f32.mrf.mxu1  ;;  %8337 = vmatmul.mubr.f32.vlgmr.msra.gmra.mxu0 %v6090_v40  ;;  %v5645_v40 = vadd.f32 %v10696_v32, %v10667_v62  ;;  %v5648_v9 = vadd.f32 %v10704_v13, %v10670_v51 }
 0x3b3   : > { %6128 = vst [vmem:[#allocation4 + $0x16] sm:$0xff] %v6092_v44  ;;  %v6091_v2 = vmax.f32 %v6055_v30, 0.0  ;;  %v6058_v27 = vadd.f32 %v10783_v57, %v6018_v14  ;;  %v6017_v41 = vmul.f32 %v10779_v50, %v5974_v43  ;;  %v5977_v20 = vadd.f32 %v8261_v48, %v5644_v31  ;;  %v10826_v31 = vpop.f32.mrf.mxu0 }
 0x3b4   : > { %v5821_v4 = vpop.f32.mrf.mxu1  ;;  %v5647_v30 = vadd.f32 %v10712_v54, %v10675_v39  ;;  %v5650_v48 = vadd.f32 %v10721_v1, %v10678_v61 }
 0x3b5   : > { %6127 = vst [vmem:[#allocation4 + $0xe] sm:$0xfc] %v6091_v2  ;;  %v6094_v16 = vmax.f32 %v6058_v27, 0.0  ;;  %v6057_v59 = vadd.f32 %v10783_v57, %v6017_v41  ;;  %v6020_v42 = vmul.f32 %v10779_v50, %v5977_v20  ;;  %v5976_v53 = vadd.f32 %v5821_v4, %v5643_v6  ;;  %v10838_v41 = vpop.f32.mrf.mxu0 }
 0x3b6   : > { %v8264_v21 = vpop.f32.mrf.mxu1  ;;  %v5649_v4 = vadd.f32 %v10730_v45, %v10683_v18 }
 0x3b7   : > { %6131 = vst [vmem:[#allocation4 + $0x24] sm:$0xff] %v6094_v16  ;;  %v6093_v10 = vmax.f32 %v6057_v59, 0.0  ;;  %v6060_v24 = vadd.f32 %v10783_v57, %v6020_v42  ;;  %v6019_v36 = vmul.f32 %v10779_v50, %v5976_v53  ;;  %v5979_v0 = vadd.f32 %v8264_v21, %v5646_v60 }
 0x3b8   : > { %v5831_v46 = vpop.f32.mrf.mxu1  ;;  %v5652_v53 = vadd.f32 %v10739_v29, %v10686_v5 }
 0x3b9   : > { %6129 = vst [vmem:[#allocation4 + $0x1e] sm:$0x3] %v6093_v10  ;;  %6130 = vst [vmem:[#allocation4 + $0x1c] sm:$0xf0] %v6093_v10  ;;  %v6096_v58 = vmax.f32 %v6060_v24, 0.0  ;;  %v6059_v44 = vadd.f32 %v10783_v57, %v6019_v36  ;;  %v6022_v62 = vmul.f32 %v10779_v50, %v5979_v0  ;;  %v5978_v32 = vadd.f32 %v5831_v46, %v5645_v40  ;;  %v10849_v24 = vpop.f32.mrf.mxu0 }
 0x3ba   : > { %v8267_v14 = vpop.f32.mrf.mxu1 }
 0x3bb   : > { %6134 = vst [vmem:[#allocation4 + $0x32] sm:$0xff] %v6096_v58  ;;  %v6095_v43 = vmax.f32 %v6059_v44, 0.0  ;;  %v10833_v6 = vadd.f32 %v10783_v57, %v6022_v62  ;;  %v6021_v51 = vmul.f32 %v10779_v50, %v5978_v32  ;;  %v5981_v13 = vadd.f32 %v8267_v14, %v5648_v9 }
 0x3bc   : > { %v5841_v2 = vpop.f32.mrf.mxu1  ;;  %v6171_v27 = vld [vmem:[#allocation4 + $0x10] sm:$0xff]  ;;  %v5651_v9 = vadd.f32 %v10748_v34, %v10691_v37  ;;  %v5654_v62 = vadd.f32 %v10756_v49, %v10694_v8 }
 0x3bd   : > { %6132 = vst [vmem:[#allocation4 + $0x2c] sm:$0xf] %v6095_v43  ;;  %6133 = vst [vmem:[#allocation4 + $0x2a] sm:$0xc0] %v6095_v43  ;;  %v6098_v39 = vmax.f32 %v10833_v6, 0.0  ;;  %v6061_v54 = vadd.f32 %v10783_v57, %v6021_v51  ;;  %v6024_v20 = vmul.f32 %v10779_v50, %v5981_v13  ;;  %v5980_v60 = vadd.f32 %v5841_v2, %v5647_v30  ;;  %v10859_v43 = vpop.f32.mrf.mxu0 }
 0x3be   : > { %8339 = vmatprep.mubr.f32.mxu0 %v6171_v27  ;;  %v8270_v16 = vpop.f32.mrf.mxu1  ;;  %v5653_v13 = vadd.f32 %v10764_v19, %v10699_v38 }
 0x3bf   : > { %v6097_v59 = vmax.f32 %v6061_v54, 0.0  ;;  %v6064_v61 = vadd.f32 %v10783_v57, %v6024_v20  ;;  %v6023_v1 = vmul.f32 %v10779_v50, %v5980_v60  ;;  %v5983_v42 = vadd.f32 %v8270_v16, %v5650_v48 }
 0x3c0   : > { %v5851_v40 = vpop.f32.mrf.mxu1  ;;  %v6172_v21 = vld [vmem:[#allocation4 + $0x18] sm:$0xff]  ;;  %v6173_v10 = vld [vmem:[#allocation4 + $0x20] sm:$0xff]  ;;  %v5656_v54 = vadd.f32 %v10774_v28, %v10702_v3 }
 0x3c1   : > { %6135 = vst [vmem:[#allocation4 + $0x3a] sm:$0x3f] %v6097_v59  ;;  %v6100_v36 = vmax.f32 %v6064_v61, 0.0  ;;  %v6063_v0 = vadd.f32 %v10783_v57, %v6023_v1  ;;  %v6026_v18 = vmul.f32 %v10779_v50, %v5983_v42  ;;  %v5982_v45 = vadd.f32 %v5851_v40, %v5649_v4  ;;  %8340 = vmatmul.mubr.f32.gmra.mxu0 %v6172_v21  ;;  %v10869_v4 = vpop.f32.mrf.mxu0 }
 0x3c2   : > { %v8273_v46 = vpop.f32.mrf.mxu1  ;;  %8342 = vmatprep.mubr.f32.mxu0 %v6173_v10  ;;  %v5655_v61 = vadd.f32 %v10787_v25, %v10707_v11  ;;  %v5658_v40 = vadd.f32 %v10796_v26, %v10710_v7 }
 0x3c3   : > { %6138 = vst [vmem:[#allocation4 + $0x4e] sm:$0xfc] %v6100_v36  ;;  %v6099_v5 = vmax.f32 %v6063_v0, 0.0  ;;  %v6066_v29 = vadd.f32 %v10783_v57, %v6026_v18  ;;  %v6025_v58 = vmul.f32 %v10779_v50, %v5982_v45  ;;  %v5985_v44 = vadd.f32 %v8273_v46, %v5652_v53  ;;  %v10879_v10 = vpop.f32.mrf.mxu0  ;;  %v11214_v0 = vld [vmem:[#allocation39_spill] sm:$0xff] }
 0x3c4   : > { %v5861_v32 = vpop.f32.mrf.mxu1  ;;  %v6174_v30 = vld [vmem:[#allocation4 + $0x28] sm:$0xff]  ;;  %v6175_v14 = vld [vmem:[#allocation4 + $0x30] sm:$0xff]  ;;  %v5657_v18 = vadd.f32 %v10806_v12, %v11214_v0 }
 0x3c5   : > { %v6102_v6 = vmax.f32 %v6066_v29, 0.0  ;;  %v6065_v37 = vadd.f32 %v10783_v57, %v6025_v58  ;;  %v6028_v34 = vmul.f32 %v10779_v50, %v5985_v44  ;;  %v5984_v51 = vadd.f32 %v5861_v32, %v5651_v9  ;;  %8343 = vmatmul.mubr.f32.gmra.mxu0 %v6174_v30  ;;  %v11215_v29 = vld [vmem:[#allocation37_spill] sm:$0xff]  ;;  %v5598_v30 = vpop.f32.mrf.mxu0 }
 0x3c6   : > { %v8276_v48 = vpop.f32.mrf.mxu1  ;;  %8345 = vmatprep.mubr.f32.mxu0 %v6175_v14  ;;  %v5660_v58 = vadd.f32 %v10816_v33, %v11215_v29 }
 0x3c7   : > { %6140 = vst [vmem:[#allocation4 + $0x5e] sm:$0x3] %v6102_v6  ;;  %6141 = vst [vmem:[#allocation4 + $0x5c] sm:$0xf0] %v6102_v6  ;;  %v6101_v8 = vmax.f32 %v6065_v37, 0.0  ;;  %v6068_v49 = vadd.f32 %v10783_v57, %v6028_v34  ;;  %v6027_v2 = vmul.f32 %v10779_v50, %v5984_v51  ;;  %v5987_v27 = vadd.f32 %v8276_v48, %v5654_v62  ;;  %v11216_v37 = vld [vmem:[#allocation38_spill] sm:$0xff] }
 0x3c8   : > { %v5871_v20 = vpop.f32.mrf.mxu1  ;;  %v6176_v60 = vld [vmem:[#allocation4 + $0x38] sm:$0xff]  ;;  %v5659_v34 = vadd.f32 %v10826_v31, %v11216_v37 }
 0x3c9   : > { %6139 = vst [vmem:[#allocation4 + $0x56] sm:$0xff] %v6101_v8  ;;  %v6104_v16 = vmax.f32 %v6068_v49, 0.0  ;;  %v6067_v38 = vadd.f32 %v10783_v57, %v6027_v2  ;;  %v6030_v19 = vmul.f32 %v10779_v50, %v5987_v27  ;;  %v5986_v59 = vadd.f32 %v5871_v20, %v5653_v13  ;;  %8346 = vmatmul.mubr.f32.gmra.mxu0 %v6176_v60  ;;  %v8211_v20 = vpop.f32.mrf.mxu0 }
 0x3ca   : > { %v8279_v1 = vpop.f32.mrf.mxu1  ;;  %8348 = vmatprep.mubr.f32.mxu0 %v6098_v39  ;;  %v5662_v49 = vadd.f32 %v10838_v41, %v10727_v17 }
 0x3cb   : > { %6143 = vst [vmem:[#allocation4 + $0x6c] sm:$0xf] %v6104_v16  ;;  %6144 = vst [vmem:[#allocation4 + $0x6a] sm:$0xc0] %v6104_v16  ;;  %v6103_v3 = vmax.f32 %v6067_v38, 0.0  ;;  %v6070_v28 = vadd.f32 %v10783_v57, %v6030_v19  ;;  %v6029_v42 = vmul.f32 %v10779_v50, %v5986_v59  ;;  %v5989_v53 = vadd.f32 %v8279_v1, %v5656_v54  ;;  %v11217_v19 = vld [vmem:[#allocation34_spill] sm:$0xff] }
 0x3cc   : > { %v5881_v21 = vpop.f32.mrf.mxu1  ;;  %v5661_v59 = vadd.f32 %v10849_v24, %v11217_v19 }
 0x3cd   : > { %6142 = vst [vmem:[#allocation4 + $0x64] sm:$0xff] %v6103_v3  ;;  %v6106_v36 = vmax.f32 %v6070_v28, 0.0  ;;  %v6069_v11 = vadd.f32 %v10783_v57, %v6029_v42  ;;  %v6032_v25 = vmul.f32 %v10779_v50, %v5989_v53  ;;  %v5988_v39 = vadd.f32 %v5881_v21, %v5655_v61  ;;  %8349 = vmatmul.mubr.f32.gmra.mxu0 %v6099_v5  ;;  %v5608_v21 = vpop.f32.mrf.mxu0 }
 0x3ce   : > { %v8282_v45 = vpop.f32.mrf.mxu1  ;;  %v5664_v28 = vadd.f32 %v10859_v43, %v10736_v23 }
 0x3cf   : > { %6146 = vst [vmem:[#allocation4 + $0x7a] sm:$0x3f] %v6106_v36  ;;  %v6105_v9 = vmax.f32 %v6069_v11, 0.0  ;;  %v10886_v46 = vadd.f32 %v10783_v57, %v6032_v25  ;;  %v6031_v7 = vmul.f32 %v10779_v50, %v5988_v39  ;;  %v5991_v26 = vadd.f32 %v8282_v45, %v5658_v40  ;;  %v11218_v39 = vld [vmem:[#allocation35_spill] sm:$0xff] }
 0x3d0   : > { %v5891_v44 = vpop.f32.mrf.mxu1  ;;  %v6179_v62 = vld [vmem:[#allocation4 + $0x50] sm:$0xff]  ;;  %v6180_v32 = vld [vmem:[#allocation4 + $0x58] sm:$0xff]  ;;  %v5663_v0 = vadd.f32 %v10869_v4, %v11218_v39 }
 0x3d1   : > { %6145 = vst [vmem:[#allocation4 + $0x72] sm:$0xff] %v6105_v9  ;;  %v6108_v5 = vmax.f32 %v10886_v46, 0.0  ;;  %v6071_v12 = vadd.f32 %v10783_v57, %v6031_v7  ;;  %v6034_v14 = vmul.f32 %v10779_v50, %v5991_v26  ;;  %v5990_v6 = vadd.f32 %v5891_v44, %v5657_v18  ;;  %8351 = vmatprep.mubr.f32.mxu0 %v6179_v62  ;;  %v8214_v26 = vpop.f32.mrf.mxu0 }
 0x3d2   : > { %v8285_v51 = vpop.f32.mrf.mxu1  ;;  %8352 = vmatmul.mubr.f32.gmra.mxu0 %v6180_v32  ;;  %v5666_v46 = vadd.f32 %v10879_v10, %v10745_v35  ;;  %v5665_v62 = vadd.f32 %v5598_v30, %v10751_v22 }
 0x3d3   : > { %v6107_v13 = vmax.f32 %v6071_v12, 0.0  ;;  %v6074_v33 = vadd.f32 %v10783_v57, %v6034_v14  ;;  %v6033_v48 = vmul.f32 %v10779_v50, %v5990_v6  ;;  %v5993_v8 = vadd.f32 %v8285_v51, %v5660_v58  ;;  %v5618_v51 = vpop.f32.mrf.mxu0 }
 0x3d4   : > { %v5901_v2 = vpop.f32.mrf.mxu1  ;;  %v6181_v27 = vld [vmem:[#allocation4 + $0x60] sm:$0xff]  ;;  %v6182_v54 = vld [vmem:[#allocation4 + $0x68] sm:$0xff]  ;;  %v5668_v6 = vadd.f32 %v8211_v20, %v10754_v52 }
 0x3d5   : > { %v6110_v60 = vmax.f32 %v6074_v33, 0.0  ;;  %v6073_v16 = vadd.f32 %v10783_v57, %v6033_v48  ;;  %v6036_v31 = vmul.f32 %v10779_v50, %v5993_v8  ;;  %v5992_v38 = vadd.f32 %v5901_v2, %v5659_v34  ;;  %8354 = vmatprep.mubr.f32.mxu0 %v6181_v27  ;;  %v8217_v8 = vpop.f32.mrf.mxu0 }
 0x3d6   : > { %v8288_v61 = vpop.f32.mrf.mxu1  ;;  %8355 = vmatmul.mubr.f32.gmra.mxu0 %v6182_v54  ;;  %v5667_v33 = vadd.f32 %v5608_v21, %v10759_v56  ;;  %v5670_v54 = vadd.f32 %v8214_v26, %v10762_v63 }
 0x3d7   : > { %6150 = vst [vmem:[#allocation4 + $0x96] sm:$0xff] %v6110_v60  ;;  %v6109_v1 = vmax.f32 %v6073_v16, 0.0  ;;  %v6076_v17 = vadd.f32 %v10783_v57, %v6036_v31  ;;  %v6035_v41 = vmul.f32 %v10779_v50, %v5992_v38  ;;  %v5995_v3 = vadd.f32 %v8288_v61, %v5662_v49 }
 0x3d8   : > { %v5911_v42 = vpop.f32.mrf.mxu1  ;;  %v6183_v53 = vld [vmem:[#allocation4 + $0x70] sm:$0xff]  ;;  %v6184_v40 = vld [vmem:[#allocation4 + $0x78] sm:$0xff] }
 0x3d9   : > { %6149 = vst [vmem:[#allocation4 + $0x8e] sm:$0xfc] %v6109_v1  ;;  %v6112_v36 = vmax.f32 %v6076_v17, 0.0  ;;  %v6075_v24 = vadd.f32 %v10783_v57, %v6035_v41  ;;  %v6038_v11 = vmul.f32 %v10779_v50, %v5995_v3  ;;  %v5994_v25 = vadd.f32 %v5911_v42, %v5661_v59  ;;  %8357 = vmatprep.mubr.f32.mxu0 %v6183_v53  ;;  %v5628_v1 = vpop.f32.mrf.mxu0 }
 0x3da   : > { %v8291_v18 = vpop.f32.mrf.mxu1  ;;  %8358 = vmatmul.mubr.f32.gmra.mxu0 %v6184_v40  ;;  %v5669_v59 = vadd.f32 %v5618_v51, %v10767_v55 }
 0x3db   : > { %6153 = vst [vmem:[#allocation4 + $0xa4] sm:$0xff] %v6112_v36  ;;  %v6111_v45 = vmax.f32 %v6075_v24, 0.0  ;;  %v6078_v23 = vadd.f32 %v10783_v57, %v6038_v11  ;;  %v6037_v43 = vmul.f32 %v10779_v50, %v5994_v25  ;;  %v5997_v9 = vadd.f32 %v8291_v18, %v5664_v28  ;;  %8360 = vmatprep.mubr.f32.mxu0 %v6107_v13 }
 0x3dc   : > { %v5921_v7 = vpop.f32.mrf.mxu1  ;;  %v5672_v28 = vadd.f32 %v8217_v8, %v10770_v15  ;;  %v5671_v11 = vadd.f32 %v5628_v1, %v10777_v47 }
 0x3dd   : > { %6151 = vst [vmem:[#allocation4 + $0x9e] sm:$0x3] %v6111_v45  ;;  %6152 = vst [vmem:[#allocation4 + $0x9c] sm:$0xf0] %v6111_v45  ;;  %v6114_v29 = vmax.f32 %v6078_v23, 0.0  ;;  %v6077_v4 = vadd.f32 %v10783_v57, %v6037_v43  ;;  %v6040_v58 = vmul.f32 %v10779_v50, %v5997_v9  ;;  %v5996_v44 = vadd.f32 %v5921_v7, %v5663_v0 }
 0x3de   : > { %v8294_v32 = vpop.f32.mrf.mxu1  ;;  %8361 = vmatmul.mubr.f32.gmra.mxu0 %v6108_v5 }
 0x3df   : > { %6156 = vst [vmem:[#allocation4 + $0xb2] sm:$0xff] %v6114_v29  ;;  %v6113_v12 = vmax.f32 %v6077_v4, 0.0  ;;  %v10920_v14 = vadd.f32 %v10783_v57, %v6040_v58  ;;  %v6039_v35 = vmul.f32 %v10779_v50, %v5996_v44  ;;  %v5999_v10 = vadd.f32 %v8294_v32, %v5666_v46 }
 0x3e0   : > { %v5931_v37 = vpop.f32.mrf.mxu1  ;;  %v6187_v34 = vld [vmem:[#allocation4 + $0x90] sm:$0xff] }
 0x3e1   : > { %6154 = vst [vmem:[#allocation4 + $0xac] sm:$0xf] %v6113_v12  ;;  %6155 = vst [vmem:[#allocation4 + $0xaa] sm:$0xc0] %v6113_v12  ;;  %v6116_v13 = vmax.f32 %v10920_v14, 0.0  ;;  %v6079_v22 = vadd.f32 %v10783_v57, %v6039_v35  ;;  %v6042_v30 = vmul.f32 %v10779_v50, %v5999_v10  ;;  %v5998_v5 = vadd.f32 %v5931_v37, %v5665_v62 }
 0x3e2   : > { %8363 = vmatprep.mubr.f32.mxu1 %v6187_v34  ;;  %v8297_v48 = vpop.f32.mrf.mxu1  ;;  %v6521_v34 = vld [vmem:[%s9267_s0 + $0x8] sm:$0xff] }
 0x3e3   : > { %v6115_v49 = vmax.f32 %v6079_v22, 0.0  ;;  %v6082_v52 = vadd.f32 %v10783_v57, %v6042_v30  ;;  %v6041_v2 = vmul.f32 %v10779_v50, %v5998_v5  ;;  %v6001_v27 = vadd.f32 %v8297_v48, %v5668_v6  ;;  %v10949_v6 = vld [vmem:[#allocation24] ss:$0 sm:$0xff]  ;;  %v6520_v30 = vld [vmem:[%s9267_s0] sm:$0xff] }
 0x3e4   : > { %v5941_v20 = vpop.f32.mrf.mxu1  ;;  %v6188_v60 = vld [vmem:[#allocation4 + $0x98] sm:$0xff]  ;;  %v6189_v16 = vld [vmem:[#allocation4 + $0xa0] sm:$0xff] }
 0x3e5   : > { %6157 = vst [vmem:[#allocation4 + $0xba] sm:$0x3f] %v6115_v49  ;;  %v6118_v31 = vmax.f32 %v6082_v52, 0.0  ;;  %v6081_v38 = vadd.f32 %v10783_v57, %v6041_v2  ;;  %v6044_v19 = vmul.f32 %v10779_v50, %v6001_v27  ;;  %v6000_v56 = vadd.f32 %v5941_v20, %v5667_v33  ;;  %8364 = vmatmul.mubr.f32.vlgmr.msra.gmra.mxu1 %v6188_v60  ;;  %v6523_v27 = vld [vmem:[%s9267_s0 + $0x18] sm:$0xff] }
 0x3e6   : > { %v8300_v61 = vpop.f32.mrf.mxu1  ;;  %8366 = vmatprep.mubr.f32.mxu1 %v6189_v16  ;;  %v6522_v16 = vld [vmem:[%s9267_s0 + $0x10] sm:$0xff] }
 0x3e7   : > { %6160 = vst [vmem:[#allocation4 + $0xce] sm:$0xfc] %v6118_v31  ;;  %v6117_v17 = vmax.f32 %v6081_v38, 0.0  ;;  %v6084_v63 = vadd.f32 %v10783_v57, %v6044_v19  ;;  %v6043_v41 = vmul.f32 %v10779_v50, %v6000_v56  ;;  %v6003_v3 = vadd.f32 %v8300_v61, %v5670_v54 }
 0x3e8   : > { %v5951_v42 = vpop.f32.mrf.mxu1  ;;  %v6190_v53 = vld [vmem:[#allocation4 + $0xa8] sm:$0xff]  ;;  %v6191_v40 = vld [vmem:[#allocation4 + $0xb0] sm:$0xff] }
 0x3e9   : > { %v6120_v21 = vmax.f32 %v6084_v63, 0.0  ;;  %v6083_v36 = vadd.f32 %v10783_v57, %v6043_v41  ;;  %v6046_v55 = vmul.f32 %v10779_v50, %v6003_v3  ;;  %v6002_v24 = vadd.f32 %v5951_v42, %v5669_v59  ;;  %8367 = vmatmul.mubr.f32.gmra.mxu1 %v6190_v53  ;;  %v6525_v59 = vld [vmem:[%s9267_s0 + $0x28] sm:$0xff]  ;;  %v6524_v3 = vld [vmem:[%s9267_s0 + $0x20] sm:$0xff] }
 0x3ea   : > { %v8303_v25 = vpop.f32.mrf.mxu1  ;;  %8369 = vmatprep.mubr.f32.mxu1 %v6191_v40 }
 0x3eb   : > { %6162 = vst [vmem:[#allocation4 + $0xde] sm:$0x3] %v6120_v21  ;;  %6163 = vst [vmem:[#allocation4 + $0xdc] sm:$0xf0] %v6120_v21  ;;  %v6119_v39 = vmax.f32 %v6083_v36, 0.0  ;;  %v6086_v0 = vadd.f32 %v10783_v57, %v6046_v55  ;;  %v6045_v15 = vmul.f32 %v10779_v50, %v6002_v24  ;;  %v6005_v18 = vadd.f32 %v8303_v25, %v5672_v28  ;;  %v6527_v36 = vld [vmem:[%s9267_s0 + $0x38] sm:$0xff] }
 0x3ec   : > { %v5961_v45 = vpop.f32.mrf.mxu1  ;;  %v6192_v23 = vld [vmem:[#allocation4 + $0xb8] sm:$0xff] }
 0x3ed   : > { %6161 = vst [vmem:[#allocation4 + $0xd6] sm:$0xff] %v6119_v39  ;;  %v6122_v43 = vmax.f32 %v6086_v0, 0.0  ;;  %v6085_v9 = vadd.f32 %v10783_v57, %v6045_v15  ;;  %v6048_v46 = vmul.f32 %v10779_v50, %v6005_v18  ;;  %v6004_v7 = vadd.f32 %v5961_v45, %v5671_v11  ;;  %8370 = vmatmul.mubr.f32.gmra.mxu1 %v6192_v23  ;;  %v6526_v0 = vld [vmem:[%s9267_s0 + $0x30] sm:$0xff] }
 0x3ee   : > { %8372 = vmatprep.mubr.f32.mxu1 %v6116_v13 }
 0x3ef   : > { %6165 = vst [vmem:[#allocation4 + $0xec] sm:$0xf] %v6122_v43  ;;  %6166 = vst [vmem:[#allocation4 + $0xea] sm:$0xc0] %v6122_v43  ;;  %v6121_v47 = vmax.f32 %v6085_v9, 0.0  ;;  %v6088_v26 = vadd.f32 %v10783_v57, %v6048_v46  ;;  %v6047_v29 = vmul.f32 %v10779_v50, %v6004_v7  ;;  %v6529_v9 = vld [vmem:[%s9267_s0 + $0x48] sm:$0xff] }
 0x3f1   : > { %6164 = vst [vmem:[#allocation4 + $0xe4] sm:$0xff] %v6121_v47  ;;  %v6124_v4 = vmax.f32 %v6088_v26, 0.0  ;;  %v6087_v58 = vadd.f32 %v10783_v57, %v6047_v29  ;;  %8373 = vmatmul.mubr.f32.gmra.mxu1 %v6117_v17  ;;  %v10947_v57 = vld [vmem:[#allocation22] ss:$0 sm:$0xff] }
 0x3f3   : > { %6168 = vst [vmem:[#allocation4 + $0xfa] sm:$0x3f] %v6124_v4  ;;  %v6123_v44 = vmax.f32 %v6087_v58, 0.0  ;;  %v6528_v4 = vld [vmem:[%s9267_s0 + $0x40] sm:$0xff] }
 0x3f4   : > { %v6195_v62 = vld [vmem:[#allocation4 + $0xd0] sm:$0xff]  ;;  %v6196_v32 = vld [vmem:[#allocation4 + $0xd8] sm:$0xff] }
 0x3f5   : > { %6167 = vst [vmem:[#allocation4 + $0xf2] sm:$0xff] %v6123_v44  ;;  %8375 = vmatprep.mubr.f32.mxu1 %v6195_v62 }
 0x3f6   : > { %8376 = vmatmul.mubr.f32.gmra.mxu1 %v6196_v32 }
 0x3f8   : > { %v6197_v12 = vld [vmem:[#allocation4 + $0xe0] sm:$0xff]  ;;  %v6198_v14 = vld [vmem:[#allocation4 + $0xe8] sm:$0xff] }
 0x3f9   : > { %8378 = vmatprep.mubr.f32.mxu1 %v6197_v12 }
 0x3fa   : > { %8379 = vmatmul.mubr.f32.gmra.mxu1 %v6198_v14 }
 0x3fc   : > { %v6199_v35 = vld [vmem:[#allocation4 + $0xf0] sm:$0xff]  ;;  %v6200_v50 = vld [vmem:[#allocation4 + $0xf8] sm:$0xff] }
 0x3fd   : > { %8381 = vmatprep.mubr.f32.mxu1 %v6199_v35 }
 0x3fe   : > { %8382 = vmatmul.mubr.f32.gmra.mxu1 %v6200_v50  ;;  %v6531_v50 = vld [vmem:[%s9267_s0 + $0x58] sm:$0xff] }
 0x472   : > { %v8338_v10 = vpop.f32.mrf.mxu0 }
 0x473   : > { %v6450_v37 = vmul.f32 %v8338_v10, %v10947_v57 }
 0x474   : > { %v6283_v51 = vpop.f32.mrf.mxu0 }
 0x475   : > { %v6489_v13 = vadd.f32 %v10949_v6, %v6450_v37  ;;  %v6449_v22 = vmul.f32 %v10947_v57, %v6283_v51 }
 0x477   : > { %v6553_v5 = vadd.f32 %v6521_v34, %v6489_v13  ;;  %v6488_v33 = vadd.f32 %v10949_v6, %v6449_v22  ;;  %v6530_v13 = vld [vmem:[%s9267_s0 + $0x50] sm:$0xff] }
 0x479   : > { %v6585_v48 = vmax.f32 %v6553_v5, 0.0  ;;  %v6552_v8 = vadd.f32 %v6520_v30, %v6488_v33 }
 0x47b   : > { %6617 = vst [vmem:[%s10959_s12 + $0x8] sm:$0xff] %v6585_v48  ;;  %v6584_v49 = vmax.f32 %v6552_v8, 0.0  ;;  %v6533_v48 = vld [vmem:[%s9267_s0 + $0x68] sm:$0xff] }
 0x47d   : > { %6616 = vst [vmem:[%s10959_s12] sm:$0xff] %v6584_v49 }
 0x481   : > { %v8341_v52 = vpop.f32.mrf.mxu0 }
 0x482   : > { %v6452_v2 = vmul.f32 %v8341_v52, %v10947_v57 }
 0x483   : > { %v6293_v54 = vpop.f32.mrf.mxu0 }
 0x484   : > { %v6491_v20 = vadd.f32 %v10949_v6, %v6452_v2  ;;  %v6451_v60 = vmul.f32 %v10947_v57, %v6293_v54  ;;  %v6532_v54 = vld [vmem:[%s9267_s0 + $0x60] sm:$0xff] }
 0x485   : > { %v8344_v31 = vpop.f32.mrf.mxu0 }
 0x486   : > { %v6555_v38 = vadd.f32 %v6523_v27, %v6491_v20  ;;  %v6490_v19 = vadd.f32 %v10949_v6, %v6451_v60  ;;  %v6454_v56 = vmul.f32 %v8344_v31, %v10947_v57 }
 0x487   : > { %v6303_v61 = vpop.f32.mrf.mxu0 }
 0x488   : > { %v6587_v1 = vmax.f32 %v6555_v38, 0.0  ;;  %v6554_v17 = vadd.f32 %v6522_v16, %v6490_v19  ;;  %v6493_v63 = vadd.f32 %v10949_v6, %v6454_v56  ;;  %v6453_v41 = vmul.f32 %v10947_v57, %v6303_v61  ;;  %v6535_v19 = vld [vmem:[%s9267_s0 + $0x78] sm:$0xff] }
 0x489   : > { %v8347_v28 = vpop.f32.mrf.mxu0 }
 0x48a   : > { %6619 = vst [vmem:[%s10959_s12 + $0x18] sm:$0xff] %v6587_v1  ;;  %v6586_v42 = vmax.f32 %v6554_v17, 0.0  ;;  %v6557_v53 = vadd.f32 %v6525_v59, %v6493_v63  ;;  %v6492_v40 = vadd.f32 %v10949_v6, %v6453_v41  ;;  %v6456_v21 = vmul.f32 %v8347_v28, %v10947_v57  ;;  %v6534_v63 = vld [vmem:[%s9267_s0 + $0x70] sm:$0xff] }
 0x48b   : > { %v6313_v55 = vpop.f32.mrf.mxu0 }
 0x48c   : > { %6618 = vst [vmem:[%s10959_s12 + $0x10] sm:$0xff] %v6586_v42  ;;  %v6589_v24 = vmax.f32 %v6557_v53, 0.0  ;;  %v6556_v11 = vadd.f32 %v6524_v3, %v6492_v40  ;;  %v6495_v25 = vadd.f32 %v10949_v6, %v6456_v21  ;;  %v6455_v39 = vmul.f32 %v10947_v57, %v6313_v55  ;;  %v6537_v40 = vld [vmem:[%s9267_s0 + $0x88] sm:$0xff] }
 0x48d   : > { %v8350_v15 = vpop.f32.mrf.mxu0 }
 0x48e   : > { %6621 = vst [vmem:[%s10959_s12 + $0x28] sm:$0xff] %v6589_v24  ;;  %v6588_v18 = vmax.f32 %v6556_v11, 0.0  ;;  %v6559_v45 = vadd.f32 %v6527_v36, %v6495_v25  ;;  %v6494_v23 = vadd.f32 %v10949_v6, %v6455_v39  ;;  %v6458_v43 = vmul.f32 %v8350_v15, %v10947_v57  ;;  %v6536_v25 = vld [vmem:[%s9267_s0 + $0x80] sm:$0xff] }
 0x48f   : > { %v6323_v46 = vpop.f32.mrf.mxu0 }
 0x490   : > { %6620 = vst [vmem:[%s10959_s12 + $0x20] sm:$0xff] %v6588_v18  ;;  %v6591_v7 = vmax.f32 %v6559_v45, 0.0  ;;  %v6558_v47 = vadd.f32 %v6526_v0, %v6494_v23  ;;  %v6497_v26 = vadd.f32 %v10949_v6, %v6458_v43  ;;  %v6457_v29 = vmul.f32 %v10947_v57, %v6323_v46  ;;  %v6539_v46 = vld [vmem:[%s9267_s0 + $0x98] sm:$0xff] }
 0x492   : > { %6623 = vst [vmem:[%s10959_s12 + $0x38] sm:$0xff] %v6591_v7  ;;  %v6590_v58 = vmax.f32 %v6558_v47, 0.0  ;;  %v6561_v44 = vadd.f32 %v6529_v9, %v6497_v26  ;;  %v6496_v62 = vadd.f32 %v10949_v6, %v6457_v29  ;;  %v8353_v32 = vpop.f32.mrf.mxu0  ;;  %v6538_v29 = vld [vmem:[%s9267_s0 + $0x90] sm:$0xff] }
 0x493   : > { %v6460_v12 = vmul.f32 %v8353_v32, %v10947_v57  ;;  %v6541_v32 = vld [vmem:[%s9267_s0 + $0xa8] sm:$0xff] }
 0x494   : > { %6622 = vst [vmem:[%s10959_s12 + $0x30] sm:$0xff] %v6590_v58  ;;  %v6593_v14 = vmax.f32 %v6561_v44, 0.0  ;;  %v6560_v35 = vadd.f32 %v6528_v4, %v6496_v62  ;;  %v6333_v10 = vpop.f32.mrf.mxu0 }
 0x495   : > { %v6499_v37 = vadd.f32 %v10949_v6, %v6460_v12  ;;  %v6459_v34 = vmul.f32 %v10947_v57, %v6333_v10 }
 0x496   : > { %6625 = vst [vmem:[%s10959_s12 + $0x48] sm:$0xff] %v6593_v14  ;;  %v6592_v51 = vmax.f32 %v6560_v35, 0.0  ;;  %v8356_v22 = vpop.f32.mrf.mxu0 }
 0x497   : > { %v6563_v30 = vadd.f32 %v6531_v50, %v6499_v37  ;;  %v6498_v5 = vadd.f32 %v10949_v6, %v6459_v34  ;;  %v6462_v33 = vmul.f32 %v8356_v22, %v10947_v57  ;;  %v6540_v37 = vld [vmem:[%s9267_s0 + $0xa0] sm:$0xff] }
 0x498   : > { %6624 = vst [vmem:[%s10959_s12 + $0x40] sm:$0xff] %v6592_v51  ;;  %v6343_v8 = vpop.f32.mrf.mxu0 }
 0x499   : > { %v6595_v49 = vmax.f32 %v6563_v30, 0.0  ;;  %v6562_v52 = vadd.f32 %v6530_v13, %v6498_v5  ;;  %v6501_v2 = vadd.f32 %v10949_v6, %v6462_v33  ;;  %v6461_v27 = vmul.f32 %v10947_v57, %v6343_v8  ;;  %v6543_v5 = vld [vmem:[%s9267_s0 + $0xb8] sm:$0xff] }
 0x49a   : > { %v8359_v20 = vpop.f32.mrf.mxu0 }
 0x49b   : > { %6627 = vst [vmem:[%s10959_s12 + $0x58] sm:$0xff] %v6595_v49  ;;  %v6594_v60 = vmax.f32 %v6562_v52, 0.0  ;;  %v6565_v16 = vadd.f32 %v6533_v48, %v6501_v2  ;;  %v6500_v31 = vadd.f32 %v10949_v6, %v6461_v27  ;;  %v6464_v38 = vmul.f32 %v8359_v20, %v10947_v57  ;;  %v6542_v2 = vld [vmem:[%s9267_s0 + $0xb0] sm:$0xff] }
 0x49c   : > { %v6353_v56 = vpop.f32.mrf.mxu0 }
 0x49d   : > { %6626 = vst [vmem:[%s10959_s12 + $0x50] sm:$0xff] %v6594_v60  ;;  %v6597_v59 = vmax.f32 %v6565_v16, 0.0  ;;  %v6564_v61 = vadd.f32 %v6532_v54, %v6500_v31  ;;  %v6503_v1 = vadd.f32 %v10949_v6, %v6464_v38  ;;  %v6463_v17 = vmul.f32 %v10947_v57, %v6353_v56  ;;  %v6545_v31 = vld [vmem:[%s9267_s0 + $0xc8] sm:$0xff] }
 0x49e   : > { %v8362_v41 = vpop.f32.mrf.mxu0 }
 0x49f   : > { %6629 = vst [vmem:[%s10959_s12 + $0x68] sm:$0xff] %v6597_v59  ;;  %v6596_v3 = vmax.f32 %v6564_v61, 0.0  ;;  %v6567_v28 = vadd.f32 %v6535_v19, %v6503_v1  ;;  %v6502_v42 = vadd.f32 %v10949_v6, %v6463_v17  ;;  %v6466_v53 = vmul.f32 %v8362_v41, %v10947_v57  ;;  %v6544_v1 = vld [vmem:[%s9267_s0 + $0xc0] sm:$0xff] }
 0x4a0   : > { %v6363_v21 = vpop.f32.mrf.mxu0 }
 0x4a1   : > { %6628 = vst [vmem:[%s10959_s12 + $0x60] sm:$0xff] %v6596_v3  ;;  %v6599_v36 = vmax.f32 %v6567_v28, 0.0  ;;  %v6566_v55 = vadd.f32 %v6534_v63, %v6502_v42  ;;  %v6505_v24 = vadd.f32 %v10949_v6, %v6466_v53  ;;  %v6465_v11 = vmul.f32 %v10947_v57, %v6363_v21 }
 0x4a3   : > { %6631 = vst [vmem:[%s10959_s12 + $0x78] sm:$0xff] %v6599_v36  ;;  %v6598_v39 = vmax.f32 %v6566_v55, 0.0  ;;  %v6569_v0 = vadd.f32 %v6537_v40, %v6505_v24  ;;  %v6504_v15 = vadd.f32 %v10949_v6, %v6465_v11  ;;  %v6547_v40 = vld [vmem:[%s9267_s0 + $0xd8] sm:$0xff]  ;;  %v6546_v11 = vld [vmem:[%s9267_s0 + $0xd0] sm:$0xff] }
 0x4a5   : > { %6630 = vst [vmem:[%s10959_s12 + $0x70] sm:$0xff] %v6598_v39  ;;  %v6601_v18 = vmax.f32 %v6569_v0, 0.0  ;;  %v6568_v45 = vadd.f32 %v6536_v25, %v6504_v15  ;;  %v8365_v23 = vpop.f32.mrf.mxu1 }
 0x4a6   : > { %v6468_v43 = vmul.f32 %v8365_v23, %v10947_v57 }
 0x4a7   : > { %6633 = vst [vmem:[%s10959_s12 + $0x88] sm:$0xff] %v6601_v18  ;;  %v6600_v9 = vmax.f32 %v6568_v45, 0.0  ;;  %v6373_v7 = vpop.f32.mrf.mxu1  ;;  %v6549_v18 = vld [vmem:[%s9267_s0 + $0xe8] sm:$0xff] }
 0x4a8   : > { %v6507_v47 = vadd.f32 %v10949_v6, %v6468_v43  ;;  %v6467_v26 = vmul.f32 %v10947_v57, %v6373_v7  ;;  %v6548_v7 = vld [vmem:[%s9267_s0 + $0xe0] sm:$0xff] }
 0x4a9   : > { %6632 = vst [vmem:[%s10959_s12 + $0x80] sm:$0xff] %v6600_v9  ;;  %v8368_v4 = vpop.f32.mrf.mxu1 }
 0x4aa   : > { %v6571_v58 = vadd.f32 %v6539_v46, %v6507_v47  ;;  %v6506_v44 = vadd.f32 %v10949_v6, %v6467_v26  ;;  %v6470_v62 = vmul.f32 %v8368_v4, %v10947_v57 }
 0x4ab   : > { %v6383_v12 = vpop.f32.mrf.mxu1 }
 0x4ac   : > { %v6603_v14 = vmax.f32 %v6571_v58, 0.0  ;;  %v6570_v35 = vadd.f32 %v6538_v29, %v6506_v44  ;;  %v6509_v50 = vadd.f32 %v10949_v6, %v6470_v62  ;;  %v6469_v10 = vmul.f32 %v10947_v57, %v6383_v12  ;;  %v6551_v44 = vld [vmem:[%s9267_s0 + $0xf8] sm:$0xff] }
 0x4ad   : > { %v8371_v34 = vpop.f32.mrf.mxu1 }
 0x4ae   : > { %6635 = vst [vmem:[%s10959_s12 + $0x98] sm:$0xff] %v6603_v14  ;;  %v6602_v51 = vmax.f32 %v6570_v35, 0.0  ;;  %v6573_v13 = vadd.f32 %v6541_v32, %v6509_v50  ;;  %v6508_v22 = vadd.f32 %v10949_v6, %v6469_v10  ;;  %v6472_v30 = vmul.f32 %v8371_v34, %v10947_v57  ;;  %v6550_v50 = vld [vmem:[%s9267_s0 + $0xf0] sm:$0xff]  ;;  %s6649_s0 = scalar_lea.sflag [#allocation7], %s9261_s5 }
 0x4af   : > { %v6393_v33 = vpop.f32.mrf.mxu1 }
 0x4b0   : > { %6634 = vst [vmem:[%s10959_s12 + $0x90] sm:$0xff] %v6602_v51  ;;  %v6605_v48 = vmax.f32 %v6573_v13, 0.0  ;;  %v6572_v8 = vadd.f32 %v6540_v37, %v6508_v22  ;;  %v6511_v49 = vadd.f32 %v10949_v6, %v6472_v30  ;;  %v6471_v52 = vmul.f32 %v10947_v57, %v6393_v33 }
 0x4b1   : > { %v8374_v27 = vpop.f32.mrf.mxu1 }
 0x4b2   : > { %6637 = vst [vmem:[%s10959_s12 + $0xa8] sm:$0xff] %v6605_v48  ;;  %v6604_v54 = vmax.f32 %v6572_v8, 0.0  ;;  %v6575_v20 = vadd.f32 %v6543_v5, %v6511_v49  ;;  %v6510_v60 = vadd.f32 %v10949_v6, %v6471_v52  ;;  %v6474_v16 = vmul.f32 %v8374_v27, %v10947_v57 }
 0x4b3   : > { %v6403_v38 = vpop.f32.mrf.mxu1 }
 0x4b4   : > { %6636 = vst [vmem:[%s10959_s12 + $0xa0] sm:$0xff] %v6604_v54  ;;  %v6607_v19 = vmax.f32 %v6575_v20, 0.0  ;;  %v6574_v56 = vadd.f32 %v6542_v2, %v6510_v60  ;;  %v6513_v59 = vadd.f32 %v10949_v6, %v6474_v16  ;;  %v6473_v61 = vmul.f32 %v10947_v57, %v6403_v38 }
 0x4b6   : > { %6639 = vst [vmem:[%s10959_s12 + $0xb8] sm:$0xff] %v6607_v19  ;;  %v6606_v17 = vmax.f32 %v6574_v56, 0.0  ;;  %v6577_v63 = vadd.f32 %v6545_v31, %v6513_v59  ;;  %v6512_v41 = vadd.f32 %v10949_v6, %v6473_v61  ;;  %v8377_v3 = vpop.f32.mrf.mxu1 }
 0x4b7   : > { %v6476_v28 = vmul.f32 %v8377_v3, %v10947_v57 }
 0x4b8   : > { %6638 = vst [vmem:[%s10959_s12 + $0xb0] sm:$0xff] %v6606_v17  ;;  %v6609_v42 = vmax.f32 %v6577_v63, 0.0  ;;  %v6576_v53 = vadd.f32 %v6544_v1, %v6512_v41  ;;  %v6413_v21 = vpop.f32.mrf.mxu1 }
 0x4b9   : > { %v6515_v36 = vadd.f32 %v10949_v6, %v6476_v28  ;;  %v6475_v55 = vmul.f32 %v10947_v57, %v6413_v21 }
 0x4ba   : > { %6641 = vst [vmem:[%s10959_s12 + $0xc8] sm:$0xff] %v6609_v42  ;;  %v6608_v24 = vmax.f32 %v6576_v53, 0.0  ;;  %v8380_v25 = vpop.f32.mrf.mxu1 }
 0x4bb   : > { %v6579_v39 = vadd.f32 %v6547_v40, %v6515_v36  ;;  %v6514_v0 = vadd.f32 %v10949_v6, %v6475_v55  ;;  %v6478_v15 = vmul.f32 %v8380_v25, %v10947_v57 }
 0x4bc   : > { %6640 = vst [vmem:[%s10959_s12 + $0xc0] sm:$0xff] %v6608_v24  ;;  %v6423_v45 = vpop.f32.mrf.mxu1 }
 0x4bd   : > { %v6611_v23 = vmax.f32 %v6579_v39, 0.0  ;;  %v6578_v43 = vadd.f32 %v6546_v11, %v6514_v0  ;;  %v6517_v9 = vadd.f32 %v10949_v6, %v6478_v15  ;;  %v6477_v46 = vmul.f32 %v10947_v57, %v6423_v45 }
 0x4be   : > { %v8383_v47 = vpop.f32.mrf.mxu1 }
 0x4bf   : > { %6643 = vst [vmem:[%s10959_s12 + $0xd8] sm:$0xff] %v6611_v23  ;;  %v6610_v26 = vmax.f32 %v6578_v43, 0.0  ;;  %v6581_v29 = vadd.f32 %v6549_v18, %v6517_v9  ;;  %v6516_v4 = vadd.f32 %v10949_v6, %v6477_v46  ;;  %v6480_v58 = vmul.f32 %v8383_v47, %v10947_v57 }
 0x4c0   : > { %v6433_v62 = vpop.f32.mrf.mxu1 }
 0x4c1   : > { %6642 = vst [vmem:[%s10959_s12 + $0xd0] sm:$0xff] %v6610_v26  ;;  %v6613_v32 = vmax.f32 %v6581_v29, 0.0  ;;  %v6580_v12 = vadd.f32 %v6548_v7, %v6516_v4  ;;  %v6519_v14 = vadd.f32 %v10949_v6, %v6480_v58  ;;  %v6479_v35 = vmul.f32 %v10947_v57, %v6433_v62 }
 0x4c3   : > { %6645 = vst [vmem:[%s10959_s12 + $0xe8] sm:$0xff] %v6613_v32  ;;  %v6612_v10 = vmax.f32 %v6580_v12, 0.0  ;;  %v6583_v37 = vadd.f32 %v6551_v44, %v6519_v14  ;;  %v6518_v34 = vadd.f32 %v10949_v6, %v6479_v35 }
 0x4c5   : > { %6644 = vst [vmem:[%s10959_s12 + $0xe0] sm:$0xff] %v6612_v10  ;;  %v6615_v51 = vmax.f32 %v6583_v37, 0.0  ;;  %v6582_v13 = vadd.f32 %v6550_v50, %v6518_v34 }
 0x4c7   : > { %6647 = vst [vmem:[%s10959_s12 + $0xf8] sm:$0xff] %v6615_v51  ;;  %v6614_v57 = vmax.f32 %v6582_v13, 0.0 }
 0x4c9   : > { %6646 = vst [vmem:[%s10959_s12 + $0xf0] sm:$0xff] %v6614_v57 }
 0x4ca   : > { %8890 = shalt.err (!%p8887_p13)
}
 0x4cb   : > { %s8891_s19 = scalar_lea.hbm %s11086_s7, 4096  ;;  %s8895_s16 = scalar_lea.hbm %s11219_s6, 8192 }
 0x4cc   : > { %p8892_p3 = scmp.ne.s32.totalorder %s11086_s7, %s8891_s19  ;;  %p8896_p8 = scmp.lt.s32.totalorder %s11086_s7, %s11219_s6 }
 0x4cd   : > { %p8897_p12 = scmp.lt.s32.totalorder %s8895_s16, %s8891_s19 }
 0x4ce   : > { %p8893_p2 = pnand %p8892_p3, %p11220_p1 }
 0x4cf   : > { %p8898_p0 = por %p8897_p12, %p8896_p8 }
 0x4d0   : > { %p8894_p9 = pneg %p8893_p2 }
 0x4d2   : > { %p8899_p7 = pnand %p8898_p0, %p8894_p9 }
 0x4d4   : > { %8902 = shalt.err (!%p8899_p7)
}
 0x4d5   : > { %s8983_s2 = smov 128   ;;  %s8984_s25 = smov 8  }
 0x4d6   : > { %8462 = dma.vmem_to_hbm [thread:$0]  (%p11220_p1), %s11088_s18, 4096, %s11086_s7, %s6649_s0, %s8983_s2, %s8983_s2, %s8984_s25  }
 0x4d7 PF: > { %s6677_s15 = sand.u32 1, %s8953_s21   ;;  %p11221_p4 = scmp.ne.s32.totalorder %s11181_s30, 0 }
 0x4d8   : > { %p11222_p5 = scmp.ge.s32.totalorder %s8965_s24, 2  ;;  %s6678_s3 = scalar_lea.sflag [#allocation7], %s6677_s15 }
 0x4da   : > { %p8503_p6 = pnand %p11222_p5, %p11221_p4 }
 0x4dc   : > { %p8504_p10 = pneg %p8503_p6 }
 0x4de   : > { %8948 = dma.done.wait (%p8504_p10), %s6678_s3, 4096  }
 0x4df   : > { %8950 = vsyncadd (%p8504_p10), %s6678_s3, 4294963200  ;;  %p31_p11 = scmp.ge.s32.totalorder %s9188_s13, 4   ;;  %s11223_s21 = smov %s8957_s22 }
 0x4e0   : > { %s11224_s22 = smov %s8961_s23  ;;  %s11225_s23 = smov %s9200_s29 }
 0x4e1   : > { %s11226_s24 = smov %s9188_s13  ;;  %33 = sbr.rel (!%p31_p11) target bundleno = 20 (0x14), region = 162 }
 0x4e6   :  { %6683 = vsyncpa [#allocation6], 1 }
 0x4e7   :  { %6685 = vsyncpa [#allocation6 + $0x1], 1 }
 0x4e8   :  { %6686 = vsyncpa [#allocation11], 1 }
 0x4e9   :  { %6687 = vsyncpa [#allocation14], 1 }
 0x4ea   :  { %6688 = vsyncpa [#allocation17], 1 }
 0x4eb   :  { %6689 = vsyncpa [#allocation20], 1 }
 0x4ec   :  { %6690 = vsyncpa [#allocation23], 1 }
 0x4ed   :  { %6691 = vsyncpa [#allocation7], 1 }
 0x4ee   :  { %6693 = vsyncpa [#allocation7 + $0x1], 1 }
 0x4ef   :  { %6694 = vsyncpa [#allocation8], 1 }
 0x4f0   :  { %6696 = vsyncpa [#allocation8 + $0x1], 1 }

</bundles_post_ra>
